<compile_context>
chip_gen: v7x
topology: tpu7x:2x2x1
jax: 0.10.0
libtpu: 0.0.40
codegen_flags: <defaults>
</compile_context>

<pallas_src>
import jax
import jax.numpy as jnp
from jax.experimental import pallas as pl
from jax.experimental.pallas import tpu as pltpu

_LANE = 128


def _round_up(x, m):
    return ((x + m - 1) // m) * m


def _vmem_limit_bytes(tile_footprint_bytes):
    """Size the VMEM limit from the real footprint, clamped per-chip capacity."""
    try:
        cap = int(pltpu.get_tpu_info().vmem_capacity_bytes)
    except Exception:
        cap = 64 * 1024 * 1024  # conservative fallback: v7x physical VMEM / TC
    ceiling = (cap * 3) // 4          # leave ~25% for compiler scratch
    want = (tile_footprint_bytes * 3) // 2 + (4 << 20)
    return int(max(16 << 20, min(want, ceiling)))


def _bn_act(g, gamma, beta, act):
    """BatchNorm1d train-mode (batch stats over rows, biased var, eps=1e-5) + act."""
    n = g.shape[0]
    mean = jnp.sum(g, axis=0, keepdims=True) * (1.0 / n)
    d = g - mean
    var = jnp.sum(d * d, axis=0, keepdims=True) * (1.0 / n)
    y = d * jax.lax.rsqrt(var + 1e-5) * gamma + beta
    if act == "relu":
        y = jnp.maximum(y, 0.0)
    elif act == "tanh":
        y = jnp.tanh(y)
    return y


# ----------------------------------------------------------------------------
# Fused kernel
# ----------------------------------------------------------------------------
def _gcn_fused_kernel(
    x_ref, a1_ref, w1_ref, p1_ref,      # layer 1 (W1 / param-slab feature chunks)
    w2_ref,                             # layer 2 weight row chunk (streamed)
    a2_ref, p2_ref,                     # layer 2 invariants
    w3_ref, a3_ref, p3_ref,             # layer 3 invariants
    wfc_ref, bfc_ref,                   # fc head invariants
    out_ref, pred_ref,                  # outputs (written on last step only)
    h2_acc,                             # scratch [m1, hidden] f32 accumulator
):
    j = pl.program_id(0)

    @pl.when(j == 0)
    def _():
        h2_acc[...] = jnp.zeros_like(h2_acc)

    # ----- layer 1, feature chunk j ----------------------------------------
    p1 = p1_ref[...]                                   # rows: b1 / gamma1 / beta1
    h1 = jnp.dot(x_ref[...].astype(w1_ref.dtype), w1_ref[...],
                 preferred_element_type=jnp.float32) + p1[0:1, :]
    g1 = jnp.dot(a1_ref[...], h1, preferred_element_type=jnp.float32)
    y1 = _bn_act(g1, p1[1:2, :], p1[2:3, :], "relu")

    # ----- layer-2 pre-aggregation: accumulate over the hidden (K) axis -----
    h2_acc[...] += jnp.dot(y1.astype(w2_ref.dtype), w2_ref[...],
                           preferred_element_type=jnp.float32)

    # ----- last chunk: finish layer 2, layer 3 and the fused fc head --------
    @pl.when(j == pl.num_programs(0) - 1)
    def _():
        p2 = p2_ref[...]
        h2 = h2_acc[...] + p2[0:1, :]
        g2 = jnp.dot(a2_ref[...], h2, preferred_element_type=jnp.float32)
        y2 = _bn_act(g2, p2[1:2, :], p2[2:3, :], "relu")

        p3 = p3_ref[...]
        h3 = jnp.dot(y2.astype(w3_ref.dtype), w3_ref[...],
                     preferred_element_type=jnp.float32) + p3[0:1, :]
        g3 = jnp.dot(a3_ref[...], h3, preferred_element_type=jnp.float32)
        y3 = _bn_act(g3, p3[1:2, :], p3[2:3, :], "tanh")
        out_ref[...] = y3.astype(out_ref.dtype)

        pred = jnp.dot(y3.astype(wfc_ref.dtype), wfc_ref[...],
                       preferred_element_type=jnp.float32) + bfc_ref[...]
        pred_ref[...] = pred.astype(pred_ref.dtype)


# ----------------------------------------------------------------------------
# Wrapper
# ----------------------------------------------------------------------------
def gcn_forward(params, x, in_affnty, anchor_affnty, out_affnty,
                batch_size, n_class, feat_tile=1024):
    n_x, d_in = x.shape
    m1 = in_affnty.shape[0]
    m2 = anchor_affnty.shape[0]
    m3 = out_affnty.shape[0]
    hidden = params["w1"].shape[1]
    d_out = params["w3"].shape[1]
    n_cls_pad = params["wfc_pad"].shape[1]

    t = min(feat_tile, hidden)
    assert hidden % t == 0 and t % _LANE == 0, \
        "hidden dim must tile in 128-lane feature chunks"
    n_steps = hidden // t

    inv = dict(pipeline_mode=pl.Buffered(1))  # grid-invariant -> single buffer

    # Approximate VMEM footprint (streamed chunks double-buffered, invariants
    # single-buffered, outputs double-buffered, scratch + epilogue temporaries).
    footprint = (
        2 * (d_in * t * 2 + 8 * t * 4 + t * hidden * 2)
        + n_x * d_in * 4 + m1 * n_x * 4 + m2 * m1 * 4 + 8 * hidden * 4
        + hidden * d_out * 2 + m3 * m2 * 4 + 8 * d_out * 4
        + d_out * n_cls_pad * 2 + n_cls_pad * 4
        + 2 * (m3 * d_out * 4 + m3 * n_cls_pad * 4)
        + m1 * hidden * 4
        + (m1 * hidden + m2 * hidden + m2 * d_out + m3 * d_out + m3 * n_cls_pad) * 4
    )

    flops = int(
        2 * n_x * d_in * hidden + 2 * m1 * n_x * hidden        # layer 1
        + 2 * m1 * hidden * hidden + 2 * m2 * m1 * hidden      # layer 2
        + 2 * m2 * hidden * d_out + 2 * m3 * m2 * d_out        # layer 3
        + 2 * m3 * d_out * n_cls_pad                           # fc head
        + 8 * (m1 * hidden + m2 * hidden + m3 * d_out)         # batch norms
    )
    transcendentals = int(m3 * d_out + 2 * hidden + d_out)
    bytes_accessed = int(
        n_x * d_in * 4 + m1 * n_x * 4 + d_in * hidden * 2 + 8 * hidden * 4
        + hidden * hidden * 2 + m2 * m1 * 4 + 8 * hidden * 4
        + hidden * d_out * 2 + m3 * m2 * 4 + 8 * d_out * 4
        + d_out * n_cls_pad * 2 + n_cls_pad * 4
        + m3 * d_out * 4 + m3 * n_cls_pad * 4
    )

    out, pred_pad = pl.pallas_call(
        _gcn_fused_kernel,
        out_shape=(jax.ShapeDtypeStruct((m3, d_out), jnp.float32),
                   jax.ShapeDtypeStruct((m3, n_cls_pad), jnp.float32)),
        grid_spec=pltpu.PrefetchScalarGridSpec(
            num_scalar_prefetch=0,
            grid=(n_steps,),
            in_specs=[
                pl.BlockSpec((n_x, d_in), lambda j: (0, 0), **inv),        # x
                pl.BlockSpec((m1, n_x), lambda j: (0, 0), **inv),          # in_affnty
                pl.BlockSpec((d_in, t), lambda j: (0, j)),                 # W1 col chunk
                pl.BlockSpec((8, t), lambda j: (0, j)),                    # b1/g1/be1 slab chunk
                pl.BlockSpec((t, hidden), lambda j: (j, 0)),               # W2 row chunk
                pl.BlockSpec((m2, m1), lambda j: (0, 0), **inv),           # anchor_affnty
                pl.BlockSpec((8, hidden), lambda j: (0, 0), **inv),        # b2/g2/be2 slab
                pl.BlockSpec((hidden, d_out), lambda j: (0, 0), **inv),    # W3
                pl.BlockSpec((m3, m2), lambda j: (0, 0), **inv),           # out_affnty
                pl.BlockSpec((8, d_out), lambda j: (0, 0), **inv),         # b3/g3/be3 slab
                pl.BlockSpec((d_out, n_cls_pad), lambda j: (0, 0), **inv),  # Wfc (padded)
                pl.BlockSpec((1, n_cls_pad), lambda j: (0, 0), **inv),     # bfc (padded)
            ],
            out_specs=(pl.BlockSpec((m3, d_out), lambda j: (0, 0)),
                       pl.BlockSpec((m3, n_cls_pad), lambda j: (0, 0))),
            scratch_shapes=[pltpu.VMEM((m1, hidden), jnp.float32)],
        ),
        compiler_params=pltpu.CompilerParams(
            dimension_semantics=("arbitrary",),  # accumulator + last-step epilogue
            vmem_limit_bytes=_vmem_limit_bytes(footprint),
        ),
        cost_estimate=pl.CostEstimate(
            flops=flops, transcendentals=transcendentals,
            bytes_accessed=bytes_accessed),
    )(x, in_affnty, params["w1"], params["p1"], params["w2"],
      anchor_affnty, params["p2"], params["w3"], out_affnty,
      params["p3"], params["wfc_pad"], params["bfc_pad"])

    pred = pred_pad[:batch_size, :n_class]   # undo row/lane padding of the fc head
    return out, pred


# ----------------------------------------------------------------------------
# Deterministic parameter init (PyTorch-style uniform(-1/sqrt(fan_in), ...)).
# Weights stored pre-transposed [in, out] in bf16; per-layer bias/gamma/beta
# packed into an (8, width) f32 slab (rows 0/1/2) for one aligned DMA per layer.
# ----------------------------------------------------------------------------
def init_params(key, n_input, n_output, n_class, hidden=2048):
    def lin(k, fan_in, fan_out):
        kw, kb = jax.random.split(k)
        bound = 1.0 / float(fan_in) ** 0.5
        w = jax.random.uniform(kw, (fan_in, fan_out), jnp.float32, -bound, bound)
        b = jax.random.uniform(kb, (fan_out,), jnp.float32, -bound, bound)
        return w, b

    def slab(width, bias):
        s = jnp.zeros((8, width), jnp.float32)
        s = s.at[0, :].set(bias)   # linear bias
        s = s.at[1, :].set(1.0)    # BN gamma
        return s                   # row 2 = BN beta = 0, rows 3..7 unused

    ks = jax.random.split(key, 4)
    w1, b1 = lin(ks[0], n_input, hidden)
    w2, b2 = lin(ks[1], hidden, hidden)
    w3, b3 = lin(ks[2], hidden, n_output)
    wfc, bfc = lin(ks[3], n_output, n_class)

    n_cls_pad = _round_up(n_class, _LANE)
    wfc_pad = jnp.zeros((n_output, n_cls_pad), jnp.float32).at[:, :n_class].set(wfc)
    bfc_pad = jnp.zeros((1, n_cls_pad), jnp.float32).at[:, :n_class].set(bfc)

    bf16 = lambda a: a.astype(jnp.bfloat16)
    return dict(
        w1=bf16(w1), p1=slab(hidden, b1),
        w2=bf16(w2), p2=slab(hidden, b2),
        w3=bf16(w3), p3=slab(n_output, b3),
        wfc_pad=bf16(wfc_pad), bfc_pad=bfc_pad,
    )


# ----------------------------------------------------------------------------
if __name__ == "__main__":
    # Shapes consistent with the module's forward:
    #   x:             [n_total, n_input]
    #   in_affnty:     [n_anchor, n_total]
    #   anchor_affnty: [n_anchor, n_anchor]
    #   out_affnty:    [n_total, n_anchor]
    n_total, n_anchor = 32, 16
    n_input, n_output, n_class = 64, 128, 8
    batch_size = 4
    hidden = 2048

    key = jax.random.PRNGKey(0)
    kx, ka1, ka2, ka3, kp = jax.random.split(key, 5)

    x = jax.random.normal(kx, (n_total, n_input), jnp.float32)

    def row_norm(a):
        a = jnp.abs(a)
        return a / jnp.sum(a, axis=1, keepdims=True)

    in_affnty = row_norm(jax.random.uniform(ka1, (n_anchor, n_total), jnp.float32))
    anchor_affnty = row_norm(jax.random.uniform(ka2, (n_anchor, n_anchor), jnp.float32))
    out_affnty = row_norm(jax.random.uniform(ka3, (n_total, n_anchor), jnp.float32))

    params = init_params(kp, n_input, n_output, n_class, hidden=hidden)

    out, pred = gcn_forward(params, x, in_affnty, anchor_affnty, out_affnty,
                            batch_size, n_class)
    jax.block_until_ready((out, pred))

    assert out.shape == (n_total, n_output)
    assert pred.shape == (batch_size, n_class)
    assert bool(jnp.all(jnp.isfinite(out))) and bool(jnp.all(jnp.isfinite(pred)))
    print("KERNEL_OK")
</pallas_src>

<mosaic_0001>
module attributes {stable_mosaic.version = 11 : i64} {
  func.func @_gcn_fused_kernel(%arg0: i32, %arg1: memref<32x64xf32, #tpu.memory_space<vmem>>, %arg2: memref<16x32xf32, #tpu.memory_space<vmem>>, %arg3: memref<64x1024xbf16, #tpu.memory_space<vmem>>, %arg4: memref<8x1024xf32, #tpu.memory_space<vmem>>, %arg5: memref<1024x2048xbf16, #tpu.memory_space<vmem>>, %arg6: memref<16x16xf32, #tpu.memory_space<vmem>>, %arg7: memref<8x2048xf32, #tpu.memory_space<vmem>>, %arg8: memref<2048x128xbf16, #tpu.memory_space<vmem>>, %arg9: memref<32x16xf32, #tpu.memory_space<vmem>>, %arg10: memref<8x128xf32, #tpu.memory_space<vmem>>, %arg11: memref<128x128xbf16, #tpu.memory_space<vmem>>, %arg12: memref<1x128xf32, #tpu.memory_space<vmem>>, %arg13: memref<32x128xf32, #tpu.memory_space<vmem>>, %arg14: memref<32x128xf32, #tpu.memory_space<vmem>>, %arg15: memref<16x2048xf32, #tpu.memory_space<vmem>>) attributes {dimension_semantics = [#tpu.dimension_semantics<arbitrary>], iteration_bounds = array<i64: 2>, scalar_prefetch = 0 : i64, scratch_operands = 1 : i64, tpu.core_type = #tpu.core_type<tc>, window_params = [{pipeline_mode = #tpu.pipeline_mode<synchronous>, transform_indices = @transform_0, window_bounds = array<i64: 32, 64>}, {pipeline_mode = #tpu.pipeline_mode<synchronous>, transform_indices = @transform_1, window_bounds = array<i64: 16, 32>}, {transform_indices = @transform_2, window_bounds = array<i64: 64, 1024>}, {transform_indices = @transform_3, window_bounds = array<i64: 8, 1024>}, {transform_indices = @transform_4, window_bounds = array<i64: 1024, 2048>}, {pipeline_mode = #tpu.pipeline_mode<synchronous>, transform_indices = @transform_5, window_bounds = array<i64: 16, 16>}, {pipeline_mode = #tpu.pipeline_mode<synchronous>, transform_indices = @transform_6, window_bounds = array<i64: 8, 2048>}, {pipeline_mode = #tpu.pipeline_mode<synchronous>, transform_indices = @transform_7, window_bounds = array<i64: 2048, 128>}, {pipeline_mode = #tpu.pipeline_mode<synchronous>, transform_indices = @transform_8, window_bounds = array<i64: 32, 16>}, {pipeline_mode = #tpu.pipeline_mode<synchronous>, transform_indices = @transform_9, window_bounds = array<i64: 8, 128>}, {pipeline_mode = #tpu.pipeline_mode<synchronous>, transform_indices = @transform_10, window_bounds = array<i64: 128, 128>}, {pipeline_mode = #tpu.pipeline_mode<synchronous>, transform_indices = @transform_11, window_bounds = array<i64: 1, 128>}, {pipeline_mode = #tpu.pipeline_mode<synchronous>, transform_indices = @transform_12, window_bounds = array<i64: 32, 128>}, {pipeline_mode = #tpu.pipeline_mode<synchronous>, transform_indices = @transform_13, window_bounds = array<i64: 32, 128>}]} {
    %c0_i32 = arith.constant 0 : i32
    %0 = arith.cmpi eq, %arg0, %c0_i32 : i32
    %1 = arith.extui %0 : i1 to i32
    %c0_i32_0 = arith.constant 0 : i32
    %2 = arith.cmpi ne, %1, %c0_i32_0 : i32
    scf.if %2 {
      %cst_23 = arith.constant 0.000000e+00 : f32
      %46 = vector.broadcast %cst_23 : f32 to vector<16x2048xf32>
      %c0_24 = arith.constant 0 : index
      %c0_25 = arith.constant 0 : index
      %47 = vector.load %arg15[%c0_24, %c0_25] : memref<16x2048xf32, #tpu.memory_space<vmem>>, vector<16x2048xf32>
      tpu.vector_store %arg15[%c0_24, %c0_25], %46 {strides = array<i32>} : memref<16x2048xf32, #tpu.memory_space<vmem>>, vector<16x2048xf32>,
    } else {
    }
    %c0 = arith.constant 0 : index
    %c0_1 = arith.constant 0 : index
    %3 = vector.load %arg4[%c0, %c0_1] : memref<8x1024xf32, #tpu.memory_space<vmem>>, vector<8x1024xf32>
    %c0_2 = arith.constant 0 : index
    %c0_3 = arith.constant 0 : index
    %4 = vector.load %arg1[%c0_2, %c0_3] : memref<32x64xf32, #tpu.memory_space<vmem>>, vector<32x64xf32>
    %5 = arith.truncf %4 : vector<32x64xf32> to vector<32x64xbf16>
    %c0_4 = arith.constant 0 : index
    %c0_5 = arith.constant 0 : index
    %6 = vector.load %arg3[%c0_4, %c0_5] : memref<64x1024xbf16, #tpu.memory_space<vmem>>, vector<64x1024xbf16>
    %cst = arith.constant dense<0.000000e+00> : vector<32x1024xf32>
    %7 = tpu.matmul %5, %6, %cst {dimension_numbers = #tpu.dot_dimension_numbers<[1], [0], [0], [1], [0, 0, 1, 1], [], []>} : vector<32x64xbf16>, vector<64x1024xbf16>, vector<32x1024xf32> -> vector<32x1024xf32>
    %8 = vector.extract_strided_slice %3 {offsets = [0, 0], sizes = [1, 1024], strides = [1, 1]} : vector<8x1024xf32> to vector<1x1024xf32>
    %9 = vector.broadcast %8 : vector<1x1024xf32> to vector<32x1024xf32>
    %10 = arith.addf %7, %9 : vector<32x1024xf32>
    %c0_6 = arith.constant 0 : index
    %c0_7 = arith.constant 0 : index
    %11 = vector.load %arg2[%c0_6, %c0_7] : memref<16x32xf32, #tpu.memory_space<vmem>>, vector<16x32xf32>
    %cst_8 = arith.constant dense<0.000000e+00> : vector<16x1024xf32>
    %12 = tpu.matmul %11, %10, %cst_8 {dimension_numbers = #tpu.dot_dimension_numbers<[1], [0], [0], [1], [0, 0, 1, 1], [], []>} : vector<16x32xf32>, vector<32x1024xf32>, vector<16x1024xf32> -> vector<16x1024xf32>
    %13 = vector.extract_strided_slice %3 {offsets = [1, 0], sizes = [1, 1024], strides = [1, 1]} : vector<8x1024xf32> to vector<1x1024xf32>
    %14 = vector.extract_strided_slice %3 {offsets = [2, 0], sizes = [1, 1024], strides = [1, 1]} : vector<8x1024xf32> to vector<1x1024xf32>
    %cst_9 = arith.constant dense<0.000000e+00> : vector<1024xf32>
    %15 = vector.multi_reduction <add>, %12, %cst_9 [0] : vector<16x1024xf32> to vector<1024xf32>
    %16 = vector.shape_cast %15 : vector<1024xf32> to vector<1x1024xf32>
    %cst_10 = arith.constant 6.250000e-02 : f32
    %17 = vector.broadcast %cst_10 : f32 to vector<1x1024xf32>
    %18 = arith.mulf %16, %17 : vector<1x1024xf32>
    %19 = vector.broadcast %18 : vector<1x1024xf32> to vector<16x1024xf32>
    %20 = arith.subf %12, %19 : vector<16x1024xf32>
    %21 = arith.mulf %20, %20 : vector<16x1024xf32>
    %cst_11 = arith.constant dense<0.000000e+00> : vector<1024xf32>
    %22 = vector.multi_reduction <add>, %21, %cst_11 [0] : vector<16x1024xf32> to vector<1024xf32>
    %23 = vector.shape_cast %22 : vector<1024xf32> to vector<1x1024xf32>
    %cst_12 = arith.constant 6.250000e-02 : f32
    %24 = vector.broadcast %cst_12 : f32 to vector<1x1024xf32>
    %25 = arith.mulf %23, %24 : vector<1x1024xf32>
    %cst_13 = arith.constant 9.99999974E-6 : f32
    %26 = vector.broadcast %cst_13 : f32 to vector<1x1024xf32>
    %27 = arith.addf %25, %26 : vector<1x1024xf32>
    %28 = math.rsqrt %27 : vector<1x1024xf32>
    %29 = vector.broadcast %28 : vector<1x1024xf32> to vector<16x1024xf32>
    %30 = arith.mulf %20, %29 : vector<16x1024xf32>
    %31 = vector.broadcast %13 : vector<1x1024xf32> to vector<16x1024xf32>
    %32 = arith.mulf %30, %31 : vector<16x1024xf32>
    %33 = vector.broadcast %14 : vector<1x1024xf32> to vector<16x1024xf32>
    %34 = arith.addf %32, %33 : vector<16x1024xf32>
    %cst_14 = arith.constant 0.000000e+00 : f32
    %35 = vector.broadcast %cst_14 : f32 to vector<16x1024xf32>
    %36 = arith.maximumf %34, %35 : vector<16x1024xf32>
    %c0_15 = arith.constant 0 : index
    %c0_16 = arith.constant 0 : index
    %37 = vector.load %arg15[%c0_15, %c0_16] : memref<16x2048xf32, #tpu.memory_space<vmem>>, vector<16x2048xf32>
    %38 = arith.truncf %36 : vector<16x1024xf32> to vector<16x1024xbf16>
    %c0_17 = arith.constant 0 : index
    %c0_18 = arith.constant 0 : index
    %39 = vector.load %arg5[%c0_17, %c0_18] : memref<1024x2048xbf16, #tpu.memory_space<vmem>>, vector<1024x2048xbf16>
    %cst_19 = arith.constant dense<0.000000e+00> : vector<16x2048xf32>
    %40 = tpu.matmul %38, %39, %cst_19 {dimension_numbers = #tpu.dot_dimension_numbers<[1], [0], [0], [1], [0, 0, 1, 1], [], []>} : vector<16x1024xbf16>, vector<1024x2048xbf16>, vector<16x2048xf32> -> vector<16x2048xf32>
    %41 = arith.addf %37, %40 : vector<16x2048xf32>
    %c0_20 = arith.constant 0 : index
    %c0_21 = arith.constant 0 : index
    %42 = vector.load %arg15[%c0_20, %c0_21] : memref<16x2048xf32, #tpu.memory_space<vmem>>, vector<16x2048xf32>
    tpu.vector_store %arg15[%c0_20, %c0_21], %41 {strides = array<i32>} : memref<16x2048xf32, #tpu.memory_space<vmem>>, vector<16x2048xf32>,
    %c1_i32 = arith.constant 1 : i32
    %43 = arith.cmpi eq, %arg0, %c1_i32 : i32
    %44 = arith.extui %43 : i1 to i32
    %c0_i32_22 = arith.constant 0 : i32
    %45 = arith.cmpi ne, %44, %c0_i32_22 : i32
    scf.if %45 {
      %c0_23 = arith.constant 0 : index
      %c0_24 = arith.constant 0 : index
      %46 = vector.load %arg7[%c0_23, %c0_24] : memref<8x2048xf32, #tpu.memory_space<vmem>>, vector<8x2048xf32>
      %c0_25 = arith.constant 0 : index
      %c0_26 = arith.constant 0 : index
      %47 = vector.load %arg15[%c0_25, %c0_26] : memref<16x2048xf32, #tpu.memory_space<vmem>>, vector<16x2048xf32>
      %48 = vector.extract_strided_slice %46 {offsets = [0, 0], sizes = [1, 2048], strides = [1, 1]} : vector<8x2048xf32> to vector<1x2048xf32>
      %49 = vector.broadcast %48 : vector<1x2048xf32> to vector<16x2048xf32>
      %50 = arith.addf %47, %49 : vector<16x2048xf32>
      %c0_27 = arith.constant 0 : index
      %c0_28 = arith.constant 0 : index
      %51 = vector.load %arg6[%c0_27, %c0_28] : memref<16x16xf32, #tpu.memory_space<vmem>>, vector<16x16xf32>
      %cst_29 = arith.constant dense<0.000000e+00> : vector<16x2048xf32>
      %52 = tpu.matmul %51, %50, %cst_29 {dimension_numbers = #tpu.dot_dimension_numbers<[1], [0], [0], [1], [0, 0, 1, 1], [], []>} : vector<16x16xf32>, vector<16x2048xf32>, vector<16x2048xf32> -> vector<16x2048xf32>
      %53 = vector.extract_strided_slice %46 {offsets = [1, 0], sizes = [1, 2048], strides = [1, 1]} : vector<8x2048xf32> to vector<1x2048xf32>
      %54 = vector.extract_strided_slice %46 {offsets = [2, 0], sizes = [1, 2048], strides = [1, 1]} : vector<8x2048xf32> to vector<1x2048xf32>
      %cst_30 = arith.constant dense<0.000000e+00> : vector<2048xf32>
      %55 = vector.multi_reduction <add>, %52, %cst_30 [0] : vector<16x2048xf32> to vector<2048xf32>
      %56 = vector.shape_cast %55 : vector<2048xf32> to vector<1x2048xf32>
      %cst_31 = arith.constant 6.250000e-02 : f32
      %57 = vector.broadcast %cst_31 : f32 to vector<1x2048xf32>
      %58 = arith.mulf %56, %57 : vector<1x2048xf32>
      %59 = vector.broadcast %58 : vector<1x2048xf32> to vector<16x2048xf32>
      %60 = arith.subf %52, %59 : vector<16x2048xf32>
      %61 = arith.mulf %60, %60 : vector<16x2048xf32>
      %cst_32 = arith.constant dense<0.000000e+00> : vector<2048xf32>
      %62 = vector.multi_reduction <add>, %61, %cst_32 [0] : vector<16x2048xf32> to vector<2048xf32>
      %63 = vector.shape_cast %62 : vector<2048xf32> to vector<1x2048xf32>
      %cst_33 = arith.constant 6.250000e-02 : f32
      %64 = vector.broadcast %cst_33 : f32 to vector<1x2048xf32>
      %65 = arith.mulf %63, %64 : vector<1x2048xf32>
      %cst_34 = arith.constant 9.99999974E-6 : f32
      %66 = vector.broadcast %cst_34 : f32 to vector<1x2048xf32>
      %67 = arith.addf %65, %66 : vector<1x2048xf32>
      %68 = math.rsqrt %67 : vector<1x2048xf32>
      %69 = vector.broadcast %68 : vector<1x2048xf32> to vector<16x2048xf32>
      %70 = arith.mulf %60, %69 : vector<16x2048xf32>
      %71 = vector.broadcast %53 : vector<1x2048xf32> to vector<16x2048xf32>
      %72 = arith.mulf %70, %71 : vector<16x2048xf32>
      %73 = vector.broadcast %54 : vector<1x2048xf32> to vector<16x2048xf32>
      %74 = arith.addf %72, %73 : vector<16x2048xf32>
      %cst_35 = arith.constant 0.000000e+00 : f32
      %75 = vector.broadcast %cst_35 : f32 to vector<16x2048xf32>
      %76 = arith.maximumf %74, %75 : vector<16x2048xf32>
      %c0_36 = arith.constant 0 : index
      %c0_37 = arith.constant 0 : index
      %77 = vector.load %arg10[%c0_36, %c0_37] : memref<8x128xf32, #tpu.memory_space<vmem>>, vector<8x128xf32>
      %78 = arith.truncf %76 : vector<16x2048xf32> to vector<16x2048xbf16>
      %c0_38 = arith.constant 0 : index
      %c0_39 = arith.constant 0 : index
      %79 = vector.load %arg8[%c0_38, %c0_39] : memref<2048x128xbf16, #tpu.memory_space<vmem>>, vector<2048x128xbf16>
      %cst_40 = arith.constant dense<0.000000e+00> : vector<16x128xf32>
      %80 = tpu.matmul %78, %79, %cst_40 {dimension_numbers = #tpu.dot_dimension_numbers<[1], [0], [0], [1], [0, 0, 1, 1], [], []>} : vector<16x2048xbf16>, vector<2048x128xbf16>, vector<16x128xf32> -> vector<16x128xf32>
      %81 = vector.extract_strided_slice %77 {offsets = [0, 0], sizes = [1, 128], strides = [1, 1]} : vector<8x128xf32> to vector<1x128xf32>
      %82 = vector.broadcast %81 : vector<1x128xf32> to vector<16x128xf32>
      %83 = arith.addf %80, %82 : vector<16x128xf32>
      %c0_41 = arith.constant 0 : index
      %c0_42 = arith.constant 0 : index
      %84 = vector.load %arg9[%c0_41, %c0_42] : memref<32x16xf32, #tpu.memory_space<vmem>>, vector<32x16xf32>
      %cst_43 = arith.constant dense<0.000000e+00> : vector<32x128xf32>
      %85 = tpu.matmul %84, %83, %cst_43 {dimension_numbers = #tpu.dot_dimension_numbers<[1], [0], [0], [1], [0, 0, 1, 1], [], []>} : vector<32x16xf32>, vector<16x128xf32>, vector<32x128xf32> -> vector<32x128xf32>
      %86 = vector.extract_strided_slice %77 {offsets = [1, 0], sizes = [1, 128], strides = [1, 1]} : vector<8x128xf32> to vector<1x128xf32>
      %87 = vector.extract_strided_slice %77 {offsets = [2, 0], sizes = [1, 128], strides = [1, 1]} : vector<8x128xf32> to vector<1x128xf32>
      %cst_44 = arith.constant dense<0.000000e+00> : vector<128xf32>
      %88 = vector.multi_reduction <add>, %85, %cst_44 [0] : vector<32x128xf32> to vector<128xf32>
      %89 = vector.shape_cast %88 : vector<128xf32> to vector<1x128xf32>
      %cst_45 = arith.constant 3.125000e-02 : f32
      %90 = vector.broadcast %cst_45 : f32 to vector<1x128xf32>
      %91 = arith.mulf %89, %90 : vector<1x128xf32>
      %92 = vector.broadcast %91 : vector<1x128xf32> to vector<32x128xf32>
      %93 = arith.subf %85, %92 : vector<32x128xf32>
      %94 = arith.mulf %93, %93 : vector<32x128xf32>
      %cst_46 = arith.constant dense<0.000000e+00> : vector<128xf32>
      %95 = vector.multi_reduction <add>, %94, %cst_46 [0] : vector<32x128xf32> to vector<128xf32>
      %96 = vector.shape_cast %95 : vector<128xf32> to vector<1x128xf32>
      %cst_47 = arith.constant 3.125000e-02 : f32
      %97 = vector.broadcast %cst_47 : f32 to vector<1x128xf32>
      %98 = arith.mulf %96, %97 : vector<1x128xf32>
      %cst_48 = arith.constant 9.99999974E-6 : f32
      %99 = vector.broadcast %cst_48 : f32 to vector<1x128xf32>
      %100 = arith.addf %98, %99 : vector<1x128xf32>
      %101 = math.rsqrt %100 : vector<1x128xf32>
      %102 = vector.broadcast %101 : vector<1x128xf32> to vector<32x128xf32>
      %103 = arith.mulf %93, %102 : vector<32x128xf32>
      %104 = vector.broadcast %86 : vector<1x128xf32> to vector<32x128xf32>
      %105 = arith.mulf %103, %104 : vector<32x128xf32>
      %106 = vector.broadcast %87 : vector<1x128xf32> to vector<32x128xf32>
      %107 = arith.addf %105, %106 : vector<32x128xf32>
      %108 = math.tanh %107 : vector<32x128xf32>
      %c0_49 = arith.constant 0 : index
      %c0_50 = arith.constant 0 : index
      %109 = vector.load %arg13[%c0_49, %c0_50] : memref<32x128xf32, #tpu.memory_space<vmem>>, vector<32x128xf32>
      tpu.vector_store %arg13[%c0_49, %c0_50], %108 {strides = array<i32>} : memref<32x128xf32, #tpu.memory_space<vmem>>, vector<32x128xf32>,
      %110 = arith.truncf %108 : vector<32x128xf32> to vector<32x128xbf16>
      %c0_51 = arith.constant 0 : index
      %c0_52 = arith.constant 0 : index
      %111 = vector.load %arg11[%c0_51, %c0_52] : memref<128x128xbf16, #tpu.memory_space<vmem>>, vector<128x128xbf16>
      %cst_53 = arith.constant dense<0.000000e+00> : vector<32x128xf32>
      %112 = tpu.matmul %110, %111, %cst_53 {dimension_numbers = #tpu.dot_dimension_numbers<[1], [0], [0], [1], [0, 0, 1, 1], [], []>} : vector<32x128xbf16>, vector<128x128xbf16>, vector<32x128xf32> -> vector<32x128xf32>
      %c0_54 = arith.constant 0 : index
      %c0_55 = arith.constant 0 : index
      %113 = vector.load %arg12[%c0_54, %c0_55] : memref<1x128xf32, #tpu.memory_space<vmem>>, vector<1x128xf32>
      %114 = vector.broadcast %113 : vector<1x128xf32> to vector<32x128xf32>
      %115 = arith.addf %112, %114 : vector<32x128xf32>
      %c0_56 = arith.constant 0 : index
      %c0_57 = arith.constant 0 : index
      %116 = vector.load %arg14[%c0_56, %c0_57] : memref<32x128xf32, #tpu.memory_space<vmem>>, vector<32x128xf32>
      tpu.vector_store %arg14[%c0_56, %c0_57], %115 {strides = array<i32>} : memref<32x128xf32, #tpu.memory_space<vmem>>, vector<32x128xf32>,
    } else {
    }
    return
  }
  func.func @transform_0(%arg0: i32) -> (i32, i32) {
    %c0_i32 = arith.constant 0 : i32
    %c0_i32_0 = arith.constant 0 : i32
    %c0_i32_1 = arith.constant 0 : i32
    return %c0_i32, %c0_i32_0 : i32, i32
  }
  func.func @transform_1(%arg0: i32) -> (i32, i32) {
    %c0_i32 = arith.constant 0 : i32
    %c0_i32_0 = arith.constant 0 : i32
    %c0_i32_1 = arith.constant 0 : i32
    return %c0_i32, %c0_i32_0 : i32, i32
  }
  func.func @transform_2(%arg0: i32) -> (i32, i32) {
    %c0_i32 = arith.constant 0 : i32
    %c0_i32_0 = arith.constant 0 : i32
    return %c0_i32, %arg0 : i32, i32
  }
  func.func @transform_3(%arg0: i32) -> (i32, i32) {
    %c0_i32 = arith.constant 0 : i32
    %c0_i32_0 = arith.constant 0 : i32
    return %c0_i32, %arg0 : i32, i32
  }
  func.func @transform_4(%arg0: i32) -> (i32, i32) {
    %c0_i32 = arith.constant 0 : i32
    %c0_i32_0 = arith.constant 0 : i32
    return %arg0, %c0_i32 : i32, i32
  }
  func.func @transform_5(%arg0: i32) -> (i32, i32) {
    %c0_i32 = arith.constant 0 : i32
    %c0_i32_0 = arith.constant 0 : i32
    %c0_i32_1 = arith.constant 0 : i32
    return %c0_i32, %c0_i32_0 : i32, i32
  }
  func.func @transform_6(%arg0: i32) -> (i32, i32) {
    %c0_i32 = arith.constant 0 : i32
    %c0_i32_0 = arith.constant 0 : i32
    %c0_i32_1 = arith.constant 0 : i32
    return %c0_i32, %c0_i32_0 : i32, i32
  }
  func.func @transform_7(%arg0: i32) -> (i32, i32) {
    %c0_i32 = arith.constant 0 : i32
    %c0_i32_0 = arith.constant 0 : i32
    %c0_i32_1 = arith.constant 0 : i32
    return %c0_i32, %c0_i32_0 : i32, i32
  }
  func.func @transform_8(%arg0: i32) -> (i32, i32) {
    %c0_i32 = arith.constant 0 : i32
    %c0_i32_0 = arith.constant 0 : i32
    %c0_i32_1 = arith.constant 0 : i32
    return %c0_i32, %c0_i32_0 : i32, i32
  }
  func.func @transform_9(%arg0: i32) -> (i32, i32) {
    %c0_i32 = arith.constant 0 : i32
    %c0_i32_0 = arith.constant 0 : i32
    %c0_i32_1 = arith.constant 0 : i32
    return %c0_i32, %c0_i32_0 : i32, i32
  }
  func.func @transform_10(%arg0: i32) -> (i32, i32) {
    %c0_i32 = arith.constant 0 : i32
    %c0_i32_0 = arith.constant 0 : i32
    %c0_i32_1 = arith.constant 0 : i32
    return %c0_i32, %c0_i32_0 : i32, i32
  }
  func.func @transform_11(%arg0: i32) -> (i32, i32) {
    %c0_i32 = arith.constant 0 : i32
    %c0_i32_0 = arith.constant 0 : i32
    %c0_i32_1 = arith.constant 0 : i32
    return %c0_i32, %c0_i32_0 : i32, i32
  }
  func.func @transform_12(%arg0: i32) -> (i32, i32) {
    %c0_i32 = arith.constant 0 : i32
    %c0_i32_0 = arith.constant 0 : i32
    %c0_i32_1 = arith.constant 0 : i32
    return %c0_i32, %c0_i32_0 : i32, i32
  }
  func.func @transform_13(%arg0: i32) -> (i32, i32) {
    %c0_i32 = arith.constant 0 : i32
    %c0_i32_0 = arith.constant 0 : i32
    %c0_i32_1 = arith.constant 0 : i32
    return %c0_i32, %c0_i32_0 : i32, i32
  }
}

</mosaic_0001>

<bundles_post_ra>
// kernel: tpu_custom_call.1
= control target key start
LH: loop header
LB: loop body
LE: loop exit
PB: predicated region body
PF: predicated region fallthrough
CT: control target
= control target key end

     0   :  { %s17676_s0 = inlined_call_operand.hbm [shape: f32[32,64], index: 0, kind: input, shape index: {}]   ;;  %s17677_s1 = inlined_call_operand.hbm [shape: f32[16,32], index: 1, kind: input, shape index: {}]   ;;  %s17678_s2 = inlined_call_operand.hbm [shape: bf16[64,2048], index: 2, kind: input, shape index: {}]   ;;  %s17679_s3 = inlined_call_operand.hbm [shape: f32[8,2048], index: 3, kind: input, shape index: {}]   ;;  %s17680_s4 = inlined_call_operand.hbm [shape: bf16[2048,2048], index: 4, kind: input, shape index: {}]   ;;  %s17681_s5 = inlined_call_operand.hbm [shape: f32[16,16], index: 5, kind: input, shape index: {}]   ;;  %s17682_s6 = inlined_call_operand.hbm [shape: f32[8,2048], index: 6, kind: input, shape index: {}]   ;;  %s17683_s7 = inlined_call_operand.hbm [shape: bf16[2048,128], index: 7, kind: input, shape index: {}]   ;;  %s17684_s8 = inlined_call_operand.vmem [shape: f32[32,16], index: 8, kind: input, shape index: {}]   ;;  %s17685_s9 = inlined_call_operand.hbm [shape: f32[8,128], index: 9, kind: input, shape index: {}]   ;;  %s17686_s10 = inlined_call_operand.hbm [shape: bf16[128,128], index: 10, kind: input, shape index: {}]   ;;  %s17687_s11 = inlined_call_operand.hbm [shape: f32[1,128], index: 11, kind: input, shape index: {}]   ;;  %s17688_s12 = inlined_call_operand.hbm [shape: f32[32,128], index: 12, kind: output, shape index: {0}]   ;;  %s17689_s13 = inlined_call_operand.hbm [shape: f32[32,128], index: 13, kind: output, shape index: {1}]  }
   0x1   :  { %17754 = sst [smem:[#allocation67_spill]] %s17676_s0 }
   0x2   :  { %17755 = sst [smem:[#allocation68_spill]] %s17678_s2 }
   0x3   :  { %17756 = sst [smem:[#allocation69_spill]] %s17680_s4 }
   0x4   :  { %17757 = sst [smem:[#allocation70_spill]] %s17684_s8 }
   0x5   :  { %17758 = sst [smem:[#allocation71_spill]] %s17688_s12 }
   0x6   :  { %17759 = sst [smem:[#allocation72_spill]] %s17689_s13 }
   0x7   :  { %19 = vsyncpa [#allocation4], 0 }
   0x8   :  { %20 = vsyncpa [#allocation7], 0 }
   0x9   :  { %21 = vsyncpa [#allocation13], 0 }
   0xa   :  { %22 = vsyncpa [#allocation16], 0 }
   0xb   :  { %23 = vsyncpa [#allocation19], 0 }
   0xc   :  { %24 = vsyncpa [#allocation5], 0 }
   0xd   :  { %25 = vsyncpa [#allocation22], 0  ;;  %s15161_s25 = smov 0   ;;  %s15163_s26 = smov 0  }
   0xe   :  { %s15165_s27 = smov 0   ;;  %s15167_s28 = smov 0  }
   0xf LB: > { %17760 = sst [smem:[#allocation32_spill]] %s15055_s26  ;;  %s15065_s29 = smov [#allocation3]   ;;  %s15063_s28 = sphi %s15167_s28, %s17874_s28   ;;  %s15059_s27 = sphi %s15165_s27, %s17877_s27   ;;  %s15055_s26 = sphi %s15163_s26, %s17876_s26   ;;  %s15051_s25 = sphi %s15161_s25, %s17875_s25  }
  0x10   : > { %17761 = sst [smem:[#allocation33_spill]] %s15059_s27  ;;  %s357_s30 = sshll.u32 %s15065_s29, 4  ;;  %s358_s30 = int_to_ptr.vmem [resolvable:$true] %s357_s30 }
  0x11   : > { %s15182_s14 = sadd.s32 4294967295, %s15063_s28   ;;  %p12608_p0 = scmp.ge.s32.totalorder %s15063_s28, 1 }
  0x12   : > { %17762 = sst [smem:[#allocation34_spill]] %s15182_s14  ;;  %p17690_p1 = scmp.eq.s32.totalorder %s15182_s14, 0 }
  0x13   : > { %p345_p2 = scmp.lt.s32.totalorder %s15063_s28, 3  ;;  %s15201_s17 = sadd.s32 1, %s15063_s28  }
  0x14   : > { %17766 = sst [smem:[#allocation36_spill]] %s15201_s17 }
  0x15   : > { %p15188_p4 = pnand %p12608_p0, %p345_p2  ;;  %s17767_s0 = sld [smem:[#allocation67_spill]] }
  0x17   : > { %s17763_s15 = scalar_select %p15188_p4, 1, 0 }
  0x18   : > { %p14315_p5 = pneg %p15188_p4 }
  0x19   : > { %17764 = sst [smem:[#allocation35_spill]] %s17763_s15 }
  0x1a   : > { %p15196_p6 = pnand %p14315_p5, %p17690_p1 }
  0x1b   : > { %s14631_s20 = scalar_lea.hbm %s17767_s0, 512 }
  0x1c   : > { %s17765_s16 = scalar_select %p15196_p6, 1, 0 }
  0x1d   : > { %p14632_p7 = scmp.ne.s32.totalorder %s17767_s0, %s14631_s20  ;;  %p15211_p8 = pneg %p15196_p6 }
  0x1e   : > { %p14638_p11 = scmp.lt.u32.totalorder %s14631_s20, %s17767_s0 }
  0x1f   : > { %s17768_s23 = scalar_select %p15211_p8, 1, 0 }
  0x20   : > { %p14634_p9 = pnand %p15211_p8, %p14632_p7 }
  0x22   : > { %p14635_p10 = pneg %p14634_p9 }
  0x24   : > { %p14640_p12 = pnand %p14638_p11, %p14635_p10 }
  0x26   : > { %14643 = shalt.err (!%p14640_p12)
}
  0x27   : > { %s14644_s18 = scalar_lea.vmem %s358_s30, 512  ;;  %p14652_p5 = scmp.lt.s32.totalorder %s358_s30, %s358_s30 }
  0x28   : > { %p14645_p13 = scmp.ne.s32.totalorder %s358_s30, %s14644_s18  ;;  %p14653_p3 = scmp.lt.s32.totalorder %s14644_s18, %s14644_s18 }
  0x2a   : > { %p14647_p0 = pnand %p14645_p13, %p15211_p8  ;;  %p14654_p1 = por %p14653_p3, %p14652_p5 }
  0x2c   : > { %p14648_p2 = pneg %p14647_p0 }
  0x2e   : > { %p14655_p4 = pnand %p14654_p1, %p14648_p2 }
  0x30   : > { %14658 = shalt.err (!%p14655_p4)
}
  0x31   : > { %s17695_s19 = smov 128   ;;  %s17697_s20 = smov 8  }
  0x32   : > { %14318 = dma.hbm_to_vmem [thread:$0]  (!%p15196_p6), %s17767_s0, 512, %s358_s30, [#allocation4], %s17695_s19, %s17695_s19, %s17697_s20  }
  0x33   : > { %s77_s24 = ssub.s32 %s15063_s28, %s15201_s17  ;;  %s80_s29 = sadd.s32 1, %s15059_s27 }
  0x34   : > { %p78_p1 = scmp.eq.s32.totalorder %s77_s24, 0  ;;  %p87_p3 = scmp.ne.s32.totalorder %s15059_s27, %s15055_s26 }
  0x35   : > { %p88_p4 = scmp.eq.s32.totalorder %s15063_s28, 0  ;;  %p93_p7 = scmp.ne.s32.totalorder %s15055_s26, %s15051_s25 }
  0x36   : > { %s15239_s18 = scalar_select %p78_p1, %s15059_s27, %s80_s29  }
  0x37   : > { %p89_p9 = por %p88_p4, %p87_p3  ;;  %p17770_p10 = scmp.eq.s32.totalorder %s15182_s14, 0 }
  0x38   : > { %17769 = sst [smem:[#allocation37_spill]] %s15239_s18  ;;  %p14358_p12 = scmp.lt.s32.totalorder %s15063_s28, 2 }
  0x39   : > { %p15243_p11 = por %p17770_p10, %p93_p7  ;;  %s459_s12 = sand.u32 1, %s15063_s28  }
  0x3a   : > { %s15250_s8 = sand.u32 1, %s15059_s27   ;;  %s13877_s21 = sshll.u32 %s15063_s28, 9 }
  0x3b   : > { %s17771_s13 = scalar_select %p15243_p11, 1, 0 }
  0x3c   : > { %s12618_s30 = sshll.u32 %s15250_s8, 8  ;;  %s17773_s2 = sld [smem:[#allocation68_spill]] }
  0x3d   : > { %17772 = sst [smem:[#allocation38_spill]] %s17771_s13  ;;  %s463_s25 = scalar_lea.vmem [#allocation8], %s12618_s30 }
  0x3e   : > { %s470_s29 = sshll.u32 %s463_s25, 4  ;;  %p15259_p13 = pnand %p14358_p12, %p89_p9  ;;  %s15263_s29 = int_to_ptr.vmem [resolvable:$true] %s470_s29 }
  0x3f   : > { %s15265_s0 = scalar_lea.sflag [#allocation4], %s459_s12 }
  0x40   : > { %s17774_s20 = scalar_select %p15259_p13, 1, 0 }
  0x41   : > { %p15271_p2 = pneg %p15259_p13 }
  0x42   : > { %s15257_s19 = scalar_lea.hbm %s17773_s2, %s13877_s21  ;;  %s14664_s24 = scalar_lea.hbm %s17773_s2, 8192 }
  0x43   : > { %s14659_s18 = scalar_lea.hbm %s15257_s19, 4096  ;;  %p14665_p3 = scmp.lt.u32.totalorder %s15257_s19, %s17773_s2 }
  0x44   : > { %p14660_p0 = scmp.ne.s32.totalorder %s15257_s19, %s14659_s18  ;;  %p14666_p4 = scmp.lt.u32.totalorder %s14664_s24, %s14659_s18 }
  0x45   : > { %s17775_s21 = scalar_select %p15271_p2, 1, 0 }
  0x46   : > { %p14662_p5 = pnand %p15271_p2, %p14660_p0  ;;  %p14667_p7 = por %p14666_p4, %p14665_p3 }
  0x47   : > { %p14668_p9 = scmp.lt.u32.totalorder %s14659_s18, %s15257_s19 }
  0x48   : > { %p14663_p1 = pneg %p14662_p5 }
  0x49   : > { %p14669_p10 = por %p14668_p9, %p14667_p7 }
  0x4b   : > { %p14670_p12 = pnand %p14669_p10, %p14663_p1 }
  0x4d   : > { %14673 = shalt.err (!%p14670_p12)
}
  0x4e   : > { %s14674_s12 = scalar_lea.vmem %s15263_s29, 4096  ;;  %s15068_s30 = smov [#allocation8]  }
  0x4f   : > { %p14675_p0 = scmp.ne.s32.totalorder %s15263_s29, %s14674_s12  ;;  %s14679_s22 = sshll.u32 %s15068_s30, 4  ;;  %s14680_s22 = int_to_ptr.vmem [resolvable:$false] %s14679_s22 }
  0x50   : > { %s14681_s27 = scalar_lea.vmem %s14680_s22, 8192  ;;  %p14682_p6 = scmp.lt.s32.totalorder %s15263_s29, %s14680_s22 }
  0x51   : > { %p14677_p5 = pnand %p14675_p0, %p15271_p2  ;;  %p14683_p8 = scmp.lt.s32.totalorder %s14681_s27, %s14674_s12 }
  0x53   : > { %p14678_p11 = pneg %p14677_p5  ;;  %p14684_p3 = por %p14683_p8, %p14682_p6 }
  0x55   : > { %p14685_p4 = pnand %p14684_p3, %p14678_p11 }
  0x57   : > { %14688 = shalt.err (!%p14685_p4)
}
  0x58   : > { %s17719_s18 = smov 1024   ;;  %s15070_s24 = smov 512  }
  0x59   : > { %s15071_s25 = smov 32   ;;  %s15072_s2 = smov [#allocation6]  }
  0x5a   : > { %14343 = dma.hbm_to_vmem [thread:$0]  (!%p15259_p13), %s15257_s19, 4096, %s15263_s29, %s15265_s0, %s17719_s18, %s15070_s24, %s15071_s25  }
  0x5b   : > { %s370_s30 = sshll.u32 %s15072_s2, 4  ;;  %s15073_s17 = smov [#allocation12]   ;;  %s371_s30 = int_to_ptr.vmem [resolvable:$true] %s370_s30 }
  0x5c   : > { %s397_s22 = sshll.u32 %s15073_s17, 4  ;;  %s14689_s13 = scalar_lea.hbm %s17677_s1, 256  ;;  %s398_s22 = int_to_ptr.vmem [resolvable:$true] %s397_s22 }
  0x5d   : > { %p14690_p6 = scmp.ne.s32.totalorder %s17677_s1, %s14689_s13  ;;  %p17776_p8 = scmp.ne.s32.totalorder %s17768_s23, 0 }
  0x5e   : > { %p14696_p7 = scmp.lt.u32.totalorder %s14689_s13, %s17677_s1 }
  0x5f   : > { %p14692_p11 = pnand %p14690_p6, %p17776_p8 }
  0x61   : > { %p14693_p1 = pneg %p14692_p11 }
  0x63   : > { %p14698_p9 = pnand %p14696_p7, %p14693_p1 }
  0x65   : > { %14701 = shalt.err (!%p14698_p9)
}
  0x66   : > { %s14702_s2 = scalar_lea.vmem %s371_s30, 256  ;;  %p14710_p5 = scmp.lt.s32.totalorder %s371_s30, %s371_s30 }
  0x67   : > { %p14703_p10 = scmp.ne.s32.totalorder %s371_s30, %s14702_s2  ;;  %p14711_p3 = scmp.lt.s32.totalorder %s14702_s2, %s14702_s2 }
  0x69   : > { %p14705_p12 = pnand %p14703_p10, %p17776_p8  ;;  %p14712_p4 = por %p14711_p3, %p14710_p5 }
  0x6b   : > { %p14706_p0 = pneg %p14705_p12 }
  0x6d   : > { %p14713_p13 = pnand %p14712_p4, %p14706_p0 }
  0x6f   : > { %14716 = shalt.err (!%p14713_p13)
}
  0x70   : > { %p17777_p6 = scmp.ne.s32.totalorder %s17765_s16, 0  ;;  %s17778_s26 = smov 8  }
  0x71   : > { %s17779_s14 = smov 128   ;;  %s14717_s19 = scalar_lea.hbm %s17682_s6, 2048 }
  0x72   : > { %14321 = dma.hbm_to_vmem [thread:$0]  (!%p17777_p6), %s17677_s1, 256, %s371_s30, [#allocation7], %s17779_s14, %s17779_s14, %s17778_s26  }
  0x73   : > { %p14718_p11 = scmp.ne.s32.totalorder %s17682_s6, %s14717_s19  ;;  %p14724_p7 = scmp.lt.u32.totalorder %s14717_s19, %s17682_s6 }
  0x75   : > { %p14720_p13 = pnand %p14718_p11, %p17776_p8 }
  0x77   : > { %p14721_p1 = pneg %p14720_p13 }
  0x79   : > { %p14726_p9 = pnand %p14724_p7, %p14721_p1 }
  0x7b   : > { %14729 = shalt.err (!%p14726_p9)
}
  0x7c   : > { %s14730_s27 = scalar_lea.vmem %s398_s22, 2048  ;;  %p14738_p5 = scmp.lt.s32.totalorder %s398_s22, %s398_s22 }
  0x7d   : > { %p14731_p10 = scmp.ne.s32.totalorder %s398_s22, %s14730_s27  ;;  %p14739_p3 = scmp.lt.s32.totalorder %s14730_s27, %s14730_s27 }
  0x7f   : > { %p14733_p12 = pnand %p14731_p10, %p17776_p8  ;;  %p14740_p4 = por %p14739_p3, %p14738_p5 }
  0x81   : > { %p14734_p0 = pneg %p14733_p12 }
  0x83   : > { %p14741_p2 = pnand %p14740_p4, %p14734_p0 }
  0x85   : > { %14744 = shalt.err (!%p14741_p2)
}
  0x86   : > { %14327 = dma.hbm_to_vmem [thread:$0]  (!%p17777_p6), %s17682_s6, 2048, %s398_s22, [#allocation13]  }
  0x87   : > { %s15074_s4 = smov [#allocation15]   ;;  %s12621_s15 = sshll.u32 %s15250_s8, 6 }
  0x88   : > { %s424_s13 = sshll.u32 %s15074_s4, 4  ;;  %s14745_s29 = scalar_lea.hbm %s17685_s9, 128  ;;  %s425_s13 = int_to_ptr.vmem [resolvable:$true] %s424_s13 }
  0x89   : > { %p14746_p2 = scmp.ne.s32.totalorder %s17685_s9, %s14745_s29  ;;  %p14752_p1 = scmp.lt.u32.totalorder %s14745_s29, %s17685_s9 }
  0x8b   : > { %p14748_p11 = pnand %p14746_p2, %p17776_p8 }
  0x8d   : > { %p14749_p13 = pneg %p14748_p11 }
  0x8f   : > { %p14754_p7 = pnand %p14752_p1, %p14749_p13 }
  0x91   : > { %14757 = shalt.err (!%p14754_p7)
}
  0x92   : > { %s14758_s22 = scalar_lea.vmem %s425_s13, 128  ;;  %p14766_p0 = scmp.lt.s32.totalorder %s425_s13, %s425_s13 }
  0x93   : > { %p14759_p9 = scmp.ne.s32.totalorder %s425_s13, %s14758_s22  ;;  %p14767_p5 = scmp.lt.s32.totalorder %s14758_s22, %s14758_s22 }
  0x95   : > { %p14761_p10 = pnand %p14759_p9, %p17776_p8  ;;  %p14768_p3 = por %p14767_p5, %p14766_p0 }
  0x97   : > { %p14762_p12 = pneg %p14761_p10 }
  0x99   : > { %p14769_p4 = pnand %p14768_p3, %p14762_p12 }
  0x9b   : > { %14772 = shalt.err (!%p14769_p4)
}
  0x9c   : > { %14333 = dma.hbm_to_vmem [thread:$0]  (!%p17777_p6), %s17685_s9, 128, %s425_s13, [#allocation16]  }
  0x9d   : > { %s13878_s4 = sshll.u32 %s15063_s28, 10  ;;  %s484_s17 = scalar_lea.vmem [#allocation9], %s12621_s15 }
  0x9e   : > { %s492_s19 = sshll.u32 %s484_s17, 4  ;;  %s490_s25 = scalar_lea.hbm %s17679_s3, %s13878_s4  ;;  %s493_s19 = int_to_ptr.vmem [resolvable:$true] %s492_s19 }
  0x9f   : > { %s14773_s12 = scalar_lea.hbm %s490_s25, 1024  ;;  %p17780_p11 = scmp.ne.s32.totalorder %s17775_s21, 0 }
  0xa0   : > { %p14774_p2 = scmp.ne.s32.totalorder %s490_s25, %s14773_s12  ;;  %s14778_s30 = scalar_lea.hbm %s17679_s3, 2048 }
  0xa1   : > { %p14779_p7 = scmp.lt.u32.totalorder %s490_s25, %s17679_s3  ;;  %p14780_p9 = scmp.lt.u32.totalorder %s14778_s30, %s14773_s12 }
  0xa2   : > { %p14776_p13 = pnand %p14774_p2, %p17780_p11  ;;  %p14782_p12 = scmp.lt.u32.totalorder %s14773_s12, %s490_s25 }
  0xa3   : > { %p14781_p10 = por %p14780_p9, %p14779_p7 }
  0xa4   : > { %p14777_p1 = pneg %p14776_p13 }
  0xa5   : > { %p14783_p0 = por %p14782_p12, %p14781_p10 }
  0xa7   : > { %p14784_p5 = pnand %p14783_p0, %p14777_p1 }
  0xa9   : > { %14787 = shalt.err (!%p14784_p5)
}
  0xaa   : > { %s14788_s13 = scalar_lea.vmem %s493_s19, 1024  ;;  %s15075_s15 = smov [#allocation9]  }
  0xab   : > { %p14789_p3 = scmp.ne.s32.totalorder %s493_s19, %s14788_s13  ;;  %s14793_s4 = sshll.u32 %s15075_s15, 4  ;;  %s14794_s4 = int_to_ptr.vmem [resolvable:$false] %s14793_s4 }
  0xac   : > { %s14795_s17 = scalar_lea.vmem %s14794_s4, 2048  ;;  %p14796_p13 = scmp.lt.s32.totalorder %s493_s19, %s14794_s4 }
  0xad   : > { %p14791_p4 = pnand %p14789_p3, %p17780_p11  ;;  %p14797_p6 = scmp.lt.s32.totalorder %s14795_s17, %s14788_s13 }
  0xaf   : > { %p14792_p2 = pneg %p14791_p4  ;;  %p14798_p8 = por %p14797_p6, %p14796_p13 }
  0xb1   : > { %p14799_p7 = pnand %p14798_p8, %p14792_p2 }
  0xb3   : > { %14802 = shalt.err (!%p14799_p7)
}
  0xb4   : > { %p17781_p9 = scmp.ne.s32.totalorder %s17774_s20, 0  ;;  %s15076_s18 = smov [#allocation11]  }
  0xb5   : > { %s383_s29 = sshll.u32 %s15076_s18, 4  ;;  %s15077_s24 = smov [#allocation14]   ;;  %s384_s29 = int_to_ptr.vmem [resolvable:$true] %s383_s29 }
  0xb6   : > { %14346 = dma.hbm_to_vmem [thread:$0]  (!%p17781_p9), %s490_s25, 1024, %s493_s19, %s15265_s0  }
  0xb7   : > { %s407_s12 = sshll.u32 %s15077_s24, 4  ;;  %s14803_s30 = scalar_lea.hbm %s17681_s5, 256  ;;  %s15371_s12 = int_to_ptr.vmem [resolvable:$true] %s407_s12 }
  0xb8   : > { %p14804_p8 = scmp.ne.s32.totalorder %s17681_s5, %s14803_s30  ;;  %p17782_p6 = scmp.ne.s32.totalorder %s17768_s23, 0 }
  0xb9   : > { %p14810_p12 = scmp.lt.u32.totalorder %s14803_s30, %s17681_s5 }
  0xba   : > { %p14806_p1 = pnand %p14804_p8, %p17782_p6 }
  0xbc   : > { %p14807_p10 = pneg %p14806_p1 }
  0xbe   : > { %p14812_p0 = pnand %p14810_p12, %p14807_p10 }
  0xc0   : > { %14815 = shalt.err (!%p14812_p0)
}
  0xc1   : > { %s14816_s25 = scalar_lea.vmem %s384_s29, 256  ;;  %p14824_p2 = scmp.lt.s32.totalorder %s384_s29, %s384_s29 }
  0xc2   : > { %p14817_p5 = scmp.ne.s32.totalorder %s384_s29, %s14816_s25  ;;  %p14825_p13 = scmp.lt.s32.totalorder %s14816_s25, %s14816_s25 }
  0xc4   : > { %p14819_p3 = pnand %p14817_p5, %p17782_p6  ;;  %p14826_p7 = por %p14825_p13, %p14824_p2 }
  0xc6   : > { %p14820_p4 = pneg %p14819_p3 }
  0xc8   : > { %p14827_p9 = pnand %p14826_p7, %p14820_p4 }
  0xca   : > { %14830 = shalt.err (!%p14827_p9)
}
  0xcb   : > { %p17783_p8 = scmp.ne.s32.totalorder %s17765_s16, 0  ;;  %s14831_s27 = scalar_lea.hbm %s17683_s7, 16384 }
  0xcc   : > { %p14832_p1 = scmp.ne.s32.totalorder %s17683_s7, %s14831_s27  ;;  %p14838_p12 = scmp.lt.u32.totalorder %s14831_s27, %s17683_s7 }
  0xcd   : > { %14324 = dma.hbm_to_vmem [thread:$0]  (!%p17783_p8), %s17681_s5, 256, %s384_s29, [#allocation7], %s17779_s14, %s17779_s14, %s17778_s26  }
  0xce   : > { %p14834_p9 = pnand %p14832_p1, %p17782_p6 }
  0xd0   : > { %p14835_p10 = pneg %p14834_p9 }
  0xd2   : > { %p14840_p0 = pnand %p14838_p12, %p14835_p10 }
  0xd4   : > { %14843 = shalt.err (!%p14840_p0)
}
  0xd5   : > { %s14844_s26 = scalar_lea.vmem %s15371_s12, 16384  ;;  %p14852_p2 = scmp.lt.s32.totalorder %s15371_s12, %s15371_s12 }
  0xd6   : > { %p14845_p5 = scmp.ne.s32.totalorder %s15371_s12, %s14844_s26  ;;  %p14853_p13 = scmp.lt.s32.totalorder %s14844_s26, %s14844_s26 }
  0xd8   : > { %p14847_p3 = pnand %p14845_p5, %p17782_p6  ;;  %p14854_p7 = por %p14853_p13, %p14852_p2 }
  0xda   : > { %p14848_p4 = pneg %p14847_p3 }
  0xdc   : > { %p14855_p1 = pnand %p14854_p7, %p14848_p4 }
  0xde   : > { %14858 = shalt.err (!%p14855_p1)
}
  0xdf   : > { %s15078_s14 = smov 64   ;;  %s15079_s29 = smov 4  }
  0xe0   : > { %14330 = dma.hbm_to_vmem [thread:$0]  (!%p17783_p8), %s17683_s7, 16384, %s15371_s12, [#allocation13], %s15078_s14, %s15078_s14, %s15079_s29  }
  0xe1   : > { %s15080_s25 = smov [#allocation17]   ;;  %s15081_s17 = smov [#allocation18]  }
  0xe2   : > { %s434_s4 = sshll.u32 %s15080_s25, 4  ;;  %s448_s18 = sshll.u32 %s15081_s17, 4  ;;  %s435_s4 = int_to_ptr.vmem [resolvable:$true] %s434_s4  ;;  %s15419_s18 = int_to_ptr.vmem [resolvable:$true] %s448_s18 }
  0xe3   : > { %s14859_s22 = scalar_lea.hbm %s17686_s10, 1024 }
  0xe4   : > { %p14860_p9 = scmp.ne.s32.totalorder %s17686_s10, %s14859_s22  ;;  %p14866_p0 = scmp.lt.u32.totalorder %s14859_s22, %s17686_s10 }
  0xe6   : > { %p14862_p10 = pnand %p14860_p9, %p17782_p6 }
  0xe8   : > { %p14863_p12 = pneg %p14862_p10 }
  0xea   : > { %p14868_p5 = pnand %p14866_p0, %p14863_p12 }
  0xec   : > { %14871 = shalt.err (!%p14868_p5)
}
  0xed   : > { %s14872_s26 = scalar_lea.vmem %s435_s4, 1024  ;;  %p14880_p13 = scmp.lt.s32.totalorder %s435_s4, %s435_s4 }
  0xee   : > { %p14873_p3 = scmp.ne.s32.totalorder %s435_s4, %s14872_s26  ;;  %p14881_p7 = scmp.lt.s32.totalorder %s14872_s26, %s14872_s26 }
  0xf0   : > { %p14875_p4 = pnand %p14873_p3, %p17782_p6  ;;  %p14882_p1 = por %p14881_p7, %p14880_p13 }
  0xf2   : > { %p14876_p2 = pneg %p14875_p4 }
  0xf4   : > { %p14883_p11 = pnand %p14882_p1, %p14876_p2 }
  0xf6   : > { %14886 = shalt.err (!%p14883_p11)
}
  0xf7   : > { %14336 = dma.hbm_to_vmem [thread:$0]  (!%p17783_p8), %s17686_s10, 1024, %s435_s4, [#allocation16], %s15078_s14, %s15078_s14, %s15079_s29  }
  0xf8   : > { %s14887_s24 = scalar_lea.hbm %s17687_s11, 16 }
  0xf9   : > { %p14888_p9 = scmp.ne.s32.totalorder %s17687_s11, %s14887_s24  ;;  %p14894_p12 = scmp.lt.u32.totalorder %s14887_s24, %s17687_s11 }
  0xfb   : > { %p14890_p10 = pnand %p14888_p9, %p17782_p6 }
  0xfd   : > { %p14891_p11 = pneg %p14890_p10 }
  0xff   : > { %p14896_p0 = pnand %p14894_p12, %p14891_p11 }
 0x101   : > { %14899 = shalt.err (!%p14896_p0)
}
 0x102   : > { %s14900_s29 = scalar_lea.vmem %s15419_s18, 16  ;;  %s14907_s4 = scalar_lea.vmem %s15419_s18, 32 }
 0x103   : > { %p14901_p5 = scmp.ne.s32.totalorder %s15419_s18, %s14900_s29  ;;  %p14908_p2 = scmp.lt.s32.totalorder %s15419_s18, %s15419_s18 }
 0x104   : > { %p14909_p13 = scmp.lt.s32.totalorder %s14907_s4, %s14900_s29 }
 0x105   : > { %p14903_p3 = pnand %p14901_p5, %p17782_p6 }
 0x106   : > { %p14910_p7 = por %p14909_p13, %p14908_p2 }
 0x107   : > { %p14904_p4 = pneg %p14903_p3 }
 0x109   : > { %p14911_p1 = pnand %p14910_p7, %p14904_p4 }
 0x10b   : > { %14914 = shalt.err (!%p14911_p1)
}
 0x10c   : > { %14339 = dma.hbm_to_vmem [thread:$0]  (!%p17783_p8), %s17687_s11, 16, %s15419_s18, [#allocation19]  }
 0x10d   : > { %s12624_s23 = sshll.u32 %s15250_s8, 13  ;;  %s13880_s26 = sshll.u32 %s15063_s28, 17 }
 0x10e   : > { %s17784_s25 = sld [smem:[#allocation69_spill]]  ;;  %s503_s16 = scalar_lea.vmem [#allocation10], %s12624_s23 }
 0x10f   : > { %s511_s27 = sshll.u32 %s503_s16, 4  ;;  %p17786_p9 = scmp.ne.s32.totalorder %s17775_s21, 0  ;;  %s15472_s27 = int_to_ptr.vmem [resolvable:$true] %s511_s27 }
 0x114   : > { %s17785_s17 = smov %s17784_s25  ;;  %s15470_s24 = scalar_lea.hbm %s17784_s25, %s13880_s26 }
 0x115   : > { %s14915_s22 = scalar_lea.hbm %s15470_s24, 131072  ;;  %s14920_s18 = scalar_lea.hbm %s17785_s17, 262144 }
 0x116   : > { %p14916_p6 = scmp.ne.s32.totalorder %s15470_s24, %s14915_s22  ;;  %p14921_p11 = scmp.lt.u32.totalorder %s15470_s24, %s17785_s17 }
 0x117   : > { %p14922_p12 = scmp.lt.u32.totalorder %s14920_s18, %s14915_s22  ;;  %p14924_p5 = scmp.lt.u32.totalorder %s14915_s22, %s15470_s24 }
 0x118   : > { %p14918_p10 = pnand %p14916_p6, %p17786_p9 }
 0x119   : > { %p14923_p0 = por %p14922_p12, %p14921_p11 }
 0x11a   : > { %p14919_p8 = pneg %p14918_p10 }
 0x11b   : > { %p14925_p3 = por %p14924_p5, %p14923_p0 }
 0x11d   : > { %p14926_p4 = pnand %p14925_p3, %p14919_p8 }
 0x11f   : > { %14929 = shalt.err (!%p14926_p4)
}
 0x120   : > { %s14930_s29 = scalar_lea.vmem %s15472_s27, 131072  ;;  %s15082_s4 = smov [#allocation10]  }
 0x121   : > { %p14931_p2 = scmp.ne.s32.totalorder %s15472_s27, %s14930_s29  ;;  %s14935_s13 = sshll.u32 %s15082_s4, 4  ;;  %s14936_s13 = int_to_ptr.vmem [resolvable:$false] %s14935_s13 }
 0x122   : > { %s14937_s12 = scalar_lea.vmem %s14936_s13, 262144  ;;  %p14938_p1 = scmp.lt.s32.totalorder %s15472_s27, %s14936_s13 }
 0x123   : > { %p14933_p13 = pnand %p14931_p2, %p17786_p9  ;;  %p14939_p6 = scmp.lt.s32.totalorder %s14937_s12, %s14930_s29 }
 0x125   : > { %p14934_p7 = pneg %p14933_p13  ;;  %p14940_p10 = por %p14939_p6, %p14938_p1 }
 0x127   : > { %p14941_p11 = pnand %p14940_p10, %p14934_p7 }
 0x129   : > { %14944 = shalt.err (!%p14941_p11)
}
 0x12a   : > { %p17787_p8 = scmp.ne.s32.totalorder %s17774_s20, 0  ;;  %s17788_s23 = smov 1024  }
 0x12b   : > { %s17789_s21 = sld [smem:[#allocation35_spill]] }
 0x12c   : > { %14349 = dma.hbm_to_vmem [thread:$0]  (!%p17787_p8), %s15470_s24, 131072, %s15472_s27, %s15265_s0, %s17788_s23, %s17788_s23, %s15078_s14  }
 0x131   : > { %p17790_p9 = scmp.ne.s32.totalorder %s17789_s21, 0 }
 0x133   : > { %523 = sbr.rel (%p17790_p9) target bundleno = 3314 (0xcf2), region = 68 }
 0x13a   : > { %s17791_s26 = sld [smem:[#allocation34_spill]] }
 0x140   : > { %p17792_p12 = scmp.eq.s32.totalorder %s17791_s26, 0 }
 0x142   : > { %15014 = dma.done.wait (%p17792_p12), [#allocation4], 512   ;;  %p17793_p0 = pmov %p17792_p12 }
 0x144   : > { %15016 = vsyncadd (%p17793_p0), [#allocation4], 4294966784  ;;  %p17794_p5 = pmov %p17793_p0 }
 0x145   : > { %p17795_p3 = pmov %p17793_p0 }
 0x146   : > { %15018 = dma.done.wait (%p17794_p5), [#allocation7], 256  }
 0x147   : > { %15020 = vsyncadd (%p17795_p3), [#allocation7], 4294967040  ;;  %s17796_s20 = sld [smem:[#allocation32_spill]]  ;;  %s17797_s15 = sld [smem:[#allocation38_spill]] }
 0x148   : > { %s533_s19 = sand.u32 1, %s17791_s26  }
 0x149   : > { %s534_s25 = scalar_lea.sflag [#allocation4], %s533_s19 }
 0x14d   : > { %s535_s0 = sand.u32 1, %s17796_s20   ;;  %p17798_p4 = scmp.ne.s32.totalorder %s17797_s15, 0 }
 0x14e   : > { %s12631_s14 = sshll.u32 %s535_s0, 8 }
 0x14f   : > { %s15511_s24 = scalar_lea.vmem [#allocation8], %s12631_s14 }
 0x150   : > { %15022 = dma.done.wait (%p17798_p4), %s534_s25, 136192  }
 0x151   : > { %15024 = vsyncadd (%p17798_p4), %s534_s25, 4294831104  ;;  %s12632_s16 = sshll.u32 %s535_s0, 6  ;;  %s12633_s27 = sshll.u32 %s535_s0, 13 }
 0x152   : > { %s15517_s22 = scalar_lea.vmem [#allocation9], %s12632_s16  ;;  %s15519_s8 = scalar_lea.vmem [#allocation10], %s12633_s27 }
 0x153   : > { %p17799_p2 = pmov %p17793_p0 }
 0x154   : > { %p17800_p13 = pmov %p17793_p0 }
 0x155   : > { %15026 = dma.done.wait (%p17799_p2), [#allocation7], 256  }
 0x156   : > { %15028 = vsyncadd (%p17800_p13), [#allocation7], 4294967040  ;;  %p17801_p7 = pmov %p17793_p0 }
 0x157   : > { %p17802_p1 = pmov %p17793_p0 }
 0x158   : > { %15030 = dma.done.wait (%p17801_p7), [#allocation13], 18432  }
 0x159   : > { %15032 = vsyncadd (%p17802_p1), [#allocation13], 4294948864  ;;  %p17803_p6 = pmov %p17793_p0 }
 0x15a   : > { %p17804_p10 = pmov %p17793_p0 }
 0x15b   : > { %15034 = dma.done.wait (%p17803_p6), [#allocation16], 1152  }
 0x15c   : > { %15036 = vsyncadd (%p17804_p10), [#allocation16], 4294966144  ;;  %p17805_p11 = pmov %p17793_p0 }
 0x15d   : > { %p17806_p8 = pmov %p17793_p0 }
 0x15e   : > { %15038 = dma.done.wait (%p17805_p11), [#allocation19], 16  }
 0x15f   : > { %15040 = vsyncadd (%p17806_p8), [#allocation19], 4294967280  ;;  %p17807_p9 = scmp.ne.s32.totalorder %s17791_s26, 0 }
 0x160   : > { %v15083_v0 = vmov (!%p17807_p9), 0.0  }
 0x161   : > { %634 = sbr.rel (%p17807_p9) target bundleno = 369 (0x171), region = 116  ;;  %635 = vst [vmem:[#allocation2] sm:$0xff] (!%p17807_p9), %v15083_v0  ;;  %636 = vst [vmem:[#allocation2 + $0x8] sm:$0xff] (!%p17807_p9), %v15083_v0 }
 0x162   : > { %637 = vst [vmem:[#allocation2 + $0x10] sm:$0xff] (!%p17807_p9), %v15083_v0  ;;  %638 = vst [vmem:[#allocation2 + $0x18] sm:$0xff] (!%p17807_p9), %v15083_v0 }
 0x163   : > { %639 = vst [vmem:[#allocation2 + $0x20] sm:$0xff] (!%p17807_p9), %v15083_v0  ;;  %640 = vst [vmem:[#allocation2 + $0x28] sm:$0xff] (!%p17807_p9), %v15083_v0 }
 0x164   : > { %641 = vst [vmem:[#allocation2 + $0x30] sm:$0xff] (!%p17807_p9), %v15083_v0  ;;  %642 = vst [vmem:[#allocation2 + $0x38] sm:$0xff] (!%p17807_p9), %v15083_v0 }
 0x165   : > { %643 = vst [vmem:[#allocation2 + $0x40] sm:$0xff] (!%p17807_p9), %v15083_v0  ;;  %644 = vst [vmem:[#allocation2 + $0x48] sm:$0xff] (!%p17807_p9), %v15083_v0 }
 0x166   : > { %645 = vst [vmem:[#allocation2 + $0x50] sm:$0xff] (!%p17807_p9), %v15083_v0  ;;  %646 = vst [vmem:[#allocation2 + $0x58] sm:$0xff] (!%p17807_p9), %v15083_v0 }
 0x167   : > { %647 = vst [vmem:[#allocation2 + $0x60] sm:$0xff] (!%p17807_p9), %v15083_v0  ;;  %648 = vst [vmem:[#allocation2 + $0x68] sm:$0xff] (!%p17807_p9), %v15083_v0 }
 0x168   : > { %649 = vst [vmem:[#allocation2 + $0x70] sm:$0xff] %v15083_v0  ;;  %650 = vst [vmem:[#allocation2 + $0x78] sm:$0xff] %v15083_v0 }
 0x169   : > { %651 = vst [vmem:[#allocation2 + $0x80] sm:$0xff] %v15083_v0  ;;  %652 = vst [vmem:[#allocation2 + $0x88] sm:$0xff] %v15083_v0 }
 0x16a   : > { %653 = vst [vmem:[#allocation2 + $0x90] sm:$0xff] %v15083_v0  ;;  %654 = vst [vmem:[#allocation2 + $0x98] sm:$0xff] %v15083_v0 }
 0x16b   : > { %655 = vst [vmem:[#allocation2 + $0xa0] sm:$0xff] %v15083_v0  ;;  %656 = vst [vmem:[#allocation2 + $0xa8] sm:$0xff] %v15083_v0 }
 0x16c   : > { %657 = vst [vmem:[#allocation2 + $0xb0] sm:$0xff] %v15083_v0  ;;  %658 = vst [vmem:[#allocation2 + $0xb8] sm:$0xff] %v15083_v0 }
 0x16d   : > { %659 = vst [vmem:[#allocation2 + $0xc0] sm:$0xff] %v15083_v0  ;;  %660 = vst [vmem:[#allocation2 + $0xc8] sm:$0xff] %v15083_v0 }
 0x16e   : > { %661 = vst [vmem:[#allocation2 + $0xd0] sm:$0xff] %v15083_v0  ;;  %662 = vst [vmem:[#allocation2 + $0xd8] sm:$0xff] %v15083_v0 }
 0x16f   : > { %663 = vst [vmem:[#allocation2 + $0xe0] sm:$0xff] %v15083_v0  ;;  %664 = vst [vmem:[#allocation2 + $0xe8] sm:$0xff] %v15083_v0 }
 0x170   : > { %665 = vst [vmem:[#allocation2 + $0xf0] sm:$0xff] %v15083_v0  ;;  %666 = vst [vmem:[#allocation2 + $0xf8] sm:$0xff] %v15083_v0 }
 0x171 PF: > { %v681_v1 = vld [vmem:[%s15511_s24] sm:$0xff]  ;;  %v15084_v7 = vmov 0   ;;  %v682_v11 = vld [vmem:[%s15511_s24 + $0x8] sm:$0xff]  ;;  %v683_v30 = vld [vmem:[%s15511_s24 + $0x10] sm:$0xff]  ;;  %vm905_vm0 = vcmask 523264   ;;  %vm1126_vm1 = vcmask 261120  }
 0x172   : > { %v685_v2 = vld [vmem:[%s15511_s24 + $0x20] sm:$0xff]  ;;  %944 = vmatprep.mubr.bf16.mxu0 %v15084_v7  ;;  %997 = vmatprep.mubr.bf16.mxu1 %v15084_v7  ;;  %v686_v12 = vld [vmem:[%s15511_s24 + $0x28] sm:$0xff]  ;;  %v687_v31 = vld [vmem:[%s15511_s24 + $0x30] sm:$0xff]  ;;  %s17811_s28 = sld [smem:[#allocation34_spill]] }
 0x173   : > { %v689_v3 = vld [vmem:[%s15511_s24 + $0x40] sm:$0xff]  ;;  %v12642_v4 = vcombine.high %v681_v1, %v685_v2  ;;  %v12641_v5 = vcombine.low %v681_v1, %v685_v2  ;;  %v12644_v14 = vcombine.high %v682_v11, %v686_v12  ;;  %v12643_v15 = vcombine.low %v682_v11, %v686_v12  ;;  %v690_v16 = vld [vmem:[%s15511_s24 + $0x48] sm:$0xff]  ;;  %v675_v34 = vld [vmem:[#allocation3] sm:$0xff] }
 0x174   : > { %v693_v6 = vld [vmem:[%s15511_s24 + $0x60] sm:$0xff]  ;;  %v694_v17 = vld [vmem:[%s15511_s24 + $0x68] sm:$0xff]  ;;  %v676_v35 = vld [vmem:[#allocation3 + $0x8] sm:$0xff]  ;;  %v12646_v37 = vcombine.high %v683_v30, %v687_v31  ;;  %v12645_v44 = vcombine.low %v683_v30, %v687_v31 }
 0x175   : > { %v12650_v8 = vcombine.high %v689_v3, %v693_v6  ;;  %v697_v9 = vld [vmem:[%s15511_s24 + $0x80] sm:$0xff]  ;;  %912 = vmatprep.subr.bf16.mxu0 %v12642_v4  ;;  %v12649_v13 = vcombine.low %v689_v3, %v693_v6  ;;  %v12652_v19 = vcombine.high %v690_v16, %v694_v17  ;;  %v698_v20 = vld [vmem:[%s15511_s24 + $0x88] sm:$0xff]  ;;  %965 = vmatprep.subr.bf16.mxu1 %v12644_v14  ;;  %v691_v38 = vld [vmem:[%s15511_s24 + $0x50] sm:$0xff] }
 0x176   : > { %v701_v10 = vld [vmem:[%s15511_s24 + $0xa0] sm:$0xff]  ;;  %913 = vmatpush1.bf16.msra.mxu0 %v12641_v5  ;;  %v702_v21 = vld [vmem:[%s15511_s24 + $0xa8] sm:$0xff]  ;;  %966 = vmatpush1.bf16.msra.mxu1 %v12643_v15  ;;  %v12651_v24 = vcombine.low %v690_v16, %v694_v17  ;;  %v695_v39 = vld [vmem:[%s15511_s24 + $0x70] sm:$0xff]  ;;  %v679_v42 = vpack.c.bf16 %v676_v35, %v675_v34 }
 0x177   : > { %914 = vmatprep.subr.bf16.mxu0 %v12650_v8  ;;  %v12658_v18 = vcombine.high %v697_v9, %v701_v10  ;;  %v705_v22 = vld [vmem:[%s15511_s24 + $0xc0] sm:$0xff]  ;;  %v12657_v25 = vcombine.low %v697_v9, %v701_v10  ;;  %967 = vmatprep.subr.bf16.mxu1 %v12652_v19  ;;  %v12660_v26 = vcombine.high %v698_v20, %v702_v21  ;;  %v706_v28 = vld [vmem:[%s15511_s24 + $0xc8] sm:$0xff]  ;;  %v684_v40 = vld [vmem:[%s15511_s24 + $0x18] sm:$0xff]  ;;  %v15085_v9 = vmov 0.0  }
 0x178   : > { %v709_v23 = vld [vmem:[%s15511_s24 + $0xe0] sm:$0xff]  ;;  %v710_v29 = vld [vmem:[%s15511_s24 + $0xe8] sm:$0xff]  ;;  %v12659_v32 = vcombine.low %v698_v20, %v702_v21  ;;  %v688_v41 = vld [vmem:[%s15511_s24 + $0x38] sm:$0xff]  ;;  %v12654_v45 = vcombine.high %v691_v38, %v695_v39  ;;  %v12653_v54 = vcombine.low %v691_v38, %v695_v39  ;;  %v713_v10 = vlaneseq  ;;  %p13713_p12 = scmp.ne.s32.totalorder %s17811_s28, 1 }
 0x179   : > { %v12666_v27 = vcombine.high %v705_v22, %v709_v23  ;;  %v12665_v33 = vcombine.low %v705_v22, %v709_v23  ;;  %v12668_v36 = vcombine.high %v706_v28, %v710_v29  ;;  %v12667_v43 = vcombine.low %v706_v28, %v710_v29  ;;  %v692_v47 = vld [vmem:[%s15511_s24 + $0x58] sm:$0xff]  ;;  %v699_v49 = vld [vmem:[%s15511_s24 + $0x90] sm:$0xff]  ;;  %v677_v52 = vld [vmem:[#allocation3 + $0x10] sm:$0xff] }
 0x17a   : > { %915 = vmatpush1.bf16.msra.mxu0 %v12649_v13  ;;  %968 = vmatpush1.bf16.msra.mxu1 %v12651_v24  ;;  %v12648_v46 = vcombine.high %v684_v40, %v688_v41  ;;  %v696_v48 = vld [vmem:[%s15511_s24 + $0x78] sm:$0xff]  ;;  %v703_v50 = vld [vmem:[%s15511_s24 + $0xb0] sm:$0xff]  ;;  %v12647_v51 = vcombine.low %v684_v40, %v688_v41  ;;  %v678_v53 = vld [vmem:[#allocation3 + $0x18] sm:$0xff]  ;;  %v15589_v11 = vshrl.u32 %v713_v10, 7 }
 0x17b   : > { %916 = vmatprep.subr.bf16.mxu0 %v12658_v18  ;;  %969 = vmatprep.subr.bf16.mxu1 %v12660_v26  ;;  %v12656_v55 = vcombine.high %v692_v47, %v696_v48  ;;  %v12662_v56 = vcombine.high %v699_v49, %v703_v50  ;;  %v707_v57 = vld [vmem:[%s15511_s24 + $0xd0] sm:$0xff]  ;;  %v700_v59 = vld [vmem:[%s15511_s24 + $0x98] sm:$0xff]  ;;  %v680_v61 = vpack.c.bf16 %v678_v53, %v677_v52  ;;  %v15595_v13 = vld [vmem:[%s15517_s22] sm:$0xff] }
 0x17c   : > { %v711_v58 = vld [vmem:[%s15511_s24 + $0xf0] sm:$0xff]  ;;  %v704_v60 = vld [vmem:[%s15511_s24 + $0xb8] sm:$0xff]  ;;  %v12655_v62 = vcombine.low %v692_v47, %v696_v48  ;;  %v12661_v63 = vcombine.low %v699_v49, %v703_v50  ;;  %v15592_v12 = vsub.s32 0, %v15589_v11  ;;  %v15598_v14 = vld [vmem:[%s15517_s22 + $0x8] sm:$0xff] }
 0x17d   : > { %v12670_v0 = vcombine.high %v707_v57, %v711_v58  ;;  %v12664_v1 = vcombine.high %v700_v59, %v704_v60  ;;  %v708_v2 = vld [vmem:[%s15511_s24 + $0xd8] sm:$0xff]  ;;  %v12663_v4 = vcombine.low %v700_v59, %v704_v60  ;;  %v12669_v5 = vcombine.low %v707_v57, %v711_v58  ;;  %v672_v48 = vld [vmem:[%s15517_s22 + $0x28] sm:$0xff]  ;;  %v673_v57 = vld [vmem:[%s15517_s22 + $0x30] sm:$0xff] }
 0x17e   : > { %917 = vmatpush1.bf16.msra.mxu0 %v12657_v25  ;;  %970 = vmatpush1.bf16.msra.mxu1 %v12659_v32  ;;  %v712_v3 = vld [vmem:[%s15511_s24 + $0xf8] sm:$0xff]  ;;  %17808 = vst [vmem:[#allocation39_spill] sm:$0xff] %v15592_v12  ;;  %v716_v16 = vrot.slane %v15595_v13, %v15592_v12  ;;  %v720_v18 = vrot.slane %v15598_v14, %v15592_v12 }
 0x17f   : > { %918 = vmatprep.subr.bf16.mxu0 %v12666_v27  ;;  %971 = vmatprep.subr.bf16.mxu1 %v12668_v36  ;;  %v12672_v6 = vcombine.high %v708_v2, %v712_v3  ;;  %v12671_v8 = vcombine.low %v708_v2, %v712_v3  ;;  %v15604_v15 = vld [vmem:[%s15517_s22 + $0x18] sm:$0xff]  ;;  %v740_v2 = vrot.slane %v673_v57, %v15592_v12  ;;  %v15621_v3 = vld [vmem:[#allocation6] sm:$0xff] }
 0x180   : > { %v728_v21 = vrot.slane %v15604_v15, %v15592_v12 }
 0x182   : > { %919 = vmatpush1.bf16.msra.mxu0 %v12665_v33  ;;  %972 = vmatpush1.bf16.msra.mxu1 %v12667_v43  ;;  %v671_v43 = vld [vmem:[%s15517_s22 + $0x20] sm:$0xff] }
 0x183   : > { %1018 = vmatprep.subr.bf16.mxu0 %v12646_v37  ;;  %1071 = vmatprep.subr.bf16.mxu1 %v12648_v46 }
 0x185   : > { %12673 = vmatmul.mubr.msk.bf16.vlgmr.msra.gmra.mrb[0].mxu0 %vm905_vm0, %v679_v42  ;;  %12675 = vmatmul.mubr.msk.bf16.vlgmr.msra.gmra.mrb[0].mxu1 %vm905_vm0, %v679_v42 }
 0x186   : > { %954 = vmatprep.mubr.bf16.mxu0 %v15084_v7  ;;  %1019 = vmatpush1.bf16.msra.mxu0 %v12645_v44 }
 0x187   : > { %1020 = vmatprep.subr.bf16.mxu0 %v12654_v45  ;;  %1007 = vmatprep.mubr.bf16.mxu1 %v15084_v7 }
 0x188   : > { %1072 = vmatpush1.bf16.msra.mxu1 %v12647_v51 }
 0x189   : > { %1073 = vmatprep.subr.bf16.mxu1 %v12656_v55 }
 0x18a   : > { %1021 = vmatpush1.bf16.msra.mxu0 %v12653_v54 }
 0x18b   : > { %1022 = vmatprep.subr.bf16.mxu0 %v12662_v56  ;;  %v732_v56 = vrot.slane %v671_v43, %v15592_v12 }
 0x18c   : > { %1074 = vmatpush1.bf16.msra.mxu1 %v12655_v62  ;;  %v674_v62 = vld [vmem:[%s15517_s22 + $0x38] sm:$0xff] }
 0x18d   : > { %12674 = vmatmul.mubr.msk.bf16.gmra.mrb[4].mxu0 %vm905_vm0, %v680_v61  ;;  %1075 = vmatprep.subr.bf16.mxu1 %v12664_v1 }
 0x18e   : > { %1023 = vmatpush1.bf16.msra.mxu0 %v12661_v63  ;;  %1050 = vmatprep.mubr.bf16.mxu0 %v15084_v7 }
 0x18f   : > { %1024 = vmatprep.subr.bf16.mxu0 %v12670_v0  ;;  %12676 = vmatmul.mubr.msk.bf16.gmra.mrb[4].mxu1 %vm905_vm0, %v680_v61 }
 0x190   : > { %1076 = vmatpush1.bf16.msra.mxu1 %v12663_v4  ;;  %1103 = vmatprep.mubr.bf16.mxu1 %v15084_v7 }
 0x191   : > { %1077 = vmatprep.subr.bf16.mxu1 %v12672_v6 }
 0x192   : > { %1025 = vmatpush1.bf16.msra.mxu0 %v12669_v5 }
 0x194   : > { %1078 = vmatpush1.bf16.msra.mxu1 %v12671_v8  ;;  %v744_v8 = vrot.slane %v674_v62, %v15592_v12  ;;  %v1809_v62 = vld [vmem:[%s15519_s8 + $0xc0] sm:$0xff] }
 0x195   : > { %12677 = vmatmul.mubr.msk.bf16.vlgmr.msra.gmra.mrb[8].mxu0 %vm905_vm0, %v679_v42 }
 0x196   : > { %1060 = vmatprep.mubr.bf16.mxu0 %v15084_v7 }
 0x197   : > { %12679 = vmatmul.mubr.msk.bf16.vlgmr.msra.gmra.mrb[8].mxu1 %vm905_vm0, %v679_v42 }
 0x198   : > { %1113 = vmatprep.mubr.bf16.mxu1 %v15084_v7  ;;  %v15601_v7 = vld [vmem:[%s15517_s22 + $0x10] sm:$0xff] }
 0x199   : > { %v724_v19 = vrot.slane %v15601_v7, %v15592_v12 }
 0x19d   : > { %12678 = vmatmul.mubr.msk.bf16.gmra.mrb[12].mxu0 %vm905_vm0, %v680_v61 }
 0x19e   : > { %1197 = vmatprep.mubr.f32.mxu0 %v15085_v9 }
 0x19f   : > { %12680 = vmatmul.mubr.msk.bf16.gmra.mrb[12].mxu1 %vm905_vm0, %v680_v61  ;;  %v736_v61 = vrot.slane %v672_v48, %v15592_v12 }
 0x1a0   : > { %1274 = vmatprep.mubr.f32.mxu1 %v15085_v9 }
 0x258   : > { %v946_v17 = vpop.f32.mrb[0].mxu0  ;;  %v999_v26 = vpop.f32.mrb[0].mxu1 }
 0x259   : > { %v948_v20 = vpop.f32.mrb[1].mxu0  ;;  %v947_v23 = vadd.f32 %v946_v17, %v716_v16  ;;  %v1000_v29 = vadd.f32 %v999_v26, %v724_v19  ;;  %v1001_v30 = vpop.f32.mrb[1].mxu1 }
 0x25a   : > { %v950_v22 = vpop.f32.mrb[2].mxu0  ;;  %v949_v27 = vadd.f32 %v948_v20, %v720_v18  ;;  %v1002_v32 = vadd.f32 %v1001_v30, %v728_v21  ;;  %v1003_v33 = vpop.f32.mrb[2].mxu1 }
 0x25b   : > { %v951_v24 = vadd.f32 %v950_v22, %v716_v16  ;;  %v952_v25 = vpop.f32.mrb[3].mxu0  ;;  %v1004_v35 = vadd.f32 %v1003_v33, %v724_v19  ;;  %v1005_v36 = vpop.f32.mrb[3].mxu1 }
 0x25c   : > { %v953_v28 = vadd.f32 %v952_v25, %v720_v18  ;;  %v1006_v37 = vadd.f32 %v1005_v36, %v728_v21 }
 0x25d   : > { %v14105_v31 = vpack.c.bf16 %v951_v24, %v947_v23  ;;  %v14113_v39 = vpack.c.bf16 %v1004_v35, %v1000_v29  ;;  %v1125_v23 = vld [vmem:[#allocation6 + $0x8] sm:$0xff] }
 0x25e   : > { %v14103_v34 = vpack.c.bf16 %v953_v28, %v949_v27  ;;  %v14111_v41 = vpack.c.bf16 %v1006_v37, %v1002_v32 }
 0x260   : > { %v956_v38 = vpop.f32.mrb[4].mxu0  ;;  %14104 = vmatprep.subr.bf16.mxu0 %v14103_v34  ;;  %14112 = vmatprep.subr.bf16.mxu1 %v14111_v41  ;;  %v1785_v41 = vld [vmem:[%s15519_s8] sm:$0xff] }
 0x261   : > { %v958_v40 = vpop.f32.mrb[5].mxu0  ;;  %14106 = vmatpush1.bf16.msra.mxu0 %v14105_v31  ;;  %v957_v44 = vadd.f32 %v956_v38, %v716_v16  ;;  %14114 = vmatpush1.bf16.msra.mxu1 %v14113_v39 }
 0x262   : > { %v960_v42 = vpop.f32.mrb[6].mxu0  ;;  %v1009_v47 = vpop.f32.mrb[4].mxu1  ;;  %v959_v49 = vadd.f32 %v958_v40, %v720_v18 }
 0x263   : > { %v961_v45 = vadd.f32 %v960_v42, %v716_v16  ;;  %v962_v46 = vpop.f32.mrb[7].mxu0  ;;  %v1010_v51 = vadd.f32 %v1009_v47, %v724_v19  ;;  %v1011_v52 = vpop.f32.mrb[5].mxu1  ;;  %v1793_v42 = vld [vmem:[%s15519_s8 + $0x40] sm:$0xff] }
 0x264   : > { %v963_v50 = vadd.f32 %v962_v46, %v720_v18  ;;  %v1012_v54 = vadd.f32 %v1011_v52, %v728_v21  ;;  %v1013_v55 = vpop.f32.mrb[6].mxu1  ;;  %v12690_v52 = vcombine.high %v1785_v41, %v1793_v42 }
 0x265   : > { %v14109_v53 = vpack.c.bf16 %v961_v45, %v957_v44  ;;  %v1014_v59 = vadd.f32 %v1013_v55, %v724_v19  ;;  %v1015_v60 = vpop.f32.mrb[7].mxu1 }
 0x266   : > { %v14107_v58 = vpack.c.bf16 %v963_v50, %v959_v49  ;;  %v1016_v63 = vadd.f32 %v1015_v60, %v728_v21 }
 0x267   : > { %v14117_v0 = vpack.c.bf16 %v1014_v59, %v1010_v51  ;;  %v12689_v59 = vcombine.low %v1785_v41, %v1793_v42 }
 0x268   : > { %14108 = vmatprep.subr.bf16.mxu0 %v14107_v58  ;;  %v1052_v1 = vpop.f32.mrb[8].mxu0  ;;  %v14115_v4 = vpack.c.bf16 %v1016_v63, %v1012_v54  ;;  %v1794_v54 = vld [vmem:[%s15519_s8 + $0x48] sm:$0xff] }
 0x269   : > { %14110 = vmatpush1.bf16.msra.mxu0 %v14109_v53  ;;  %v1053_v5 = vadd.f32 %v1052_v1, %v732_v56  ;;  %v1054_v6 = vpop.f32.mrb[9].mxu0  ;;  %v1786_v53 = vld [vmem:[%s15519_s8 + $0x8] sm:$0xff] }
 0x26a   : > { %v1055_v10 = vadd.f32 %v1054_v6, %v736_v61  ;;  %v1056_v16 = vpop.f32.mrb[10].mxu0  ;;  %14116 = vmatprep.subr.bf16.mxu1 %v14115_v4  ;;  %v1105_v19 = vpop.f32.mrb[8].mxu1  ;;  %v12692_v58 = vcombine.high %v1786_v53, %v1794_v54  ;;  %v12691_v60 = vcombine.low %v1786_v53, %v1794_v54  ;;  %v1802_v63 = vld [vmem:[%s15519_s8 + $0x88] sm:$0xff] }
 0x26b   : > { %v1057_v17 = vadd.f32 %v1056_v16, %v732_v56  ;;  %v1058_v18 = vpop.f32.mrb[11].mxu0  ;;  %14118 = vmatpush1.bf16.msra.mxu1 %v14117_v0  ;;  %v1106_v21 = vadd.f32 %v1105_v19, %v740_v2  ;;  %v1107_v22 = vpop.f32.mrb[9].mxu1  ;;  %v1810_v1 = vld [vmem:[%s15519_s8 + $0xc8] sm:$0xff]  ;;  %v1833_v19 = vld [vmem:[%s15519_s8 + $0x180] sm:$0xff] }
 0x26c   : > { %12681 = vmatmul.mubr.msk.f32.vlgmr.msra.gmra.mrb[16].mxu0 %vm1126_vm1, %v15621_v3  ;;  %v1059_v20 = vadd.f32 %v1058_v18, %v736_v61  ;;  %v1108_v25 = vadd.f32 %v1107_v22, %v744_v8  ;;  %v1109_v26 = vpop.f32.mrb[10].mxu1  ;;  %v12707_v4 = vcombine.low %v1802_v63, %v1810_v1  ;;  %v1818_v6 = vld [vmem:[%s15519_s8 + $0x108] sm:$0xff] }
 0x26d   : > { %1203 = vmatprep.mubr.f32.mxu0 %v15085_v9  ;;  %v14121_v24 = vpack.c.bf16 %v1057_v17, %v1053_v5  ;;  %v1110_v28 = vadd.f32 %v1109_v26, %v740_v2  ;;  %v1111_v29 = vpop.f32.mrb[11].mxu1  ;;  %v12708_v5 = vcombine.high %v1802_v63, %v1810_v1  ;;  %v1898_v53 = vld [vmem:[%s15519_s8 + $0x388] sm:$0xff] }
 0x26e   : > { %v14119_v27 = vpack.c.bf16 %v1059_v20, %v1055_v10  ;;  %12683 = vmatmul.mubr.msk.f32.vlgmr.msra.gmra.mrb[16].mxu1 %vm1126_vm1, %v15621_v3  ;;  %v1112_v30 = vadd.f32 %v1111_v29, %v744_v8  ;;  %v1826_v10 = vld [vmem:[%s15519_s8 + $0x148] sm:$0xff]  ;;  %v1841_v20 = vld [vmem:[%s15519_s8 + $0x1c0] sm:$0xff] }
 0x26f   : > { %1280 = vmatprep.mubr.f32.mxu1 %v15085_v9  ;;  %v14129_v32 = vpack.c.bf16 %v1110_v28, %v1106_v21  ;;  %v12723_v17 = vcombine.low %v1818_v6, %v1826_v10  ;;  %v12724_v18 = vcombine.high %v1818_v6, %v1826_v10  ;;  %v1834_v21 = vld [vmem:[%s15519_s8 + $0x188] sm:$0xff]  ;;  %v12738_v22 = vcombine.high %v1833_v19, %v1841_v20  ;;  %v1857_v28 = vld [vmem:[%s15519_s8 + $0x240] sm:$0xff] }
 0x270   : > { %12682 = vmatmul.mubr.msk.f32.gmra.mrb[18].mxu0 %vm1126_vm1, %v1125_v23  ;;  %v1062_v31 = vpop.f32.mrb[12].mxu0  ;;  %14120 = vmatprep.subr.bf16.mxu0 %v14119_v27  ;;  %v14127_v35 = vpack.c.bf16 %v1112_v30, %v1108_v25  ;;  %v1849_v27 = vld [vmem:[%s15519_s8 + $0x200] sm:$0xff]  ;;  %v1850_v29 = vld [vmem:[%s15519_s8 + $0x208] sm:$0xff] }
 0x271   : > { %v1063_v33 = vadd.f32 %v1062_v31, %v732_v56  ;;  %v1064_v34 = vpop.f32.mrb[13].mxu0  ;;  %1351 = vmatprep.mubr.f32.mxu0 %v15085_v9  ;;  %14122 = vmatpush1.bf16.msra.mxu0 %v14121_v24  ;;  %v12737_v24 = vcombine.low %v1833_v19, %v1841_v20  ;;  %v12754_v30 = vcombine.high %v1849_v27, %v1857_v28  ;;  %v1858_v31 = vld [vmem:[%s15519_s8 + $0x248] sm:$0xff] }
 0x272   : > { %v1065_v36 = vadd.f32 %v1064_v34, %v736_v61  ;;  %v1066_v37 = vpop.f32.mrb[14].mxu0  ;;  %12684 = vmatmul.mubr.msk.f32.gmra.mrb[18].mxu1 %vm1126_vm1, %v1125_v23  ;;  %v1115_v40 = vpop.f32.mrb[12].mxu1  ;;  %14128 = vmatprep.subr.bf16.mxu1 %v14127_v35  ;;  %v12756_v34 = vcombine.high %v1850_v29, %v1858_v31  ;;  %v1865_v35 = vld [vmem:[%s15519_s8 + $0x280] sm:$0xff]  ;;  %v1922_v63 = vld [vmem:[%s15519_s8 + $0x448] sm:$0xff] }
 0x273   : > { %v1067_v38 = vadd.f32 %v1066_v37, %v732_v56  ;;  %v1068_v39 = vpop.f32.mrb[15].mxu0  ;;  %v1116_v44 = vadd.f32 %v1115_v40, %v740_v2  ;;  %v1117_v45 = vpop.f32.mrb[13].mxu1  ;;  %14130 = vmatpush1.bf16.msra.mxu1 %v14129_v32  ;;  %1428 = vmatprep.mubr.f32.mxu1 %v15085_v9  ;;  %v12753_v32 = vcombine.low %v1849_v27, %v1857_v28  ;;  %v1866_v37 = vld [vmem:[%s15519_s8 + $0x288] sm:$0xff] }
 0x274   : > { %v1069_v43 = vadd.f32 %v1068_v39, %v736_v61  ;;  %v1118_v47 = vadd.f32 %v1117_v45, %v744_v8  ;;  %v1119_v48 = vpop.f32.mrb[14].mxu1  ;;  %v1801_v61 = vld [vmem:[%s15519_s8 + $0x80] sm:$0xff]  ;;  %v1874_v39 = vld [vmem:[%s15519_s8 + $0x2c8] sm:$0xff] }
 0x275   : > { %v14125_v46 = vpack.c.bf16 %v1067_v38, %v1063_v33  ;;  %v1120_v50 = vadd.f32 %v1119_v48, %v740_v2  ;;  %v1121_v51 = vpop.f32.mrb[15].mxu1  ;;  %v12706_v0 = vcombine.high %v1801_v61, %v1809_v62  ;;  %v12705_v2 = vcombine.low %v1801_v61, %v1809_v62  ;;  %v1882_v45 = vld [vmem:[%s15519_s8 + $0x308] sm:$0xff] }
 0x276   : > { %v14123_v49 = vpack.c.bf16 %v1069_v43, %v1065_v36  ;;  %v1122_v55 = vadd.f32 %v1121_v51, %v744_v8  ;;  %v12755_v33 = vcombine.low %v1850_v29, %v1858_v31  ;;  %v1873_v36 = vld [vmem:[%s15519_s8 + $0x2c0] sm:$0xff]  ;;  %v12771_v41 = vcombine.low %v1866_v37, %v1874_v39  ;;  %v1914_v61 = vld [vmem:[%s15519_s8 + $0x408] sm:$0xff] }
 0x277   : > { %v14133_v56 = vpack.c.bf16 %v1120_v50, %v1116_v44  ;;  %v12770_v38 = vcombine.high %v1865_v35, %v1873_v36  ;;  %v12769_v40 = vcombine.low %v1865_v35, %v1873_v36  ;;  %v12772_v42 = vcombine.high %v1866_v37, %v1874_v39  ;;  %v1881_v43 = vld [vmem:[%s15519_s8 + $0x300] sm:$0xff]  ;;  %v1938_v6 = vld [vmem:[%s15519_s8 + $0x4c8] sm:$0xff] }
 0x278   : > { %14124 = vmatprep.subr.bf16.mxu0 %v14123_v49  ;;  %v14131_v57 = vpack.c.bf16 %v1122_v55, %v1118_v47  ;;  %v1889_v44 = vld [vmem:[%s15519_s8 + $0x340] sm:$0xff]  ;;  %v1890_v47 = vld [vmem:[%s15519_s8 + $0x348] sm:$0xff]  ;;  %v12819_v1 = vcombine.low %v1914_v61, %v1922_v63 }
 0x279   : > { %14126 = vmatpush1.bf16.msra.mxu0 %v14125_v46  ;;  %v12786_v46 = vcombine.high %v1881_v43, %v1889_v44  ;;  %v12785_v48 = vcombine.low %v1881_v43, %v1889_v44  ;;  %v12787_v49 = vcombine.low %v1882_v45, %v1890_v47  ;;  %v12788_v50 = vcombine.high %v1882_v45, %v1890_v47  ;;  %v1897_v51 = vld [vmem:[%s15519_s8 + $0x380] sm:$0xff]  ;;  %v1906_v55 = vld [vmem:[%s15519_s8 + $0x3c8] sm:$0xff] }
 0x27a   : > { %7929 = vmatprep.subr.bf16.mxu0 %v12690_v52  ;;  %14132 = vmatprep.subr.bf16.mxu1 %v14131_v57  ;;  %v1905_v52 = vld [vmem:[%s15519_s8 + $0x3c0] sm:$0xff]  ;;  %v12803_v57 = vcombine.low %v1898_v53, %v1906_v55  ;;  %v1946_v19 = vld [vmem:[%s15519_s8 + $0x508] sm:$0xff] }
 0x27b   : > { %14134 = vmatpush1.bf16.msra.mxu1 %v14133_v56  ;;  %v12802_v54 = vcombine.high %v1897_v51, %v1905_v52  ;;  %v12801_v56 = vcombine.low %v1897_v51, %v1905_v52  ;;  %v1962_v27 = vld [vmem:[%s15519_s8 + $0x588] sm:$0xff] }
 0x27c   : > { %12685 = vmatmul.mubr.msk.f32.vlgmr.msra.gmra.mrb[20].mxu0 %vm1126_vm1, %v15621_v3  ;;  %8101 = vmatprep.subr.bf16.mxu1 %v12692_v58  ;;  %v12804_v58 = vcombine.high %v1898_v53, %v1906_v55  ;;  %v1970_v29 = vld [vmem:[%s15519_s8 + $0x5c8] sm:$0xff] }
 0x27d   : > { %1357 = vmatprep.mubr.f32.mxu0 %v15085_v9  ;;  %7930 = vmatpush1.bf16.msra.mxu0 %v12689_v59  ;;  %v1913_v59 = vld [vmem:[%s15519_s8 + $0x400] sm:$0xff]  ;;  %v12867_v31 = vcombine.low %v1962_v27, %v1970_v29  ;;  %v1978_v35 = vld [vmem:[%s15519_s8 + $0x608] sm:$0xff] }
 0x27e   : > { %12687 = vmatmul.mubr.msk.f32.vlgmr.msra.gmra.mrb[20].mxu1 %vm1126_vm1, %v15621_v3  ;;  %7931 = vmatprep.subr.bf16.mxu0 %v12706_v0  ;;  %v1825_v3 = vld [vmem:[%s15519_s8 + $0x140] sm:$0xff]  ;;  %v1986_v37 = vld [vmem:[%s15519_s8 + $0x648] sm:$0xff] }
 0x27f   : > { %1434 = vmatprep.mubr.f32.mxu1 %v15085_v9  ;;  %8102 = vmatpush1.bf16.msra.mxu1 %v12691_v60  ;;  %v1817_v9 = vld [vmem:[%s15519_s8 + $0x100] sm:$0xff]  ;;  %v12883_v39 = vcombine.low %v1978_v35, %v1986_v37  ;;  %v1994_v43 = vld [vmem:[%s15519_s8 + $0x688] sm:$0xff] }
 0x280   : > { %12686 = vmatmul.mubr.msk.f32.gmra.mrb[22].mxu0 %vm1126_vm1, %v1125_v23  ;;  %8103 = vmatprep.subr.bf16.mxu1 %v12708_v5  ;;  %v12722_v8 = vcombine.high %v1817_v9, %v1825_v3  ;;  %v12721_v16 = vcombine.low %v1817_v9, %v1825_v3  ;;  %v1921_v60 = vld [vmem:[%s15519_s8 + $0x440] sm:$0xff]  ;;  %v1930_v9 = vld [vmem:[%s15519_s8 + $0x488] sm:$0xff] }
 0x281   : > { %7932 = vmatpush1.bf16.msra.mxu0 %v12705_v2  ;;  %v12818_v62 = vcombine.high %v1913_v59, %v1921_v60  ;;  %v12817_v0 = vcombine.low %v1913_v59, %v1921_v60  ;;  %v12820_v2 = vcombine.high %v1914_v61, %v1922_v63  ;;  %v1937_v5 = vld [vmem:[%s15519_s8 + $0x4c0] sm:$0xff]  ;;  %v12835_v10 = vcombine.low %v1930_v9, %v1938_v6  ;;  %v2002_v45 = vld [vmem:[%s15519_s8 + $0x6c8] sm:$0xff] }
 0x282   : > { %12688 = vmatmul.mubr.msk.f32.gmra.mrb[22].mxu1 %vm1126_vm1, %v1125_v23  ;;  %7933 = vmatprep.subr.bf16.mxu0 %v12722_v8  ;;  %v1842_v23 = vld [vmem:[%s15519_s8 + $0x1c8] sm:$0xff]  ;;  %v12899_v47 = vcombine.low %v1994_v43, %v2002_v45 }
 0x283   : > { %8104 = vmatpush1.bf16.msra.mxu1 %v12707_v4  ;;  %v12739_v25 = vcombine.low %v1834_v21, %v1842_v23  ;;  %v12740_v26 = vcombine.high %v1834_v21, %v1842_v23  ;;  %v1929_v4 = vld [vmem:[%s15519_s8 + $0x480] sm:$0xff]  ;;  %v1954_v21 = vld [vmem:[%s15519_s8 + $0x548] sm:$0xff] }
 0x284   : > { %8105 = vmatprep.subr.bf16.mxu1 %v12724_v18  ;;  %v12834_v3 = vcombine.high %v1929_v4, %v1937_v5  ;;  %v12833_v8 = vcombine.low %v1929_v4, %v1937_v5  ;;  %v1953_v18 = vld [vmem:[%s15519_s8 + $0x540] sm:$0xff]  ;;  %v12851_v23 = vcombine.low %v1946_v19, %v1954_v21  ;;  %v2010_v51 = vld [vmem:[%s15519_s8 + $0x708] sm:$0xff] }
 0x285   : > { %7934 = vmatpush1.bf16.msra.mxu0 %v12721_v16  ;;  %v12836_v16 = vcombine.high %v1930_v9, %v1938_v6  ;;  %v2018_v53 = vld [vmem:[%s15519_s8 + $0x748] sm:$0xff] }
 0x286   : > { %7935 = vmatprep.subr.bf16.mxu0 %v12738_v22  ;;  %v12915_v55 = vcombine.low %v2010_v51, %v2018_v53  ;;  %v2026_v59 = vld [vmem:[%s15519_s8 + $0x788] sm:$0xff] }
 0x287   : > { %8106 = vmatpush1.bf16.msra.mxu1 %v12723_v17  ;;  %v1945_v17 = vld [vmem:[%s15519_s8 + $0x500] sm:$0xff]  ;;  %v2034_v61 = vld [vmem:[%s15519_s8 + $0x7c8] sm:$0xff] }
 0x288   : > { %8107 = vmatprep.subr.bf16.mxu1 %v12740_v26  ;;  %v12850_v20 = vcombine.high %v1945_v17, %v1953_v18  ;;  %v12849_v22 = vcombine.low %v1945_v17, %v1953_v18  ;;  %v1969_v26 = vld [vmem:[%s15519_s8 + $0x5c0] sm:$0xff]  ;;  %v12931_v63 = vcombine.low %v2026_v59, %v2034_v61  ;;  %v15713_v4 = vld [vmem:[%s15519_s8 + $0x808] sm:$0xff] }
 0x289   : > { %7936 = vmatpush1.bf16.msra.mxu0 %v12737_v24  ;;  %v12852_v24 = vcombine.high %v1946_v19, %v1954_v21  ;;  %v15718_v9 = vld [vmem:[%s15519_s8 + $0x848] sm:$0xff] }
 0x28a   : > { %7937 = vmatprep.subr.bf16.mxu0 %v12754_v30  ;;  %v12947_v6 = vcombine.low %v15713_v4, %v15718_v9 }
 0x28b   : > { %8108 = vmatpush1.bf16.msra.mxu1 %v12739_v25  ;;  %v1961_v25 = vld [vmem:[%s15519_s8 + $0x580] sm:$0xff] }
 0x28c   : > { %8109 = vmatprep.subr.bf16.mxu1 %v12756_v34  ;;  %v12866_v28 = vcombine.high %v1961_v25, %v1969_v26  ;;  %v12865_v30 = vcombine.low %v1961_v25, %v1969_v26  ;;  %v1985_v34 = vld [vmem:[%s15519_s8 + $0x640] sm:$0xff] }
 0x28d   : > { %7938 = vmatpush1.bf16.msra.mxu0 %v12753_v32  ;;  %v12868_v32 = vcombine.high %v1962_v27, %v1970_v29 }
 0x28e   : > { %7939 = vmatprep.subr.bf16.mxu0 %v12770_v38 }
 0x28f   : > { %8110 = vmatpush1.bf16.msra.mxu1 %v12755_v33  ;;  %v1977_v33 = vld [vmem:[%s15519_s8 + $0x600] sm:$0xff] }
 0x290   : > { %8111 = vmatprep.subr.bf16.mxu1 %v12772_v42  ;;  %v12882_v36 = vcombine.high %v1977_v33, %v1985_v34  ;;  %v12881_v38 = vcombine.low %v1977_v33, %v1985_v34  ;;  %v2001_v42 = vld [vmem:[%s15519_s8 + $0x6c0] sm:$0xff] }
 0x291   : > { %7940 = vmatpush1.bf16.msra.mxu0 %v12769_v40  ;;  %v12884_v40 = vcombine.high %v1978_v35, %v1986_v37 }
 0x292   : > { %7941 = vmatprep.subr.bf16.mxu0 %v12786_v46 }
 0x293   : > { %8112 = vmatpush1.bf16.msra.mxu1 %v12771_v41  ;;  %v1993_v41 = vld [vmem:[%s15519_s8 + $0x680] sm:$0xff] }
 0x294   : > { %8113 = vmatprep.subr.bf16.mxu1 %v12788_v50  ;;  %v12898_v44 = vcombine.high %v1993_v41, %v2001_v42  ;;  %v12897_v46 = vcombine.low %v1993_v41, %v2001_v42  ;;  %v2017_v50 = vld [vmem:[%s15519_s8 + $0x740] sm:$0xff] }
 0x295   : > { %7942 = vmatpush1.bf16.msra.mxu0 %v12785_v48  ;;  %v12900_v48 = vcombine.high %v1994_v43, %v2002_v45 }
 0x296   : > { %7943 = vmatprep.subr.bf16.mxu0 %v12802_v54 }
 0x297   : > { %8114 = vmatpush1.bf16.msra.mxu1 %v12787_v49  ;;  %v2009_v49 = vld [vmem:[%s15519_s8 + $0x700] sm:$0xff] }
 0x298   : > { %8115 = vmatprep.subr.bf16.mxu1 %v12804_v58  ;;  %v12914_v52 = vcombine.high %v2009_v49, %v2017_v50  ;;  %v12913_v54 = vcombine.low %v2009_v49, %v2017_v50  ;;  %v2033_v58 = vld [vmem:[%s15519_s8 + $0x7c0] sm:$0xff] }
 0x299   : > { %7944 = vmatpush1.bf16.msra.mxu0 %v12801_v56  ;;  %v12916_v56 = vcombine.high %v2010_v51, %v2018_v53 }
 0x29a   : > { %7945 = vmatprep.subr.bf16.mxu0 %v12818_v62 }
 0x29b   : > { %8116 = vmatpush1.bf16.msra.mxu1 %v12803_v57  ;;  %v2025_v57 = vld [vmem:[%s15519_s8 + $0x780] sm:$0xff] }
 0x29c   : > { %8117 = vmatprep.subr.bf16.mxu1 %v12820_v2  ;;  %v12930_v60 = vcombine.high %v2025_v57, %v2033_v58  ;;  %v12929_v62 = vcombine.low %v2025_v57, %v2033_v58  ;;  %v15710_v2 = vld [vmem:[%s15519_s8 + $0x840] sm:$0xff] }
 0x29d   : > { %7946 = vmatpush1.bf16.msra.mxu0 %v12817_v0  ;;  %v12932_v0 = vcombine.high %v2026_v59, %v2034_v61 }
 0x29e   : > { %7947 = vmatprep.subr.bf16.mxu0 %v12834_v3 }
 0x29f   : > { %8118 = vmatpush1.bf16.msra.mxu1 %v12819_v1  ;;  %v15707_v1 = vld [vmem:[%s15519_s8 + $0x800] sm:$0xff] }
 0x2a0   : > { %8119 = vmatprep.subr.bf16.mxu1 %v12836_v16  ;;  %v12946_v5 = vcombine.high %v15707_v1, %v15710_v2  ;;  %v12945_v3 = vcombine.low %v15707_v1, %v15710_v2 }
 0x2a1   : > { %7948 = vmatpush1.bf16.msra.mxu0 %v12833_v8  ;;  %v12948_v8 = vcombine.high %v15713_v4, %v15718_v9  ;;  %v2089_v4 = vld [vmem:[%s15519_s8 + $0x980] sm:$0xff] }
 0x2a2   : > { %7949 = vmatprep.subr.bf16.mxu0 %v12850_v20 }
 0x2a3   : > { %8120 = vmatpush1.bf16.msra.mxu1 %v12835_v10 }
 0x2a4   : > { %8121 = vmatprep.subr.bf16.mxu1 %v12852_v24 }
 0x2a5   : > { %7950 = vmatpush1.bf16.msra.mxu0 %v12849_v22 }
 0x2a6   : > { %7951 = vmatprep.subr.bf16.mxu0 %v12866_v28 }
 0x2a7   : > { %8122 = vmatpush1.bf16.msra.mxu1 %v12851_v23 }
 0x2a8   : > { %8123 = vmatprep.subr.bf16.mxu1 %v12868_v32 }
 0x2a9   : > { %7952 = vmatpush1.bf16.msra.mxu0 %v12865_v30 }
 0x2aa   : > { %7953 = vmatprep.subr.bf16.mxu0 %v12882_v36 }
 0x2ab   : > { %8124 = vmatpush1.bf16.msra.mxu1 %v12867_v31 }
 0x2ac   : > { %8125 = vmatprep.subr.bf16.mxu1 %v12884_v40 }
 0x2ad   : > { %7954 = vmatpush1.bf16.msra.mxu0 %v12881_v38 }
 0x2ae   : > { %7955 = vmatprep.subr.bf16.mxu0 %v12898_v44 }
 0x2af   : > { %8126 = vmatpush1.bf16.msra.mxu1 %v12883_v39 }
 0x2b0   : > { %8127 = vmatprep.subr.bf16.mxu1 %v12900_v48 }
 0x2b1   : > { %7956 = vmatpush1.bf16.msra.mxu0 %v12897_v46 }
 0x2b2   : > { %7957 = vmatprep.subr.bf16.mxu0 %v12914_v52 }
 0x2b3   : > { %8128 = vmatpush1.bf16.msra.mxu1 %v12899_v47 }
 0x2b4   : > { %8129 = vmatprep.subr.bf16.mxu1 %v12916_v56 }
 0x2b5   : > { %7958 = vmatpush1.bf16.msra.mxu0 %v12913_v54 }
 0x2b6   : > { %7959 = vmatprep.subr.bf16.mxu0 %v12930_v60 }
 0x2b7   : > { %8130 = vmatpush1.bf16.msra.mxu1 %v12915_v55 }
 0x2b8   : > { %8131 = vmatprep.subr.bf16.mxu1 %v12932_v0 }
 0x2b9   : > { %7960 = vmatpush1.bf16.msra.mxu0 %v12929_v62 }
 0x2ba   : > { %7972 = vmatprep.subr.bf16.mxu0 %v12946_v5 }
 0x2bb   : > { %8132 = vmatpush1.bf16.msra.mxu1 %v12931_v63 }
 0x2bc   : > { %8144 = vmatprep.subr.bf16.mxu1 %v12948_v8 }
 0x33f   : > { %v1199_v10 = vpop.f32.mrb[16].mxu0 }
 0x340   : > { %v1201_v16 = vpop.f32.mrb[17].mxu0 }
 0x341   : > { %v1276_v17 = vpop.f32.mrb[16].mxu1 }
 0x342   : > { %v1278_v19 = vpop.f32.mrb[17].mxu1 }
 0x343   : > { %v1205_v18 = vpop.f32.mrb[18].mxu0 }
 0x344   : > { %v1441_v20 = vadd.f32 %v1205_v18, %v1199_v10  ;;  %v1207_v21 = vpop.f32.mrb[19].mxu0 }
 0x345   : > { %v1448_v22 = vadd.f32 %v1207_v21, %v1201_v16  ;;  %v1282_v24 = vpop.f32.mrb[18].mxu1 }
 0x346   : > { %v1442_v23 = vrot.slane %v1441_v20, 4  ;;  %v1455_v26 = vadd.f32 %v1282_v24, %v1276_v17  ;;  %v1284_v27 = vpop.f32.mrb[19].mxu1 }
 0x347   : > { %v1449_v25 = vrot.slane %v1448_v22, 4  ;;  %v1462_v29 = vadd.f32 %v1284_v27, %v1278_v19 }
 0x348   : > { %v1443_v28 = vadd.f32 %v1442_v23, %v1441_v20  ;;  %v1456_v31 = vrot.slane %v1455_v26, 4 }
 0x349   : > { %v1450_v30 = vadd.f32 %v1449_v25, %v1448_v22  ;;  %v1463_v33 = vrot.slane %v1462_v29, 4 }
 0x34a   : > { %v1444_v32 = vrot.slane %v1443_v28, 2  ;;  %v1457_v35 = vadd.f32 %v1456_v31, %v1455_v26 }
 0x34b   : > { %v1451_v34 = vrot.slane %v1450_v30, 2  ;;  %v1464_v37 = vadd.f32 %v1463_v33, %v1462_v29 }
 0x34c   : > { %v1445_v36 = vadd.f32 %v1444_v32, %v1443_v28  ;;  %v1458_v39 = vrot.slane %v1457_v35, 2 }
 0x34d   : > { %v1452_v38 = vadd.f32 %v1451_v34, %v1450_v30  ;;  %v1465_v41 = vrot.slane %v1464_v37, 2 }
 0x34e   : > { %v1446_v40 = vrot.slane %v1445_v36, 1  ;;  %v1459_v43 = vadd.f32 %v1458_v39, %v1457_v35 }
 0x34f   : > { %v1453_v42 = vrot.slane %v1452_v38, 1  ;;  %v15726_v44 = vpop.f32.mrb[20].mxu0  ;;  %v1466_v46 = vadd.f32 %v1465_v41, %v1464_v37 }
 0x350   : > { %v1447_v45 = vadd.f32 %v1446_v40, %v1445_v36  ;;  %v15728_v47 = vpop.f32.mrb[21].mxu0  ;;  %v1460_v49 = vrot.slane %v1459_v43, 1 }
 0x351   : > { %v1454_v48 = vadd.f32 %v1453_v42, %v1452_v38  ;;  %v1467_v51 = vrot.slane %v1466_v46, 1  ;;  %v15730_v52 = vpop.f32.mrb[20].mxu1 }
 0x352   : > { %v1497_v50 = vmul.f32 0.0625, %v1447_v45  ;;  %v1461_v54 = vadd.f32 %v1460_v49, %v1459_v43  ;;  %v15734_v56 = vpop.f32.mrb[21].mxu1 }
 0x353   : > { %v1498_v53 = vmul.f32 0.0625, %v1454_v48  ;;  %v15732_v55 = vpop.f32.mrb[22].mxu0  ;;  %v1468_v59 = vadd.f32 %v1467_v51, %v1466_v46 }
 0x354   : > { %v15736_v57 = vsub.f32 %v1199_v10, %v1497_v50  ;;  %v15738_v58 = vsub.f32 %v1205_v18, %v1497_v50  ;;  %v1469_v60 = vadd.f32 %v15732_v55, %v15726_v44  ;;  %v15742_v61 = vpop.f32.mrb[23].mxu0  ;;  %v1499_v0 = vmul.f32 0.0625, %v1461_v54 }
 0x355   : > { %v15744_v62 = vsub.f32 %v1201_v16, %v1498_v53  ;;  %v15746_v63 = vsub.f32 %v1207_v21, %v1498_v53  ;;  %v1476_v5 = vadd.f32 %v15742_v61, %v15728_v47  ;;  %v1500_v18 = vmul.f32 0.0625, %v1468_v59  ;;  %v15754_v22 = vpop.f32.mrb[22].mxu1 }
 0x356   : > { %v1521_v8 = vmul.f32 %v15736_v57, %v15736_v57  ;;  %v1529_v10 = vmul.f32 %v15738_v58, %v15738_v58  ;;  %v1470_v20 = vrot.slane %v1469_v60, 4  ;;  %v15760_v23 = vsub.f32 %v1276_v17, %v1499_v0  ;;  %v15764_v26 = vpop.f32.mrb[23].mxu1 }
 0x357   : > { %v1522_v16 = vmul.f32 %v15744_v62, %v15744_v62  ;;  %v1530_v21 = vmul.f32 %v15746_v63, %v15746_v63  ;;  %v15762_v25 = vsub.f32 %v1282_v24, %v1499_v0  ;;  %v15766_v29 = vsub.f32 %v1278_v19, %v1500_v18 }
 0x358   : > { %v1537_v28 = vadd.f32 %v1529_v10, %v1521_v8  ;;  %v15768_v30 = vsub.f32 %v1284_v27, %v1500_v18  ;;  %v1471_v31 = vadd.f32 %v1470_v20, %v1469_v60  ;;  %v1523_v33 = vmul.f32 %v15760_v23, %v15760_v23 }
 0x359   : > { %v1544_v32 = vadd.f32 %v1530_v21, %v1522_v16  ;;  %v1531_v34 = vmul.f32 %v15762_v25, %v15762_v25  ;;  %v1477_v35 = vrot.slane %v1476_v5, 4  ;;  %v1524_v24 = vmul.f32 %v15766_v29, %v15766_v29 }
 0x35a   : > { %v1538_v17 = vrot.slane %v1537_v28, 4  ;;  %v1532_v36 = vmul.f32 %v15768_v30, %v15768_v30  ;;  %v1472_v19 = vrot.slane %v1471_v31, 2  ;;  %v1483_v39 = vadd.f32 %v15754_v22, %v15730_v52 }
 0x35b   : > { %v1545_v37 = vrot.slane %v1544_v32, 4  ;;  %v1551_v27 = vadd.f32 %v1531_v34, %v1523_v33  ;;  %v1478_v38 = vadd.f32 %v1477_v35, %v1476_v5  ;;  %v15781_v50 = vsub.s32 1, %v15589_v11 }
 0x35c   : > { %v1539_v40 = vadd.f32 %v1538_v17, %v1537_v28  ;;  %v1558_v41 = vadd.f32 %v1532_v36, %v1524_v24  ;;  %v1473_v42 = vadd.f32 %v1472_v19, %v1471_v31  ;;  %v1484_v48 = vrot.slane %v1483_v39, 4 }
 0x35d   : > { %v1546_v43 = vadd.f32 %v1545_v37, %v1544_v32  ;;  %v1552_v45 = vrot.slane %v1551_v27, 4  ;;  %v1479_v46 = vrot.slane %v1478_v38, 2  ;;  %17809 = vst [vmem:[#allocation40_spill] sm:$0xff] %v15781_v50  ;;  %v1490_v18 = vadd.f32 %v15764_v26, %v15734_v56 }
 0x35e   : > { %v1540_v49 = vrot.slane %v1539_v40, 2  ;;  %v1559_v51 = vrot.slane %v1558_v41, 4  ;;  %v1474_v53 = vrot.slane %v1473_v42, 1  ;;  %v1485_v0 = vadd.f32 %v1484_v48, %v1483_v39 }
 0x35f   : > { %v1547_v54 = vrot.slane %v1546_v43, 2  ;;  %v1553_v59 = vadd.f32 %v1552_v45, %v1551_v27  ;;  %v1480_v60 = vadd.f32 %v1479_v46, %v1478_v38  ;;  %v1491_v34 = vrot.slane %v1490_v18, 4 }
 0x360   : > { %v1541_v5 = vadd.f32 %v1540_v49, %v1539_v40  ;;  %v1560_v8 = vadd.f32 %v1559_v51, %v1558_v41  ;;  %v1475_v10 = vadd.f32 %v1474_v53, %v1473_v42  ;;  %v1486_v28 = vrot.slane %v1485_v0, 2 }
 0x361   : > { %v1548_v20 = vadd.f32 %v1547_v54, %v1546_v43  ;;  %v1554_v16 = vrot.slane %v1553_v59, 2  ;;  %v1481_v21 = vrot.slane %v1480_v60, 1 }
 0x362   : > { %v1542_v31 = vrot.slane %v1541_v5, 1  ;;  %v1561_v32 = vrot.slane %v1560_v8, 2  ;;  %v1501_v33 = vmul.f32 0.0625, %v1475_v10  ;;  %v1487_v36 = vadd.f32 %v1486_v28, %v1485_v0 }
 0x363   : > { %v1549_v35 = vrot.slane %v1548_v20, 1  ;;  %v1555_v17 = vadd.f32 %v1554_v16, %v1553_v59  ;;  %v1482_v24 = vadd.f32 %v1481_v21, %v1480_v60  ;;  %v1492_v28 = vadd.f32 %v1491_v34, %v1490_v18 }
 0x364   : > { %v1543_v19 = vadd.f32 %v1542_v31, %v1541_v5  ;;  %v1562_v37 = vadd.f32 %v1561_v32, %v1560_v8  ;;  %v15786_v27 = vsub.f32 %v15726_v44, %v1501_v33  ;;  %v15789_v38 = vsub.f32 %v15732_v55, %v1501_v33 }
 0x365   : > { %v1550_v39 = vadd.f32 %v1549_v35, %v1548_v20  ;;  %v1556_v40 = vrot.slane %v1555_v17, 1  ;;  %v1502_v41 = vmul.f32 0.0625, %v1482_v24  ;;  %v1488_v42 = vrot.slane %v1487_v36, 1 }
 0x366   : > { %v1593_v43 = vmul.f32 0.0625, %v1543_v19  ;;  %v1563_v45 = vrot.slane %v1562_v37, 1  ;;  %v1525_v46 = vmul.f32 %v15786_v27, %v15786_v27  ;;  %v1533_v48 = vmul.f32 %v15789_v38, %v15789_v38 }
 0x367   : > { %v1594_v49 = vmul.f32 0.0625, %v1550_v39  ;;  %v1557_v51 = vadd.f32 %v1556_v40, %v1555_v17  ;;  %v15796_v44 = vsub.f32 %v15728_v47, %v1502_v41  ;;  %v15799_v55 = vsub.f32 %v15742_v61, %v1502_v41  ;;  %v15823_v39 = vld [vmem:[%s15519_s8 + $0x880] sm:$0xff] }
 0x368   : > { %v1601_v53 = vadd.f32 1e-05, %v1593_v43  ;;  %v1564_v54 = vadd.f32 %v1563_v45, %v1562_v37  ;;  %v1565_v59 = vadd.f32 %v1533_v48, %v1525_v46  ;;  %v1489_v60 = vadd.f32 %v1488_v42, %v1487_v36  ;;  %v15830_v45 = vld [vmem:[%s15519_s8 + $0x8c0] sm:$0xff]  ;;  %v15833_v46 = vld [vmem:[%s15519_s8 + $0x888] sm:$0xff] }
 0x369   : > { %v1602_v0 = vadd.f32 1e-05, %v1594_v49  ;;  %v1595_v5 = vmul.f32 0.0625, %v1557_v51  ;;  %v1526_v8 = vmul.f32 %v15796_v44, %v15796_v44  ;;  %v1534_v10 = vmul.f32 %v15799_v55, %v15799_v55  ;;  %v15836_v48 = vld [vmem:[%s15519_s8 + $0x8c8] sm:$0xff] }
 0x36a   : > { %14426 = vrsqrt.f32 %v1601_v53  ;;  %v1596_v20 = vmul.f32 0.0625, %v1564_v54  ;;  %v1566_v16 = vrot.slane %v1565_v59, 4  ;;  %v1503_v47 = vmul.f32 0.0625, %v1489_v60 }
 0x36b   : > { %14428 = vrsqrt.f32 %v1602_v0  ;;  %v1603_v21 = vadd.f32 1e-05, %v1595_v5  ;;  %v1572_v61 = vadd.f32 %v1534_v10, %v1526_v8  ;;  %v15812_v17 = vsub.s32 2, %v15589_v11 }
 0x36c   : > { %v1604_v31 = vadd.f32 1e-05, %v1596_v20  ;;  %v1567_v32 = vadd.f32 %v1566_v16, %v1565_v59  ;;  %v15806_v33 = vsub.f32 %v15730_v52, %v1503_v47  ;;  %v15809_v35 = vsub.f32 %v15754_v22, %v1503_v47 }
 0x36d   : > { %17810 = vst [vmem:[#allocation41_spill] sm:$0xff] %v15812_v17  ;;  %14430 = vrsqrt.f32 %v1603_v21  ;;  %v1573_v24 = vrot.slane %v1572_v61, 4  ;;  %v1493_v36 = vrot.slane %v1492_v28, 2  ;;  %v1636_v11 = vrot.slane %v15595_v13, %v15781_v50 }
 0x36e   : > { %14432 = vrsqrt.f32 %v1604_v31  ;;  %v1568_v18 = vrot.slane %v1567_v32, 2  ;;  %v1527_v34 = vmul.f32 %v15806_v33, %v15806_v33  ;;  %v1535_v52 = vmul.f32 %v15809_v35, %v15809_v35 }
 0x36f   : > { %v1574_v19 = vadd.f32 %v1573_v24, %v1572_v61  ;;  %v1494_v22 = vadd.f32 %v1493_v36, %v1492_v28  ;;  %v1640_v37 = vrot.slane %v15598_v14, %v15781_v50  ;;  %v1684_v42 = vrot.slane %v15595_v13, %v15812_v17 }
 0x370   : > { %v1569_v40 = vadd.f32 %v1568_v18, %v1567_v32  ;;  %v1579_v41 = vadd.f32 %v1535_v52, %v1527_v34  ;;  %v1688_v43 = vrot.slane %v15598_v14, %v15812_v17  ;;  %v1644_v53 = vrot.slane %v15601_v7, %v15781_v50 }
 0x371   : > { %v1575_v49 = vrot.slane %v1574_v19, 2  ;;  %v1495_v51 = vrot.slane %v1494_v22, 1  ;;  %v1692_v54 = vrot.slane %v15601_v7, %v15812_v17  ;;  %v1648_v13 = vrot.slane %v15604_v15, %v15781_v50 }
 0x372   : > { %v1570_v59 = vrot.slane %v1569_v40, 1  ;;  %v1580_v60 = vrot.slane %v1579_v41, 4  ;;  %v1696_v14 = vrot.slane %v15604_v15, %v15812_v17  ;;  %v12962_v10 = vcombine.high %v15823_v39, %v15830_v45 }
 0x373   : > { %v1576_v0 = vadd.f32 %v1575_v49, %v1574_v19  ;;  %v1496_v5 = vadd.f32 %v1495_v51, %v1494_v22  ;;  %v12964_v20 = vcombine.high %v15833_v46, %v15836_v48 }
 0x374   : > { %v14427_v8 = vpop.eup %14426  ;;  %v1571_v16 = vadd.f32 %v1570_v59, %v1569_v40  ;;  %v1581_v47 = vadd.f32 %v1580_v60, %v1579_v41 }
 0x375   : > { %v14429_v7 = vpop.eup %14428  ;;  %v1617_v21 = vmul.f32 %v14427_v8, %v15736_v57  ;;  %v1625_v61 = vmul.f32 %v14427_v8, %v15738_v58  ;;  %v1577_v28 = vrot.slane %v1576_v0, 1  ;;  %v1504_v31 = vmul.f32 0.0625, %v1496_v5 }
 0x376   : > { %v1618_v15 = vmul.f32 %v14429_v7, %v15744_v62  ;;  %v1626_v32 = vmul.f32 %v14429_v7, %v15746_v63  ;;  %v1597_v24 = vmul.f32 0.0625, %v1571_v16  ;;  %v1582_v36 = vrot.slane %v1581_v47, 2 }
 0x377   : > { %v14431_v18 = vpop.eup %14430  ;;  %v1665_v34 = vmul.f32 %v1636_v11, %v1617_v21  ;;  %v1673_v52 = vmul.f32 %v1636_v11, %v1625_v61  ;;  %v1578_v19 = vadd.f32 %v1577_v28, %v1576_v0  ;;  %v15855_v22 = vsub.f32 %v15734_v56, %v1504_v31 }
 0x378   : > { %v14433_v40 = vpop.eup %14432  ;;  %v1666_v41 = vmul.f32 %v1640_v37, %v1618_v15  ;;  %v1674_v57 = vmul.f32 %v1640_v37, %v1626_v32  ;;  %v1619_v58 = vmul.f32 %v14431_v18, %v15760_v23  ;;  %v1627_v49 = vmul.f32 %v14431_v18, %v15762_v25 }
 0x379   : > { %v1713_v51 = vadd.f32 %v1684_v42, %v1665_v34  ;;  %v1721_v62 = vadd.f32 %v1684_v42, %v1673_v52  ;;  %v1620_v63 = vmul.f32 %v14433_v40, %v15766_v29  ;;  %v1628_v59 = vmul.f32 %v14433_v40, %v15768_v30  ;;  %v2082_v40 = vld [vmem:[%s15519_s8 + $0x948] sm:$0xff] }
 0x37a   : > { %v1714_v60 = vadd.f32 %v1688_v43, %v1666_v41  ;;  %v1722_v5 = vadd.f32 %v1688_v43, %v1674_v57  ;;  %v1667_v11 = vmul.f32 %v1644_v53, %v1619_v58  ;;  %v1675_v0 = vmul.f32 %v1644_v53, %v1627_v49  ;;  %v2098_v58 = vld [vmem:[%s15519_s8 + $0x9c8] sm:$0xff] }
 0x37b   : > { %v1729_v8 = vmax.f32 %v1713_v51, 0.0  ;;  %v1737_v56 = vmax.f32 %v1721_v62, 0.0  ;;  %v1668_v16 = vmul.f32 %v1648_v13, %v1620_v63  ;;  %v1676_v7 = vmul.f32 %v1648_v13, %v1628_v59  ;;  %v2073_v13 = vld [vmem:[%s15519_s8 + $0x900] sm:$0xff]  ;;  %v2106_v59 = vld [vmem:[%s15519_s8 + $0xa08] sm:$0xff] }
 0x37c   : > { %v1730_v37 = vmax.f32 %v1714_v60, 0.0  ;;  %v1738_v21 = vmax.f32 %v1722_v5, 0.0  ;;  %v1715_v23 = vadd.f32 %v1692_v54, %v1667_v11  ;;  %v1723_v61 = vadd.f32 %v1692_v54, %v1675_v0  ;;  %v2081_v54 = vld [vmem:[%s15519_s8 + $0x940] sm:$0xff]  ;;  %v2114_v60 = vld [vmem:[%s15519_s8 + $0xa48] sm:$0xff] }
 0x37d   : > { %v15861_v25 = vpack.c.bf16 %v1737_v56, %v1729_v8  ;;  %v1716_v42 = vadd.f32 %v1696_v14, %v1668_v16  ;;  %v1724_v29 = vadd.f32 %v1696_v14, %v1676_v7  ;;  %v1605_v30 = vadd.f32 1e-05, %v1597_v24  ;;  %v2074_v14 = vld [vmem:[%s15519_s8 + $0x908] sm:$0xff]  ;;  %v2105_v51 = vld [vmem:[%s15519_s8 + $0xa00] sm:$0xff] }
 0x37e   : > { %v15863_v43 = vpack.c.bf16 %v1738_v21, %v1730_v37  ;;  %v1731_v53 = vmax.f32 %v1715_v23, 0.0  ;;  %v1739_v28 = vmax.f32 %v1723_v61, 0.0  ;;  %v1598_v15 = vmul.f32 0.0625, %v1578_v19  ;;  %v2113_v63 = vld [vmem:[%s15519_s8 + $0xa40] sm:$0xff] }
 0x37f   : > { %v1732_v32 = vmax.f32 %v1716_v42, 0.0  ;;  %v1740_v18 = vmax.f32 %v1724_v29, 0.0  ;;  %14434 = vrsqrt.f32 %v1605_v30  ;;  %v1583_v34 = vadd.f32 %v1582_v36, %v1581_v47  ;;  %v14442_v5 = vld [vmem:[%s15517_s22 + $0x20] sm:$0xff] }
 0x380   : > { %v15866_v52 = vpack.c.bf16 %v1739_v28, %v1731_v53  ;;  %7961 = vmatprep.mubr.bf16.mxu0 %v15863_v43  ;;  %8133 = vmatprep.mubr.bf16.mxu1 %v15863_v43  ;;  %v1606_v24 = vadd.f32 1e-05, %v1598_v15  ;;  %v15874_v41 = vsub.f32 %v15764_v26, %v1504_v31  ;;  %v1528_v19 = vmul.f32 %v15855_v22, %v15855_v22  ;;  %v2121_v29 = vld [vmem:[%s15519_s8 + $0xa80] sm:$0xff]  ;;  %v14443_v53 = vld [vmem:[%s15517_s22 + $0x28] sm:$0xff] }
 0x381   : > { %v15878_v57 = vpack.c.bf16 %v1740_v18, %v1732_v32  ;;  %7962 = vmatmul.mubr.bf16.vlgmr.msra.gmra.mrb[24].mxu0 %v15861_v25  ;;  %8134 = vmatmul.mubr.bf16.vlgmr.msra.gmra.mrb[24].mxu1 %v15861_v25  ;;  %v1584_v47 = vrot.slane %v1583_v34, 1  ;;  %v12961_v26 = vcombine.low %v15823_v39, %v15830_v45  ;;  %v12963_v31 = vcombine.low %v15833_v46, %v15836_v48  ;;  %v2129_v30 = vld [vmem:[%s15519_s8 + $0xac0] sm:$0xff] }
 0x382   : > { %7973 = vmatpush1.bf16.msra.mxu0 %v12945_v3  ;;  %8145 = vmatpush1.bf16.msra.mxu1 %v12947_v6  ;;  %14436 = vrsqrt.f32 %v1606_v24  ;;  %v1536_v36 = vmul.f32 %v15874_v41, %v15874_v41  ;;  %v12978_v1 = vcombine.high %v2073_v13, %v2081_v54  ;;  %v12980_v2 = vcombine.high %v2074_v14, %v2082_v40  ;;  %v2097_v3 = vld [vmem:[%s15519_s8 + $0x9c0] sm:$0xff]  ;;  %v2090_v6 = vld [vmem:[%s15519_s8 + $0x988] sm:$0xff] }
 0x383   : > { %7974 = vmatprep.subr.bf16.mxu0 %v12962_v10  ;;  %8146 = vmatprep.subr.bf16.mxu1 %v12964_v20  ;;  %v1585_v9 = vadd.f32 %v1584_v47, %v1583_v34  ;;  %v12977_v46 = vcombine.low %v2073_v13, %v2081_v54  ;;  %v12979_v48 = vcombine.low %v2074_v14, %v2082_v40  ;;  %v2122_v13 = vld [vmem:[%s15519_s8 + $0xa88] sm:$0xff] }
 0x384   : > { %8004 = vmatprep.mubr.bf16.mxu0 %v15878_v57  ;;  %8176 = vmatprep.mubr.bf16.mxu1 %v15878_v57  ;;  %v1586_v39 = vadd.f32 %v1536_v36, %v1528_v19  ;;  %v12994_v20 = vcombine.high %v2089_v4, %v2097_v3  ;;  %v12996_v49 = vcombine.high %v2090_v6, %v2098_v58  ;;  %v2130_v34 = vld [vmem:[%s15519_s8 + $0xac8] sm:$0xff] }
 0x385   : > { %v1599_v45 = vmul.f32 0.0625, %v1585_v9  ;;  %v1652_v11 = vrot.slane %v14442_v5, %v15781_v50  ;;  %v12993_v56 = vcombine.low %v2089_v4, %v2097_v3  ;;  %v12995_v16 = vcombine.low %v2090_v6, %v2098_v58  ;;  %v2145_v9 = vld [vmem:[%s15519_s8 + $0xb40] sm:$0xff]  ;;  %v2138_v3 = vld [vmem:[%s15519_s8 + $0xb08] sm:$0xff] }
 0x386   : > { %7975 = vmatpush1.bf16.msra.mxu0 %v12961_v26  ;;  %8147 = vmatpush1.bf16.msra.mxu1 %v12963_v31  ;;  %v1587_v10 = vrot.slane %v1586_v39, 4  ;;  %v1700_v21 = vrot.slane %v14442_v5, %v15812_v17  ;;  %v13010_v61 = vcombine.high %v2105_v51, %v2113_v63  ;;  %v13012_v42 = vcombine.high %v2106_v59, %v2114_v60  ;;  %v2146_v6 = vld [vmem:[%s15519_s8 + $0xb48] sm:$0xff] }
 0x387   : > { %7976 = vmatprep.subr.bf16.mxu0 %v12978_v1  ;;  %8148 = vmatprep.subr.bf16.mxu1 %v12980_v2  ;;  %v1607_v62 = vadd.f32 1e-05, %v1599_v45  ;;  %v1656_v28 = vrot.slane %v14443_v53, %v15781_v50  ;;  %v13009_v32 = vcombine.low %v2105_v51, %v2113_v63  ;;  %v13011_v54 = vcombine.low %v2106_v59, %v2114_v60 }
 0x388   : > { %v1588_v0 = vadd.f32 %v1587_v10, %v1586_v39  ;;  %v1704_v24 = vrot.slane %v14443_v53, %v15812_v17  ;;  %v13026_v26 = vcombine.high %v2121_v29, %v2129_v30  ;;  %v13028_v36 = vcombine.high %v2122_v13, %v2130_v34 }
 0x389   : > { %v14435_v8 = vpop.eup %14434  ;;  %14438 = vrsqrt.f32 %v1607_v62  ;;  %v13025_v39 = vcombine.low %v2121_v29, %v2129_v30  ;;  %v13027_v10 = vcombine.low %v2122_v13, %v2130_v34  ;;  %v13044_v5 = vcombine.high %v2138_v3, %v2146_v6 }
 0x38a   : > { %7977 = vmatpush1.bf16.msra.mxu0 %v12977_v46  ;;  %8149 = vmatpush1.bf16.msra.mxu1 %v12979_v48  ;;  %v1621_v7 = vmul.f32 %v14435_v8, %v15786_v27  ;;  %v1629_v37 = vmul.f32 %v14435_v8, %v15789_v38  ;;  %v1589_v23 = vrot.slane %v1588_v0, 2  ;;  %v2154_v8 = vld [vmem:[%s15519_s8 + $0xb88] sm:$0xff] }
 0x38b   : > { %7978 = vmatprep.subr.bf16.mxu0 %v12994_v20  ;;  %8150 = vmatprep.subr.bf16.mxu1 %v12996_v49  ;;  %v14444_v20 = vld [vmem:[%s15517_s22 + $0x30] sm:$0xff] }
 0x38c   : > { %v14437_v15 = vpop.eup %14436  ;;  %v1669_v18 = vmul.f32 %v1652_v11, %v1621_v7  ;;  %v1677_v27 = vmul.f32 %v1652_v11, %v1629_v37  ;;  %v1590_v38 = vadd.f32 %v1589_v23, %v1588_v0  ;;  %v1660_v49 = vrot.slane %v14444_v20, %v15781_v50  ;;  %v2153_v11 = vld [vmem:[%s15519_s8 + $0xb80] sm:$0xff] }
 0x38d   : > { %v1622_v14 = vmul.f32 %v14437_v15, %v15796_v44  ;;  %v1630_v40 = vmul.f32 %v14437_v15, %v15799_v55  ;;  %v2137_v44 = vld [vmem:[%s15519_s8 + $0xb00] sm:$0xff]  ;;  %v1708_v37 = vrot.slane %v14444_v20, %v15812_v17  ;;  %v2170_v15 = vld [vmem:[%s15519_s8 + $0xc08] sm:$0xff] }
 0x38e   : > { %7979 = vmatpush1.bf16.msra.mxu0 %v12993_v56  ;;  %8151 = vmatpush1.bf16.msra.mxu1 %v12995_v16  ;;  %v1717_v19 = vadd.f32 %v1700_v21, %v1669_v18  ;;  %v1725_v47 = vadd.f32 %v1700_v21, %v1677_v27  ;;  %v1591_v31 = vrot.slane %v1590_v38, 1  ;;  %v13042_v60 = vcombine.high %v2137_v44, %v2145_v9  ;;  %v2161_v0 = vld [vmem:[%s15519_s8 + $0xbc0] sm:$0xff]  ;;  %v2162_v56 = vld [vmem:[%s15519_s8 + $0xbc8] sm:$0xff] }
 0x38f   : > { %7980 = vmatprep.subr.bf16.mxu0 %v13010_v61  ;;  %8152 = vmatprep.subr.bf16.mxu1 %v13012_v42  ;;  %v1670_v1 = vmul.f32 %v1656_v28, %v1622_v14  ;;  %v1678_v2 = vmul.f32 %v1656_v28, %v1630_v40  ;;  %v13041_v61 = vcombine.low %v2137_v44, %v2145_v9  ;;  %v2177_v28 = vld [vmem:[%s15519_s8 + $0xc40] sm:$0xff]  ;;  %v14445_v9 = vld [vmem:[%s15517_s22 + $0x38] sm:$0xff] }
 0x390   : > { %v1733_v4 = vmax.f32 %v1717_v19, 0.0  ;;  %v1741_v55 = vmax.f32 %v1725_v47, 0.0  ;;  %v1592_v58 = vadd.f32 %v1591_v31, %v1590_v38  ;;  %v13043_v42 = vcombine.low %v2138_v3, %v2146_v6  ;;  %v2193_v19 = vld [vmem:[%s15519_s8 + $0xcc0] sm:$0xff]  ;;  %v2186_v47 = vld [vmem:[%s15519_s8 + $0xc88] sm:$0xff] }
 0x391   : > { %v1718_v45 = vadd.f32 %v1704_v24, %v1670_v1  ;;  %v1726_v46 = vadd.f32 %v1704_v24, %v1678_v2  ;;  %v13060_v53 = vcombine.high %v2154_v8, %v2162_v56  ;;  %v13057_v13 = vcombine.low %v2153_v11, %v2161_v0  ;;  %v2185_v24 = vld [vmem:[%s15519_s8 + $0xc80] sm:$0xff] }
 0x392   : > { %7981 = vmatpush1.bf16.msra.mxu0 %v13009_v32  ;;  %8153 = vmatpush1.bf16.msra.mxu1 %v13011_v54  ;;  %v15928_v48 = vpack.c.bf16 %v1741_v55, %v1733_v4  ;;  %v1600_v51 = vmul.f32 0.0625, %v1592_v58  ;;  %v2178_v32 = vld [vmem:[%s15519_s8 + $0xc48] sm:$0xff]  ;;  %v13059_v34 = vcombine.low %v2154_v8, %v2162_v56  ;;  %v13090_v2 = vcombine.high %v2185_v24, %v2193_v19  ;;  %v2201_v4 = vld [vmem:[%s15519_s8 + $0xd00] sm:$0xff] }
 0x393   : > { %v14439_v62 = vpop.eup %14438  ;;  %7982 = vmatprep.subr.bf16.mxu0 %v13026_v26  ;;  %8154 = vmatprep.subr.bf16.mxu1 %v13028_v36  ;;  %v1734_v63 = vmax.f32 %v1718_v45, 0.0  ;;  %v1742_v59 = vmax.f32 %v1726_v46, 0.0  ;;  %v13076_v40 = vcombine.high %v2170_v15, %v2178_v32  ;;  %v2194_v26 = vld [vmem:[%s15519_s8 + $0xcc8] sm:$0xff]  ;;  %v13075_v1 = vcombine.low %v2170_v15, %v2178_v32  ;;  %v2209_v55 = vld [vmem:[%s15519_s8 + $0xd40] sm:$0xff] }
 0x394   : > { %v1623_v16 = vmul.f32 %v14439_v62, %v15806_v33  ;;  %v1631_v7 = vmul.f32 %v14439_v62, %v15809_v35  ;;  %v1608_v21 = vadd.f32 1e-05, %v1600_v51  ;;  %v13058_v33 = vcombine.high %v2153_v11, %v2161_v0  ;;  %v2169_v35 = vld [vmem:[%s15519_s8 + $0xc00] sm:$0xff]  ;;  %v2202_v58 = vld [vmem:[%s15519_s8 + $0xd08] sm:$0xff] }
 0x395   : > { %v15939_v23 = vpack.c.bf16 %v1742_v59, %v1734_v63  ;;  %v13074_v14 = vcombine.high %v2169_v35, %v2177_v28  ;;  %v13073_v36 = vcombine.low %v2169_v35, %v2177_v28  ;;  %v13092_v44 = vcombine.high %v2186_v47, %v2194_v26  ;;  %v2217_v63 = vld [vmem:[%s15519_s8 + $0xd80] sm:$0xff]  ;;  %v2226_v11 = vld [vmem:[%s15519_s8 + $0xdc8] sm:$0xff] }
 0x396   : > { %7983 = vmatpush1.bf16.msra.mxu0 %v13025_v39  ;;  %8155 = vmatpush1.bf16.msra.mxu1 %v13027_v10  ;;  %v1671_v29 = vmul.f32 %v1660_v49, %v1623_v16  ;;  %v1679_v30 = vmul.f32 %v1660_v49, %v1631_v7  ;;  %14440 = vrsqrt.f32 %v1608_v21  ;;  %v1664_v3 = vrot.slane %v14445_v9, %v15781_v50  ;;  %v2210_v39 = vld [vmem:[%s15519_s8 + $0xd48] sm:$0xff]  ;;  %v2249_v32 = vld [vmem:[%s15519_s8 + $0xe80] sm:$0xff] }
 0x397   : > { %7984 = vmatprep.subr.bf16.mxu0 %v13042_v60  ;;  %8156 = vmatprep.subr.bf16.mxu1 %v13044_v5  ;;  %v1712_v10 = vrot.slane %v14445_v9, %v15812_v17  ;;  %v13089_v20 = vcombine.low %v2185_v24, %v2193_v19  ;;  %v13091_v49 = vcombine.low %v2186_v47, %v2194_v26  ;;  %v2225_v5 = vld [vmem:[%s15519_s8 + $0xdc0] sm:$0xff]  ;;  %v2266_v19 = vld [vmem:[%s15519_s8 + $0xf08] sm:$0xff] }
 0x398   : > { %v1719_v18 = vadd.f32 %v1708_v37, %v1671_v29  ;;  %v1727_v27 = vadd.f32 %v1708_v37, %v1679_v30  ;;  %v13106_v51 = vcombine.high %v2201_v4, %v2209_v55  ;;  %v13108_v62 = vcombine.high %v2202_v58, %v2210_v39  ;;  %v2233_v37 = vld [vmem:[%s15519_s8 + $0xe00] sm:$0xff]  ;;  %v2234_v29 = vld [vmem:[%s15519_s8 + $0xe08] sm:$0xff] }
 0x399   : > { %v13105_v8 = vcombine.low %v2201_v4, %v2209_v55  ;;  %v13107_v56 = vcombine.low %v2202_v58, %v2210_v39  ;;  %v13122_v16 = vcombine.high %v2217_v63, %v2225_v5  ;;  %v2242_v30 = vld [vmem:[%s15519_s8 + $0xe48] sm:$0xff]  ;;  %v2273_v24 = vld [vmem:[%s15519_s8 + $0xf40] sm:$0xff] }
 0x39a   : > { %7985 = vmatpush1.bf16.msra.mxu0 %v13041_v61  ;;  %8157 = vmatpush1.bf16.msra.mxu1 %v13043_v42  ;;  %v1735_v38 = vmax.f32 %v1719_v18, 0.0  ;;  %v1743_v54 = vmax.f32 %v1727_v27, 0.0  ;;  %v2241_v42 = vld [vmem:[%s15519_s8 + $0xe40] sm:$0xff]  ;;  %v13140_v15 = vcombine.high %v2234_v29, %v2242_v30  ;;  %v2250_v27 = vld [vmem:[%s15519_s8 + $0xe88] sm:$0xff] }
 0x39b   : > { %7986 = vmatprep.subr.bf16.mxu0 %v13058_v33  ;;  %8158 = vmatprep.subr.bf16.mxu1 %v13060_v53  ;;  %v13121_v53 = vcombine.low %v2217_v63, %v2225_v5  ;;  %v13138_v28 = vcombine.high %v2233_v37, %v2241_v42  ;;  %v2257_v18 = vld [vmem:[%s15519_s8 + $0xec0] sm:$0xff]  ;;  %v2274_v47 = vld [vmem:[%s15519_s8 + $0xf48] sm:$0xff] }
 0x39c   : > { %v15949_v31 = vpack.c.bf16 %v1743_v54, %v1735_v38  ;;  %v13139_v38 = vcombine.low %v2234_v29, %v2242_v30  ;;  %v13154_v54 = vcombine.high %v2249_v32, %v2257_v18  ;;  %v13153_v26 = vcombine.low %v2249_v32, %v2257_v18  ;;  %v2289_v4 = vld [vmem:[%s15519_s8 + $0xfc0] sm:$0xff]  ;;  %v2282_v55 = vld [vmem:[%s15519_s8 + $0xf88] sm:$0xff] }
 0x39d   : > { %v2290_v9 = vld [vmem:[%s15519_s8 + $0xfc8] sm:$0xff]  ;;  %v2345_v30 = vld [vmem:[%s15519_s8 + $0x1180] sm:$0xff] }
 0x39e   : > { %7987 = vmatpush1.bf16.msra.mxu0 %v13057_v13  ;;  %8159 = vmatpush1.bf16.msra.mxu1 %v13059_v34  ;;  %v2258_v13 = vld [vmem:[%s15519_s8 + $0xec8] sm:$0xff]  ;;  %v13137_v34 = vcombine.low %v2233_v37, %v2241_v42  ;;  %v13188_v39 = vcombine.high %v2282_v55, %v2290_v9 }
 0x39f   : > { %7988 = vmatprep.subr.bf16.mxu0 %v13074_v14  ;;  %8160 = vmatprep.subr.bf16.mxu1 %v13076_v40  ;;  %v13156_v14 = vcombine.high %v2250_v27, %v2258_v13  ;;  %v2265_v40 = vld [vmem:[%s15519_s8 + $0xf00] sm:$0xff]  ;;  %v2314_v5 = vld [vmem:[%s15519_s8 + $0x1088] sm:$0xff] }
 0x3a0   : > { %v14441_v6 = vpop.eup %14440  ;;  %v2338_v37 = vld [vmem:[%s15519_s8 + $0x1148] sm:$0xff] }
 0x3a1   : > { %v1624_v45 = vmul.f32 %v14441_v6, %v15855_v22  ;;  %v1632_v46 = vmul.f32 %v14441_v6, %v15874_v41  ;;  %v2218_v22 = vld [vmem:[%s15519_s8 + $0xd88] sm:$0xff]  ;;  %v13171_v6 = vcombine.low %v2266_v19, %v2274_v47 }
 0x3a2   : > { %7989 = vmatpush1.bf16.msra.mxu0 %v13073_v36  ;;  %8161 = vmatpush1.bf16.msra.mxu1 %v13075_v1  ;;  %v13124_v7 = vcombine.high %v2218_v22, %v2226_v11  ;;  %v13123_v35 = vcombine.low %v2218_v22, %v2226_v11  ;;  %v13155_v36 = vcombine.low %v2250_v27, %v2258_v13  ;;  %v2322_v22 = vld [vmem:[%s15519_s8 + $0x10c8] sm:$0xff]  ;;  %v2361_v13 = vld [vmem:[%s15519_s8 + $0x1200] sm:$0xff] }
 0x3a3   : > { %7990 = vmatprep.subr.bf16.mxu0 %v13090_v2  ;;  %8162 = vmatprep.subr.bf16.mxu1 %v13092_v44  ;;  %v1672_v59 = vmul.f32 %v1664_v3, %v1624_v45  ;;  %v1680_v60 = vmul.f32 %v1664_v3, %v1632_v46  ;;  %v13170_v1 = vcombine.high %v2265_v40, %v2273_v24  ;;  %v2281_v44 = vld [vmem:[%s15519_s8 + $0xf80] sm:$0xff] }
 0x3a4   : > { %v13172_v2 = vcombine.high %v2266_v19, %v2274_v47  ;;  %v13169_v3 = vcombine.low %v2265_v40, %v2273_v24  ;;  %v13186_v58 = vcombine.high %v2281_v44, %v2289_v4  ;;  %v2297_v45 = vld [vmem:[%s15519_s8 + $0x1000] sm:$0xff] }
 0x3a5   : > { %v1720_v41 = vadd.f32 %v1712_v10, %v1672_v59  ;;  %v1728_v0 = vadd.f32 %v1712_v10, %v1680_v60  ;;  %v2305_v46 = vld [vmem:[%s15519_s8 + $0x1040] sm:$0xff]  ;;  %v2298_v10 = vld [vmem:[%s15519_s8 + $0x1008] sm:$0xff] }
 0x3a6   : > { %7991 = vmatpush1.bf16.msra.mxu0 %v13089_v20  ;;  %8163 = vmatpush1.bf16.msra.mxu1 %v13091_v49  ;;  %v2306_v20 = vld [vmem:[%s15519_s8 + $0x1048] sm:$0xff]  ;;  %v13185_v49 = vcombine.low %v2281_v44, %v2289_v4  ;;  %v2313_v59 = vld [vmem:[%s15519_s8 + $0x1080] sm:$0xff]  ;;  %v13201_v11 = vcombine.low %v2297_v45, %v2305_v46 }
 0x3a7   : > { %7992 = vmatprep.subr.bf16.mxu0 %v13106_v51  ;;  %8164 = vmatprep.subr.bf16.mxu1 %v13108_v62  ;;  %v1736_v21 = vmax.f32 %v1720_v41, 0.0  ;;  %v1744_v61 = vmax.f32 %v1728_v0, 0.0  ;;  %v13187_v51 = vcombine.low %v2282_v55, %v2290_v9  ;;  %v13202_v62 = vcombine.high %v2297_v45, %v2305_v46  ;;  %v2321_v60 = vld [vmem:[%s15519_s8 + $0x10c0] sm:$0xff] }
 0x3a8   : > { %v13204_v63 = vcombine.high %v2298_v10, %v2306_v20  ;;  %v13203_v41 = vcombine.low %v2298_v10, %v2306_v20  ;;  %v13218_v0 = vcombine.high %v2313_v59, %v2321_v60  ;;  %v2377_v47 = vld [vmem:[%s15519_s8 + $0x1280] sm:$0xff] }
 0x3a9   : > { %v15968_v33 = vpack.c.bf16 %v1744_v61, %v1736_v21  ;;  %v13217_v21 = vcombine.low %v2313_v59, %v2321_v60  ;;  %v13219_v61 = vcombine.low %v2314_v5, %v2322_v22  ;;  %v2393_v9 = vld [vmem:[%s15519_s8 + $0x1300] sm:$0xff] }
 0x3aa   : > { %7993 = vmatpush1.bf16.msra.mxu0 %v13105_v8  ;;  %8165 = vmatpush1.bf16.msra.mxu1 %v13107_v56  ;;  %v13220_v8 = vcombine.high %v2314_v5, %v2322_v22  ;;  %v2329_v56 = vld [vmem:[%s15519_s8 + $0x1100] sm:$0xff] }
 0x3ab   : > { %7994 = vmatprep.subr.bf16.mxu0 %v13122_v16  ;;  %8166 = vmatprep.subr.bf16.mxu1 %v13124_v7  ;;  %v2337_v16 = vld [vmem:[%s15519_s8 + $0x1140] sm:$0xff]  ;;  %v2330_v7 = vld [vmem:[%s15519_s8 + $0x1108] sm:$0xff] }
 0x3ac   : > { %v13234_v42 = vcombine.high %v2329_v56, %v2337_v16  ;;  %v13236_v29 = vcombine.high %v2330_v7, %v2338_v37  ;;  %v13235_v32 = vcombine.low %v2330_v7, %v2338_v37  ;;  %v2409_v20 = vld [vmem:[%s15519_s8 + $0x1380] sm:$0xff] }
 0x3ad   : > { %v2425_v22 = vld [vmem:[%s15519_s8 + $0x1400] sm:$0xff] }
 0x3ae   : > { %7995 = vmatpush1.bf16.msra.mxu0 %v13121_v53  ;;  %8167 = vmatpush1.bf16.msra.mxu1 %v13123_v35  ;;  %v2353_v53 = vld [vmem:[%s15519_s8 + $0x11c0] sm:$0xff]  ;;  %v2346_v35 = vld [vmem:[%s15519_s8 + $0x1188] sm:$0xff] }
 0x3af   : > { %7996 = vmatprep.subr.bf16.mxu0 %v13138_v28  ;;  %8168 = vmatprep.subr.bf16.mxu1 %v13140_v15  ;;  %v2354_v28 = vld [vmem:[%s15519_s8 + $0x11c8] sm:$0xff]  ;;  %v13233_v15 = vcombine.low %v2329_v56, %v2337_v16  ;;  %v13250_v18 = vcombine.high %v2345_v30, %v2353_v53  ;;  %v2441_v37 = vld [vmem:[%s15519_s8 + $0x1480] sm:$0xff] }
 0x3b0   : > { %v13252_v27 = vcombine.high %v2346_v35, %v2354_v28  ;;  %v13251_v40 = vcombine.low %v2346_v35, %v2354_v28  ;;  %v2457_v28 = vld [vmem:[%s15519_s8 + $0x1500] sm:$0xff] }
 0x3b2   : > { %7997 = vmatpush1.bf16.msra.mxu0 %v13137_v34  ;;  %8169 = vmatpush1.bf16.msra.mxu1 %v13139_v38  ;;  %v2369_v34 = vld [vmem:[%s15519_s8 + $0x1240] sm:$0xff]  ;;  %v2362_v38 = vld [vmem:[%s15519_s8 + $0x1208] sm:$0xff] }
 0x3b3   : > { %7998 = vmatprep.subr.bf16.mxu0 %v13154_v54  ;;  %8170 = vmatprep.subr.bf16.mxu1 %v13156_v14  ;;  %v2370_v54 = vld [vmem:[%s15519_s8 + $0x1248] sm:$0xff]  ;;  %v13249_v14 = vcombine.low %v2345_v30, %v2353_v53  ;;  %v13266_v24 = vcombine.high %v2361_v13, %v2369_v34 }
 0x3b4   : > { %v13268_v19 = vcombine.high %v2362_v38, %v2370_v54  ;;  %v13267_v44 = vcombine.low %v2362_v38, %v2370_v54  ;;  %v2473_v54 = vld [vmem:[%s15519_s8 + $0x1580] sm:$0xff] }
 0x3b6   : > { %7999 = vmatpush1.bf16.msra.mxu0 %v13153_v26  ;;  %8171 = vmatpush1.bf16.msra.mxu1 %v13155_v36  ;;  %v2385_v26 = vld [vmem:[%s15519_s8 + $0x12c0] sm:$0xff]  ;;  %v2378_v36 = vld [vmem:[%s15519_s8 + $0x1288] sm:$0xff] }
 0x3b7   : > { %8000 = vmatprep.subr.bf16.mxu0 %v13170_v1  ;;  %8172 = vmatprep.subr.bf16.mxu1 %v13172_v2  ;;  %v2386_v1 = vld [vmem:[%s15519_s8 + $0x12c8] sm:$0xff]  ;;  %v13265_v2 = vcombine.low %v2361_v13, %v2369_v34  ;;  %v13282_v4 = vcombine.high %v2377_v47, %v2385_v26 }
 0x3b8   : > { %v13284_v55 = vcombine.high %v2378_v36, %v2386_v1  ;;  %v13283_v45 = vcombine.low %v2378_v36, %v2386_v1  ;;  %v2489_v1 = vld [vmem:[%s15519_s8 + $0x1600] sm:$0xff] }
 0x3ba   : > { %8001 = vmatpush1.bf16.msra.mxu0 %v13169_v3  ;;  %8173 = vmatpush1.bf16.msra.mxu1 %v13171_v6  ;;  %v2401_v3 = vld [vmem:[%s15519_s8 + $0x1340] sm:$0xff]  ;;  %v2394_v6 = vld [vmem:[%s15519_s8 + $0x1308] sm:$0xff] }
 0x3bb   : > { %8002 = vmatprep.subr.bf16.mxu0 %v13186_v58  ;;  %8174 = vmatprep.subr.bf16.mxu1 %v13188_v39  ;;  %v2402_v58 = vld [vmem:[%s15519_s8 + $0x1348] sm:$0xff]  ;;  %v13281_v39 = vcombine.low %v2377_v47, %v2385_v26  ;;  %v13298_v46 = vcombine.high %v2393_v9, %v2401_v3 }
 0x3bc   : > { %v13300_v10 = vcombine.high %v2394_v6, %v2402_v58  ;;  %v13299_v59 = vcombine.low %v2394_v6, %v2402_v58  ;;  %v2505_v58 = vld [vmem:[%s15519_s8 + $0x1680] sm:$0xff] }
 0x3be   : > { %8003 = vmatpush1.bf16.msra.mxu0 %v13185_v49  ;;  %8175 = vmatpush1.bf16.msra.mxu1 %v13187_v51  ;;  %v2417_v49 = vld [vmem:[%s15519_s8 + $0x13c0] sm:$0xff]  ;;  %v2410_v51 = vld [vmem:[%s15519_s8 + $0x1388] sm:$0xff] }
 0x3bf   : > { %8015 = vmatprep.subr.bf16.mxu0 %v13202_v62  ;;  %8187 = vmatprep.subr.bf16.mxu1 %v13204_v63  ;;  %v2418_v62 = vld [vmem:[%s15519_s8 + $0x13c8] sm:$0xff]  ;;  %v13297_v63 = vcombine.low %v2393_v9, %v2401_v3  ;;  %v13314_v60 = vcombine.high %v2409_v20, %v2417_v49 }
 0x3c0   : > { %v13316_v5 = vcombine.high %v2410_v51, %v2418_v62  ;;  %v13315_v56 = vcombine.low %v2410_v51, %v2418_v62  ;;  %v2521_v62 = vld [vmem:[%s15519_s8 + $0x1700] sm:$0xff] }
 0x3c1   : > { %8005 = vmatmul.mubr.bf16.vlgmr.msra.gmra.mrb[24].mxu0 %v15866_v52  ;;  %8177 = vmatmul.mubr.bf16.vlgmr.msra.gmra.mrb[24].mxu1 %v15866_v52 }
 0x3c2   : > { %8016 = vmatpush1.bf16.msra.mxu0 %v13201_v11  ;;  %8188 = vmatpush1.bf16.msra.mxu1 %v13203_v41  ;;  %v2433_v11 = vld [vmem:[%s15519_s8 + $0x1440] sm:$0xff]  ;;  %v2426_v41 = vld [vmem:[%s15519_s8 + $0x1408] sm:$0xff] }
 0x3c3   : > { %8017 = vmatprep.subr.bf16.mxu0 %v13218_v0  ;;  %8189 = vmatprep.subr.bf16.mxu1 %v13220_v8  ;;  %v2434_v0 = vld [vmem:[%s15519_s8 + $0x1448] sm:$0xff]  ;;  %v13313_v8 = vcombine.low %v2409_v20, %v2417_v49  ;;  %v13330_v16 = vcombine.high %v2425_v22, %v2433_v11 }
 0x3c4   : > { %8047 = vmatprep.mubr.bf16.mxu0 %v15939_v23  ;;  %8219 = vmatprep.mubr.bf16.mxu1 %v15939_v23  ;;  %v13332_v7 = vcombine.high %v2426_v41, %v2434_v0  ;;  %v13331_v30 = vcombine.low %v2426_v41, %v2434_v0  ;;  %v2537_v0 = vld [vmem:[%s15519_s8 + $0x1780] sm:$0xff] }
 0x3c6   : > { %8018 = vmatpush1.bf16.msra.mxu0 %v13217_v21  ;;  %8190 = vmatpush1.bf16.msra.mxu1 %v13219_v61  ;;  %v2449_v21 = vld [vmem:[%s15519_s8 + $0x14c0] sm:$0xff]  ;;  %v2442_v61 = vld [vmem:[%s15519_s8 + $0x1488] sm:$0xff] }
 0x3c7   : > { %8019 = vmatprep.subr.bf16.mxu0 %v13234_v42  ;;  %8191 = vmatprep.subr.bf16.mxu1 %v13236_v29  ;;  %v2450_v42 = vld [vmem:[%s15519_s8 + $0x14c8] sm:$0xff]  ;;  %v13329_v29 = vcombine.low %v2425_v22, %v2433_v11  ;;  %v13346_v53 = vcombine.high %v2441_v37, %v2449_v21 }
 0x3c8   : > { %v13348_v35 = vcombine.high %v2442_v61, %v2450_v42  ;;  %v13347_v13 = vcombine.low %v2442_v61, %v2450_v42  ;;  %v2553_v42 = vld [vmem:[%s15519_s8 + $0x1800] sm:$0xff] }
 0x3ca   : > { %8020 = vmatpush1.bf16.msra.mxu0 %v13233_v15  ;;  %8192 = vmatpush1.bf16.msra.mxu1 %v13235_v32  ;;  %v2465_v15 = vld [vmem:[%s15519_s8 + $0x1540] sm:$0xff]  ;;  %v2458_v32 = vld [vmem:[%s15519_s8 + $0x1508] sm:$0xff] }
 0x3cb   : > { %8021 = vmatprep.subr.bf16.mxu0 %v13250_v18  ;;  %8193 = vmatprep.subr.bf16.mxu1 %v13252_v27  ;;  %v2466_v18 = vld [vmem:[%s15519_s8 + $0x1548] sm:$0xff]  ;;  %v13345_v27 = vcombine.low %v2441_v37, %v2449_v21  ;;  %v13362_v34 = vcombine.high %v2457_v28, %v2465_v15 }
 0x3cc   : > { %v13364_v38 = vcombine.high %v2458_v32, %v2466_v18  ;;  %v13363_v47 = vcombine.low %v2458_v32, %v2466_v18  ;;  %v2569_v18 = vld [vmem:[%s15519_s8 + $0x1880] sm:$0xff] }
 0x3ce   : > { %8022 = vmatpush1.bf16.msra.mxu0 %v13249_v14  ;;  %8194 = vmatpush1.bf16.msra.mxu1 %v13251_v40  ;;  %v2481_v14 = vld [vmem:[%s15519_s8 + $0x15c0] sm:$0xff]  ;;  %v2474_v40 = vld [vmem:[%s15519_s8 + $0x1588] sm:$0xff] }
 0x3cf   : > { %8023 = vmatprep.subr.bf16.mxu0 %v13266_v24  ;;  %8195 = vmatprep.subr.bf16.mxu1 %v13268_v19  ;;  %v2482_v24 = vld [vmem:[%s15519_s8 + $0x15c8] sm:$0xff]  ;;  %v13361_v19 = vcombine.low %v2457_v28, %v2465_v15  ;;  %v13378_v26 = vcombine.high %v2473_v54, %v2481_v14 }
 0x3d0   : > { %v13380_v36 = vcombine.high %v2474_v40, %v2482_v24  ;;  %v13379_v9 = vcombine.low %v2474_v40, %v2482_v24  ;;  %v2585_v24 = vld [vmem:[%s15519_s8 + $0x1900] sm:$0xff] }
 0x3d2   : > { %8024 = vmatpush1.bf16.msra.mxu0 %v13265_v2  ;;  %8196 = vmatpush1.bf16.msra.mxu1 %v13267_v44  ;;  %v2497_v2 = vld [vmem:[%s15519_s8 + $0x1640] sm:$0xff]  ;;  %v2490_v44 = vld [vmem:[%s15519_s8 + $0x1608] sm:$0xff] }
 0x3d3   : > { %8025 = vmatprep.subr.bf16.mxu0 %v13282_v4  ;;  %8197 = vmatprep.subr.bf16.mxu1 %v13284_v55  ;;  %v2498_v4 = vld [vmem:[%s15519_s8 + $0x1648] sm:$0xff]  ;;  %v13377_v55 = vcombine.low %v2473_v54, %v2481_v14  ;;  %v13394_v3 = vcombine.high %v2489_v1, %v2497_v2 }
 0x3d4   : > { %v13396_v6 = vcombine.high %v2490_v44, %v2498_v4  ;;  %v13395_v20 = vcombine.low %v2490_v44, %v2498_v4  ;;  %v2601_v4 = vld [vmem:[%s15519_s8 + $0x1980] sm:$0xff] }
 0x3d6   : > { %8026 = vmatpush1.bf16.msra.mxu0 %v13281_v39  ;;  %8198 = vmatpush1.bf16.msra.mxu1 %v13283_v45  ;;  %v2513_v39 = vld [vmem:[%s15519_s8 + $0x16c0] sm:$0xff]  ;;  %v2506_v45 = vld [vmem:[%s15519_s8 + $0x1688] sm:$0xff] }
 0x3d7   : > { %8027 = vmatprep.subr.bf16.mxu0 %v13298_v46  ;;  %8199 = vmatprep.subr.bf16.mxu1 %v13300_v10  ;;  %v2514_v46 = vld [vmem:[%s15519_s8 + $0x16c8] sm:$0xff]  ;;  %v13393_v10 = vcombine.low %v2489_v1, %v2497_v2  ;;  %v13410_v49 = vcombine.high %v2505_v58, %v2513_v39 }
 0x3d8   : > { %v13412_v51 = vcombine.high %v2506_v45, %v2514_v46  ;;  %v13411_v22 = vcombine.low %v2506_v45, %v2514_v46  ;;  %v2617_v46 = vld [vmem:[%s15519_s8 + $0x1a00] sm:$0xff] }
 0x3da   : > { %8028 = vmatpush1.bf16.msra.mxu0 %v13297_v63  ;;  %8200 = vmatpush1.bf16.msra.mxu1 %v13299_v59  ;;  %v2529_v63 = vld [vmem:[%s15519_s8 + $0x1740] sm:$0xff]  ;;  %v2522_v59 = vld [vmem:[%s15519_s8 + $0x1708] sm:$0xff] }
 0x3db   : > { %8029 = vmatprep.subr.bf16.mxu0 %v13314_v60  ;;  %8201 = vmatprep.subr.bf16.mxu1 %v13316_v5  ;;  %v2530_v60 = vld [vmem:[%s15519_s8 + $0x1748] sm:$0xff]  ;;  %v13409_v5 = vcombine.low %v2505_v58, %v2513_v39  ;;  %v13426_v11 = vcombine.high %v2521_v62, %v2529_v63 }
 0x3dc   : > { %v13428_v41 = vcombine.high %v2522_v59, %v2530_v60  ;;  %v13427_v37 = vcombine.low %v2522_v59, %v2530_v60  ;;  %v2633_v60 = vld [vmem:[%s15519_s8 + $0x1a80] sm:$0xff] }
 0x3de   : > { %8030 = vmatpush1.bf16.msra.mxu0 %v13313_v8  ;;  %8202 = vmatpush1.bf16.msra.mxu1 %v13315_v56  ;;  %v2545_v8 = vld [vmem:[%s15519_s8 + $0x17c0] sm:$0xff]  ;;  %v2538_v56 = vld [vmem:[%s15519_s8 + $0x1788] sm:$0xff] }
 0x3df   : > { %8031 = vmatprep.subr.bf16.mxu0 %v13330_v16  ;;  %8203 = vmatprep.subr.bf16.mxu1 %v13332_v7  ;;  %v2546_v16 = vld [vmem:[%s15519_s8 + $0x17c8] sm:$0xff]  ;;  %v13425_v7 = vcombine.low %v2521_v62, %v2529_v63  ;;  %v13442_v21 = vcombine.high %v2537_v0, %v2545_v8 }
 0x3e0   : > { %v13444_v61 = vcombine.high %v2538_v56, %v2546_v16  ;;  %v13443_v28 = vcombine.low %v2538_v56, %v2546_v16  ;;  %v2649_v16 = vld [vmem:[%s15519_s8 + $0x1b00] sm:$0xff] }
 0x3e2   : > { %8032 = vmatpush1.bf16.msra.mxu0 %v13329_v29  ;;  %8204 = vmatpush1.bf16.msra.mxu1 %v13331_v30  ;;  %v2561_v29 = vld [vmem:[%s15519_s8 + $0x1840] sm:$0xff]  ;;  %v2554_v30 = vld [vmem:[%s15519_s8 + $0x1808] sm:$0xff] }
 0x3e3   : > { %8033 = vmatprep.subr.bf16.mxu0 %v13346_v53  ;;  %8205 = vmatprep.subr.bf16.mxu1 %v13348_v35  ;;  %v2562_v53 = vld [vmem:[%s15519_s8 + $0x1848] sm:$0xff]  ;;  %v13441_v35 = vcombine.low %v2537_v0, %v2545_v8  ;;  %v13458_v15 = vcombine.high %v2553_v42, %v2561_v29 }
 0x3e4   : > { %v13460_v32 = vcombine.high %v2554_v30, %v2562_v53  ;;  %v13459_v54 = vcombine.low %v2554_v30, %v2562_v53  ;;  %v2665_v53 = vld [vmem:[%s15519_s8 + $0x1b80] sm:$0xff] }
 0x3e6   : > { %8034 = vmatpush1.bf16.msra.mxu0 %v13345_v27  ;;  %8206 = vmatpush1.bf16.msra.mxu1 %v13347_v13  ;;  %v2577_v27 = vld [vmem:[%s15519_s8 + $0x18c0] sm:$0xff]  ;;  %v2570_v13 = vld [vmem:[%s15519_s8 + $0x1888] sm:$0xff] }
 0x3e7   : > { %8035 = vmatprep.subr.bf16.mxu0 %v13362_v34  ;;  %8207 = vmatprep.subr.bf16.mxu1 %v13364_v38  ;;  %v2578_v34 = vld [vmem:[%s15519_s8 + $0x18c8] sm:$0xff]  ;;  %v13457_v38 = vcombine.low %v2553_v42, %v2561_v29  ;;  %v13474_v14 = vcombine.high %v2569_v18, %v2577_v27 }
 0x3e8   : > { %v13476_v40 = vcombine.high %v2570_v13, %v2578_v34  ;;  %v13475_v1 = vcombine.low %v2570_v13, %v2578_v34  ;;  %v2681_v34 = vld [vmem:[%s15519_s8 + $0x1c00] sm:$0xff] }
 0x3ea   : > { %8036 = vmatpush1.bf16.msra.mxu0 %v13361_v19  ;;  %8208 = vmatpush1.bf16.msra.mxu1 %v13363_v47  ;;  %v2593_v19 = vld [vmem:[%s15519_s8 + $0x1940] sm:$0xff]  ;;  %v2586_v47 = vld [vmem:[%s15519_s8 + $0x1908] sm:$0xff] }
 0x3eb   : > { %8037 = vmatprep.subr.bf16.mxu0 %v13378_v26  ;;  %8209 = vmatprep.subr.bf16.mxu1 %v13380_v36  ;;  %v2594_v26 = vld [vmem:[%s15519_s8 + $0x1948] sm:$0xff]  ;;  %v13473_v36 = vcombine.low %v2569_v18, %v2577_v27  ;;  %v13490_v2 = vcombine.high %v2585_v24, %v2593_v19 }
 0x3ec   : > { %v13492_v44 = vcombine.high %v2586_v47, %v2594_v26  ;;  %v13491_v58 = vcombine.low %v2586_v47, %v2594_v26  ;;  %v2697_v26 = vld [vmem:[%s15519_s8 + $0x1c80] sm:$0xff] }
 0x3ee   : > { %8038 = vmatpush1.bf16.msra.mxu0 %v13377_v55  ;;  %8210 = vmatpush1.bf16.msra.mxu1 %v13379_v9  ;;  %v2609_v55 = vld [vmem:[%s15519_s8 + $0x19c0] sm:$0xff]  ;;  %v2602_v9 = vld [vmem:[%s15519_s8 + $0x1988] sm:$0xff] }
 0x3ef   : > { %8039 = vmatprep.subr.bf16.mxu0 %v13394_v3  ;;  %8211 = vmatprep.subr.bf16.mxu1 %v13396_v6  ;;  %v2610_v3 = vld [vmem:[%s15519_s8 + $0x19c8] sm:$0xff]  ;;  %v13489_v6 = vcombine.low %v2585_v24, %v2593_v19  ;;  %v13506_v39 = vcombine.high %v2601_v4, %v2609_v55 }
 0x3f0   : > { %v13508_v45 = vcombine.high %v2602_v9, %v2610_v3  ;;  %v13507_v62 = vcombine.low %v2602_v9, %v2610_v3  ;;  %v2713_v3 = vld [vmem:[%s15519_s8 + $0x1d00] sm:$0xff] }
 0x3f2   : > { %8040 = vmatpush1.bf16.msra.mxu0 %v13393_v10  ;;  %8212 = vmatpush1.bf16.msra.mxu1 %v13395_v20  ;;  %v2625_v10 = vld [vmem:[%s15519_s8 + $0x1a40] sm:$0xff]  ;;  %v2618_v20 = vld [vmem:[%s15519_s8 + $0x1a08] sm:$0xff] }
 0x3f3   : > { %8041 = vmatprep.subr.bf16.mxu0 %v13410_v49  ;;  %8213 = vmatprep.subr.bf16.mxu1 %v13412_v51  ;;  %v2626_v49 = vld [vmem:[%s15519_s8 + $0x1a48] sm:$0xff]  ;;  %v13505_v51 = vcombine.low %v2601_v4, %v2609_v55  ;;  %v13522_v63 = vcombine.high %v2617_v46, %v2625_v10 }
 0x3f4   : > { %v13524_v59 = vcombine.high %v2618_v20, %v2626_v49  ;;  %v13523_v0 = vcombine.low %v2618_v20, %v2626_v49  ;;  %v2729_v49 = vld [vmem:[%s15519_s8 + $0x1d80] sm:$0xff] }
 0x3f6   : > { %8042 = vmatpush1.bf16.msra.mxu0 %v13409_v5  ;;  %8214 = vmatpush1.bf16.msra.mxu1 %v13411_v22  ;;  %v2641_v5 = vld [vmem:[%s15519_s8 + $0x1ac0] sm:$0xff]  ;;  %v2634_v22 = vld [vmem:[%s15519_s8 + $0x1a88] sm:$0xff] }
 0x3f7   : > { %8043 = vmatprep.subr.bf16.mxu0 %v13426_v11  ;;  %8215 = vmatprep.subr.bf16.mxu1 %v13428_v41  ;;  %v2642_v11 = vld [vmem:[%s15519_s8 + $0x1ac8] sm:$0xff]  ;;  %v13521_v41 = vcombine.low %v2617_v46, %v2625_v10  ;;  %v13538_v8 = vcombine.high %v2633_v60, %v2641_v5 }
 0x3f8   : > { %v13540_v56 = vcombine.high %v2634_v22, %v2642_v11  ;;  %v13539_v42 = vcombine.low %v2634_v22, %v2642_v11  ;;  %v2745_v11 = vld [vmem:[%s15519_s8 + $0x1e00] sm:$0xff] }
 0x3fa   : > { %8044 = vmatpush1.bf16.msra.mxu0 %v13425_v7  ;;  %8216 = vmatpush1.bf16.msra.mxu1 %v13427_v37  ;;  %v2657_v7 = vld [vmem:[%s15519_s8 + $0x1b40] sm:$0xff]  ;;  %v2650_v37 = vld [vmem:[%s15519_s8 + $0x1b08] sm:$0xff] }
 0x3fb   : > { %8045 = vmatprep.subr.bf16.mxu0 %v13442_v21  ;;  %8217 = vmatprep.subr.bf16.mxu1 %v13444_v61  ;;  %v2658_v21 = vld [vmem:[%s15519_s8 + $0x1b48] sm:$0xff]  ;;  %v13537_v61 = vcombine.low %v2633_v60, %v2641_v5  ;;  %v13554_v29 = vcombine.high %v2649_v16, %v2657_v7 }
 0x3fc   : > { %v13556_v30 = vcombine.high %v2650_v37, %v2658_v21  ;;  %v13555_v18 = vcombine.low %v2650_v37, %v2658_v21  ;;  %v2761_v21 = vld [vmem:[%s15519_s8 + $0x1e80] sm:$0xff] }
 0x3fe   : > { %8046 = vmatpush1.bf16.msra.mxu0 %v13441_v35  ;;  %8218 = vmatpush1.bf16.msra.mxu1 %v13443_v28  ;;  %v2673_v35 = vld [vmem:[%s15519_s8 + $0x1bc0] sm:$0xff]  ;;  %v2666_v28 = vld [vmem:[%s15519_s8 + $0x1b88] sm:$0xff] }
 0x3ff   : > { %8058 = vmatprep.subr.bf16.mxu0 %v13458_v15  ;;  %8230 = vmatprep.subr.bf16.mxu1 %v13460_v32  ;;  %v2674_v15 = vld [vmem:[%s15519_s8 + $0x1bc8] sm:$0xff]  ;;  %v13553_v32 = vcombine.low %v2649_v16, %v2657_v7  ;;  %v13570_v27 = vcombine.high %v2665_v53, %v2673_v35 }
 0x400   : > { %v13572_v13 = vcombine.high %v2666_v28, %v2674_v15  ;;  %v13571_v24 = vcombine.low %v2666_v28, %v2674_v15  ;;  %v2777_v15 = vld [vmem:[%s15519_s8 + $0x1f00] sm:$0xff] }
 0x401   : > { %8048 = vmatmul.mubr.bf16.vlgmr.msra.gmra.mrb[24].mxu0 %v15928_v48  ;;  %8220 = vmatmul.mubr.bf16.vlgmr.msra.gmra.mrb[24].mxu1 %v15928_v48 }
 0x402   : > { %8059 = vmatpush1.bf16.msra.mxu0 %v13457_v38  ;;  %8231 = vmatpush1.bf16.msra.mxu1 %v13459_v54  ;;  %v2689_v38 = vld [vmem:[%s15519_s8 + $0x1c40] sm:$0xff]  ;;  %v2682_v54 = vld [vmem:[%s15519_s8 + $0x1c08] sm:$0xff] }
 0x403   : > { %8060 = vmatprep.subr.bf16.mxu0 %v13474_v14  ;;  %8232 = vmatprep.subr.bf16.mxu1 %v13476_v40  ;;  %v2690_v14 = vld [vmem:[%s15519_s8 + $0x1c48] sm:$0xff]  ;;  %v13569_v40 = vcombine.low %v2665_v53, %v2673_v35  ;;  %v13586_v19 = vcombine.high %v2681_v34, %v2689_v38 }
 0x404   : > { %8090 = vmatprep.mubr.bf16.mxu0 %v15968_v33  ;;  %8262 = vmatprep.mubr.bf16.mxu1 %v15968_v33  ;;  %v13588_v47 = vcombine.high %v2682_v54, %v2690_v14  ;;  %v13587_v4 = vcombine.low %v2682_v54, %v2690_v14  ;;  %v2793_v14 = vld [vmem:[%s15519_s8 + $0x1f80] sm:$0xff] }
 0x406   : > { %8061 = vmatpush1.bf16.msra.mxu0 %v13473_v36  ;;  %8233 = vmatpush1.bf16.msra.mxu1 %v13475_v1  ;;  %v2705_v36 = vld [vmem:[%s15519_s8 + $0x1cc0] sm:$0xff]  ;;  %v2698_v1 = vld [vmem:[%s15519_s8 + $0x1c88] sm:$0xff] }
 0x407   : > { %8062 = vmatprep.subr.bf16.mxu0 %v13490_v2  ;;  %8234 = vmatprep.subr.bf16.mxu1 %v13492_v44  ;;  %v2706_v2 = vld [vmem:[%s15519_s8 + $0x1cc8] sm:$0xff]  ;;  %v13585_v44 = vcombine.low %v2681_v34, %v2689_v38  ;;  %v13602_v55 = vcombine.high %v2697_v26, %v2705_v36 }
 0x408   : > { %v13604_v9 = vcombine.high %v2698_v1, %v2706_v2  ;;  %v13603_v46 = vcombine.low %v2698_v1, %v2706_v2  ;;  %v1787_v2 = vld [vmem:[%s15519_s8 + $0x10] sm:$0xff] }
 0x40a   : > { %8063 = vmatpush1.bf16.msra.mxu0 %v13489_v6  ;;  %8235 = vmatpush1.bf16.msra.mxu1 %v13491_v58  ;;  %v2721_v6 = vld [vmem:[%s15519_s8 + $0x1d40] sm:$0xff]  ;;  %v2714_v58 = vld [vmem:[%s15519_s8 + $0x1d08] sm:$0xff] }
 0x40b   : > { %8064 = vmatprep.subr.bf16.mxu0 %v13506_v39  ;;  %8236 = vmatprep.subr.bf16.mxu1 %v13508_v45  ;;  %v2722_v39 = vld [vmem:[%s15519_s8 + $0x1d48] sm:$0xff]  ;;  %v13601_v45 = vcombine.low %v2697_v26, %v2705_v36  ;;  %v13618_v10 = vcombine.high %v2713_v3, %v2721_v6 }
 0x40c   : > { %v13620_v20 = vcombine.high %v2714_v58, %v2722_v39  ;;  %v13619_v60 = vcombine.low %v2714_v58, %v2722_v39  ;;  %v1803_v39 = vld [vmem:[%s15519_s8 + $0x90] sm:$0xff] }
 0x40e   : > { %8065 = vmatpush1.bf16.msra.mxu0 %v13505_v51  ;;  %8237 = vmatpush1.bf16.msra.mxu1 %v13507_v62  ;;  %v2737_v51 = vld [vmem:[%s15519_s8 + $0x1dc0] sm:$0xff]  ;;  %v2730_v62 = vld [vmem:[%s15519_s8 + $0x1d88] sm:$0xff] }
 0x40f   : > { %8066 = vmatprep.subr.bf16.mxu0 %v13522_v63  ;;  %8238 = vmatprep.subr.bf16.mxu1 %v13524_v59  ;;  %v2738_v63 = vld [vmem:[%s15519_s8 + $0x1dc8] sm:$0xff]  ;;  %v13617_v59 = vcombine.low %v2713_v3, %v2721_v6  ;;  %v13634_v5 = vcombine.high %v2729_v49, %v2737_v51 }
 0x410   : > { %v13636_v22 = vcombine.high %v2730_v62, %v2738_v63  ;;  %v13635_v16 = vcombine.low %v2730_v62, %v2738_v63  ;;  %v1819_v63 = vld [vmem:[%s15519_s8 + $0x110] sm:$0xff] }
 0x412   : > { %8067 = vmatpush1.bf16.msra.mxu0 %v13521_v41  ;;  %8239 = vmatpush1.bf16.msra.mxu1 %v13523_v0  ;;  %v2753_v41 = vld [vmem:[%s15519_s8 + $0x1e40] sm:$0xff]  ;;  %v2746_v0 = vld [vmem:[%s15519_s8 + $0x1e08] sm:$0xff] }
 0x413   : > { %8068 = vmatprep.subr.bf16.mxu0 %v13538_v8  ;;  %8240 = vmatprep.subr.bf16.mxu1 %v13540_v56  ;;  %v2754_v8 = vld [vmem:[%s15519_s8 + $0x1e48] sm:$0xff]  ;;  %v13633_v56 = vcombine.low %v2729_v49, %v2737_v51  ;;  %v13650_v7 = vcombine.high %v2745_v11, %v2753_v41 }
 0x414   : > { %v13652_v37 = vcombine.high %v2746_v0, %v2754_v8  ;;  %v13651_v53 = vcombine.low %v2746_v0, %v2754_v8  ;;  %v1835_v8 = vld [vmem:[%s15519_s8 + $0x190] sm:$0xff] }
 0x416   : > { %8069 = vmatpush1.bf16.msra.mxu0 %v13537_v61  ;;  %8241 = vmatpush1.bf16.msra.mxu1 %v13539_v42  ;;  %v2769_v61 = vld [vmem:[%s15519_s8 + $0x1ec0] sm:$0xff]  ;;  %v2762_v42 = vld [vmem:[%s15519_s8 + $0x1e88] sm:$0xff] }
 0x417   : > { %8070 = vmatprep.subr.bf16.mxu0 %v13554_v29  ;;  %8242 = vmatprep.subr.bf16.mxu1 %v13556_v30  ;;  %v2770_v29 = vld [vmem:[%s15519_s8 + $0x1ec8] sm:$0xff]  ;;  %v13649_v30 = vcombine.low %v2745_v11, %v2753_v41  ;;  %v13666_v35 = vcombine.high %v2761_v21, %v2769_v61 }
 0x418   : > { %v13668_v28 = vcombine.high %v2762_v42, %v2770_v29  ;;  %v13667_v34 = vcombine.low %v2762_v42, %v2770_v29  ;;  %v1851_v29 = vld [vmem:[%s15519_s8 + $0x210] sm:$0xff] }
 0x41a   : > { %8071 = vmatpush1.bf16.msra.mxu0 %v13553_v32  ;;  %8243 = vmatpush1.bf16.msra.mxu1 %v13555_v18  ;;  %v2785_v32 = vld [vmem:[%s15519_s8 + $0x1f40] sm:$0xff]  ;;  %v2778_v18 = vld [vmem:[%s15519_s8 + $0x1f08] sm:$0xff] }
 0x41b   : > { %8072 = vmatprep.subr.bf16.mxu0 %v13570_v27  ;;  %8244 = vmatprep.subr.bf16.mxu1 %v13572_v13  ;;  %v2786_v27 = vld [vmem:[%s15519_s8 + $0x1f48] sm:$0xff]  ;;  %v13665_v13 = vcombine.low %v2761_v21, %v2769_v61  ;;  %v13682_v38 = vcombine.high %v2777_v15, %v2785_v32 }
 0x41c   : > { %v13684_v54 = vcombine.high %v2778_v18, %v2786_v27  ;;  %v13683_v26 = vcombine.low %v2778_v18, %v2786_v27  ;;  %v1867_v27 = vld [vmem:[%s15519_s8 + $0x290] sm:$0xff] }
 0x41e   : > { %8073 = vmatpush1.bf16.msra.mxu0 %v13569_v40  ;;  %8245 = vmatpush1.bf16.msra.mxu1 %v13571_v24  ;;  %v2801_v40 = vld [vmem:[%s15519_s8 + $0x1fc0] sm:$0xff]  ;;  %v2794_v24 = vld [vmem:[%s15519_s8 + $0x1f88] sm:$0xff] }
 0x41f   : > { %8074 = vmatprep.subr.bf16.mxu0 %v13586_v19  ;;  %8246 = vmatprep.subr.bf16.mxu1 %v13588_v47  ;;  %v2802_v19 = vld [vmem:[%s15519_s8 + $0x1fc8] sm:$0xff]  ;;  %v13681_v47 = vcombine.low %v2777_v15, %v2785_v32  ;;  %v13698_v36 = vcombine.high %v2793_v14, %v2801_v40 }
 0x420   : > { %v13700_v1 = vcombine.high %v2794_v24, %v2802_v19  ;;  %v13699_v3 = vcombine.low %v2794_v24, %v2802_v19  ;;  %v1883_v19 = vld [vmem:[%s15519_s8 + $0x310] sm:$0xff] }
 0x422   : > { %8075 = vmatpush1.bf16.msra.mxu0 %v13585_v44  ;;  %8247 = vmatpush1.bf16.msra.mxu1 %v13587_v4  ;;  %v1795_v44 = vld [vmem:[%s15519_s8 + $0x50] sm:$0xff]  ;;  %v1788_v4 = vld [vmem:[%s15519_s8 + $0x18] sm:$0xff] }
 0x423   : > { %8076 = vmatprep.subr.bf16.mxu0 %v13602_v55  ;;  %8248 = vmatprep.subr.bf16.mxu1 %v13604_v9  ;;  %v1796_v55 = vld [vmem:[%s15519_s8 + $0x58] sm:$0xff]  ;;  %v13697_v9 = vcombine.low %v2793_v14, %v2801_v40  ;;  %v12694_v6 = vcombine.high %v1787_v2, %v1795_v44 }
 0x424   : > { %v12696_v58 = vcombine.high %v1788_v4, %v1796_v55  ;;  %v12695_v49 = vcombine.low %v1788_v4, %v1796_v55  ;;  %v1899_v55 = vld [vmem:[%s15519_s8 + $0x390] sm:$0xff] }
 0x426   : > { %8077 = vmatpush1.bf16.msra.mxu0 %v13601_v45  ;;  %8249 = vmatpush1.bf16.msra.mxu1 %v13603_v46  ;;  %v1811_v45 = vld [vmem:[%s15519_s8 + $0xd0] sm:$0xff]  ;;  %v1804_v46 = vld [vmem:[%s15519_s8 + $0x98] sm:$0xff] }
 0x427   : > { %8078 = vmatprep.subr.bf16.mxu0 %v13618_v10  ;;  %8250 = vmatprep.subr.bf16.mxu1 %v13620_v20  ;;  %v1812_v10 = vld [vmem:[%s15519_s8 + $0xd8] sm:$0xff]  ;;  %v12693_v20 = vcombine.low %v1787_v2, %v1795_v44  ;;  %v12710_v51 = vcombine.high %v1803_v39, %v1811_v45 }
 0x428   : > { %v12712_v62 = vcombine.high %v1804_v46, %v1812_v10  ;;  %v12711_v11 = vcombine.low %v1804_v46, %v1812_v10  ;;  %v1915_v10 = vld [vmem:[%s15519_s8 + $0x410] sm:$0xff] }
 0x42a   : > { %8079 = vmatpush1.bf16.msra.mxu0 %v13617_v59  ;;  %8251 = vmatpush1.bf16.msra.mxu1 %v13619_v60  ;;  %v1827_v59 = vld [vmem:[%s15519_s8 + $0x150] sm:$0xff]  ;;  %v1820_v60 = vld [vmem:[%s15519_s8 + $0x118] sm:$0xff] }
 0x42b   : > { %8080 = vmatprep.subr.bf16.mxu0 %v13634_v5  ;;  %8252 = vmatprep.subr.bf16.mxu1 %v13636_v22  ;;  %v1828_v5 = vld [vmem:[%s15519_s8 + $0x158] sm:$0xff]  ;;  %v12709_v22 = vcombine.low %v1803_v39, %v1811_v45  ;;  %v12726_v41 = vcombine.high %v1819_v63, %v1827_v59 }
 0x42c   : > { %v12728_v0 = vcombine.high %v1820_v60, %v1828_v5  ;;  %v12727_v21 = vcombine.low %v1820_v60, %v1828_v5  ;;  %v1931_v5 = vld [vmem:[%s15519_s8 + $0x490] sm:$0xff] }
 0x42e   : > { %8081 = vmatpush1.bf16.msra.mxu0 %v13633_v56  ;;  %8253 = vmatpush1.bf16.msra.mxu1 %v13635_v16  ;;  %v1843_v56 = vld [vmem:[%s15519_s8 + $0x1d0] sm:$0xff]  ;;  %v1836_v16 = vld [vmem:[%s15519_s8 + $0x198] sm:$0xff] }
 0x42f   : > { %8082 = vmatprep.subr.bf16.mxu0 %v13650_v7  ;;  %8254 = vmatprep.subr.bf16.mxu1 %v13652_v37  ;;  %v1844_v7 = vld [vmem:[%s15519_s8 + $0x1d8] sm:$0xff]  ;;  %v12725_v37 = vcombine.low %v1819_v63, %v1827_v59  ;;  %v12742_v61 = vcombine.high %v1835_v8, %v1843_v56 }
 0x430   : > { %v12744_v42 = vcombine.high %v1836_v16, %v1844_v7  ;;  %v12743_v15 = vcombine.low %v1836_v16, %v1844_v7  ;;  %v1947_v7 = vld [vmem:[%s15519_s8 + $0x510] sm:$0xff] }
 0x432   : > { %8083 = vmatpush1.bf16.msra.mxu0 %v13649_v30  ;;  %8255 = vmatpush1.bf16.msra.mxu1 %v13651_v53  ;;  %v1859_v30 = vld [vmem:[%s15519_s8 + $0x250] sm:$0xff]  ;;  %v1852_v53 = vld [vmem:[%s15519_s8 + $0x218] sm:$0xff] }
 0x433   : > { %8084 = vmatprep.subr.bf16.mxu0 %v13666_v35  ;;  %8256 = vmatprep.subr.bf16.mxu1 %v13668_v28  ;;  %v1860_v35 = vld [vmem:[%s15519_s8 + $0x258] sm:$0xff]  ;;  %v12741_v28 = vcombine.low %v1835_v8, %v1843_v56  ;;  %v12758_v32 = vcombine.high %v1851_v29, %v1859_v30 }
 0x434   : > { %v12760_v18 = vcombine.high %v1852_v53, %v1860_v35  ;;  %v12759_v14 = vcombine.low %v1852_v53, %v1860_v35  ;;  %v1963_v35 = vld [vmem:[%s15519_s8 + $0x590] sm:$0xff] }
 0x436   : > { %8085 = vmatpush1.bf16.msra.mxu0 %v13665_v13  ;;  %8257 = vmatpush1.bf16.msra.mxu1 %v13667_v34  ;;  %v1875_v13 = vld [vmem:[%s15519_s8 + $0x2d0] sm:$0xff]  ;;  %v1868_v34 = vld [vmem:[%s15519_s8 + $0x298] sm:$0xff] }
 0x437   : > { %8086 = vmatprep.subr.bf16.mxu0 %v13682_v38  ;;  %8258 = vmatprep.subr.bf16.mxu1 %v13684_v54  ;;  %v1876_v38 = vld [vmem:[%s15519_s8 + $0x2d8] sm:$0xff]  ;;  %v12757_v54 = vcombine.low %v1851_v29, %v1859_v30  ;;  %v12774_v40 = vcombine.high %v1867_v27, %v1875_v13 }
 0x438   : > { %v12776_v24 = vcombine.high %v1868_v34, %v1876_v38  ;;  %v12775_v2 = vcombine.low %v1868_v34, %v1876_v38  ;;  %v1979_v38 = vld [vmem:[%s15519_s8 + $0x610] sm:$0xff] }
 0x43a   : > { %8087 = vmatpush1.bf16.msra.mxu0 %v13681_v47  ;;  %8259 = vmatpush1.bf16.msra.mxu1 %v13683_v26  ;;  %v1891_v47 = vld [vmem:[%s15519_s8 + $0x350] sm:$0xff]  ;;  %v1884_v26 = vld [vmem:[%s15519_s8 + $0x318] sm:$0xff] }
 0x43b   : > { %8088 = vmatprep.subr.bf16.mxu0 %v13698_v36  ;;  %8260 = vmatprep.subr.bf16.mxu1 %v13700_v1  ;;  %v1892_v36 = vld [vmem:[%s15519_s8 + $0x358] sm:$0xff]  ;;  %v12773_v1 = vcombine.low %v1867_v27, %v1875_v13  ;;  %v12790_v44 = vcombine.high %v1883_v19, %v1891_v47 }
 0x43c   : > { %v12792_v4 = vcombine.high %v1884_v26, %v1892_v36  ;;  %v12791_v39 = vcombine.low %v1884_v26, %v1892_v36  ;;  %v1995_v36 = vld [vmem:[%s15519_s8 + $0x690] sm:$0xff] }
 0x43e   : > { %8089 = vmatpush1.bf16.msra.mxu0 %v13697_v9  ;;  %8261 = vmatpush1.bf16.msra.mxu1 %v13699_v3  ;;  %v1907_v9 = vld [vmem:[%s15519_s8 + $0x3d0] sm:$0xff]  ;;  %v1900_v3 = vld [vmem:[%s15519_s8 + $0x398] sm:$0xff] }
 0x43f   : > { %8273 = vmatprep.subr.bf16.mxu0 %v12694_v6  ;;  %8445 = vmatprep.subr.bf16.mxu1 %v12696_v58  ;;  %v1908_v6 = vld [vmem:[%s15519_s8 + $0x3d8] sm:$0xff]  ;;  %v12789_v58 = vcombine.low %v1883_v19, %v1891_v47  ;;  %v12806_v45 = vcombine.high %v1899_v55, %v1907_v9 }
 0x440   : > { %v12808_v46 = vcombine.high %v1900_v3, %v1908_v6  ;;  %v12807_v63 = vcombine.low %v1900_v3, %v1908_v6  ;;  %v2011_v6 = vld [vmem:[%s15519_s8 + $0x710] sm:$0xff] }
 0x441   : > { %8091 = vmatmul.mubr.bf16.vlgmr.msra.gmra.mrb[24].mxu0 %v15949_v31  ;;  %8263 = vmatmul.mubr.bf16.vlgmr.msra.gmra.mrb[24].mxu1 %v15949_v31 }
 0x442   : > { %8274 = vmatpush1.bf16.msra.mxu0 %v12693_v20  ;;  %8305 = vmatprep.mubr.bf16.mxu0 %v15863_v43  ;;  %v1923_v20 = vld [vmem:[%s15519_s8 + $0x450] sm:$0xff] }
 0x443   : > { %8446 = vmatpush1.bf16.msra.mxu1 %v12695_v49  ;;  %8477 = vmatprep.mubr.bf16.mxu1 %v15863_v43  ;;  %v1916_v49 = vld [vmem:[%s15519_s8 + $0x418] sm:$0xff]  ;;  %v12822_v59 = vcombine.high %v1915_v10, %v1923_v20 }
 0x444   : > { %8275 = vmatprep.subr.bf16.mxu0 %v12710_v51  ;;  %8447 = vmatprep.subr.bf16.mxu1 %v12712_v62  ;;  %v1924_v51 = vld [vmem:[%s15519_s8 + $0x458] sm:$0xff]  ;;  %v12805_v62 = vcombine.low %v1899_v55, %v1907_v9 }
 0x445   : > { %v12824_v60 = vcombine.high %v1916_v49, %v1924_v51  ;;  %v12823_v8 = vcombine.low %v1916_v49, %v1924_v51  ;;  %v2027_v51 = vld [vmem:[%s15519_s8 + $0x790] sm:$0xff] }
 0x446   : > { %8276 = vmatpush1.bf16.msra.mxu0 %v12709_v22  ;;  %v1939_v22 = vld [vmem:[%s15519_s8 + $0x4d0] sm:$0xff] }
 0x447   : > { %8448 = vmatpush1.bf16.msra.mxu1 %v12711_v11  ;;  %8277 = vmatprep.subr.bf16.mxu0 %v12726_v41  ;;  %v1932_v11 = vld [vmem:[%s15519_s8 + $0x498] sm:$0xff]  ;;  %v12838_v56 = vcombine.high %v1931_v5, %v1939_v22 }
 0x448   : > { %8449 = vmatprep.subr.bf16.mxu1 %v12728_v0  ;;  %v1940_v41 = vld [vmem:[%s15519_s8 + $0x4d8] sm:$0xff]  ;;  %v12821_v0 = vcombine.low %v1915_v10, %v1923_v20 }
 0x449   : > { %v12840_v16 = vcombine.high %v1932_v11, %v1940_v41  ;;  %v12839_v29 = vcombine.low %v1932_v11, %v1940_v41  ;;  %v2043_v41 = vld [vmem:[%s15519_s8 + $0x810] sm:$0xff] }
 0x44a   : > { %8278 = vmatpush1.bf16.msra.mxu0 %v12725_v37  ;;  %v1955_v37 = vld [vmem:[%s15519_s8 + $0x550] sm:$0xff] }
 0x44b   : > { %8450 = vmatpush1.bf16.msra.mxu1 %v12727_v21  ;;  %8279 = vmatprep.subr.bf16.mxu0 %v12742_v61  ;;  %v1948_v21 = vld [vmem:[%s15519_s8 + $0x518] sm:$0xff]  ;;  %v12854_v30 = vcombine.high %v1947_v7, %v1955_v37 }
 0x44c   : > { %8451 = vmatprep.subr.bf16.mxu1 %v12744_v42  ;;  %v1956_v61 = vld [vmem:[%s15519_s8 + $0x558] sm:$0xff]  ;;  %v12837_v42 = vcombine.low %v1931_v5, %v1939_v22 }
 0x44d   : > { %v12856_v53 = vcombine.high %v1948_v21, %v1956_v61  ;;  %v12855_v27 = vcombine.low %v1948_v21, %v1956_v61  ;;  %v2059_v61 = vld [vmem:[%s15519_s8 + $0x890] sm:$0xff] }
 0x44e   : > { %8280 = vmatpush1.bf16.msra.mxu0 %v12741_v28  ;;  %v1971_v28 = vld [vmem:[%s15519_s8 + $0x5d0] sm:$0xff] }
 0x44f   : > { %8452 = vmatpush1.bf16.msra.mxu1 %v12743_v15  ;;  %8281 = vmatprep.subr.bf16.mxu0 %v12758_v32  ;;  %v1964_v15 = vld [vmem:[%s15519_s8 + $0x598] sm:$0xff]  ;;  %v12870_v13 = vcombine.high %v1963_v35, %v1971_v28 }
 0x450   : > { %8453 = vmatprep.subr.bf16.mxu1 %v12760_v18  ;;  %v1972_v32 = vld [vmem:[%s15519_s8 + $0x5d8] sm:$0xff]  ;;  %v12853_v18 = vcombine.low %v1947_v7, %v1955_v37 }
 0x451   : > { %v12872_v34 = vcombine.high %v1964_v15, %v1972_v32  ;;  %v12871_v19 = vcombine.low %v1964_v15, %v1972_v32  ;;  %v2075_v15 = vld [vmem:[%s15519_s8 + $0x910] sm:$0xff] }
 0x452   : > { %8282 = vmatpush1.bf16.msra.mxu0 %v12757_v54  ;;  %v1987_v54 = vld [vmem:[%s15519_s8 + $0x650] sm:$0xff] }
 0x453   : > { %8454 = vmatpush1.bf16.msra.mxu1 %v12759_v14  ;;  %8283 = vmatprep.subr.bf16.mxu0 %v12774_v40  ;;  %v1980_v14 = vld [vmem:[%s15519_s8 + $0x618] sm:$0xff]  ;;  %v12886_v47 = vcombine.high %v1979_v38, %v1987_v54  ;;  %v2083_v32 = vld [vmem:[%s15519_s8 + $0x950] sm:$0xff] }
 0x454   : > { %8455 = vmatprep.subr.bf16.mxu1 %v12776_v24  ;;  %v1988_v40 = vld [vmem:[%s15519_s8 + $0x658] sm:$0xff]  ;;  %v12869_v24 = vcombine.low %v1963_v35, %v1971_v28 }
 0x455   : > { %v12888_v26 = vcombine.high %v1980_v14, %v1988_v40  ;;  %v12887_v55 = vcombine.low %v1980_v14, %v1988_v40  ;;  %v2091_v40 = vld [vmem:[%s15519_s8 + $0x990] sm:$0xff] }
 0x456   : > { %8284 = vmatpush1.bf16.msra.mxu0 %v12773_v1  ;;  %v2003_v1 = vld [vmem:[%s15519_s8 + $0x6d0] sm:$0xff] }
 0x457   : > { %8456 = vmatpush1.bf16.msra.mxu1 %v12775_v2  ;;  %8285 = vmatprep.subr.bf16.mxu0 %v12790_v44  ;;  %v1996_v2 = vld [vmem:[%s15519_s8 + $0x698] sm:$0xff]  ;;  %v12902_v9 = vcombine.high %v1995_v36, %v2003_v1 }
 0x458   : > { %8457 = vmatprep.subr.bf16.mxu1 %v12792_v4  ;;  %v2004_v44 = vld [vmem:[%s15519_s8 + $0x6d8] sm:$0xff]  ;;  %v12885_v4 = vcombine.low %v1979_v38, %v1987_v54  ;;  %v12982_v54 = vcombine.high %v2075_v15, %v2083_v32 }
 0x459   : > { %v12904_v3 = vcombine.high %v1996_v2, %v2004_v44  ;;  %v12903_v10 = vcombine.low %v1996_v2, %v2004_v44  ;;  %v2107_v44 = vld [vmem:[%s15519_s8 + $0xa10] sm:$0xff] }
 0x45a   : > { %8286 = vmatpush1.bf16.msra.mxu0 %v12789_v58  ;;  %v2019_v58 = vld [vmem:[%s15519_s8 + $0x750] sm:$0xff] }
 0x45b   : > { %8458 = vmatpush1.bf16.msra.mxu1 %v12791_v39  ;;  %8287 = vmatprep.subr.bf16.mxu0 %v12806_v45  ;;  %v2012_v39 = vld [vmem:[%s15519_s8 + $0x718] sm:$0xff]  ;;  %v12918_v20 = vcombine.high %v2011_v6, %v2019_v58 }
 0x45c   : > { %8459 = vmatprep.subr.bf16.mxu1 %v12808_v46  ;;  %v2020_v45 = vld [vmem:[%s15519_s8 + $0x758] sm:$0xff]  ;;  %v12901_v46 = vcombine.low %v1995_v36, %v2003_v1 }
 0x45d   : > { %v12920_v49 = vcombine.high %v2012_v39, %v2020_v45  ;;  %v12919_v5 = vcombine.low %v2012_v39, %v2020_v45  ;;  %v2123_v45 = vld [vmem:[%s15519_s8 + $0xa90] sm:$0xff] }
 0x45e   : > { %8288 = vmatpush1.bf16.msra.mxu0 %v12805_v62  ;;  %v2035_v62 = vld [vmem:[%s15519_s8 + $0x7d0] sm:$0xff] }
 0x45f   : > { %8460 = vmatpush1.bf16.msra.mxu1 %v12807_v63  ;;  %8289 = vmatprep.subr.bf16.mxu0 %v12822_v59  ;;  %v2028_v63 = vld [vmem:[%s15519_s8 + $0x798] sm:$0xff]  ;;  %v12934_v22 = vcombine.high %v2027_v51, %v2035_v62 }
 0x460   : > { %8461 = vmatprep.subr.bf16.mxu1 %v12824_v60  ;;  %v2036_v59 = vld [vmem:[%s15519_s8 + $0x7d8] sm:$0xff]  ;;  %v12917_v60 = vcombine.low %v2011_v6, %v2019_v58 }
 0x461   : > { %v12936_v11 = vcombine.high %v2028_v63, %v2036_v59  ;;  %v12935_v7 = vcombine.low %v2028_v63, %v2036_v59  ;;  %v2139_v59 = vld [vmem:[%s15519_s8 + $0xb10] sm:$0xff] }
 0x462   : > { %8290 = vmatpush1.bf16.msra.mxu0 %v12821_v0  ;;  %v2051_v0 = vld [vmem:[%s15519_s8 + $0x850] sm:$0xff] }
 0x463   : > { %8462 = vmatpush1.bf16.msra.mxu1 %v12823_v8  ;;  %8291 = vmatprep.subr.bf16.mxu0 %v12838_v56  ;;  %v2044_v8 = vld [vmem:[%s15519_s8 + $0x818] sm:$0xff]  ;;  %v12950_v37 = vcombine.high %v2043_v41, %v2051_v0 }
 0x464   : > { %8463 = vmatprep.subr.bf16.mxu1 %v12840_v16  ;;  %v2052_v56 = vld [vmem:[%s15519_s8 + $0x858] sm:$0xff]  ;;  %v12933_v16 = vcombine.low %v2027_v51, %v2035_v62 }
 0x465   : > { %v12952_v21 = vcombine.high %v2044_v8, %v2052_v56  ;;  %v12951_v35 = vcombine.low %v2044_v8, %v2052_v56  ;;  %v2155_v56 = vld [vmem:[%s15519_s8 + $0xb90] sm:$0xff] }
 0x466   : > { %8292 = vmatpush1.bf16.msra.mxu0 %v12837_v42  ;;  %v2067_v42 = vld [vmem:[%s15519_s8 + $0x8d0] sm:$0xff] }
 0x467   : > { %8464 = vmatpush1.bf16.msra.mxu1 %v12839_v29  ;;  %8293 = vmatprep.subr.bf16.mxu0 %v12854_v30  ;;  %v12949_v29 = vcombine.low %v2043_v41, %v2051_v0  ;;  %v2060_v30 = vld [vmem:[%s15519_s8 + $0x898] sm:$0xff]  ;;  %v12966_v28 = vcombine.high %v2059_v61, %v2067_v42 }
 0x468   : > { %8465 = vmatprep.subr.bf16.mxu1 %v12856_v53  ;;  %v2068_v53 = vld [vmem:[%s15519_s8 + $0x8d8] sm:$0xff] }
 0x469   : > { %v12967_v38 = vcombine.low %v2060_v30, %v2068_v53 }
 0x46a   : > { %8294 = vmatpush1.bf16.msra.mxu0 %v12853_v18  ;;  %v12968_v18 = vcombine.high %v2060_v30, %v2068_v53  ;;  %v2171_v30 = vld [vmem:[%s15519_s8 + $0xc10] sm:$0xff] }
 0x46b   : > { %8466 = vmatpush1.bf16.msra.mxu1 %v12855_v27  ;;  %8295 = vmatprep.subr.bf16.mxu0 %v12870_v13  ;;  %v2076_v27 = vld [vmem:[%s15519_s8 + $0x918] sm:$0xff]  ;;  %v2179_v53 = vld [vmem:[%s15519_s8 + $0xc50] sm:$0xff] }
 0x46c   : > { %8467 = vmatprep.subr.bf16.mxu1 %v12872_v34  ;;  %v2084_v13 = vld [vmem:[%s15519_s8 + $0x958] sm:$0xff]  ;;  %v12965_v34 = vcombine.low %v2059_v61, %v2067_v42 }
 0x46d   : > { %v12984_v14 = vcombine.high %v2076_v27, %v2084_v13  ;;  %v12983_v36 = vcombine.low %v2076_v27, %v2084_v13  ;;  %v2187_v13 = vld [vmem:[%s15519_s8 + $0xc90] sm:$0xff] }
 0x46e   : > { %8296 = vmatpush1.bf16.msra.mxu0 %v12869_v24  ;;  %v2099_v24 = vld [vmem:[%s15519_s8 + $0x9d0] sm:$0xff] }
 0x46f   : > { %8468 = vmatpush1.bf16.msra.mxu1 %v12871_v19  ;;  %8297 = vmatprep.subr.bf16.mxu0 %v12886_v47  ;;  %v2092_v19 = vld [vmem:[%s15519_s8 + $0x998] sm:$0xff]  ;;  %v12998_v1 = vcombine.high %v2091_v40, %v2099_v24 }
 0x470   : > { %8469 = vmatprep.subr.bf16.mxu1 %v12888_v26  ;;  %v2100_v47 = vld [vmem:[%s15519_s8 + $0x9d8] sm:$0xff]  ;;  %v12981_v26 = vcombine.low %v2075_v15, %v2083_v32 }
 0x471   : > { %v13000_v2 = vcombine.high %v2092_v19, %v2100_v47  ;;  %v12999_v6 = vcombine.low %v2092_v19, %v2100_v47  ;;  %v2203_v47 = vld [vmem:[%s15519_s8 + $0xd10] sm:$0xff] }
 0x472   : > { %8298 = vmatpush1.bf16.msra.mxu0 %v12885_v4  ;;  %v2115_v4 = vld [vmem:[%s15519_s8 + $0xa50] sm:$0xff] }
 0x473   : > { %8470 = vmatpush1.bf16.msra.mxu1 %v12887_v55  ;;  %8299 = vmatprep.subr.bf16.mxu0 %v12902_v9  ;;  %v2108_v55 = vld [vmem:[%s15519_s8 + $0xa18] sm:$0xff]  ;;  %v13014_v58 = vcombine.high %v2107_v44, %v2115_v4 }
 0x474   : > { %8471 = vmatprep.subr.bf16.mxu1 %v12904_v3  ;;  %v2116_v9 = vld [vmem:[%s15519_s8 + $0xa58] sm:$0xff]  ;;  %v12997_v3 = vcombine.low %v2091_v40, %v2099_v24 }
 0x475   : > { %v13016_v39 = vcombine.high %v2108_v55, %v2116_v9  ;;  %v13015_v51 = vcombine.low %v2108_v55, %v2116_v9  ;;  %v2219_v9 = vld [vmem:[%s15519_s8 + $0xd90] sm:$0xff] }
 0x476   : > { %8300 = vmatpush1.bf16.msra.mxu0 %v12901_v46  ;;  %v2131_v46 = vld [vmem:[%s15519_s8 + $0xad0] sm:$0xff] }
 0x477   : > { %8472 = vmatpush1.bf16.msra.mxu1 %v12903_v10  ;;  %8301 = vmatprep.subr.bf16.mxu0 %v12918_v20  ;;  %v2124_v10 = vld [vmem:[%s15519_s8 + $0xa98] sm:$0xff]  ;;  %v13030_v62 = vcombine.high %v2123_v45, %v2131_v46 }
 0x478   : > { %8473 = vmatprep.subr.bf16.mxu1 %v12920_v49  ;;  %v2132_v20 = vld [vmem:[%s15519_s8 + $0xad8] sm:$0xff]  ;;  %v13013_v49 = vcombine.low %v2107_v44, %v2115_v4 }
 0x479   : > { %v13032_v63 = vcombine.high %v2124_v10, %v2132_v20  ;;  %v13031_v41 = vcombine.low %v2124_v10, %v2132_v20  ;;  %v2235_v20 = vld [vmem:[%s15519_s8 + $0xe10] sm:$0xff] }
 0x47a   : > { %8302 = vmatpush1.bf16.msra.mxu0 %v12917_v60  ;;  %v2147_v60 = vld [vmem:[%s15519_s8 + $0xb50] sm:$0xff] }
 0x47b   : > { %8474 = vmatpush1.bf16.msra.mxu1 %v12919_v5  ;;  %8303 = vmatprep.subr.bf16.mxu0 %v12934_v22  ;;  %v2140_v5 = vld [vmem:[%s15519_s8 + $0xb18] sm:$0xff]  ;;  %v13046_v0 = vcombine.high %v2139_v59, %v2147_v60 }
 0x47c   : > { %8475 = vmatprep.subr.bf16.mxu1 %v12936_v11  ;;  %v2148_v22 = vld [vmem:[%s15519_s8 + $0xb58] sm:$0xff]  ;;  %v13029_v11 = vcombine.low %v2123_v45, %v2131_v46 }
 0x47d   : > { %v13048_v8 = vcombine.high %v2140_v5, %v2148_v22  ;;  %v13047_v61 = vcombine.low %v2140_v5, %v2148_v22  ;;  %v2251_v22 = vld [vmem:[%s15519_s8 + $0xe90] sm:$0xff] }
 0x47e   : > { %8304 = vmatpush1.bf16.msra.mxu0 %v12933_v16  ;;  %v2163_v16 = vld [vmem:[%s15519_s8 + $0xbd0] sm:$0xff] }
 0x47f   : > { %8476 = vmatpush1.bf16.msra.mxu1 %v12935_v7  ;;  %8316 = vmatprep.subr.bf16.mxu0 %v12950_v37  ;;  %v2156_v7 = vld [vmem:[%s15519_s8 + $0xb98] sm:$0xff]  ;;  %v13062_v42 = vcombine.high %v2155_v56, %v2163_v16  ;;  %v13061_v15 = vcombine.low %v2155_v56, %v2163_v16 }
 0x480   : > { %8488 = vmatprep.subr.bf16.mxu1 %v12952_v21  ;;  %v2164_v37 = vld [vmem:[%s15519_s8 + $0xbd8] sm:$0xff]  ;;  %v13045_v21 = vcombine.low %v2139_v59, %v2147_v60 }
 0x481   : > { %8306 = vmatmul.mubr.bf16.vlgmr.msra.gmra.mrb[28].mxu0 %v15861_v25  ;;  %v13063_v32 = vcombine.low %v2156_v7, %v2164_v37 }
 0x482   : > { %8478 = vmatmul.mubr.bf16.vlgmr.msra.gmra.mrb[28].mxu1 %v15861_v25  ;;  %8317 = vmatpush1.bf16.msra.mxu0 %v12949_v29  ;;  %v13064_v29 = vcombine.high %v2156_v7, %v2164_v37  ;;  %v2267_v37 = vld [vmem:[%s15519_s8 + $0xf10] sm:$0xff] }
 0x483   : > { %8348 = vmatprep.mubr.bf16.mxu0 %v15878_v57  ;;  %8489 = vmatpush1.bf16.msra.mxu1 %v12951_v35  ;;  %v2172_v35 = vld [vmem:[%s15519_s8 + $0xc18] sm:$0xff] }
 0x484   : > { %8520 = vmatprep.mubr.bf16.mxu1 %v15878_v57  ;;  %8318 = vmatprep.subr.bf16.mxu0 %v12966_v28  ;;  %v2180_v28 = vld [vmem:[%s15519_s8 + $0xc58] sm:$0xff] }
 0x485   : > { %8490 = vmatprep.subr.bf16.mxu1 %v12968_v18  ;;  %v13078_v18 = vcombine.high %v2171_v30, %v2179_v53  ;;  %v13080_v27 = vcombine.high %v2172_v35, %v2180_v28  ;;  %v13079_v40 = vcombine.low %v2172_v35, %v2180_v28  ;;  %v2283_v28 = vld [vmem:[%s15519_s8 + $0xf90] sm:$0xff] }
 0x486   : > { %8319 = vmatpush1.bf16.msra.mxu0 %v12965_v34  ;;  %v2195_v34 = vld [vmem:[%s15519_s8 + $0xcd0] sm:$0xff] }
 0x487   : > { %8491 = vmatpush1.bf16.msra.mxu1 %v12967_v38  ;;  %8320 = vmatprep.subr.bf16.mxu0 %v12982_v54  ;;  %v2188_v38 = vld [vmem:[%s15519_s8 + $0xc98] sm:$0xff]  ;;  %v13094_v24 = vcombine.high %v2187_v13, %v2195_v34 }
 0x488   : > { %8492 = vmatprep.subr.bf16.mxu1 %v12984_v14  ;;  %v2196_v54 = vld [vmem:[%s15519_s8 + $0xcd8] sm:$0xff]  ;;  %v13077_v14 = vcombine.low %v2171_v30, %v2179_v53 }
 0x489   : > { %v13096_v19 = vcombine.high %v2188_v38, %v2196_v54  ;;  %v13095_v44 = vcombine.low %v2188_v38, %v2196_v54  ;;  %v2299_v54 = vld [vmem:[%s15519_s8 + $0x1010] sm:$0xff] }
 0x48a   : > { %8321 = vmatpush1.bf16.msra.mxu0 %v12981_v26  ;;  %v2211_v26 = vld [vmem:[%s15519_s8 + $0xd50] sm:$0xff] }
 0x48b   : > { %8493 = vmatpush1.bf16.msra.mxu1 %v12983_v36  ;;  %8322 = vmatprep.subr.bf16.mxu0 %v12998_v1  ;;  %v2204_v36 = vld [vmem:[%s15519_s8 + $0xd18] sm:$0xff]  ;;  %v13110_v4 = vcombine.high %v2203_v47, %v2211_v26 }
 0x48c   : > { %8494 = vmatprep.subr.bf16.mxu1 %v13000_v2  ;;  %v2212_v1 = vld [vmem:[%s15519_s8 + $0xd58] sm:$0xff]  ;;  %v13093_v2 = vcombine.low %v2187_v13, %v2195_v34 }
 0x48d   : > { %v13112_v55 = vcombine.high %v2204_v36, %v2212_v1  ;;  %v13111_v45 = vcombine.low %v2204_v36, %v2212_v1  ;;  %v2315_v1 = vld [vmem:[%s15519_s8 + $0x1090] sm:$0xff] }
 0x48e   : > { %8323 = vmatpush1.bf16.msra.mxu0 %v12997_v3  ;;  %v2227_v3 = vld [vmem:[%s15519_s8 + $0xdd0] sm:$0xff] }
 0x48f   : > { %8495 = vmatpush1.bf16.msra.mxu1 %v12999_v6  ;;  %8324 = vmatprep.subr.bf16.mxu0 %v13014_v58  ;;  %v2220_v6 = vld [vmem:[%s15519_s8 + $0xd98] sm:$0xff]  ;;  %v13126_v46 = vcombine.high %v2219_v9, %v2227_v3 }
 0x490   : > { %8496 = vmatprep.subr.bf16.mxu1 %v13016_v39  ;;  %v2228_v58 = vld [vmem:[%s15519_s8 + $0xdd8] sm:$0xff]  ;;  %v13109_v39 = vcombine.low %v2203_v47, %v2211_v26 }
 0x491   : > { %v13128_v10 = vcombine.high %v2220_v6, %v2228_v58  ;;  %v13127_v59 = vcombine.low %v2220_v6, %v2228_v58  ;;  %v2331_v6 = vld [vmem:[%s15519_s8 + $0x1110] sm:$0xff] }
 0x492   : > { %8325 = vmatpush1.bf16.msra.mxu0 %v13013_v49  ;;  %v2243_v49 = vld [vmem:[%s15519_s8 + $0xe50] sm:$0xff] }
 0x493   : > { %8497 = vmatpush1.bf16.msra.mxu1 %v13015_v51  ;;  %8326 = vmatprep.subr.bf16.mxu0 %v13030_v62  ;;  %v2236_v51 = vld [vmem:[%s15519_s8 + $0xe18] sm:$0xff]  ;;  %v13142_v60 = vcombine.high %v2235_v20, %v2243_v49  ;;  %v2339_v58 = vld [vmem:[%s15519_s8 + $0x1150] sm:$0xff] }
 0x494   : > { %8498 = vmatprep.subr.bf16.mxu1 %v13032_v63  ;;  %v2244_v62 = vld [vmem:[%s15519_s8 + $0xe58] sm:$0xff]  ;;  %v13125_v63 = vcombine.low %v2219_v9, %v2227_v3 }
 0x495   : > { %v13144_v5 = vcombine.high %v2236_v51, %v2244_v62  ;;  %v13143_v56 = vcombine.low %v2236_v51, %v2244_v62  ;;  %v2347_v62 = vld [vmem:[%s15519_s8 + $0x1190] sm:$0xff] }
 0x496   : > { %8327 = vmatpush1.bf16.msra.mxu0 %v13029_v11  ;;  %v2259_v11 = vld [vmem:[%s15519_s8 + $0xed0] sm:$0xff] }
 0x497   : > { %8499 = vmatpush1.bf16.msra.mxu1 %v13031_v41  ;;  %8328 = vmatprep.subr.bf16.mxu0 %v13046_v0  ;;  %v2252_v41 = vld [vmem:[%s15519_s8 + $0xe98] sm:$0xff]  ;;  %v13158_v16 = vcombine.high %v2251_v22, %v2259_v11 }
 0x498   : > { %8500 = vmatprep.subr.bf16.mxu1 %v13048_v8  ;;  %v2260_v0 = vld [vmem:[%s15519_s8 + $0xed8] sm:$0xff]  ;;  %v13141_v8 = vcombine.low %v2235_v20, %v2243_v49  ;;  %v13238_v49 = vcombine.high %v2331_v6, %v2339_v58 }
 0x499   : > { %v13160_v7 = vcombine.high %v2252_v41, %v2260_v0  ;;  %v13159_v30 = vcombine.low %v2252_v41, %v2260_v0  ;;  %v2363_v0 = vld [vmem:[%s15519_s8 + $0x1210] sm:$0xff] }
 0x49a   : > { %8329 = vmatpush1.bf16.msra.mxu0 %v13045_v21  ;;  %v2275_v21 = vld [vmem:[%s15519_s8 + $0xf50] sm:$0xff] }
 0x49b   : > { %8501 = vmatpush1.bf16.msra.mxu1 %v13047_v61  ;;  %8330 = vmatprep.subr.bf16.mxu0 %v13062_v42  ;;  %v2268_v61 = vld [vmem:[%s15519_s8 + $0xf18] sm:$0xff]  ;;  %v13174_v53 = vcombine.high %v2267_v37, %v2275_v21 }
 0x49c   : > { %8502 = vmatprep.subr.bf16.mxu1 %v13064_v29  ;;  %v2276_v42 = vld [vmem:[%s15519_s8 + $0xf58] sm:$0xff]  ;;  %v13157_v29 = vcombine.low %v2251_v22, %v2259_v11 }
 0x49d   : > { %v13176_v35 = vcombine.high %v2268_v61, %v2276_v42  ;;  %v13175_v13 = vcombine.low %v2268_v61, %v2276_v42  ;;  %v2379_v42 = vld [vmem:[%s15519_s8 + $0x1290] sm:$0xff] }
 0x49e   : > { %8331 = vmatpush1.bf16.msra.mxu0 %v13061_v15  ;;  %v2291_v15 = vld [vmem:[%s15519_s8 + $0xfd0] sm:$0xff] }
 0x49f   : > { %8503 = vmatpush1.bf16.msra.mxu1 %v13063_v32  ;;  %8332 = vmatprep.subr.bf16.mxu0 %v13078_v18  ;;  %v2284_v32 = vld [vmem:[%s15519_s8 + $0xf98] sm:$0xff]  ;;  %v13190_v34 = vcombine.high %v2283_v28, %v2291_v15 }
 0x4a0   : > { %8504 = vmatprep.subr.bf16.mxu1 %v13080_v27  ;;  %v2292_v18 = vld [vmem:[%s15519_s8 + $0xfd8] sm:$0xff]  ;;  %v13173_v27 = vcombine.low %v2267_v37, %v2275_v21 }
 0x4a1   : > { %v13192_v38 = vcombine.high %v2284_v32, %v2292_v18  ;;  %v13191_v47 = vcombine.low %v2284_v32, %v2292_v18  ;;  %v2395_v18 = vld [vmem:[%s15519_s8 + $0x1310] sm:$0xff] }
 0x4a2   : > { %8333 = vmatpush1.bf16.msra.mxu0 %v13077_v14  ;;  %v2307_v14 = vld [vmem:[%s15519_s8 + $0x1050] sm:$0xff] }
 0x4a3   : > { %8505 = vmatpush1.bf16.msra.mxu1 %v13079_v40  ;;  %8334 = vmatprep.subr.bf16.mxu0 %v13094_v24  ;;  %v2300_v40 = vld [vmem:[%s15519_s8 + $0x1018] sm:$0xff]  ;;  %v13206_v26 = vcombine.high %v2299_v54, %v2307_v14 }
 0x4a4   : > { %8506 = vmatprep.subr.bf16.mxu1 %v13096_v19  ;;  %v2308_v24 = vld [vmem:[%s15519_s8 + $0x1058] sm:$0xff]  ;;  %v13189_v19 = vcombine.low %v2283_v28, %v2291_v15 }
 0x4a5   : > { %v13208_v36 = vcombine.high %v2300_v40, %v2308_v24  ;;  %v13207_v9 = vcombine.low %v2300_v40, %v2308_v24  ;;  %v2411_v24 = vld [vmem:[%s15519_s8 + $0x1390] sm:$0xff] }
 0x4a6   : > { %8335 = vmatpush1.bf16.msra.mxu0 %v13093_v2  ;;  %v2323_v2 = vld [vmem:[%s15519_s8 + $0x10d0] sm:$0xff] }
 0x4a7   : > { %8507 = vmatpush1.bf16.msra.mxu1 %v13095_v44  ;;  %8336 = vmatprep.subr.bf16.mxu0 %v13110_v4  ;;  %v13205_v44 = vcombine.low %v2299_v54, %v2307_v14  ;;  %v2316_v4 = vld [vmem:[%s15519_s8 + $0x1098] sm:$0xff]  ;;  %v13222_v3 = vcombine.high %v2315_v1, %v2323_v2 }
 0x4a8   : > { %8508 = vmatprep.subr.bf16.mxu1 %v13112_v55  ;;  %v2324_v55 = vld [vmem:[%s15519_s8 + $0x10d8] sm:$0xff] }
 0x4a9   : > { %v13223_v20 = vcombine.low %v2316_v4, %v2324_v55 }
 0x4aa   : > { %8337 = vmatpush1.bf16.msra.mxu0 %v13109_v39  ;;  %v13224_v39 = vcombine.high %v2316_v4, %v2324_v55  ;;  %v2427_v4 = vld [vmem:[%s15519_s8 + $0x1410] sm:$0xff] }
 0x4ab   : > { %8509 = vmatpush1.bf16.msra.mxu1 %v13111_v45  ;;  %8338 = vmatprep.subr.bf16.mxu0 %v13126_v46  ;;  %v2332_v45 = vld [vmem:[%s15519_s8 + $0x1118] sm:$0xff]  ;;  %v2435_v55 = vld [vmem:[%s15519_s8 + $0x1450] sm:$0xff] }
 0x4ac   : > { %8510 = vmatprep.subr.bf16.mxu1 %v13128_v10  ;;  %v2340_v46 = vld [vmem:[%s15519_s8 + $0x1158] sm:$0xff]  ;;  %v13221_v10 = vcombine.low %v2315_v1, %v2323_v2 }
 0x4ad   : > { %v13240_v51 = vcombine.high %v2332_v45, %v2340_v46  ;;  %v13239_v22 = vcombine.low %v2332_v45, %v2340_v46  ;;  %v2443_v46 = vld [vmem:[%s15519_s8 + $0x1490] sm:$0xff] }
 0x4ae   : > { %8339 = vmatpush1.bf16.msra.mxu0 %v13125_v63  ;;  %v2355_v63 = vld [vmem:[%s15519_s8 + $0x11d0] sm:$0xff] }
 0x4af   : > { %8511 = vmatpush1.bf16.msra.mxu1 %v13127_v59  ;;  %8340 = vmatprep.subr.bf16.mxu0 %v13142_v60  ;;  %v2348_v59 = vld [vmem:[%s15519_s8 + $0x1198] sm:$0xff]  ;;  %v13254_v11 = vcombine.high %v2347_v62, %v2355_v63 }
 0x4b0   : > { %8512 = vmatprep.subr.bf16.mxu1 %v13144_v5  ;;  %v2356_v60 = vld [vmem:[%s15519_s8 + $0x11d8] sm:$0xff]  ;;  %v13237_v5 = vcombine.low %v2331_v6, %v2339_v58 }
 0x4b1   : > { %v13256_v41 = vcombine.high %v2348_v59, %v2356_v60  ;;  %v13255_v37 = vcombine.low %v2348_v59, %v2356_v60  ;;  %v2459_v60 = vld [vmem:[%s15519_s8 + $0x1510] sm:$0xff] }
 0x4b2   : > { %8341 = vmatpush1.bf16.msra.mxu0 %v13141_v8  ;;  %v2371_v8 = vld [vmem:[%s15519_s8 + $0x1250] sm:$0xff] }
 0x4b3   : > { %8513 = vmatpush1.bf16.msra.mxu1 %v13143_v56  ;;  %8342 = vmatprep.subr.bf16.mxu0 %v13158_v16  ;;  %v2364_v56 = vld [vmem:[%s15519_s8 + $0x1218] sm:$0xff]  ;;  %v13270_v21 = vcombine.high %v2363_v0, %v2371_v8 }
 0x4b4   : > { %8514 = vmatprep.subr.bf16.mxu1 %v13160_v7  ;;  %v2372_v16 = vld [vmem:[%s15519_s8 + $0x1258] sm:$0xff]  ;;  %v13253_v7 = vcombine.low %v2347_v62, %v2355_v63 }
 0x4b5   : > { %v13272_v61 = vcombine.high %v2364_v56, %v2372_v16  ;;  %v13271_v28 = vcombine.low %v2364_v56, %v2372_v16  ;;  %v2475_v16 = vld [vmem:[%s15519_s8 + $0x1590] sm:$0xff] }
 0x4b6   : > { %8343 = vmatpush1.bf16.msra.mxu0 %v13157_v29  ;;  %v2387_v29 = vld [vmem:[%s15519_s8 + $0x12d0] sm:$0xff] }
 0x4b7   : > { %8515 = vmatpush1.bf16.msra.mxu1 %v13159_v30  ;;  %8344 = vmatprep.subr.bf16.mxu0 %v13174_v53  ;;  %v2380_v30 = vld [vmem:[%s15519_s8 + $0x1298] sm:$0xff]  ;;  %v13286_v15 = vcombine.high %v2379_v42, %v2387_v29 }
 0x4b8   : > { %8516 = vmatprep.subr.bf16.mxu1 %v13176_v35  ;;  %v2388_v53 = vld [vmem:[%s15519_s8 + $0x12d8] sm:$0xff]  ;;  %v13269_v35 = vcombine.low %v2363_v0, %v2371_v8 }
 0x4b9   : > { %v13288_v32 = vcombine.high %v2380_v30, %v2388_v53  ;;  %v13287_v54 = vcombine.low %v2380_v30, %v2388_v53  ;;  %v2491_v53 = vld [vmem:[%s15519_s8 + $0x1610] sm:$0xff] }
 0x4ba   : > { %8345 = vmatpush1.bf16.msra.mxu0 %v13173_v27  ;;  %v2403_v27 = vld [vmem:[%s15519_s8 + $0x1350] sm:$0xff] }
 0x4bb   : > { %8517 = vmatpush1.bf16.msra.mxu1 %v13175_v13  ;;  %8346 = vmatprep.subr.bf16.mxu0 %v13190_v34  ;;  %v2396_v13 = vld [vmem:[%s15519_s8 + $0x1318] sm:$0xff]  ;;  %v13302_v14 = vcombine.high %v2395_v18, %v2403_v27 }
 0x4bc   : > { %8518 = vmatprep.subr.bf16.mxu1 %v13192_v38  ;;  %v2404_v34 = vld [vmem:[%s15519_s8 + $0x1358] sm:$0xff]  ;;  %v13285_v38 = vcombine.low %v2379_v42, %v2387_v29 }
 0x4bd   : > { %v13304_v40 = vcombine.high %v2396_v13, %v2404_v34  ;;  %v13303_v1 = vcombine.low %v2396_v13, %v2404_v34  ;;  %v2507_v34 = vld [vmem:[%s15519_s8 + $0x1690] sm:$0xff] }
 0x4be   : > { %8347 = vmatpush1.bf16.msra.mxu0 %v13189_v19  ;;  %v2419_v19 = vld [vmem:[%s15519_s8 + $0x13d0] sm:$0xff] }
 0x4bf   : > { %8519 = vmatpush1.bf16.msra.mxu1 %v13191_v47  ;;  %8359 = vmatprep.subr.bf16.mxu0 %v13206_v26  ;;  %v2412_v47 = vld [vmem:[%s15519_s8 + $0x1398] sm:$0xff]  ;;  %v13318_v2 = vcombine.high %v2411_v24, %v2419_v19  ;;  %v13317_v6 = vcombine.low %v2411_v24, %v2419_v19 }
 0x4c0   : > { %8531 = vmatprep.subr.bf16.mxu1 %v13208_v36  ;;  %v2420_v26 = vld [vmem:[%s15519_s8 + $0x13d8] sm:$0xff]  ;;  %v13301_v36 = vcombine.low %v2395_v18, %v2403_v27 }
 0x4c1   : > { %8349 = vmatmul.mubr.bf16.vlgmr.msra.gmra.mrb[28].mxu0 %v15866_v52  ;;  %v13319_v58 = vcombine.low %v2412_v47, %v2420_v26 }
 0x4c2   : > { %8521 = vmatmul.mubr.bf16.vlgmr.msra.gmra.mrb[28].mxu1 %v15866_v52  ;;  %8360 = vmatpush1.bf16.msra.mxu0 %v13205_v44  ;;  %v13320_v44 = vcombine.high %v2412_v47, %v2420_v26  ;;  %v2523_v26 = vld [vmem:[%s15519_s8 + $0x1710] sm:$0xff] }
 0x4c3   : > { %8391 = vmatprep.mubr.bf16.mxu0 %v15939_v23  ;;  %8532 = vmatpush1.bf16.msra.mxu1 %v13207_v9  ;;  %v2428_v9 = vld [vmem:[%s15519_s8 + $0x1418] sm:$0xff] }
 0x4c4   : > { %8563 = vmatprep.mubr.bf16.mxu1 %v15939_v23  ;;  %8361 = vmatprep.subr.bf16.mxu0 %v13222_v3  ;;  %v2436_v3 = vld [vmem:[%s15519_s8 + $0x1458] sm:$0xff] }
 0x4c5   : > { %8533 = vmatprep.subr.bf16.mxu1 %v13224_v39  ;;  %v13334_v39 = vcombine.high %v2427_v4, %v2435_v55  ;;  %v13336_v45 = vcombine.high %v2428_v9, %v2436_v3  ;;  %v13335_v62 = vcombine.low %v2428_v9, %v2436_v3  ;;  %v2539_v3 = vld [vmem:[%s15519_s8 + $0x1790] sm:$0xff] }
 0x4c6   : > { %8362 = vmatpush1.bf16.msra.mxu0 %v13221_v10  ;;  %v2451_v10 = vld [vmem:[%s15519_s8 + $0x14d0] sm:$0xff] }
 0x4c7   : > { %8534 = vmatpush1.bf16.msra.mxu1 %v13223_v20  ;;  %8363 = vmatprep.subr.bf16.mxu0 %v13238_v49  ;;  %v2444_v20 = vld [vmem:[%s15519_s8 + $0x1498] sm:$0xff]  ;;  %v13350_v63 = vcombine.high %v2443_v46, %v2451_v10 }
 0x4c8   : > { %8535 = vmatprep.subr.bf16.mxu1 %v13240_v51  ;;  %v2452_v49 = vld [vmem:[%s15519_s8 + $0x14d8] sm:$0xff]  ;;  %v13333_v51 = vcombine.low %v2427_v4, %v2435_v55 }
 0x4c9   : > { %v13352_v59 = vcombine.high %v2444_v20, %v2452_v49  ;;  %v13351_v0 = vcombine.low %v2444_v20, %v2452_v49  ;;  %v2555_v49 = vld [vmem:[%s15519_s8 + $0x1810] sm:$0xff] }
 0x4ca   : > { %8364 = vmatpush1.bf16.msra.mxu0 %v13237_v5  ;;  %v2467_v5 = vld [vmem:[%s15519_s8 + $0x1550] sm:$0xff] }
 0x4cb   : > { %8536 = vmatpush1.bf16.msra.mxu1 %v13239_v22  ;;  %8365 = vmatprep.subr.bf16.mxu0 %v13254_v11  ;;  %v2460_v22 = vld [vmem:[%s15519_s8 + $0x1518] sm:$0xff]  ;;  %v13366_v8 = vcombine.high %v2459_v60, %v2467_v5 }
 0x4cc   : > { %8537 = vmatprep.subr.bf16.mxu1 %v13256_v41  ;;  %v2468_v11 = vld [vmem:[%s15519_s8 + $0x1558] sm:$0xff]  ;;  %v13349_v41 = vcombine.low %v2443_v46, %v2451_v10 }
 0x4cd   : > { %v13368_v56 = vcombine.high %v2460_v22, %v2468_v11  ;;  %v13367_v42 = vcombine.low %v2460_v22, %v2468_v11  ;;  %v2571_v11 = vld [vmem:[%s15519_s8 + $0x1890] sm:$0xff] }
 0x4ce   : > { %8366 = vmatpush1.bf16.msra.mxu0 %v13253_v7  ;;  %v2483_v7 = vld [vmem:[%s15519_s8 + $0x15d0] sm:$0xff] }
 0x4cf   : > { %8538 = vmatpush1.bf16.msra.mxu1 %v13255_v37  ;;  %8367 = vmatprep.subr.bf16.mxu0 %v13270_v21  ;;  %v2476_v37 = vld [vmem:[%s15519_s8 + $0x1598] sm:$0xff]  ;;  %v13382_v29 = vcombine.high %v2475_v16, %v2483_v7 }
 0x4d0   : > { %8539 = vmatprep.subr.bf16.mxu1 %v13272_v61  ;;  %v2484_v21 = vld [vmem:[%s15519_s8 + $0x15d8] sm:$0xff]  ;;  %v13365_v61 = vcombine.low %v2459_v60, %v2467_v5 }
 0x4d1   : > { %v13384_v30 = vcombine.high %v2476_v37, %v2484_v21  ;;  %v13383_v18 = vcombine.low %v2476_v37, %v2484_v21  ;;  %v2587_v37 = vld [vmem:[%s15519_s8 + $0x1910] sm:$0xff] }
 0x4d2   : > { %8368 = vmatpush1.bf16.msra.mxu0 %v13269_v35  ;;  %v2499_v35 = vld [vmem:[%s15519_s8 + $0x1650] sm:$0xff] }
 0x4d3   : > { %8540 = vmatpush1.bf16.msra.mxu1 %v13271_v28  ;;  %8369 = vmatprep.subr.bf16.mxu0 %v13286_v15  ;;  %v2492_v28 = vld [vmem:[%s15519_s8 + $0x1618] sm:$0xff]  ;;  %v13398_v27 = vcombine.high %v2491_v53, %v2499_v35  ;;  %v2595_v21 = vld [vmem:[%s15519_s8 + $0x1950] sm:$0xff] }
 0x4d4   : > { %8541 = vmatprep.subr.bf16.mxu1 %v13288_v32  ;;  %v2500_v15 = vld [vmem:[%s15519_s8 + $0x1658] sm:$0xff]  ;;  %v13381_v32 = vcombine.low %v2475_v16, %v2483_v7 }
 0x4d5   : > { %v13400_v13 = vcombine.high %v2492_v28, %v2500_v15  ;;  %v13399_v24 = vcombine.low %v2492_v28, %v2500_v15  ;;  %v2603_v15 = vld [vmem:[%s15519_s8 + $0x1990] sm:$0xff] }
 0x4d6   : > { %8370 = vmatpush1.bf16.msra.mxu0 %v13285_v38  ;;  %v2515_v38 = vld [vmem:[%s15519_s8 + $0x16d0] sm:$0xff] }
 0x4d7   : > { %8542 = vmatpush1.bf16.msra.mxu1 %v13287_v54  ;;  %8371 = vmatprep.subr.bf16.mxu0 %v13302_v14  ;;  %v2508_v54 = vld [vmem:[%s15519_s8 + $0x1698] sm:$0xff]  ;;  %v13414_v19 = vcombine.high %v2507_v34, %v2515_v38 }
 0x4d8   : > { %8543 = vmatprep.subr.bf16.mxu1 %v13304_v40  ;;  %v2516_v14 = vld [vmem:[%s15519_s8 + $0x16d8] sm:$0xff]  ;;  %v13397_v40 = vcombine.low %v2491_v53, %v2499_v35  ;;  %v13494_v35 = vcombine.high %v2587_v37, %v2595_v21 }
 0x4d9   : > { %v13416_v47 = vcombine.high %v2508_v54, %v2516_v14  ;;  %v13415_v4 = vcombine.low %v2508_v54, %v2516_v14  ;;  %v2619_v14 = vld [vmem:[%s15519_s8 + $0x1a10] sm:$0xff] }
 0x4da   : > { %8372 = vmatpush1.bf16.msra.mxu0 %v13301_v36  ;;  %v2531_v36 = vld [vmem:[%s15519_s8 + $0x1750] sm:$0xff] }
 0x4db   : > { %8544 = vmatpush1.bf16.msra.mxu1 %v13303_v1  ;;  %8373 = vmatprep.subr.bf16.mxu0 %v13318_v2  ;;  %v2524_v1 = vld [vmem:[%s15519_s8 + $0x1718] sm:$0xff]  ;;  %v13430_v55 = vcombine.high %v2523_v26, %v2531_v36 }
 0x4dc   : > { %8545 = vmatprep.subr.bf16.mxu1 %v13320_v44  ;;  %v2532_v2 = vld [vmem:[%s15519_s8 + $0x1758] sm:$0xff]  ;;  %v13413_v44 = vcombine.low %v2507_v34, %v2515_v38 }
 0x4dd   : > { %v13432_v9 = vcombine.high %v2524_v1, %v2532_v2  ;;  %v13431_v46 = vcombine.low %v2524_v1, %v2532_v2  ;;  %v2635_v2 = vld [vmem:[%s15519_s8 + $0x1a90] sm:$0xff] }
 0x4de   : > { %8374 = vmatpush1.bf16.msra.mxu0 %v13317_v6  ;;  %v2547_v6 = vld [vmem:[%s15519_s8 + $0x17d0] sm:$0xff] }
 0x4df   : > { %8546 = vmatpush1.bf16.msra.mxu1 %v13319_v58  ;;  %8375 = vmatprep.subr.bf16.mxu0 %v13334_v39  ;;  %v2540_v58 = vld [vmem:[%s15519_s8 + $0x1798] sm:$0xff]  ;;  %v13446_v10 = vcombine.high %v2539_v3, %v2547_v6 }
 0x4e0   : > { %8547 = vmatprep.subr.bf16.mxu1 %v13336_v45  ;;  %v2548_v39 = vld [vmem:[%s15519_s8 + $0x17d8] sm:$0xff]  ;;  %v13429_v45 = vcombine.low %v2523_v26, %v2531_v36 }
 0x4e1   : > { %v13448_v20 = vcombine.high %v2540_v58, %v2548_v39  ;;  %v13447_v60 = vcombine.low %v2540_v58, %v2548_v39  ;;  %v2651_v39 = vld [vmem:[%s15519_s8 + $0x1b10] sm:$0xff] }
 0x4e2   : > { %8376 = vmatpush1.bf16.msra.mxu0 %v13333_v51  ;;  %v2563_v51 = vld [vmem:[%s15519_s8 + $0x1850] sm:$0xff] }
 0x4e3   : > { %8548 = vmatpush1.bf16.msra.mxu1 %v13335_v62  ;;  %8377 = vmatprep.subr.bf16.mxu0 %v13350_v63  ;;  %v2556_v62 = vld [vmem:[%s15519_s8 + $0x1818] sm:$0xff]  ;;  %v13462_v5 = vcombine.high %v2555_v49, %v2563_v51 }
 0x4e4   : > { %8549 = vmatprep.subr.bf16.mxu1 %v13352_v59  ;;  %v2564_v63 = vld [vmem:[%s15519_s8 + $0x1858] sm:$0xff]  ;;  %v13445_v59 = vcombine.low %v2539_v3, %v2547_v6 }
 0x4e5   : > { %v13464_v22 = vcombine.high %v2556_v62, %v2564_v63  ;;  %v13463_v16 = vcombine.low %v2556_v62, %v2564_v63  ;;  %v1748_v63 = vld [vmem:[#allocation2 + $0x18] sm:$0xff] }
 0x4e6   : > { %8378 = vmatpush1.bf16.msra.mxu0 %v13349_v41  ;;  %v2579_v41 = vld [vmem:[%s15519_s8 + $0x18d0] sm:$0xff] }
 0x4e7   : > { %8550 = vmatpush1.bf16.msra.mxu1 %v13351_v0  ;;  %8379 = vmatprep.subr.bf16.mxu0 %v13366_v8  ;;  %v13461_v0 = vcombine.low %v2555_v49, %v2563_v51  ;;  %v2572_v8 = vld [vmem:[%s15519_s8 + $0x1898] sm:$0xff]  ;;  %v13478_v7 = vcombine.high %v2571_v11, %v2579_v41  ;;  %v1747_v49 = vld [vmem:[#allocation2 + $0x10] sm:$0xff] }
 0x4e8   : > { %8551 = vmatprep.subr.bf16.mxu1 %v13368_v56  ;;  %v2580_v56 = vld [vmem:[%s15519_s8 + $0x18d8] sm:$0xff] }
 0x4e9   : > { %v13479_v53 = vcombine.low %v2572_v8, %v2580_v56  ;;  %v1746_v51 = vld [vmem:[#allocation2 + $0x8] sm:$0xff] }
 0x4ea   : > { %8380 = vmatpush1.bf16.msra.mxu0 %v13365_v61  ;;  %v13480_v61 = vcombine.high %v2572_v8, %v2580_v56  ;;  %v2667_v56 = vld [vmem:[%s15519_s8 + $0x1b90] sm:$0xff] }
 0x4eb   : > { %8552 = vmatpush1.bf16.msra.mxu1 %v13367_v42  ;;  %8381 = vmatprep.subr.bf16.mxu0 %v13382_v29  ;;  %v2588_v42 = vld [vmem:[%s15519_s8 + $0x1918] sm:$0xff] }
 0x4ec   : > { %8553 = vmatprep.subr.bf16.mxu1 %v13384_v30  ;;  %v2596_v29 = vld [vmem:[%s15519_s8 + $0x1958] sm:$0xff]  ;;  %v13477_v30 = vcombine.low %v2571_v11, %v2579_v41 }
 0x4ed   : > { %v13496_v28 = vcombine.high %v2588_v42, %v2596_v29  ;;  %v13495_v34 = vcombine.low %v2588_v42, %v2596_v29  ;;  %v1764_v42 = vld [vmem:[#allocation2 + $0x98] sm:$0xff]  ;;  %v2668_v29 = vld [vmem:[%s15519_s8 + $0x1b98] sm:$0xff] }
 0x4ee   : > { %8382 = vmatpush1.bf16.msra.mxu0 %v13381_v32  ;;  %v2611_v32 = vld [vmem:[%s15519_s8 + $0x19d0] sm:$0xff] }
 0x4ef   : > { %8554 = vmatpush1.bf16.msra.mxu1 %v13383_v18  ;;  %8383 = vmatprep.subr.bf16.mxu0 %v13398_v27  ;;  %v2604_v18 = vld [vmem:[%s15519_s8 + $0x1998] sm:$0xff]  ;;  %v13510_v38 = vcombine.high %v2603_v15, %v2611_v32 }
 0x4f0   : > { %8555 = vmatprep.subr.bf16.mxu1 %v13400_v13  ;;  %v2612_v27 = vld [vmem:[%s15519_s8 + $0x19d8] sm:$0xff]  ;;  %v13493_v13 = vcombine.low %v2587_v37, %v2595_v21 }
 0x4f1   : > { %v13512_v54 = vcombine.high %v2604_v18, %v2612_v27  ;;  %v13511_v26 = vcombine.low %v2604_v18, %v2612_v27 }
 0x4f2   : > { %8384 = vmatpush1.bf16.msra.mxu0 %v13397_v40  ;;  %v2627_v40 = vld [vmem:[%s15519_s8 + $0x1a50] sm:$0xff] }
 0x4f3   : > { %8556 = vmatpush1.bf16.msra.mxu1 %v13399_v24  ;;  %8385 = vmatprep.subr.bf16.mxu0 %v13414_v19  ;;  %v2620_v24 = vld [vmem:[%s15519_s8 + $0x1a18] sm:$0xff]  ;;  %v13526_v36 = vcombine.high %v2619_v14, %v2627_v40 }
 0x4f4   : > { %8557 = vmatprep.subr.bf16.mxu1 %v13416_v47  ;;  %v2628_v19 = vld [vmem:[%s15519_s8 + $0x1a58] sm:$0xff]  ;;  %v13509_v47 = vcombine.low %v2603_v15, %v2611_v32 }
 0x4f5   : > { %v13528_v1 = vcombine.high %v2620_v24, %v2628_v19  ;;  %v13527_v3 = vcombine.low %v2620_v24, %v2628_v19  ;;  %v2683_v19 = vld [vmem:[%s15519_s8 + $0x1c10] sm:$0xff] }
 0x4f6   : > { %8386 = vmatpush1.bf16.msra.mxu0 %v13413_v44  ;;  %v2643_v44 = vld [vmem:[%s15519_s8 + $0x1ad0] sm:$0xff] }
 0x4f7   : > { %8558 = vmatpush1.bf16.msra.mxu1 %v13415_v4  ;;  %8387 = vmatprep.subr.bf16.mxu0 %v13430_v55  ;;  %v2636_v4 = vld [vmem:[%s15519_s8 + $0x1a98] sm:$0xff]  ;;  %v13542_v6 = vcombine.high %v2635_v2, %v2643_v44  ;;  %v13541_v62 = vcombine.low %v2635_v2, %v2643_v44 }
 0x4f8   : > { %8559 = vmatprep.subr.bf16.mxu1 %v13432_v9  ;;  %v2644_v55 = vld [vmem:[%s15519_s8 + $0x1ad8] sm:$0xff]  ;;  %v13525_v9 = vcombine.low %v2619_v14, %v2627_v40 }
 0x4f9   : > { %v13544_v58 = vcombine.high %v2636_v4, %v2644_v55 }
 0x4fa   : > { %8388 = vmatpush1.bf16.msra.mxu0 %v13429_v45  ;;  %v2659_v45 = vld [vmem:[%s15519_s8 + $0x1b50] sm:$0xff] }
 0x4fb   : > { %8560 = vmatpush1.bf16.msra.mxu1 %v13431_v46  ;;  %8389 = vmatprep.subr.bf16.mxu0 %v13446_v10  ;;  %v2652_v46 = vld [vmem:[%s15519_s8 + $0x1b18] sm:$0xff]  ;;  %v13557_v32 = vcombine.low %v2651_v39, %v2659_v45 }
 0x4fc   : > { %8561 = vmatprep.subr.bf16.mxu1 %v13448_v20  ;;  %v2660_v10 = vld [vmem:[%s15519_s8 + $0x1b58] sm:$0xff]  ;;  %v1745_v20 = vld [vmem:[#allocation2] sm:$0xff] }
 0x4fd   : > { %v13560_v8 = vcombine.high %v2652_v46, %v2660_v10  ;;  %v13559_v18 = vcombine.low %v2652_v46, %v2660_v10  ;;  %v2715_v10 = vld [vmem:[%s15519_s8 + $0x1d10] sm:$0xff] }
 0x4fe   : > { %8390 = vmatpush1.bf16.msra.mxu0 %v13445_v59  ;;  %v13543_v59 = vcombine.low %v2636_v4, %v2644_v55  ;;  %v2699_v55 = vld [vmem:[%s15519_s8 + $0x1c90] sm:$0xff] }
 0x4ff   : > { %8562 = vmatpush1.bf16.msra.mxu1 %v13447_v60  ;;  %8402 = vmatprep.subr.bf16.mxu0 %v13462_v5  ;;  %v1761_v60 = vld [vmem:[#allocation2 + $0x80] sm:$0xff]  ;;  %v1763_v5 = vld [vmem:[#allocation2 + $0x90] sm:$0xff] }
 0x500   : > { %8574 = vmatprep.subr.bf16.mxu1 %v13464_v22  ;;  %v13558_v22 = vcombine.high %v2651_v39, %v2659_v45 }
 0x501   : > { %8392 = vmatmul.mubr.bf16.vlgmr.msra.gmra.mrb[28].mxu0 %v15928_v48 }
 0x502   : > { %8564 = vmatmul.mubr.bf16.vlgmr.msra.gmra.mrb[28].mxu1 %v15928_v48  ;;  %8403 = vmatpush1.bf16.msra.mxu0 %v13461_v0  ;;  %v1762_v0 = vld [vmem:[#allocation2 + $0x88] sm:$0xff] }
 0x503   : > { %8434 = vmatprep.mubr.bf16.mxu0 %v15968_v33  ;;  %8575 = vmatpush1.bf16.msra.mxu1 %v13463_v16  ;;  %v2675_v16 = vld [vmem:[%s15519_s8 + $0x1bd0] sm:$0xff] }
 0x504   : > { %8606 = vmatprep.mubr.bf16.mxu1 %v15968_v33  ;;  %8404 = vmatprep.subr.bf16.mxu0 %v13478_v7 }
 0x505   : > { %8576 = vmatprep.subr.bf16.mxu1 %v13480_v61 }
 0x506   : > { %8405 = vmatpush1.bf16.msra.mxu0 %v13477_v30  ;;  %v2676_v30 = vld [vmem:[%s15519_s8 + $0x1bd8] sm:$0xff] }
 0x507   : > { %8577 = vmatpush1.bf16.msra.mxu1 %v13479_v53  ;;  %8406 = vmatprep.subr.bf16.mxu0 %v13494_v35  ;;  %v13576_v24 = vcombine.high %v2668_v29, %v2676_v30  ;;  %v13575_v2 = vcombine.low %v2668_v29, %v2676_v30 }
 0x508   : > { %8578 = vmatprep.subr.bf16.mxu1 %v13496_v28 }
 0x50a   : > { %8407 = vmatpush1.bf16.msra.mxu0 %v13493_v13 }
 0x50b   : > { %8579 = vmatpush1.bf16.msra.mxu1 %v13495_v34  ;;  %8408 = vmatprep.subr.bf16.mxu0 %v13510_v38 }
 0x50c   : > { %8580 = vmatprep.subr.bf16.mxu1 %v13512_v54  ;;  %v13574_v54 = vcombine.high %v2667_v56, %v2675_v16 }
 0x50e   : > { %8409 = vmatpush1.bf16.msra.mxu0 %v13509_v47  ;;  %v2691_v47 = vld [vmem:[%s15519_s8 + $0x1c50] sm:$0xff] }
 0x50f   : > { %8581 = vmatpush1.bf16.msra.mxu1 %v13511_v26  ;;  %8410 = vmatprep.subr.bf16.mxu0 %v13526_v36  ;;  %v2684_v26 = vld [vmem:[%s15519_s8 + $0x1c18] sm:$0xff]  ;;  %v13590_v44 = vcombine.high %v2683_v19, %v2691_v47 }
 0x510   : > { %8582 = vmatprep.subr.bf16.mxu1 %v13528_v1  ;;  %v2692_v36 = vld [vmem:[%s15519_s8 + $0x1c58] sm:$0xff]  ;;  %v13573_v1 = vcombine.low %v2667_v56, %v2675_v16 }
 0x511   : > { %v13592_v4 = vcombine.high %v2684_v26, %v2692_v36  ;;  %v13591_v39 = vcombine.low %v2684_v26, %v2692_v36  ;;  %v2795_v36 = vld [vmem:[%s15519_s8 + $0x1f90] sm:$0xff] }
 0x512   : > { %8411 = vmatpush1.bf16.msra.mxu0 %v13525_v9  ;;  %v2707_v9 = vld [vmem:[%s15519_s8 + $0x1cd0] sm:$0xff] }
 0x513   : > { %8583 = vmatpush1.bf16.msra.mxu1 %v13527_v3  ;;  %8412 = vmatprep.subr.bf16.mxu0 %v13542_v6  ;;  %v2700_v3 = vld [vmem:[%s15519_s8 + $0x1c98] sm:$0xff]  ;;  %v13606_v45 = vcombine.high %v2699_v55, %v2707_v9 }
 0x514   : > { %v8092_v11 = vpop.f32.mrb[24].mxu0  ;;  %v8264_v41 = vpop.f32.mrb[24].mxu1  ;;  %8584 = vmatprep.subr.bf16.mxu1 %v13544_v58  ;;  %v2708_v6 = vld [vmem:[%s15519_s8 + $0x1cd8] sm:$0xff]  ;;  %v13589_v58 = vcombine.low %v2683_v19, %v2691_v47 }
 0x515   : > { %v9305_v7 = vadd.f32 %v8092_v11, %v1745_v20  ;;  %v9307_v37 = vadd.f32 %v8264_v41, %v1747_v49  ;;  %v8094_v21 = vpop.f32.mrb[25].mxu0  ;;  %v8266_v61 = vpop.f32.mrb[25].mxu1  ;;  %v13608_v46 = vcombine.high %v2700_v3, %v2708_v6  ;;  %v2723_v20 = vld [vmem:[%s15519_s8 + $0x1d50] sm:$0xff]  ;;  %v2716_v49 = vld [vmem:[%s15519_s8 + $0x1d18] sm:$0xff] }
 0x516   : > { %v9306_v53 = vadd.f32 %v8094_v21, %v1746_v51  ;;  %v9308_v35 = vadd.f32 %v8266_v61, %v1748_v63  ;;  %v8096_v28 = vpop.f32.mrb[26].mxu0  ;;  %v8268_v15 = vpop.f32.mrb[26].mxu1  ;;  %8413 = vmatpush1.bf16.msra.mxu0 %v13541_v62  ;;  %v2724_v51 = vld [vmem:[%s15519_s8 + $0x1d58] sm:$0xff]  ;;  %v13605_v62 = vcombine.low %v2699_v55, %v2707_v9  ;;  %v13607_v63 = vcombine.low %v2700_v3, %v2708_v6  ;;  %v1789_v6 = vld [vmem:[%s15519_s8 + $0x20] sm:$0xff] }
 0x517   : > { %9337 = vst [vmem:[#allocation2] sm:$0xff] %v9305_v7  ;;  %9339 = vst [vmem:[#allocation2 + $0x10] sm:$0xff] %v9307_v37  ;;  %v9321_v27 = vadd.f32 %v8096_v28, %v1761_v60  ;;  %v9323_v13 = vadd.f32 %v8268_v15, %v1763_v5  ;;  %8585 = vmatpush1.bf16.msra.mxu1 %v13543_v59  ;;  %v8098_v34 = vpop.f32.mrb[27].mxu0  ;;  %v8270_v38 = vpop.f32.mrb[27].mxu1  ;;  %8414 = vmatprep.subr.bf16.mxu0 %v13558_v22  ;;  %v2731_v5 = vld [vmem:[%s15519_s8 + $0x1d90] sm:$0xff]  ;;  %v2732_v11 = vld [vmem:[%s15519_s8 + $0x1d98] sm:$0xff] }
 0x518   : > { %9338 = vst [vmem:[#allocation2 + $0x8] sm:$0xff] %v9306_v53  ;;  %9340 = vst [vmem:[#allocation2 + $0x18] sm:$0xff] %v9308_v35  ;;  %v9322_v14 = vadd.f32 %v8098_v34, %v1762_v0  ;;  %v9324_v40 = vadd.f32 %v8270_v38, %v1764_v42  ;;  %8586 = vmatprep.subr.bf16.mxu1 %v13560_v8  ;;  %v13622_v59 = vcombine.high %v2715_v10, %v2723_v20  ;;  %v2739_v22 = vld [vmem:[%s15519_s8 + $0x1dd0] sm:$0xff]  ;;  %v2740_v41 = vld [vmem:[%s15519_s8 + $0x1dd8] sm:$0xff] }
 0x519   : > { %9353 = vst [vmem:[#allocation2 + $0x80] sm:$0xff] %v9321_v27  ;;  %9355 = vst [vmem:[#allocation2 + $0x90] sm:$0xff] %v9323_v13  ;;  %v13624_v60 = vcombine.high %v2716_v49, %v2724_v51  ;;  %v13621_v0 = vcombine.low %v2715_v10, %v2723_v20  ;;  %v13623_v8 = vcombine.low %v2716_v49, %v2724_v51  ;;  %v2747_v7 = vld [vmem:[%s15519_s8 + $0x1e10] sm:$0xff]  ;;  %v2748_v21 = vld [vmem:[%s15519_s8 + $0x1e18] sm:$0xff] }
 0x51a   : > { %9354 = vst [vmem:[#allocation2 + $0x88] sm:$0xff] %v9322_v14  ;;  %9356 = vst [vmem:[#allocation2 + $0x98] sm:$0xff] %v9324_v40  ;;  %8415 = vmatpush1.bf16.msra.mxu0 %v13557_v32  ;;  %v13638_v56 = vcombine.high %v2731_v5, %v2739_v22  ;;  %v13640_v16 = vcombine.high %v2732_v11, %v2740_v41  ;;  %v2755_v37 = vld [vmem:[%s15519_s8 + $0x1e50] sm:$0xff]  ;;  %v2756_v61 = vld [vmem:[%s15519_s8 + $0x1e58] sm:$0xff]  ;;  %v13637_v42 = vcombine.low %v2731_v5, %v2739_v22 }
 0x51b   : > { %8587 = vmatpush1.bf16.msra.mxu1 %v13559_v18  ;;  %8416 = vmatprep.subr.bf16.mxu0 %v13574_v54  ;;  %v13639_v29 = vcombine.low %v2732_v11, %v2740_v41  ;;  %v13654_v30 = vcombine.high %v2747_v7, %v2755_v37  ;;  %v13656_v53 = vcombine.high %v2748_v21, %v2756_v61  ;;  %v2763_v35 = vld [vmem:[%s15519_s8 + $0x1e90] sm:$0xff]  ;;  %v2764_v15 = vld [vmem:[%s15519_s8 + $0x1e98] sm:$0xff]  ;;  %v1805_v51 = vld [vmem:[%s15519_s8 + $0xa0] sm:$0xff] }
 0x51c   : > { %8588 = vmatprep.subr.bf16.mxu1 %v13576_v24  ;;  %v2771_v28 = vld [vmem:[%s15519_s8 + $0x1ed0] sm:$0xff]  ;;  %v2772_v32 = vld [vmem:[%s15519_s8 + $0x1ed8] sm:$0xff]  ;;  %v13653_v18 = vcombine.low %v2747_v7, %v2755_v37  ;;  %v13655_v27 = vcombine.low %v2748_v21, %v2756_v61  ;;  %v1821_v11 = vld [vmem:[%s15519_s8 + $0x120] sm:$0xff] }
 0x51d   : > { %v13670_v13 = vcombine.high %v2763_v35, %v2771_v28  ;;  %v13672_v34 = vcombine.high %v2764_v15, %v2772_v32  ;;  %v2779_v38 = vld [vmem:[%s15519_s8 + $0x1f10] sm:$0xff]  ;;  %v2780_v14 = vld [vmem:[%s15519_s8 + $0x1f18] sm:$0xff]  ;;  %v13669_v24 = vcombine.low %v2763_v35, %v2771_v28  ;;  %v13671_v19 = vcombine.low %v2764_v15, %v2772_v32  ;;  %v1829_v41 = vld [vmem:[%s15519_s8 + $0x160] sm:$0xff] }
 0x51e   : > { %8417 = vmatpush1.bf16.msra.mxu0 %v13573_v1  ;;  %v2787_v54 = vld [vmem:[%s15519_s8 + $0x1f50] sm:$0xff]  ;;  %v2788_v40 = vld [vmem:[%s15519_s8 + $0x1f58] sm:$0xff]  ;;  %v12730_v37 = vcombine.high %v1821_v11, %v1829_v41  ;;  %v1837_v61 = vld [vmem:[%s15519_s8 + $0x1a0] sm:$0xff] }
 0x51f   : > { %8589 = vmatpush1.bf16.msra.mxu1 %v13575_v2  ;;  %8418 = vmatprep.subr.bf16.mxu0 %v13590_v44  ;;  %v13686_v47 = vcombine.high %v2779_v38, %v2787_v54  ;;  %v13688_v26 = vcombine.high %v2780_v14, %v2788_v40  ;;  %v2803_v1 = vld [vmem:[%s15519_s8 + $0x1fd0] sm:$0xff]  ;;  %v2796_v2 = vld [vmem:[%s15519_s8 + $0x1f98] sm:$0xff]  ;;  %v13687_v55 = vcombine.low %v2780_v14, %v2788_v40  ;;  %v1853_v32 = vld [vmem:[%s15519_s8 + $0x220] sm:$0xff] }
 0x520   : > { %8590 = vmatprep.subr.bf16.mxu1 %v13592_v4  ;;  %v2804_v44 = vld [vmem:[%s15519_s8 + $0x1fd8] sm:$0xff]  ;;  %v13685_v4 = vcombine.low %v2779_v38, %v2787_v54  ;;  %v13702_v9 = vcombine.high %v2795_v36, %v2803_v1  ;;  %v1869_v40 = vld [vmem:[%s15519_s8 + $0x2a0] sm:$0xff] }
 0x521   : > { %v13704_v3 = vcombine.high %v2796_v2, %v2804_v44  ;;  %v13703_v10 = vcombine.low %v2796_v2, %v2804_v44  ;;  %v1885_v44 = vld [vmem:[%s15519_s8 + $0x320] sm:$0xff] }
 0x522   : > { %8419 = vmatpush1.bf16.msra.mxu0 %v13589_v58  ;;  %v1797_v58 = vld [vmem:[%s15519_s8 + $0x60] sm:$0xff] }
 0x523   : > { %8591 = vmatpush1.bf16.msra.mxu1 %v13591_v39  ;;  %8420 = vmatprep.subr.bf16.mxu0 %v13606_v45  ;;  %v1790_v39 = vld [vmem:[%s15519_s8 + $0x28] sm:$0xff]  ;;  %v12698_v20 = vcombine.high %v1789_v6, %v1797_v58 }
 0x524   : > { %8592 = vmatprep.subr.bf16.mxu1 %v13608_v46  ;;  %v1798_v45 = vld [vmem:[%s15519_s8 + $0x68] sm:$0xff]  ;;  %v13701_v46 = vcombine.low %v2795_v36, %v2803_v1 }
 0x525   : > { %v12700_v49 = vcombine.high %v1790_v39, %v1798_v45  ;;  %v12699_v5 = vcombine.low %v1790_v39, %v1798_v45  ;;  %v1901_v45 = vld [vmem:[%s15519_s8 + $0x3a0] sm:$0xff] }
 0x526   : > { %8421 = vmatpush1.bf16.msra.mxu0 %v13605_v62  ;;  %v1813_v62 = vld [vmem:[%s15519_s8 + $0xe0] sm:$0xff] }
 0x527   : > { %8593 = vmatpush1.bf16.msra.mxu1 %v13607_v63  ;;  %8422 = vmatprep.subr.bf16.mxu0 %v13622_v59  ;;  %v12697_v63 = vcombine.low %v1789_v6, %v1797_v58  ;;  %v1806_v59 = vld [vmem:[%s15519_s8 + $0xa8] sm:$0xff]  ;;  %v12714_v22 = vcombine.high %v1805_v51, %v1813_v62 }
 0x528   : > { %8594 = vmatprep.subr.bf16.mxu1 %v13624_v60  ;;  %v1814_v60 = vld [vmem:[%s15519_s8 + $0xe8] sm:$0xff] }
 0x529   : > { %v12715_v7 = vcombine.low %v1806_v59, %v1814_v60 }
 0x52a   : > { %8423 = vmatpush1.bf16.msra.mxu0 %v13621_v0  ;;  %v12716_v0 = vcombine.high %v1806_v59, %v1814_v60  ;;  %v1917_v59 = vld [vmem:[%s15519_s8 + $0x420] sm:$0xff] }
 0x52b   : > { %8595 = vmatpush1.bf16.msra.mxu1 %v13623_v8  ;;  %8424 = vmatprep.subr.bf16.mxu0 %v13638_v56  ;;  %v1822_v8 = vld [vmem:[%s15519_s8 + $0x128] sm:$0xff]  ;;  %v1925_v60 = vld [vmem:[%s15519_s8 + $0x460] sm:$0xff] }
 0x52c   : > { %8596 = vmatprep.subr.bf16.mxu1 %v13640_v16  ;;  %v1830_v56 = vld [vmem:[%s15519_s8 + $0x168] sm:$0xff]  ;;  %v12713_v16 = vcombine.low %v1805_v51, %v1813_v62 }
 0x52d   : > { %v12732_v21 = vcombine.high %v1822_v8, %v1830_v56  ;;  %v12731_v35 = vcombine.low %v1822_v8, %v1830_v56  ;;  %v1933_v56 = vld [vmem:[%s15519_s8 + $0x4a0] sm:$0xff] }
 0x52e   : > { %8425 = vmatpush1.bf16.msra.mxu0 %v13637_v42  ;;  %v1845_v42 = vld [vmem:[%s15519_s8 + $0x1e0] sm:$0xff] }
 0x52f   : > { %8597 = vmatpush1.bf16.msra.mxu1 %v13639_v29  ;;  %8426 = vmatprep.subr.bf16.mxu0 %v13654_v30  ;;  %v1838_v29 = vld [vmem:[%s15519_s8 + $0x1a8] sm:$0xff]  ;;  %v12746_v28 = vcombine.high %v1837_v61, %v1845_v42 }
 0x530   : > { %8598 = vmatprep.subr.bf16.mxu1 %v13656_v53  ;;  %v1846_v30 = vld [vmem:[%s15519_s8 + $0x1e8] sm:$0xff]  ;;  %v12729_v53 = vcombine.low %v1821_v11, %v1829_v41 }
 0x531   : > { %v12748_v15 = vcombine.high %v1838_v29, %v1846_v30  ;;  %v12747_v38 = vcombine.low %v1838_v29, %v1846_v30  ;;  %v1949_v30 = vld [vmem:[%s15519_s8 + $0x520] sm:$0xff] }
 0x532   : > { %8427 = vmatpush1.bf16.msra.mxu0 %v13653_v18  ;;  %v1861_v18 = vld [vmem:[%s15519_s8 + $0x260] sm:$0xff] }
 0x533   : > { %8599 = vmatpush1.bf16.msra.mxu1 %v13655_v27  ;;  %8428 = vmatprep.subr.bf16.mxu0 %v13670_v13  ;;  %v1854_v27 = vld [vmem:[%s15519_s8 + $0x228] sm:$0xff]  ;;  %v12762_v54 = vcombine.high %v1853_v32, %v1861_v18 }
 0x534   : > { %8600 = vmatprep.subr.bf16.mxu1 %v13672_v34  ;;  %v1862_v13 = vld [vmem:[%s15519_s8 + $0x268] sm:$0xff]  ;;  %v12745_v34 = vcombine.low %v1837_v61, %v1845_v42 }
 0x535   : > { %v12764_v14 = vcombine.high %v1854_v27, %v1862_v13  ;;  %v12763_v36 = vcombine.low %v1854_v27, %v1862_v13  ;;  %v1965_v13 = vld [vmem:[%s15519_s8 + $0x5a0] sm:$0xff] }
 0x536   : > { %8429 = vmatpush1.bf16.msra.mxu0 %v13669_v24  ;;  %v1877_v24 = vld [vmem:[%s15519_s8 + $0x2e0] sm:$0xff] }
 0x537   : > { %8601 = vmatpush1.bf16.msra.mxu1 %v13671_v19  ;;  %8430 = vmatprep.subr.bf16.mxu0 %v13686_v47  ;;  %v1870_v19 = vld [vmem:[%s15519_s8 + $0x2a8] sm:$0xff]  ;;  %v12778_v1 = vcombine.high %v1869_v40, %v1877_v24 }
 0x538   : > { %8602 = vmatprep.subr.bf16.mxu1 %v13688_v26  ;;  %v1878_v47 = vld [vmem:[%s15519_s8 + $0x2e8] sm:$0xff]  ;;  %v12761_v26 = vcombine.low %v1853_v32, %v1861_v18 }
 0x539   : > { %v12780_v2 = vcombine.high %v1870_v19, %v1878_v47  ;;  %v12779_v6 = vcombine.low %v1870_v19, %v1878_v47  ;;  %v1981_v47 = vld [vmem:[%s15519_s8 + $0x620] sm:$0xff] }
 0x53a   : > { %8431 = vmatpush1.bf16.msra.mxu0 %v13685_v4  ;;  %v1893_v4 = vld [vmem:[%s15519_s8 + $0x360] sm:$0xff] }
 0x53b   : > { %8603 = vmatpush1.bf16.msra.mxu1 %v13687_v55  ;;  %8432 = vmatprep.subr.bf16.mxu0 %v13702_v9  ;;  %v1886_v55 = vld [vmem:[%s15519_s8 + $0x328] sm:$0xff]  ;;  %v12794_v58 = vcombine.high %v1885_v44, %v1893_v4 }
 0x53c   : > { %8604 = vmatprep.subr.bf16.mxu1 %v13704_v3  ;;  %v1894_v9 = vld [vmem:[%s15519_s8 + $0x368] sm:$0xff]  ;;  %v12777_v3 = vcombine.low %v1869_v40, %v1877_v24 }
 0x53d   : > { %v12796_v39 = vcombine.high %v1886_v55, %v1894_v9  ;;  %v12795_v51 = vcombine.low %v1886_v55, %v1894_v9  ;;  %v1997_v9 = vld [vmem:[%s15519_s8 + $0x6a0] sm:$0xff] }
 0x53e   : > { %8433 = vmatpush1.bf16.msra.mxu0 %v13701_v46  ;;  %v1909_v46 = vld [vmem:[%s15519_s8 + $0x3e0] sm:$0xff] }
 0x53f   : > { %8605 = vmatpush1.bf16.msra.mxu1 %v13703_v10  ;;  %8617 = vmatprep.subr.bf16.mxu0 %v12698_v20  ;;  %v1902_v10 = vld [vmem:[%s15519_s8 + $0x3a8] sm:$0xff]  ;;  %v12810_v62 = vcombine.high %v1901_v45, %v1909_v46  ;;  %v12809_v11 = vcombine.low %v1901_v45, %v1909_v46 }
 0x540   : > { %8789 = vmatprep.subr.bf16.mxu1 %v12700_v49  ;;  %v1910_v20 = vld [vmem:[%s15519_s8 + $0x3e8] sm:$0xff]  ;;  %v12793_v49 = vcombine.low %v1885_v44, %v1893_v4 }
 0x541   : > { %8435 = vmatmul.mubr.bf16.vlgmr.msra.gmra.mrb[28].mxu0 %v15949_v31  ;;  %v12811_v41 = vcombine.low %v1902_v10, %v1910_v20 }
 0x542   : > { %8607 = vmatmul.mubr.bf16.vlgmr.msra.gmra.mrb[28].mxu1 %v15949_v31  ;;  %8618 = vmatpush1.bf16.msra.mxu0 %v12697_v63  ;;  %v12812_v63 = vcombine.high %v1902_v10, %v1910_v20  ;;  %v2013_v20 = vld [vmem:[%s15519_s8 + $0x720] sm:$0xff] }
 0x543   : > { %8649 = vmatprep.mubr.bf16.mxu0 %v15863_v43  ;;  %8790 = vmatpush1.bf16.msra.mxu1 %v12699_v5  ;;  %v1918_v5 = vld [vmem:[%s15519_s8 + $0x428] sm:$0xff] }
 0x544   : > { %8821 = vmatprep.mubr.bf16.mxu1 %v15863_v43  ;;  %8619 = vmatprep.subr.bf16.mxu0 %v12714_v22  ;;  %v1926_v22 = vld [vmem:[%s15519_s8 + $0x468] sm:$0xff] }
 0x545   : > { %8791 = vmatprep.subr.bf16.mxu1 %v12716_v0  ;;  %v12826_v0 = vcombine.high %v1917_v59, %v1925_v60  ;;  %v12828_v8 = vcombine.high %v1918_v5, %v1926_v22  ;;  %v12827_v61 = vcombine.low %v1918_v5, %v1926_v22  ;;  %v2029_v22 = vld [vmem:[%s15519_s8 + $0x7a0] sm:$0xff] }
 0x546   : > { %8620 = vmatpush1.bf16.msra.mxu0 %v12713_v16  ;;  %v1941_v16 = vld [vmem:[%s15519_s8 + $0x4e0] sm:$0xff] }
 0x547   : > { %8792 = vmatpush1.bf16.msra.mxu1 %v12715_v7  ;;  %8621 = vmatprep.subr.bf16.mxu0 %v12730_v37  ;;  %v1934_v7 = vld [vmem:[%s15519_s8 + $0x4a8] sm:$0xff]  ;;  %v12842_v42 = vcombine.high %v1933_v56, %v1941_v16 }
 0x548   : > { %8793 = vmatprep.subr.bf16.mxu1 %v12732_v21  ;;  %v1942_v37 = vld [vmem:[%s15519_s8 + $0x4e8] sm:$0xff]  ;;  %v12825_v21 = vcombine.low %v1917_v59, %v1925_v60 }
 0x549   : > { %v12844_v29 = vcombine.high %v1934_v7, %v1942_v37  ;;  %v12843_v32 = vcombine.low %v1934_v7, %v1942_v37  ;;  %v2045_v37 = vld [vmem:[%s15519_s8 + $0x820] sm:$0xff] }
 0x54a   : > { %8622 = vmatpush1.bf16.msra.mxu0 %v12729_v53  ;;  %v1957_v53 = vld [vmem:[%s15519_s8 + $0x560] sm:$0xff] }
 0x54b   : > { %8794 = vmatpush1.bf16.msra.mxu1 %v12731_v35  ;;  %8623 = vmatprep.subr.bf16.mxu0 %v12746_v28  ;;  %v1950_v35 = vld [vmem:[%s15519_s8 + $0x528] sm:$0xff]  ;;  %v12858_v18 = vcombine.high %v1949_v30, %v1957_v53 }
 0x54c   : > { %8795 = vmatprep.subr.bf16.mxu1 %v12748_v15  ;;  %v1958_v28 = vld [vmem:[%s15519_s8 + $0x568] sm:$0xff]  ;;  %v12841_v15 = vcombine.low %v1933_v56, %v1941_v16 }
 0x54d   : > { %v12860_v27 = vcombine.high %v1950_v35, %v1958_v28  ;;  %v12859_v40 = vcombine.low %v1950_v35, %v1958_v28  ;;  %v2061_v28 = vld [vmem:[%s15519_s8 + $0x8a0] sm:$0xff] }
 0x54e   : > { %8624 = vmatpush1.bf16.msra.mxu0 %v12745_v34  ;;  %v1973_v34 = vld [vmem:[%s15519_s8 + $0x5e0] sm:$0xff] }
 0x54f   : > { %8796 = vmatpush1.bf16.msra.mxu1 %v12747_v38  ;;  %8625 = vmatprep.subr.bf16.mxu0 %v12762_v54  ;;  %v1966_v38 = vld [vmem:[%s15519_s8 + $0x5a8] sm:$0xff]  ;;  %v12874_v24 = vcombine.high %v1965_v13, %v1973_v34 }
 0x550   : > { %8797 = vmatprep.subr.bf16.mxu1 %v12764_v14  ;;  %v1974_v54 = vld [vmem:[%s15519_s8 + $0x5e8] sm:$0xff]  ;;  %v12857_v14 = vcombine.low %v1949_v30, %v1957_v53 }
 0x551   : > { %v12876_v19 = vcombine.high %v1966_v38, %v1974_v54  ;;  %v12875_v44 = vcombine.low %v1966_v38, %v1974_v54  ;;  %v2077_v38 = vld [vmem:[%s15519_s8 + $0x920] sm:$0xff] }
 0x552   : > { %8626 = vmatpush1.bf16.msra.mxu0 %v12761_v26  ;;  %v1989_v26 = vld [vmem:[%s15519_s8 + $0x660] sm:$0xff] }
 0x553   : > { %8798 = vmatpush1.bf16.msra.mxu1 %v12763_v36  ;;  %8627 = vmatprep.subr.bf16.mxu0 %v12778_v1  ;;  %v1982_v36 = vld [vmem:[%s15519_s8 + $0x628] sm:$0xff]  ;;  %v12890_v4 = vcombine.high %v1981_v47, %v1989_v26  ;;  %v2085_v54 = vld [vmem:[%s15519_s8 + $0x960] sm:$0xff] }
 0x554   : > { %8799 = vmatprep.subr.bf16.mxu1 %v12780_v2  ;;  %v1990_v1 = vld [vmem:[%s15519_s8 + $0x668] sm:$0xff]  ;;  %v12873_v2 = vcombine.low %v1965_v13, %v1973_v34 }
 0x555   : > { %v12892_v55 = vcombine.high %v1982_v36, %v1990_v1  ;;  %v12891_v45 = vcombine.low %v1982_v36, %v1990_v1  ;;  %v2093_v1 = vld [vmem:[%s15519_s8 + $0x9a0] sm:$0xff] }
 0x556   : > { %8628 = vmatpush1.bf16.msra.mxu0 %v12777_v3  ;;  %v2005_v3 = vld [vmem:[%s15519_s8 + $0x6e0] sm:$0xff] }
 0x557   : > { %8800 = vmatpush1.bf16.msra.mxu1 %v12779_v6  ;;  %8629 = vmatprep.subr.bf16.mxu0 %v12794_v58  ;;  %v1998_v6 = vld [vmem:[%s15519_s8 + $0x6a8] sm:$0xff]  ;;  %v12906_v46 = vcombine.high %v1997_v9, %v2005_v3 }
 0x558   : > { %8801 = vmatprep.subr.bf16.mxu1 %v12796_v39  ;;  %v2006_v58 = vld [vmem:[%s15519_s8 + $0x6e8] sm:$0xff]  ;;  %v12889_v39 = vcombine.low %v1981_v47, %v1989_v26  ;;  %v12986_v26 = vcombine.high %v2077_v38, %v2085_v54 }
 0x559   : > { %v12908_v10 = vcombine.high %v1998_v6, %v2006_v58  ;;  %v12907_v59 = vcombine.low %v1998_v6, %v2006_v58  ;;  %v2109_v58 = vld [vmem:[%s15519_s8 + $0xa20] sm:$0xff] }
 0x55a   : > { %8630 = vmatpush1.bf16.msra.mxu0 %v12793_v49  ;;  %v2021_v49 = vld [vmem:[%s15519_s8 + $0x760] sm:$0xff] }
 0x55b   : > { %8802 = vmatpush1.bf16.msra.mxu1 %v12795_v51  ;;  %8631 = vmatprep.subr.bf16.mxu0 %v12810_v62  ;;  %v2014_v51 = vld [vmem:[%s15519_s8 + $0x728] sm:$0xff]  ;;  %v12922_v60 = vcombine.high %v2013_v20, %v2021_v49 }
 0x55c   : > { %8803 = vmatprep.subr.bf16.mxu1 %v12812_v63  ;;  %v2022_v62 = vld [vmem:[%s15519_s8 + $0x768] sm:$0xff]  ;;  %v12905_v63 = vcombine.low %v1997_v9, %v2005_v3 }
 0x55d   : > { %v12924_v5 = vcombine.high %v2014_v51, %v2022_v62  ;;  %v12923_v56 = vcombine.low %v2014_v51, %v2022_v62  ;;  %v2125_v62 = vld [vmem:[%s15519_s8 + $0xaa0] sm:$0xff] }
 0x55e   : > { %8632 = vmatpush1.bf16.msra.mxu0 %v12809_v11  ;;  %v2037_v11 = vld [vmem:[%s15519_s8 + $0x7e0] sm:$0xff] }
 0x55f   : > { %8804 = vmatpush1.bf16.msra.mxu1 %v12811_v41  ;;  %8633 = vmatprep.subr.bf16.mxu0 %v12826_v0  ;;  %v2030_v41 = vld [vmem:[%s15519_s8 + $0x7a8] sm:$0xff]  ;;  %v12938_v16 = vcombine.high %v2029_v22, %v2037_v11 }
 0x560   : > { %8805 = vmatprep.subr.bf16.mxu1 %v12828_v8  ;;  %v2038_v0 = vld [vmem:[%s15519_s8 + $0x7e8] sm:$0xff]  ;;  %v12921_v8 = vcombine.low %v2013_v20, %v2021_v49 }
 0x561   : > { %v12940_v7 = vcombine.high %v2030_v41, %v2038_v0  ;;  %v12939_v30 = vcombine.low %v2030_v41, %v2038_v0  ;;  %v2141_v0 = vld [vmem:[%s15519_s8 + $0xb20] sm:$0xff] }
 0x562   : > { %8634 = vmatpush1.bf16.msra.mxu0 %v12825_v21  ;;  %v2053_v21 = vld [vmem:[%s15519_s8 + $0x860] sm:$0xff] }
 0x563   : > { %8806 = vmatpush1.bf16.msra.mxu1 %v12827_v61  ;;  %8635 = vmatprep.subr.bf16.mxu0 %v12842_v42  ;;  %v2046_v61 = vld [vmem:[%s15519_s8 + $0x828] sm:$0xff]  ;;  %v12954_v53 = vcombine.high %v2045_v37, %v2053_v21 }
 0x564   : > { %8807 = vmatprep.subr.bf16.mxu1 %v12844_v29  ;;  %v2054_v42 = vld [vmem:[%s15519_s8 + $0x868] sm:$0xff]  ;;  %v12937_v29 = vcombine.low %v2029_v22, %v2037_v11 }
 0x565   : > { %v12956_v35 = vcombine.high %v2046_v61, %v2054_v42  ;;  %v12955_v13 = vcombine.low %v2046_v61, %v2054_v42  ;;  %v2157_v42 = vld [vmem:[%s15519_s8 + $0xba0] sm:$0xff] }
 0x566   : > { %8636 = vmatpush1.bf16.msra.mxu0 %v12841_v15  ;;  %v2069_v15 = vld [vmem:[%s15519_s8 + $0x8e0] sm:$0xff] }
 0x567   : > { %8808 = vmatpush1.bf16.msra.mxu1 %v12843_v32  ;;  %8637 = vmatprep.subr.bf16.mxu0 %v12858_v18  ;;  %v12953_v32 = vcombine.low %v2045_v37, %v2053_v21  ;;  %v2062_v18 = vld [vmem:[%s15519_s8 + $0x8a8] sm:$0xff]  ;;  %v12970_v34 = vcombine.high %v2061_v28, %v2069_v15 }
 0x568   : > { %8809 = vmatprep.subr.bf16.mxu1 %v12860_v27  ;;  %v2070_v27 = vld [vmem:[%s15519_s8 + $0x8e8] sm:$0xff] }
 0x569   : > { %v12971_v47 = vcombine.low %v2062_v18, %v2070_v27 }
 0x56a   : > { %8638 = vmatpush1.bf16.msra.mxu0 %v12857_v14  ;;  %v12972_v14 = vcombine.high %v2062_v18, %v2070_v27  ;;  %v2173_v18 = vld [vmem:[%s15519_s8 + $0xc20] sm:$0xff] }
 0x56b   : > { %8810 = vmatpush1.bf16.msra.mxu1 %v12859_v40  ;;  %8639 = vmatprep.subr.bf16.mxu0 %v12874_v24  ;;  %v2078_v40 = vld [vmem:[%s15519_s8 + $0x928] sm:$0xff]  ;;  %v2181_v27 = vld [vmem:[%s15519_s8 + $0xc60] sm:$0xff] }
 0x56c   : > { %8811 = vmatprep.subr.bf16.mxu1 %v12876_v19  ;;  %v2086_v24 = vld [vmem:[%s15519_s8 + $0x968] sm:$0xff]  ;;  %v12969_v19 = vcombine.low %v2061_v28, %v2069_v15 }
 0x56d   : > { %v12988_v36 = vcombine.high %v2078_v40, %v2086_v24  ;;  %v12987_v9 = vcombine.low %v2078_v40, %v2086_v24  ;;  %v2189_v24 = vld [vmem:[%s15519_s8 + $0xca0] sm:$0xff] }
 0x56e   : > { %8640 = vmatpush1.bf16.msra.mxu0 %v12873_v2  ;;  %v2101_v2 = vld [vmem:[%s15519_s8 + $0x9e0] sm:$0xff] }
 0x56f   : > { %8812 = vmatpush1.bf16.msra.mxu1 %v12875_v44  ;;  %8641 = vmatprep.subr.bf16.mxu0 %v12890_v4  ;;  %v2094_v44 = vld [vmem:[%s15519_s8 + $0x9a8] sm:$0xff]  ;;  %v13002_v3 = vcombine.high %v2093_v1, %v2101_v2 }
 0x570   : > { %8813 = vmatprep.subr.bf16.mxu1 %v12892_v55  ;;  %v2102_v4 = vld [vmem:[%s15519_s8 + $0x9e8] sm:$0xff]  ;;  %v12985_v55 = vcombine.low %v2077_v38, %v2085_v54 }
 0x571   : > { %v13004_v6 = vcombine.high %v2094_v44, %v2102_v4  ;;  %v13003_v20 = vcombine.low %v2094_v44, %v2102_v4  ;;  %v2205_v4 = vld [vmem:[%s15519_s8 + $0xd20] sm:$0xff] }
 0x572   : > { %8642 = vmatpush1.bf16.msra.mxu0 %v12889_v39  ;;  %v2117_v39 = vld [vmem:[%s15519_s8 + $0xa60] sm:$0xff] }
 0x573   : > { %8814 = vmatpush1.bf16.msra.mxu1 %v12891_v45  ;;  %8643 = vmatprep.subr.bf16.mxu0 %v12906_v46  ;;  %v2110_v45 = vld [vmem:[%s15519_s8 + $0xa28] sm:$0xff]  ;;  %v13018_v49 = vcombine.high %v2109_v58, %v2117_v39 }
 0x574   : > { %8815 = vmatprep.subr.bf16.mxu1 %v12908_v10  ;;  %v2118_v46 = vld [vmem:[%s15519_s8 + $0xa68] sm:$0xff]  ;;  %v13001_v10 = vcombine.low %v2093_v1, %v2101_v2 }
 0x575   : > { %v13020_v51 = vcombine.high %v2110_v45, %v2118_v46  ;;  %v13019_v22 = vcombine.low %v2110_v45, %v2118_v46  ;;  %v2221_v46 = vld [vmem:[%s15519_s8 + $0xda0] sm:$0xff] }
 0x576   : > { %8644 = vmatpush1.bf16.msra.mxu0 %v12905_v63  ;;  %v2133_v63 = vld [vmem:[%s15519_s8 + $0xae0] sm:$0xff] }
 0x577   : > { %8816 = vmatpush1.bf16.msra.mxu1 %v12907_v59  ;;  %8645 = vmatprep.subr.bf16.mxu0 %v12922_v60  ;;  %v2126_v59 = vld [vmem:[%s15519_s8 + $0xaa8] sm:$0xff]  ;;  %v13034_v11 = vcombine.high %v2125_v62, %v2133_v63 }
 0x578   : > { %8817 = vmatprep.subr.bf16.mxu1 %v12924_v5  ;;  %v2134_v60 = vld [vmem:[%s15519_s8 + $0xae8] sm:$0xff]  ;;  %v13017_v5 = vcombine.low %v2109_v58, %v2117_v39 }
 0x579   : > { %v13036_v41 = vcombine.high %v2126_v59, %v2134_v60  ;;  %v13035_v37 = vcombine.low %v2126_v59, %v2134_v60  ;;  %v2237_v60 = vld [vmem:[%s15519_s8 + $0xe20] sm:$0xff] }
 0x57a   : > { %8646 = vmatpush1.bf16.msra.mxu0 %v12921_v8  ;;  %v2149_v8 = vld [vmem:[%s15519_s8 + $0xb60] sm:$0xff] }
 0x57b   : > { %8818 = vmatpush1.bf16.msra.mxu1 %v12923_v56  ;;  %8647 = vmatprep.subr.bf16.mxu0 %v12938_v16  ;;  %v2142_v56 = vld [vmem:[%s15519_s8 + $0xb28] sm:$0xff]  ;;  %v13050_v21 = vcombine.high %v2141_v0, %v2149_v8 }
 0x57c   : > { %8819 = vmatprep.subr.bf16.mxu1 %v12940_v7  ;;  %v2150_v16 = vld [vmem:[%s15519_s8 + $0xb68] sm:$0xff]  ;;  %v13033_v7 = vcombine.low %v2125_v62, %v2133_v63 }
 0x57d   : > { %v13052_v61 = vcombine.high %v2142_v56, %v2150_v16  ;;  %v13051_v28 = vcombine.low %v2142_v56, %v2150_v16  ;;  %v2253_v16 = vld [vmem:[%s15519_s8 + $0xea0] sm:$0xff] }
 0x57e   : > { %8648 = vmatpush1.bf16.msra.mxu0 %v12937_v29  ;;  %v2165_v29 = vld [vmem:[%s15519_s8 + $0xbe0] sm:$0xff] }
 0x57f   : > { %8820 = vmatpush1.bf16.msra.mxu1 %v12939_v30  ;;  %8660 = vmatprep.subr.bf16.mxu0 %v12954_v53  ;;  %v2158_v30 = vld [vmem:[%s15519_s8 + $0xba8] sm:$0xff]  ;;  %v13066_v15 = vcombine.high %v2157_v42, %v2165_v29  ;;  %v13065_v38 = vcombine.low %v2157_v42, %v2165_v29 }
 0x580   : > { %8832 = vmatprep.subr.bf16.mxu1 %v12956_v35  ;;  %v2166_v53 = vld [vmem:[%s15519_s8 + $0xbe8] sm:$0xff]  ;;  %v13049_v35 = vcombine.low %v2141_v0, %v2149_v8 }
 0x581   : > { %8650 = vmatmul.mubr.bf16.vlgmr.msra.gmra.mrb[32].mxu0 %v15861_v25  ;;  %v13067_v54 = vcombine.low %v2158_v30, %v2166_v53 }
 0x582   : > { %8822 = vmatmul.mubr.bf16.vlgmr.msra.gmra.mrb[32].mxu1 %v15861_v25  ;;  %8661 = vmatpush1.bf16.msra.mxu0 %v12953_v32  ;;  %v13068_v32 = vcombine.high %v2158_v30, %v2166_v53  ;;  %v2269_v53 = vld [vmem:[%s15519_s8 + $0xf20] sm:$0xff] }
 0x583   : > { %8692 = vmatprep.mubr.bf16.mxu0 %v15878_v57  ;;  %8833 = vmatpush1.bf16.msra.mxu1 %v12955_v13  ;;  %v2174_v13 = vld [vmem:[%s15519_s8 + $0xc28] sm:$0xff] }
 0x584   : > { %8864 = vmatprep.mubr.bf16.mxu1 %v15878_v57  ;;  %8662 = vmatprep.subr.bf16.mxu0 %v12970_v34  ;;  %v2182_v34 = vld [vmem:[%s15519_s8 + $0xc68] sm:$0xff] }
 0x585   : > { %8834 = vmatprep.subr.bf16.mxu1 %v12972_v14  ;;  %v13082_v14 = vcombine.high %v2173_v18, %v2181_v27  ;;  %v13084_v40 = vcombine.high %v2174_v13, %v2182_v34  ;;  %v13083_v1 = vcombine.low %v2174_v13, %v2182_v34  ;;  %v2285_v34 = vld [vmem:[%s15519_s8 + $0xfa0] sm:$0xff] }
 0x586   : > { %8663 = vmatpush1.bf16.msra.mxu0 %v12969_v19  ;;  %v2197_v19 = vld [vmem:[%s15519_s8 + $0xce0] sm:$0xff] }
 0x587   : > { %8835 = vmatpush1.bf16.msra.mxu1 %v12971_v47  ;;  %8664 = vmatprep.subr.bf16.mxu0 %v12986_v26  ;;  %v2190_v47 = vld [vmem:[%s15519_s8 + $0xca8] sm:$0xff]  ;;  %v13098_v2 = vcombine.high %v2189_v24, %v2197_v19 }
 0x588   : > { %8836 = vmatprep.subr.bf16.mxu1 %v12988_v36  ;;  %v2198_v26 = vld [vmem:[%s15519_s8 + $0xce8] sm:$0xff]  ;;  %v13081_v36 = vcombine.low %v2173_v18, %v2181_v27 }
 0x589   : > { %v13100_v44 = vcombine.high %v2190_v47, %v2198_v26  ;;  %v13099_v58 = vcombine.low %v2190_v47, %v2198_v26  ;;  %v2301_v26 = vld [vmem:[%s15519_s8 + $0x1020] sm:$0xff] }
 0x58a   : > { %8665 = vmatpush1.bf16.msra.mxu0 %v12985_v55  ;;  %v2213_v55 = vld [vmem:[%s15519_s8 + $0xd60] sm:$0xff] }
 0x58b   : > { %8837 = vmatpush1.bf16.msra.mxu1 %v12987_v9  ;;  %8666 = vmatprep.subr.bf16.mxu0 %v13002_v3  ;;  %v2206_v9 = vld [vmem:[%s15519_s8 + $0xd28] sm:$0xff]  ;;  %v13114_v39 = vcombine.high %v2205_v4, %v2213_v55 }
 0x58c   : > { %8838 = vmatprep.subr.bf16.mxu1 %v13004_v6  ;;  %v2214_v3 = vld [vmem:[%s15519_s8 + $0xd68] sm:$0xff]  ;;  %v13097_v6 = vcombine.low %v2189_v24, %v2197_v19 }
 0x58d   : > { %v13116_v45 = vcombine.high %v2206_v9, %v2214_v3  ;;  %v13115_v62 = vcombine.low %v2206_v9, %v2214_v3  ;;  %v2317_v3 = vld [vmem:[%s15519_s8 + $0x10a0] sm:$0xff] }
 0x58e   : > { %8667 = vmatpush1.bf16.msra.mxu0 %v13001_v10  ;;  %v2229_v10 = vld [vmem:[%s15519_s8 + $0xde0] sm:$0xff] }
 0x58f   : > { %8839 = vmatpush1.bf16.msra.mxu1 %v13003_v20  ;;  %8668 = vmatprep.subr.bf16.mxu0 %v13018_v49  ;;  %v2222_v20 = vld [vmem:[%s15519_s8 + $0xda8] sm:$0xff]  ;;  %v13130_v63 = vcombine.high %v2221_v46, %v2229_v10 }
 0x590   : > { %8840 = vmatprep.subr.bf16.mxu1 %v13020_v51  ;;  %v2230_v49 = vld [vmem:[%s15519_s8 + $0xde8] sm:$0xff]  ;;  %v13113_v51 = vcombine.low %v2205_v4, %v2213_v55 }
 0x591   : > { %v13132_v59 = vcombine.high %v2222_v20, %v2230_v49  ;;  %v13131_v0 = vcombine.low %v2222_v20, %v2230_v49  ;;  %v2333_v20 = vld [vmem:[%s15519_s8 + $0x1120] sm:$0xff] }
 0x592   : > { %8669 = vmatpush1.bf16.msra.mxu0 %v13017_v5  ;;  %v2245_v5 = vld [vmem:[%s15519_s8 + $0xe60] sm:$0xff] }
 0x593   : > { %8841 = vmatpush1.bf16.msra.mxu1 %v13019_v22  ;;  %8670 = vmatprep.subr.bf16.mxu0 %v13034_v11  ;;  %v2238_v22 = vld [vmem:[%s15519_s8 + $0xe28] sm:$0xff]  ;;  %v13146_v8 = vcombine.high %v2237_v60, %v2245_v5  ;;  %v2341_v49 = vld [vmem:[%s15519_s8 + $0x1160] sm:$0xff] }
 0x594   : > { %8842 = vmatprep.subr.bf16.mxu1 %v13036_v41  ;;  %v2246_v11 = vld [vmem:[%s15519_s8 + $0xe68] sm:$0xff]  ;;  %v13129_v41 = vcombine.low %v2221_v46, %v2229_v10 }
 0x595   : > { %v13148_v56 = vcombine.high %v2238_v22, %v2246_v11  ;;  %v13147_v42 = vcombine.low %v2238_v22, %v2246_v11  ;;  %v2349_v11 = vld [vmem:[%s15519_s8 + $0x11a0] sm:$0xff] }
 0x596   : > { %8671 = vmatpush1.bf16.msra.mxu0 %v13033_v7  ;;  %v2261_v7 = vld [vmem:[%s15519_s8 + $0xee0] sm:$0xff] }
 0x597   : > { %8843 = vmatpush1.bf16.msra.mxu1 %v13035_v37  ;;  %8672 = vmatprep.subr.bf16.mxu0 %v13050_v21  ;;  %v2254_v37 = vld [vmem:[%s15519_s8 + $0xea8] sm:$0xff]  ;;  %v13162_v29 = vcombine.high %v2253_v16, %v2261_v7 }
 0x598   : > { %8844 = vmatprep.subr.bf16.mxu1 %v13052_v61  ;;  %v2262_v21 = vld [vmem:[%s15519_s8 + $0xee8] sm:$0xff]  ;;  %v13145_v61 = vcombine.low %v2237_v60, %v2245_v5  ;;  %v13242_v5 = vcombine.high %v2333_v20, %v2341_v49 }
 0x599   : > { %v13164_v30 = vcombine.high %v2254_v37, %v2262_v21  ;;  %v13163_v18 = vcombine.low %v2254_v37, %v2262_v21  ;;  %v2365_v21 = vld [vmem:[%s15519_s8 + $0x1220] sm:$0xff] }
 0x59a   : > { %8673 = vmatpush1.bf16.msra.mxu0 %v13049_v35  ;;  %v2277_v35 = vld [vmem:[%s15519_s8 + $0xf60] sm:$0xff] }
 0x59b   : > { %8845 = vmatpush1.bf16.msra.mxu1 %v13051_v28  ;;  %8674 = vmatprep.subr.bf16.mxu0 %v13066_v15  ;;  %v2270_v28 = vld [vmem:[%s15519_s8 + $0xf28] sm:$0xff]  ;;  %v13178_v27 = vcombine.high %v2269_v53, %v2277_v35 }
 0x59c   : > { %8846 = vmatprep.subr.bf16.mxu1 %v13068_v32  ;;  %v2278_v15 = vld [vmem:[%s15519_s8 + $0xf68] sm:$0xff]  ;;  %v13161_v32 = vcombine.low %v2253_v16, %v2261_v7 }
 0x59d   : > { %v13180_v13 = vcombine.high %v2270_v28, %v2278_v15  ;;  %v13179_v24 = vcombine.low %v2270_v28, %v2278_v15  ;;  %v2381_v15 = vld [vmem:[%s15519_s8 + $0x12a0] sm:$0xff] }
 0x59e   : > { %8675 = vmatpush1.bf16.msra.mxu0 %v13065_v38  ;;  %v2293_v38 = vld [vmem:[%s15519_s8 + $0xfe0] sm:$0xff] }
 0x59f   : > { %8847 = vmatpush1.bf16.msra.mxu1 %v13067_v54  ;;  %8676 = vmatprep.subr.bf16.mxu0 %v13082_v14  ;;  %v2286_v54 = vld [vmem:[%s15519_s8 + $0xfa8] sm:$0xff]  ;;  %v13194_v19 = vcombine.high %v2285_v34, %v2293_v38 }
 0x5a0   : > { %8848 = vmatprep.subr.bf16.mxu1 %v13084_v40  ;;  %v2294_v14 = vld [vmem:[%s15519_s8 + $0xfe8] sm:$0xff]  ;;  %v13177_v40 = vcombine.low %v2269_v53, %v2277_v35 }
 0x5a1   : > { %v13196_v47 = vcombine.high %v2286_v54, %v2294_v14  ;;  %v13195_v4 = vcombine.low %v2286_v54, %v2294_v14  ;;  %v2397_v14 = vld [vmem:[%s15519_s8 + $0x1320] sm:$0xff] }
 0x5a2   : > { %8677 = vmatpush1.bf16.msra.mxu0 %v13081_v36  ;;  %v2309_v36 = vld [vmem:[%s15519_s8 + $0x1060] sm:$0xff] }
 0x5a3   : > { %8849 = vmatpush1.bf16.msra.mxu1 %v13083_v1  ;;  %8678 = vmatprep.subr.bf16.mxu0 %v13098_v2  ;;  %v2302_v1 = vld [vmem:[%s15519_s8 + $0x1028] sm:$0xff]  ;;  %v13210_v55 = vcombine.high %v2301_v26, %v2309_v36 }
 0x5a4   : > { %8850 = vmatprep.subr.bf16.mxu1 %v13100_v44  ;;  %v2310_v2 = vld [vmem:[%s15519_s8 + $0x1068] sm:$0xff]  ;;  %v13193_v44 = vcombine.low %v2285_v34, %v2293_v38 }
 0x5a5   : > { %v13212_v9 = vcombine.high %v2302_v1, %v2310_v2  ;;  %v13211_v46 = vcombine.low %v2302_v1, %v2310_v2  ;;  %v2413_v2 = vld [vmem:[%s15519_s8 + $0x13a0] sm:$0xff] }
 0x5a6   : > { %8679 = vmatpush1.bf16.msra.mxu0 %v13097_v6  ;;  %v2325_v6 = vld [vmem:[%s15519_s8 + $0x10e0] sm:$0xff] }
 0x5a7   : > { %8851 = vmatpush1.bf16.msra.mxu1 %v13099_v58  ;;  %8680 = vmatprep.subr.bf16.mxu0 %v13114_v39  ;;  %v13209_v58 = vcombine.low %v2301_v26, %v2309_v36  ;;  %v2318_v39 = vld [vmem:[%s15519_s8 + $0x10a8] sm:$0xff]  ;;  %v13226_v10 = vcombine.high %v2317_v3, %v2325_v6 }
 0x5a8   : > { %8852 = vmatprep.subr.bf16.mxu1 %v13116_v45  ;;  %v2326_v45 = vld [vmem:[%s15519_s8 + $0x10e8] sm:$0xff] }
 0x5a9   : > { %v13227_v60 = vcombine.low %v2318_v39, %v2326_v45 }
 0x5aa   : > { %8681 = vmatpush1.bf16.msra.mxu0 %v13113_v51  ;;  %v13228_v51 = vcombine.high %v2318_v39, %v2326_v45  ;;  %v2429_v39 = vld [vmem:[%s15519_s8 + $0x1420] sm:$0xff] }
 0x5ab   : > { %8853 = vmatpush1.bf16.msra.mxu1 %v13115_v62  ;;  %8682 = vmatprep.subr.bf16.mxu0 %v13130_v63  ;;  %v2334_v62 = vld [vmem:[%s15519_s8 + $0x1128] sm:$0xff]  ;;  %v2437_v45 = vld [vmem:[%s15519_s8 + $0x1460] sm:$0xff] }
 0x5ac   : > { %8854 = vmatprep.subr.bf16.mxu1 %v13132_v59  ;;  %v2342_v63 = vld [vmem:[%s15519_s8 + $0x1168] sm:$0xff]  ;;  %v13225_v59 = vcombine.low %v2317_v3, %v2325_v6 }
 0x5ad   : > { %v13244_v22 = vcombine.high %v2334_v62, %v2342_v63  ;;  %v13243_v16 = vcombine.low %v2334_v62, %v2342_v63  ;;  %v2445_v63 = vld [vmem:[%s15519_s8 + $0x14a0] sm:$0xff] }
 0x5ae   : > { %8683 = vmatpush1.bf16.msra.mxu0 %v13129_v41  ;;  %v2357_v41 = vld [vmem:[%s15519_s8 + $0x11e0] sm:$0xff] }
 0x5af   : > { %8855 = vmatpush1.bf16.msra.mxu1 %v13131_v0  ;;  %8684 = vmatprep.subr.bf16.mxu0 %v13146_v8  ;;  %v2350_v0 = vld [vmem:[%s15519_s8 + $0x11a8] sm:$0xff]  ;;  %v13258_v7 = vcombine.high %v2349_v11, %v2357_v41 }
 0x5b0   : > { %8856 = vmatprep.subr.bf16.mxu1 %v13148_v56  ;;  %v2358_v8 = vld [vmem:[%s15519_s8 + $0x11e8] sm:$0xff]  ;;  %v13241_v56 = vcombine.low %v2333_v20, %v2341_v49 }
 0x5b1   : > { %v13260_v37 = vcombine.high %v2350_v0, %v2358_v8  ;;  %v13259_v53 = vcombine.low %v2350_v0, %v2358_v8  ;;  %v2461_v8 = vld [vmem:[%s15519_s8 + $0x1520] sm:$0xff] }
 0x5b2   : > { %8685 = vmatpush1.bf16.msra.mxu0 %v13145_v61  ;;  %v2373_v61 = vld [vmem:[%s15519_s8 + $0x1260] sm:$0xff] }
 0x5b3   : > { %8857 = vmatpush1.bf16.msra.mxu1 %v13147_v42  ;;  %8686 = vmatprep.subr.bf16.mxu0 %v13162_v29  ;;  %v2366_v42 = vld [vmem:[%s15519_s8 + $0x1228] sm:$0xff]  ;;  %v13274_v35 = vcombine.high %v2365_v21, %v2373_v61 }
 0x5b4   : > { %8858 = vmatprep.subr.bf16.mxu1 %v13164_v30  ;;  %v2374_v29 = vld [vmem:[%s15519_s8 + $0x1268] sm:$0xff]  ;;  %v13257_v30 = vcombine.low %v2349_v11, %v2357_v41 }
 0x5b5   : > { %v13276_v28 = vcombine.high %v2366_v42, %v2374_v29  ;;  %v13275_v34 = vcombine.low %v2366_v42, %v2374_v29  ;;  %v2477_v29 = vld [vmem:[%s15519_s8 + $0x15a0] sm:$0xff] }
 0x5b6   : > { %8687 = vmatpush1.bf16.msra.mxu0 %v13161_v32  ;;  %v2389_v32 = vld [vmem:[%s15519_s8 + $0x12e0] sm:$0xff] }
 0x5b7   : > { %8859 = vmatpush1.bf16.msra.mxu1 %v13163_v18  ;;  %8688 = vmatprep.subr.bf16.mxu0 %v13178_v27  ;;  %v2382_v18 = vld [vmem:[%s15519_s8 + $0x12a8] sm:$0xff]  ;;  %v13290_v38 = vcombine.high %v2381_v15, %v2389_v32 }
 0x5b8   : > { %8860 = vmatprep.subr.bf16.mxu1 %v13180_v13  ;;  %v2390_v27 = vld [vmem:[%s15519_s8 + $0x12e8] sm:$0xff]  ;;  %v13273_v13 = vcombine.low %v2365_v21, %v2373_v61 }
 0x5b9   : > { %v13292_v54 = vcombine.high %v2382_v18, %v2390_v27  ;;  %v13291_v26 = vcombine.low %v2382_v18, %v2390_v27  ;;  %v2493_v27 = vld [vmem:[%s15519_s8 + $0x1620] sm:$0xff] }
 0x5ba   : > { %8689 = vmatpush1.bf16.msra.mxu0 %v13177_v40  ;;  %v2405_v40 = vld [vmem:[%s15519_s8 + $0x1360] sm:$0xff] }
 0x5bb   : > { %8861 = vmatpush1.bf16.msra.mxu1 %v13179_v24  ;;  %8690 = vmatprep.subr.bf16.mxu0 %v13194_v19  ;;  %v2398_v24 = vld [vmem:[%s15519_s8 + $0x1328] sm:$0xff]  ;;  %v13306_v36 = vcombine.high %v2397_v14, %v2405_v40 }
 0x5bc   : > { %8862 = vmatprep.subr.bf16.mxu1 %v13196_v47  ;;  %v2406_v19 = vld [vmem:[%s15519_s8 + $0x1368] sm:$0xff]  ;;  %v13289_v47 = vcombine.low %v2381_v15, %v2389_v32 }
 0x5bd   : > { %v13308_v1 = vcombine.high %v2398_v24, %v2406_v19  ;;  %v13307_v3 = vcombine.low %v2398_v24, %v2406_v19  ;;  %v2509_v19 = vld [vmem:[%s15519_s8 + $0x16a0] sm:$0xff] }
 0x5be   : > { %8691 = vmatpush1.bf16.msra.mxu0 %v13193_v44  ;;  %v2421_v44 = vld [vmem:[%s15519_s8 + $0x13e0] sm:$0xff] }
 0x5bf   : > { %8863 = vmatpush1.bf16.msra.mxu1 %v13195_v4  ;;  %8703 = vmatprep.subr.bf16.mxu0 %v13210_v55  ;;  %v2414_v4 = vld [vmem:[%s15519_s8 + $0x13a8] sm:$0xff]  ;;  %v13322_v6 = vcombine.high %v2413_v2, %v2421_v44  ;;  %v13321_v20 = vcombine.low %v2413_v2, %v2421_v44 }
 0x5c0   : > { %8875 = vmatprep.subr.bf16.mxu1 %v13212_v9  ;;  %v2422_v55 = vld [vmem:[%s15519_s8 + $0x13e8] sm:$0xff]  ;;  %v13305_v9 = vcombine.low %v2397_v14, %v2405_v40 }
 0x5c1   : > { %8693 = vmatmul.mubr.bf16.vlgmr.msra.gmra.mrb[32].mxu0 %v15866_v52  ;;  %v13323_v49 = vcombine.low %v2414_v4, %v2422_v55 }
 0x5c2   : > { %8865 = vmatmul.mubr.bf16.vlgmr.msra.gmra.mrb[32].mxu1 %v15866_v52  ;;  %8704 = vmatpush1.bf16.msra.mxu0 %v13209_v58  ;;  %v13324_v58 = vcombine.high %v2414_v4, %v2422_v55  ;;  %v2525_v55 = vld [vmem:[%s15519_s8 + $0x1720] sm:$0xff] }
 0x5c3   : > { %8735 = vmatprep.mubr.bf16.mxu0 %v15939_v23  ;;  %8876 = vmatpush1.bf16.msra.mxu1 %v13211_v46  ;;  %v2430_v46 = vld [vmem:[%s15519_s8 + $0x1428] sm:$0xff] }
 0x5c4   : > { %8907 = vmatprep.mubr.bf16.mxu1 %v15939_v23  ;;  %8705 = vmatprep.subr.bf16.mxu0 %v13226_v10  ;;  %v2438_v10 = vld [vmem:[%s15519_s8 + $0x1468] sm:$0xff] }
 0x5c5   : > { %8877 = vmatprep.subr.bf16.mxu1 %v13228_v51  ;;  %v13338_v51 = vcombine.high %v2429_v39, %v2437_v45  ;;  %v13340_v62 = vcombine.high %v2430_v46, %v2438_v10  ;;  %v13339_v11 = vcombine.low %v2430_v46, %v2438_v10  ;;  %v2541_v10 = vld [vmem:[%s15519_s8 + $0x17a0] sm:$0xff] }
 0x5c6   : > { %8706 = vmatpush1.bf16.msra.mxu0 %v13225_v59  ;;  %v2453_v59 = vld [vmem:[%s15519_s8 + $0x14e0] sm:$0xff] }
 0x5c7   : > { %8878 = vmatpush1.bf16.msra.mxu1 %v13227_v60  ;;  %8707 = vmatprep.subr.bf16.mxu0 %v13242_v5  ;;  %v2446_v60 = vld [vmem:[%s15519_s8 + $0x14a8] sm:$0xff]  ;;  %v13354_v41 = vcombine.high %v2445_v63, %v2453_v59 }
 0x5c8   : > { %8879 = vmatprep.subr.bf16.mxu1 %v13244_v22  ;;  %v2454_v5 = vld [vmem:[%s15519_s8 + $0x14e8] sm:$0xff]  ;;  %v13337_v22 = vcombine.low %v2429_v39, %v2437_v45 }
 0x5c9   : > { %v13356_v0 = vcombine.high %v2446_v60, %v2454_v5  ;;  %v13355_v21 = vcombine.low %v2446_v60, %v2454_v5  ;;  %v2557_v5 = vld [vmem:[%s15519_s8 + $0x1820] sm:$0xff] }
 0x5ca   : > { %8708 = vmatpush1.bf16.msra.mxu0 %v13241_v56  ;;  %v2469_v56 = vld [vmem:[%s15519_s8 + $0x1560] sm:$0xff] }
 0x5cb   : > { %8880 = vmatpush1.bf16.msra.mxu1 %v13243_v16  ;;  %8709 = vmatprep.subr.bf16.mxu0 %v13258_v7  ;;  %v2462_v16 = vld [vmem:[%s15519_s8 + $0x1528] sm:$0xff]  ;;  %v13370_v61 = vcombine.high %v2461_v8, %v2469_v56 }
 0x5cc   : > { %8881 = vmatprep.subr.bf16.mxu1 %v13260_v37  ;;  %v2470_v7 = vld [vmem:[%s15519_s8 + $0x1568] sm:$0xff]  ;;  %v13353_v37 = vcombine.low %v2445_v63, %v2453_v59 }
 0x5cd   : > { %v13372_v42 = vcombine.high %v2462_v16, %v2470_v7  ;;  %v13371_v15 = vcombine.low %v2462_v16, %v2470_v7  ;;  %v2573_v7 = vld [vmem:[%s15519_s8 + $0x18a0] sm:$0xff] }
 0x5ce   : > { %8710 = vmatpush1.bf16.msra.mxu0 %v13257_v30  ;;  %v2485_v30 = vld [vmem:[%s15519_s8 + $0x15e0] sm:$0xff] }
 0x5cf   : > { %8882 = vmatpush1.bf16.msra.mxu1 %v13259_v53  ;;  %8711 = vmatprep.subr.bf16.mxu0 %v13274_v35  ;;  %v2478_v53 = vld [vmem:[%s15519_s8 + $0x15a8] sm:$0xff]  ;;  %v13386_v32 = vcombine.high %v2477_v29, %v2485_v30 }
 0x5d0   : > { %8883 = vmatprep.subr.bf16.mxu1 %v13276_v28  ;;  %v2486_v35 = vld [vmem:[%s15519_s8 + $0x15e8] sm:$0xff]  ;;  %v13369_v28 = vcombine.low %v2461_v8, %v2469_v56 }
 0x5d1   : > { %v13388_v18 = vcombine.high %v2478_v53, %v2486_v35  ;;  %v13387_v14 = vcombine.low %v2478_v53, %v2486_v35  ;;  %v2589_v53 = vld [vmem:[%s15519_s8 + $0x1920] sm:$0xff] }
 0x5d2   : > { %8712 = vmatpush1.bf16.msra.mxu0 %v13273_v13  ;;  %v2501_v13 = vld [vmem:[%s15519_s8 + $0x1660] sm:$0xff] }
 0x5d3   : > { %8884 = vmatpush1.bf16.msra.mxu1 %v13275_v34  ;;  %8713 = vmatprep.subr.bf16.mxu0 %v13290_v38  ;;  %v2494_v34 = vld [vmem:[%s15519_s8 + $0x1628] sm:$0xff]  ;;  %v13402_v40 = vcombine.high %v2493_v27, %v2501_v13  ;;  %v2597_v35 = vld [vmem:[%s15519_s8 + $0x1960] sm:$0xff] }
 0x5d4   : > { %8885 = vmatprep.subr.bf16.mxu1 %v13292_v54  ;;  %v2502_v38 = vld [vmem:[%s15519_s8 + $0x1668] sm:$0xff]  ;;  %v13385_v54 = vcombine.low %v2477_v29, %v2485_v30 }
 0x5d5   : > { %v13404_v24 = vcombine.high %v2494_v34, %v2502_v38  ;;  %v13403_v2 = vcombine.low %v2494_v34, %v2502_v38  ;;  %v2605_v38 = vld [vmem:[%s15519_s8 + $0x19a0] sm:$0xff] }
 0x5d6   : > { %8714 = vmatpush1.bf16.msra.mxu0 %v13289_v47  ;;  %v2517_v47 = vld [vmem:[%s15519_s8 + $0x16e0] sm:$0xff] }
 0x5d7   : > { %8886 = vmatpush1.bf16.msra.mxu1 %v13291_v26  ;;  %8715 = vmatprep.subr.bf16.mxu0 %v13306_v36  ;;  %v2510_v26 = vld [vmem:[%s15519_s8 + $0x16a8] sm:$0xff]  ;;  %v13418_v44 = vcombine.high %v2509_v19, %v2517_v47 }
 0x5d8   : > { %8887 = vmatprep.subr.bf16.mxu1 %v13308_v1  ;;  %v2518_v36 = vld [vmem:[%s15519_s8 + $0x16e8] sm:$0xff]  ;;  %v13401_v1 = vcombine.low %v2493_v27, %v2501_v13  ;;  %v13498_v13 = vcombine.high %v2589_v53, %v2597_v35 }
 0x5d9   : > { %v13420_v4 = vcombine.high %v2510_v26, %v2518_v36  ;;  %v13419_v39 = vcombine.low %v2510_v26, %v2518_v36  ;;  %v2621_v36 = vld [vmem:[%s15519_s8 + $0x1a20] sm:$0xff] }
 0x5da   : > { %8716 = vmatpush1.bf16.msra.mxu0 %v13305_v9  ;;  %v2533_v9 = vld [vmem:[%s15519_s8 + $0x1760] sm:$0xff] }
 0x5db   : > { %8888 = vmatpush1.bf16.msra.mxu1 %v13307_v3  ;;  %8717 = vmatprep.subr.bf16.mxu0 %v13322_v6  ;;  %v2526_v3 = vld [vmem:[%s15519_s8 + $0x1728] sm:$0xff]  ;;  %v13434_v45 = vcombine.high %v2525_v55, %v2533_v9 }
 0x5dc   : > { %8889 = vmatprep.subr.bf16.mxu1 %v13324_v58  ;;  %v2534_v6 = vld [vmem:[%s15519_s8 + $0x1768] sm:$0xff]  ;;  %v13417_v58 = vcombine.low %v2509_v19, %v2517_v47 }
 0x5dd   : > { %v13436_v46 = vcombine.high %v2526_v3, %v2534_v6  ;;  %v13435_v63 = vcombine.low %v2526_v3, %v2534_v6  ;;  %v2637_v6 = vld [vmem:[%s15519_s8 + $0x1aa0] sm:$0xff] }
 0x5de   : > { %8718 = vmatpush1.bf16.msra.mxu0 %v13321_v20  ;;  %v2549_v20 = vld [vmem:[%s15519_s8 + $0x17e0] sm:$0xff] }
 0x5df   : > { %8890 = vmatpush1.bf16.msra.mxu1 %v13323_v49  ;;  %8719 = vmatprep.subr.bf16.mxu0 %v13338_v51  ;;  %v2542_v49 = vld [vmem:[%s15519_s8 + $0x17a8] sm:$0xff]  ;;  %v13450_v59 = vcombine.high %v2541_v10, %v2549_v20 }
 0x5e0   : > { %8891 = vmatprep.subr.bf16.mxu1 %v13340_v62  ;;  %v2550_v51 = vld [vmem:[%s15519_s8 + $0x17e8] sm:$0xff]  ;;  %v13433_v62 = vcombine.low %v2525_v55, %v2533_v9 }
 0x5e1   : > { %v13452_v60 = vcombine.high %v2542_v49, %v2550_v51  ;;  %v13451_v8 = vcombine.low %v2542_v49, %v2550_v51  ;;  %v2653_v51 = vld [vmem:[%s15519_s8 + $0x1b20] sm:$0xff] }
 0x5e2   : > { %8720 = vmatpush1.bf16.msra.mxu0 %v13337_v22  ;;  %v2565_v22 = vld [vmem:[%s15519_s8 + $0x1860] sm:$0xff] }
 0x5e3   : > { %8892 = vmatpush1.bf16.msra.mxu1 %v13339_v11  ;;  %8721 = vmatprep.subr.bf16.mxu0 %v13354_v41  ;;  %v2558_v11 = vld [vmem:[%s15519_s8 + $0x1828] sm:$0xff]  ;;  %v13466_v56 = vcombine.high %v2557_v5, %v2565_v22 }
 0x5e4   : > { %8893 = vmatprep.subr.bf16.mxu1 %v13356_v0  ;;  %v2566_v41 = vld [vmem:[%s15519_s8 + $0x1868] sm:$0xff]  ;;  %v13449_v0 = vcombine.low %v2541_v10, %v2549_v20 }
 0x5e5   : > { %v13468_v16 = vcombine.high %v2558_v11, %v2566_v41  ;;  %v13467_v29 = vcombine.low %v2558_v11, %v2566_v41  ;;  %v1750_v11 = vld [vmem:[#allocation2 + $0x28] sm:$0xff]  ;;  %v1752_v41 = vld [vmem:[#allocation2 + $0x38] sm:$0xff] }
 0x5e6   : > { %8722 = vmatpush1.bf16.msra.mxu0 %v13353_v37  ;;  %v2581_v37 = vld [vmem:[%s15519_s8 + $0x18e0] sm:$0xff] }
 0x5e7   : > { %8894 = vmatpush1.bf16.msra.mxu1 %v13355_v21  ;;  %8723 = vmatprep.subr.bf16.mxu0 %v13370_v61  ;;  %v13465_v21 = vcombine.low %v2557_v5, %v2565_v22  ;;  %v2574_v61 = vld [vmem:[%s15519_s8 + $0x18a8] sm:$0xff]  ;;  %v13482_v30 = vcombine.high %v2573_v7, %v2581_v37  ;;  %v1751_v5 = vld [vmem:[#allocation2 + $0x30] sm:$0xff] }
 0x5e8   : > { %8895 = vmatprep.subr.bf16.mxu1 %v13372_v42  ;;  %v2582_v42 = vld [vmem:[%s15519_s8 + $0x18e8] sm:$0xff] }
 0x5e9   : > { %v13483_v27 = vcombine.low %v2574_v61, %v2582_v42 }
 0x5ea   : > { %8724 = vmatpush1.bf16.msra.mxu0 %v13369_v28  ;;  %v13484_v28 = vcombine.high %v2574_v61, %v2582_v42  ;;  %v2677_v61 = vld [vmem:[%s15519_s8 + $0x1be0] sm:$0xff] }
 0x5eb   : > { %8896 = vmatpush1.bf16.msra.mxu1 %v13371_v15  ;;  %8725 = vmatprep.subr.bf16.mxu0 %v13386_v32  ;;  %v2590_v15 = vld [vmem:[%s15519_s8 + $0x1928] sm:$0xff] }
 0x5ec   : > { %8897 = vmatprep.subr.bf16.mxu1 %v13388_v18  ;;  %v2598_v32 = vld [vmem:[%s15519_s8 + $0x1968] sm:$0xff]  ;;  %v13481_v18 = vcombine.low %v2573_v7, %v2581_v37  ;;  %v1767_v7 = vld [vmem:[#allocation2 + $0xb0] sm:$0xff] }
 0x5ed   : > { %v13500_v34 = vcombine.high %v2590_v15, %v2598_v32  ;;  %v13499_v19 = vcombine.low %v2590_v15, %v2598_v32 }
 0x5ee   : > { %8726 = vmatpush1.bf16.msra.mxu0 %v13385_v54  ;;  %v2613_v54 = vld [vmem:[%s15519_s8 + $0x19e0] sm:$0xff] }
 0x5ef   : > { %8898 = vmatpush1.bf16.msra.mxu1 %v13387_v14  ;;  %8727 = vmatprep.subr.bf16.mxu0 %v13402_v40  ;;  %v2606_v14 = vld [vmem:[%s15519_s8 + $0x19a8] sm:$0xff]  ;;  %v13514_v47 = vcombine.high %v2605_v38, %v2613_v54 }
 0x5f0   : > { %8899 = vmatprep.subr.bf16.mxu1 %v13404_v24  ;;  %v2614_v40 = vld [vmem:[%s15519_s8 + $0x19e8] sm:$0xff]  ;;  %v13497_v24 = vcombine.low %v2589_v53, %v2597_v35  ;;  %v1766_v53 = vld [vmem:[#allocation2 + $0xa8] sm:$0xff] }
 0x5f1   : > { %v13516_v26 = vcombine.high %v2606_v14, %v2614_v40  ;;  %v13515_v55 = vcombine.low %v2606_v14, %v2614_v40  ;;  %v2670_v35 = vld [vmem:[%s15519_s8 + $0x1ba8] sm:$0xff] }
 0x5f2   : > { %8728 = vmatpush1.bf16.msra.mxu0 %v13401_v1  ;;  %v2629_v1 = vld [vmem:[%s15519_s8 + $0x1a60] sm:$0xff] }
 0x5f3   : > { %8900 = vmatpush1.bf16.msra.mxu1 %v13403_v2  ;;  %8729 = vmatprep.subr.bf16.mxu0 %v13418_v44  ;;  %v2622_v2 = vld [vmem:[%s15519_s8 + $0x1a28] sm:$0xff]  ;;  %v13530_v9 = vcombine.high %v2621_v36, %v2629_v1 }
 0x5f4   : > { %8901 = vmatprep.subr.bf16.mxu1 %v13420_v4  ;;  %v2630_v44 = vld [vmem:[%s15519_s8 + $0x1a68] sm:$0xff]  ;;  %v13513_v4 = vcombine.low %v2605_v38, %v2613_v54 }
 0x5f5   : > { %v13532_v3 = vcombine.high %v2622_v2, %v2630_v44  ;;  %v13531_v10 = vcombine.low %v2622_v2, %v2630_v44  ;;  %v2685_v2 = vld [vmem:[%s15519_s8 + $0x1c20] sm:$0xff] }
 0x5f6   : > { %8730 = vmatpush1.bf16.msra.mxu0 %v13417_v58  ;;  %v2645_v58 = vld [vmem:[%s15519_s8 + $0x1ae0] sm:$0xff] }
 0x5f7   : > { %8902 = vmatpush1.bf16.msra.mxu1 %v13419_v39  ;;  %8731 = vmatprep.subr.bf16.mxu0 %v13434_v45  ;;  %v2638_v39 = vld [vmem:[%s15519_s8 + $0x1aa8] sm:$0xff]  ;;  %v13546_v20 = vcombine.high %v2637_v6, %v2645_v58  ;;  %v13545_v22 = vcombine.low %v2637_v6, %v2645_v58  ;;  %v2693_v44 = vld [vmem:[%s15519_s8 + $0x1c60] sm:$0xff] }
 0x5f8   : > { %8903 = vmatprep.subr.bf16.mxu1 %v13436_v46  ;;  %v2646_v45 = vld [vmem:[%s15519_s8 + $0x1ae8] sm:$0xff]  ;;  %v13529_v46 = vcombine.low %v2621_v36, %v2629_v1  ;;  %v13594_v58 = vcombine.high %v2685_v2, %v2693_v44 }
 0x5f9   : > { %v13548_v49 = vcombine.high %v2638_v39, %v2646_v45 }
 0x5fa   : > { %8732 = vmatpush1.bf16.msra.mxu0 %v13433_v62  ;;  %v2661_v62 = vld [vmem:[%s15519_s8 + $0x1b60] sm:$0xff] }
 0x5fb   : > { %8904 = vmatpush1.bf16.msra.mxu1 %v13435_v63  ;;  %8733 = vmatprep.subr.bf16.mxu0 %v13450_v59  ;;  %v2654_v63 = vld [vmem:[%s15519_s8 + $0x1b28] sm:$0xff] }
 0x5fc   : > { %8905 = vmatprep.subr.bf16.mxu1 %v13452_v60  ;;  %v2662_v59 = vld [vmem:[%s15519_s8 + $0x1b68] sm:$0xff]  ;;  %v1749_v60 = vld [vmem:[#allocation2 + $0x20] sm:$0xff] }
 0x5fd   : > { %v13564_v37 = vcombine.high %v2654_v63, %v2662_v59  ;;  %v13563_v38 = vcombine.low %v2654_v63, %v2662_v59  ;;  %v2717_v59 = vld [vmem:[%s15519_s8 + $0x1d20] sm:$0xff] }
 0x5fe   : > { %8734 = vmatpush1.bf16.msra.mxu0 %v13449_v0  ;;  %v13547_v0 = vcombine.low %v2638_v39, %v2646_v45  ;;  %v2701_v45 = vld [vmem:[%s15519_s8 + $0x1ca0] sm:$0xff] }
 0x5ff   : > { %8906 = vmatpush1.bf16.msra.mxu1 %v13451_v8  ;;  %8746 = vmatprep.subr.bf16.mxu0 %v13466_v56  ;;  %v1765_v8 = vld [vmem:[#allocation2 + $0xa0] sm:$0xff]  ;;  %v13562_v56 = vcombine.high %v2653_v51, %v2661_v62 }
 0x600   : > { %8918 = vmatprep.subr.bf16.mxu1 %v13468_v16 }
 0x601   : > { %8736 = vmatmul.mubr.bf16.vlgmr.msra.gmra.mrb[32].mxu0 %v15928_v48 }
 0x602   : > { %8908 = vmatmul.mubr.bf16.vlgmr.msra.gmra.mrb[32].mxu1 %v15928_v48  ;;  %8747 = vmatpush1.bf16.msra.mxu0 %v13465_v21  ;;  %v2669_v21 = vld [vmem:[%s15519_s8 + $0x1ba0] sm:$0xff] }
 0x603   : > { %8778 = vmatprep.mubr.bf16.mxu0 %v15968_v33  ;;  %8919 = vmatpush1.bf16.msra.mxu1 %v13467_v29 }
 0x604   : > { %8950 = vmatprep.mubr.bf16.mxu1 %v15968_v33  ;;  %8748 = vmatprep.subr.bf16.mxu0 %v13482_v30 }
 0x605   : > { %8920 = vmatprep.subr.bf16.mxu1 %v13484_v28  ;;  %v2678_v28 = vld [vmem:[%s15519_s8 + $0x1be8] sm:$0xff] }
 0x606   : > { %8749 = vmatpush1.bf16.msra.mxu0 %v13481_v18  ;;  %v13580_v1 = vcombine.high %v2670_v35, %v2678_v28  ;;  %v13579_v6 = vcombine.low %v2670_v35, %v2678_v28  ;;  %v2750_v35 = vld [vmem:[%s15519_s8 + $0x1e28] sm:$0xff] }
 0x607   : > { %8921 = vmatpush1.bf16.msra.mxu1 %v13483_v27  ;;  %8750 = vmatprep.subr.bf16.mxu0 %v13498_v13  ;;  %v1768_v13 = vld [vmem:[#allocation2 + $0xb8] sm:$0xff] }
 0x608   : > { %8922 = vmatprep.subr.bf16.mxu1 %v13500_v34  ;;  %v13561_v34 = vcombine.low %v2653_v51, %v2661_v62  ;;  %v2758_v28 = vld [vmem:[%s15519_s8 + $0x1e68] sm:$0xff] }
 0x60a   : > { %8751 = vmatpush1.bf16.msra.mxu0 %v13497_v24 }
 0x60b   : > { %8923 = vmatpush1.bf16.msra.mxu1 %v13499_v19  ;;  %8752 = vmatprep.subr.bf16.mxu0 %v13514_v47  ;;  %v13578_v19 = vcombine.high %v2669_v21, %v2677_v61 }
 0x60c   : > { %8924 = vmatprep.subr.bf16.mxu1 %v13516_v26 }
 0x60e   : > { %8753 = vmatpush1.bf16.msra.mxu0 %v13513_v4 }
 0x60f   : > { %8925 = vmatpush1.bf16.msra.mxu1 %v13515_v55  ;;  %8754 = vmatprep.subr.bf16.mxu0 %v13530_v9  ;;  %v2686_v55 = vld [vmem:[%s15519_s8 + $0x1c28] sm:$0xff] }
 0x610   : > { %8926 = vmatprep.subr.bf16.mxu1 %v13532_v3  ;;  %v2694_v9 = vld [vmem:[%s15519_s8 + $0x1c68] sm:$0xff]  ;;  %v13577_v3 = vcombine.low %v2669_v21, %v2677_v61 }
 0x611   : > { %v13596_v39 = vcombine.high %v2686_v55, %v2694_v9  ;;  %v13595_v51 = vcombine.low %v2686_v55, %v2694_v9  ;;  %v2797_v9 = vld [vmem:[%s15519_s8 + $0x1fa0] sm:$0xff] }
 0x612   : > { %8755 = vmatpush1.bf16.msra.mxu0 %v13529_v46  ;;  %v2709_v46 = vld [vmem:[%s15519_s8 + $0x1ce0] sm:$0xff] }
 0x613   : > { %8927 = vmatpush1.bf16.msra.mxu1 %v13531_v10  ;;  %8756 = vmatprep.subr.bf16.mxu0 %v13546_v20  ;;  %v2702_v10 = vld [vmem:[%s15519_s8 + $0x1ca8] sm:$0xff]  ;;  %v13610_v62 = vcombine.high %v2701_v45, %v2709_v46 }
 0x614   : > { %v8436_v16 = vpop.f32.mrb[28].mxu0  ;;  %8928 = vmatprep.subr.bf16.mxu1 %v13548_v49  ;;  %v2710_v20 = vld [vmem:[%s15519_s8 + $0x1ce8] sm:$0xff]  ;;  %v13593_v49 = vcombine.low %v2685_v2, %v2693_v44 }
 0x615   : > { %v9309_v42 = vadd.f32 %v8436_v16, %v1749_v60  ;;  %v8608_v29 = vpop.f32.mrb[28].mxu1  ;;  %v8438_v30 = vpop.f32.mrb[29].mxu0  ;;  %v13612_v63 = vcombine.high %v2702_v10, %v2710_v20  ;;  %v2725_v60 = vld [vmem:[%s15519_s8 + $0x1d60] sm:$0xff] }
 0x616   : > { %v9311_v15 = vadd.f32 %v8608_v29, %v1751_v5  ;;  %v9310_v32 = vadd.f32 %v8438_v30, %v1750_v11  ;;  %v8610_v18 = vpop.f32.mrb[29].mxu1  ;;  %v8440_v27 = vpop.f32.mrb[30].mxu0  ;;  %8757 = vmatpush1.bf16.msra.mxu0 %v13545_v22  ;;  %v2718_v5 = vld [vmem:[%s15519_s8 + $0x1d28] sm:$0xff]  ;;  %v13609_v11 = vcombine.low %v2701_v45, %v2709_v46  ;;  %v2741_v16 = vld [vmem:[%s15519_s8 + $0x1de0] sm:$0xff]  ;;  %v13625_v21 = vcombine.low %v2717_v59, %v2725_v60 }
 0x617   : > { %9341 = vst [vmem:[#allocation2 + $0x20] sm:$0xff] %v9309_v42  ;;  %v9312_v54 = vadd.f32 %v8610_v18, %v1752_v41  ;;  %v9325_v14 = vadd.f32 %v8440_v27, %v1765_v8  ;;  %v8612_v40 = vpop.f32.mrb[30].mxu1  ;;  %8929 = vmatpush1.bf16.msra.mxu1 %v13547_v0  ;;  %v8442_v24 = vpop.f32.mrb[31].mxu0  ;;  %8758 = vmatprep.subr.bf16.mxu0 %v13562_v56  ;;  %v2726_v22 = vld [vmem:[%s15519_s8 + $0x1d68] sm:$0xff]  ;;  %v2733_v56 = vld [vmem:[%s15519_s8 + $0x1da0] sm:$0xff] }
 0x618   : > { %9343 = vst [vmem:[#allocation2 + $0x30] sm:$0xff] %v9311_v15  ;;  %9342 = vst [vmem:[#allocation2 + $0x28] sm:$0xff] %v9310_v32  ;;  %v9327_v47 = vadd.f32 %v8612_v40, %v1767_v7  ;;  %v9326_v26 = vadd.f32 %v8442_v24, %v1766_v53  ;;  %v8614_v36 = vpop.f32.mrb[31].mxu1  ;;  %8930 = vmatprep.subr.bf16.mxu1 %v13564_v37  ;;  %v13611_v41 = vcombine.low %v2702_v10, %v2710_v20  ;;  %v2734_v7 = vld [vmem:[%s15519_s8 + $0x1da8] sm:$0xff]  ;;  %v2749_v30 = vld [vmem:[%s15519_s8 + $0x1e20] sm:$0xff] }
 0x619   : > { %9344 = vst [vmem:[#allocation2 + $0x38] sm:$0xff] %v9312_v54  ;;  %9357 = vst [vmem:[#allocation2 + $0xa0] sm:$0xff] %v9325_v14  ;;  %v9328_v4 = vadd.f32 %v8614_v36, %v1768_v13  ;;  %v13626_v0 = vcombine.high %v2717_v59, %v2725_v60  ;;  %v13628_v8 = vcombine.high %v2718_v5, %v2726_v22  ;;  %v2742_v37 = vld [vmem:[%s15519_s8 + $0x1de8] sm:$0xff]  ;;  %v2757_v53 = vld [vmem:[%s15519_s8 + $0x1e60] sm:$0xff] }
 0x61a   : > { %9359 = vst [vmem:[#allocation2 + $0xb0] sm:$0xff] %v9327_v47  ;;  %9358 = vst [vmem:[#allocation2 + $0xa8] sm:$0xff] %v9326_v26  ;;  %8759 = vmatpush1.bf16.msra.mxu0 %v13561_v34  ;;  %v13627_v61 = vcombine.low %v2718_v5, %v2726_v22  ;;  %v13642_v42 = vcombine.high %v2733_v56, %v2741_v16  ;;  %v13644_v29 = vcombine.high %v2734_v7, %v2742_v37  ;;  %v2765_v13 = vld [vmem:[%s15519_s8 + $0x1ea0] sm:$0xff]  ;;  %v2774_v54 = vld [vmem:[%s15519_s8 + $0x1ee8] sm:$0xff] }
 0x61b   : > { %9360 = vst [vmem:[#allocation2 + $0xb8] sm:$0xff] %v9328_v4  ;;  %8931 = vmatpush1.bf16.msra.mxu1 %v13563_v38  ;;  %8760 = vmatprep.subr.bf16.mxu0 %v13578_v19  ;;  %v13641_v15 = vcombine.low %v2733_v56, %v2741_v16  ;;  %v13643_v32 = vcombine.low %v2734_v7, %v2742_v37  ;;  %v2773_v34 = vld [vmem:[%s15519_s8 + $0x1ee0] sm:$0xff]  ;;  %v2766_v38 = vld [vmem:[%s15519_s8 + $0x1ea8] sm:$0xff]  ;;  %v1791_v20 = vld [vmem:[%s15519_s8 + $0x30] sm:$0xff] }
 0x61c   : > { %8932 = vmatprep.subr.bf16.mxu1 %v13580_v1  ;;  %v13658_v18 = vcombine.high %v2749_v30, %v2757_v53  ;;  %v13660_v27 = vcombine.high %v2750_v35, %v2758_v28  ;;  %v13657_v14 = vcombine.low %v2749_v30, %v2757_v53  ;;  %v13659_v40 = vcombine.low %v2750_v35, %v2758_v28  ;;  %v2781_v47 = vld [vmem:[%s15519_s8 + $0x1f20] sm:$0xff]  ;;  %v2782_v36 = vld [vmem:[%s15519_s8 + $0x1f28] sm:$0xff]  ;;  %v1807_v22 = vld [vmem:[%s15519_s8 + $0xb0] sm:$0xff] }
 0x61d   : > { %v13674_v24 = vcombine.high %v2765_v13, %v2773_v34  ;;  %v13676_v19 = vcombine.high %v2766_v38, %v2774_v54  ;;  %v2789_v26 = vld [vmem:[%s15519_s8 + $0x1f60] sm:$0xff]  ;;  %v2790_v1 = vld [vmem:[%s15519_s8 + $0x1f68] sm:$0xff]  ;;  %v13673_v2 = vcombine.low %v2765_v13, %v2773_v34  ;;  %v13675_v44 = vcombine.low %v2766_v38, %v2774_v54  ;;  %v1823_v7 = vld [vmem:[%s15519_s8 + $0x130] sm:$0xff] }
 0x61e   : > { %8761 = vmatpush1.bf16.msra.mxu0 %v13577_v3  ;;  %v13690_v4 = vcombine.high %v2781_v47, %v2789_v26  ;;  %v13692_v55 = vcombine.high %v2782_v36, %v2790_v1  ;;  %v2805_v3 = vld [vmem:[%s15519_s8 + $0x1fe0] sm:$0xff]  ;;  %v13691_v45 = vcombine.low %v2782_v36, %v2790_v1  ;;  %v1831_v37 = vld [vmem:[%s15519_s8 + $0x170] sm:$0xff] }
 0x61f   : > { %8933 = vmatpush1.bf16.msra.mxu1 %v13579_v6  ;;  %8762 = vmatprep.subr.bf16.mxu0 %v13594_v58  ;;  %v2798_v6 = vld [vmem:[%s15519_s8 + $0x1fa8] sm:$0xff]  ;;  %v13706_v46 = vcombine.high %v2797_v9, %v2805_v3  ;;  %v12734_v53 = vcombine.high %v1823_v7, %v1831_v37  ;;  %v1839_v28 = vld [vmem:[%s15519_s8 + $0x1b0] sm:$0xff] }
 0x620   : > { %8934 = vmatprep.subr.bf16.mxu1 %v13596_v39  ;;  %v2806_v58 = vld [vmem:[%s15519_s8 + $0x1fe8] sm:$0xff]  ;;  %v13689_v39 = vcombine.low %v2781_v47, %v2789_v26  ;;  %v1855_v38 = vld [vmem:[%s15519_s8 + $0x230] sm:$0xff] }
 0x621   : > { %v13708_v10 = vcombine.high %v2798_v6, %v2806_v58  ;;  %v13707_v59 = vcombine.low %v2798_v6, %v2806_v58  ;;  %v1863_v54 = vld [vmem:[%s15519_s8 + $0x270] sm:$0xff] }
 0x622   : > { %8763 = vmatpush1.bf16.msra.mxu0 %v13593_v49  ;;  %v1799_v49 = vld [vmem:[%s15519_s8 + $0x70] sm:$0xff]  ;;  %v12766_v47 = vcombine.high %v1855_v38, %v1863_v54 }
 0x623   : > { %8935 = vmatpush1.bf16.msra.mxu1 %v13595_v51  ;;  %8764 = vmatprep.subr.bf16.mxu0 %v13610_v62  ;;  %v1792_v51 = vld [vmem:[%s15519_s8 + $0x38] sm:$0xff]  ;;  %v12702_v60 = vcombine.high %v1791_v20, %v1799_v49  ;;  %v1871_v36 = vld [vmem:[%s15519_s8 + $0x2b0] sm:$0xff] }
 0x624   : > { %8936 = vmatprep.subr.bf16.mxu1 %v13612_v63  ;;  %v1800_v62 = vld [vmem:[%s15519_s8 + $0x78] sm:$0xff]  ;;  %v13705_v63 = vcombine.low %v2797_v9, %v2805_v3  ;;  %v1879_v1 = vld [vmem:[%s15519_s8 + $0x2f0] sm:$0xff] }
 0x625   : > { %v12704_v5 = vcombine.high %v1792_v51, %v1800_v62  ;;  %v12703_v56 = vcombine.low %v1792_v51, %v1800_v62  ;;  %v12782_v9 = vcombine.high %v1871_v36, %v1879_v1  ;;  %v1887_v6 = vld [vmem:[%s15519_s8 + $0x330] sm:$0xff] }
 0x626   : > { %8765 = vmatpush1.bf16.msra.mxu0 %v13609_v11  ;;  %v1815_v11 = vld [vmem:[%s15519_s8 + $0xf0] sm:$0xff] }
 0x627   : > { %8937 = vmatpush1.bf16.msra.mxu1 %v13611_v41  ;;  %8766 = vmatprep.subr.bf16.mxu0 %v13626_v0  ;;  %v12701_v41 = vcombine.low %v1791_v20, %v1799_v49  ;;  %v1808_v0 = vld [vmem:[%s15519_s8 + $0xb8] sm:$0xff]  ;;  %v12718_v16 = vcombine.high %v1807_v22, %v1815_v11  ;;  %v1895_v58 = vld [vmem:[%s15519_s8 + $0x370] sm:$0xff] }
 0x628   : > { %8938 = vmatprep.subr.bf16.mxu1 %v13628_v8  ;;  %v1816_v8 = vld [vmem:[%s15519_s8 + $0xf8] sm:$0xff]  ;;  %v12798_v20 = vcombine.high %v1887_v6, %v1895_v58  ;;  %v1903_v51 = vld [vmem:[%s15519_s8 + $0x3b0] sm:$0xff] }
 0x629   : > { %v12719_v30 = vcombine.low %v1808_v0, %v1816_v8  ;;  %v1911_v62 = vld [vmem:[%s15519_s8 + $0x3f0] sm:$0xff] }
 0x62a   : > { %8767 = vmatpush1.bf16.msra.mxu0 %v13625_v21  ;;  %v12720_v21 = vcombine.high %v1808_v0, %v1816_v8  ;;  %v1927_v0 = vld [vmem:[%s15519_s8 + $0x470] sm:$0xff]  ;;  %v1920_v8 = vld [vmem:[%s15519_s8 + $0x438] sm:$0xff] }
 0x62b   : > { %8939 = vmatpush1.bf16.msra.mxu1 %v13627_v61  ;;  %8768 = vmatprep.subr.bf16.mxu0 %v13642_v42  ;;  %v1824_v61 = vld [vmem:[%s15519_s8 + $0x138] sm:$0xff] }
 0x62c   : > { %8940 = vmatprep.subr.bf16.mxu1 %v13644_v29  ;;  %v1832_v42 = vld [vmem:[%s15519_s8 + $0x178] sm:$0xff]  ;;  %v12717_v29 = vcombine.low %v1807_v22, %v1815_v11  ;;  %v12814_v22 = vcombine.high %v1903_v51, %v1911_v62 }
 0x62d   : > { %v12736_v35 = vcombine.high %v1824_v61, %v1832_v42  ;;  %v12735_v13 = vcombine.low %v1824_v61, %v1832_v42  ;;  %v1935_v61 = vld [vmem:[%s15519_s8 + $0x4b0] sm:$0xff] }
 0x62e   : > { %8769 = vmatpush1.bf16.msra.mxu0 %v13641_v15  ;;  %v1847_v15 = vld [vmem:[%s15519_s8 + $0x1f0] sm:$0xff] }
 0x62f   : > { %8941 = vmatpush1.bf16.msra.mxu1 %v13643_v32  ;;  %8770 = vmatprep.subr.bf16.mxu0 %v13658_v18  ;;  %v1840_v32 = vld [vmem:[%s15519_s8 + $0x1b8] sm:$0xff]  ;;  %v12750_v34 = vcombine.high %v1839_v28, %v1847_v15  ;;  %v1943_v42 = vld [vmem:[%s15519_s8 + $0x4f0] sm:$0xff] }
 0x630   : > { %8942 = vmatprep.subr.bf16.mxu1 %v13660_v27  ;;  %v1848_v18 = vld [vmem:[%s15519_s8 + $0x1f8] sm:$0xff]  ;;  %v12733_v27 = vcombine.low %v1823_v7, %v1831_v37 }
 0x632   : > { %8771 = vmatpush1.bf16.msra.mxu0 %v13657_v14  ;;  %v1856_v14 = vld [vmem:[%s15519_s8 + $0x238] sm:$0xff] }
 0x633   : > { %8943 = vmatpush1.bf16.msra.mxu1 %v13659_v40  ;;  %8772 = vmatprep.subr.bf16.mxu0 %v13674_v24  ;;  %v1864_v40 = vld [vmem:[%s15519_s8 + $0x278] sm:$0xff]  ;;  %v12749_v24 = vcombine.low %v1839_v28, %v1847_v15  ;;  %v12846_v28 = vcombine.high %v1935_v61, %v1943_v42 }
 0x634   : > { %8944 = vmatprep.subr.bf16.mxu1 %v13676_v19  ;;  %v12751_v19 = vcombine.low %v1840_v32, %v1848_v18  ;;  %v12768_v26 = vcombine.high %v1856_v14, %v1864_v40 }
 0x636   : > { %8773 = vmatpush1.bf16.msra.mxu0 %v13673_v2  ;;  %v1872_v2 = vld [vmem:[%s15519_s8 + $0x2b8] sm:$0xff] }
 0x637   : > { %8945 = vmatpush1.bf16.msra.mxu1 %v13675_v44  ;;  %8774 = vmatprep.subr.bf16.mxu0 %v13690_v4  ;;  %v1880_v44 = vld [vmem:[%s15519_s8 + $0x2f8] sm:$0xff]  ;;  %v12765_v4 = vcombine.low %v1855_v38, %v1863_v54 }
 0x638   : > { %8946 = vmatprep.subr.bf16.mxu1 %v13692_v55  ;;  %v12767_v55 = vcombine.low %v1856_v14, %v1864_v40  ;;  %v12784_v3 = vcombine.high %v1872_v2, %v1880_v44  ;;  %v1967_v14 = vld [vmem:[%s15519_s8 + $0x5b0] sm:$0xff] }
 0x639   : > { %v1975_v40 = vld [vmem:[%s15519_s8 + $0x5f0] sm:$0xff] }
 0x63a   : > { %8775 = vmatpush1.bf16.msra.mxu0 %v13689_v39  ;;  %v1888_v39 = vld [vmem:[%s15519_s8 + $0x338] sm:$0xff] }
 0x63b   : > { %8947 = vmatpush1.bf16.msra.mxu1 %v13691_v45  ;;  %8776 = vmatprep.subr.bf16.mxu0 %v13706_v46  ;;  %v1896_v45 = vld [vmem:[%s15519_s8 + $0x378] sm:$0xff]  ;;  %v12781_v46 = vcombine.low %v1871_v36, %v1879_v1  ;;  %v12878_v36 = vcombine.high %v1967_v14, %v1975_v40 }
 0x63c   : > { %8948 = vmatprep.subr.bf16.mxu1 %v13708_v10  ;;  %v12783_v10 = vcombine.low %v1872_v2, %v1880_v44  ;;  %v12800_v49 = vcombine.high %v1888_v39, %v1896_v45  ;;  %v1983_v2 = vld [vmem:[%s15519_s8 + $0x630] sm:$0xff] }
 0x63d   : > { %v1991_v44 = vld [vmem:[%s15519_s8 + $0x670] sm:$0xff] }
 0x63e   : > { %8777 = vmatpush1.bf16.msra.mxu0 %v13705_v63  ;;  %v1904_v63 = vld [vmem:[%s15519_s8 + $0x3b8] sm:$0xff] }
 0x63f   : > { %8949 = vmatpush1.bf16.msra.mxu1 %v13707_v59  ;;  %8961 = vmatprep.subr.bf16.mxu0 %v12702_v60  ;;  %v1912_v59 = vld [vmem:[%s15519_s8 + $0x3f8] sm:$0xff]  ;;  %v12797_v60 = vcombine.low %v1887_v6, %v1895_v58  ;;  %v12894_v6 = vcombine.high %v1983_v2, %v1991_v44 }
 0x640   : > { %9133 = vmatprep.subr.bf16.mxu1 %v12704_v5  ;;  %v12799_v5 = vcombine.low %v1888_v39, %v1896_v45  ;;  %v12816_v11 = vcombine.high %v1904_v63, %v1912_v59  ;;  %v12815_v7 = vcombine.low %v1904_v63, %v1912_v59  ;;  %v1999_v39 = vld [vmem:[%s15519_s8 + $0x6b0] sm:$0xff] }
 0x641   : > { %8779 = vmatmul.mubr.bf16.vlgmr.msra.gmra.mrb[32].mxu0 %v15949_v31  ;;  %v2007_v45 = vld [vmem:[%s15519_s8 + $0x6f0] sm:$0xff] }
 0x642   : > { %8951 = vmatmul.mubr.bf16.vlgmr.msra.gmra.mrb[32].mxu1 %v15949_v31  ;;  %8962 = vmatpush1.bf16.msra.mxu0 %v12701_v41  ;;  %v1919_v41 = vld [vmem:[%s15519_s8 + $0x430] sm:$0xff] }
 0x643   : > { %8993 = vmatprep.mubr.bf16.mxu0 %v15863_v43  ;;  %9134 = vmatpush1.bf16.msra.mxu1 %v12703_v56  ;;  %v1928_v56 = vld [vmem:[%s15519_s8 + $0x478] sm:$0xff]  ;;  %v12830_v37 = vcombine.high %v1919_v41, %v1927_v0  ;;  %v2015_v63 = vld [vmem:[%s15519_s8 + $0x730] sm:$0xff] }
 0x644   : > { %9165 = vmatprep.mubr.bf16.mxu1 %v15863_v43  ;;  %8963 = vmatprep.subr.bf16.mxu0 %v12718_v16  ;;  %v12752_v43 = vcombine.high %v1840_v32, %v1848_v18  ;;  %v12813_v16 = vcombine.low %v1903_v51, %v1911_v62  ;;  %v1951_v32 = vld [vmem:[%s15519_s8 + $0x530] sm:$0xff]  ;;  %v12910_v51 = vcombine.high %v1999_v39, %v2007_v45 }
 0x645   : > { %9135 = vmatprep.subr.bf16.mxu1 %v12720_v21  ;;  %v12832_v21 = vcombine.high %v1920_v8, %v1928_v56  ;;  %v1959_v18 = vld [vmem:[%s15519_s8 + $0x570] sm:$0xff] }
 0x646   : > { %8964 = vmatpush1.bf16.msra.mxu0 %v12717_v29  ;;  %v1936_v29 = vld [vmem:[%s15519_s8 + $0x4b8] sm:$0xff]  ;;  %v12862_v38 = vcombine.high %v1951_v32, %v1959_v18  ;;  %v2023_v59 = vld [vmem:[%s15519_s8 + $0x770] sm:$0xff] }
 0x647   : > { %9136 = vmatpush1.bf16.msra.mxu1 %v12719_v30  ;;  %8965 = vmatprep.subr.bf16.mxu0 %v12734_v53  ;;  %v1944_v30 = vld [vmem:[%s15519_s8 + $0x4f8] sm:$0xff]  ;;  %v12829_v53 = vcombine.low %v1919_v41, %v1927_v0  ;;  %v12926_v41 = vcombine.high %v2015_v63, %v2023_v59 }
 0x648   : > { %9137 = vmatprep.subr.bf16.mxu1 %v12736_v35  ;;  %v12831_v35 = vcombine.low %v1920_v8, %v1928_v56  ;;  %v12848_v15 = vcombine.high %v1936_v29, %v1944_v30  ;;  %v2031_v8 = vld [vmem:[%s15519_s8 + $0x7b0] sm:$0xff] }
 0x649   : > { %v2039_v56 = vld [vmem:[%s15519_s8 + $0x7f0] sm:$0xff] }
 0x64a   : > { %8966 = vmatpush1.bf16.msra.mxu0 %v12733_v27  ;;  %v1952_v27 = vld [vmem:[%s15519_s8 + $0x538] sm:$0xff] }
 0x64b   : > { %9138 = vmatpush1.bf16.msra.mxu1 %v12735_v13  ;;  %8967 = vmatprep.subr.bf16.mxu0 %v12750_v34  ;;  %v1960_v13 = vld [vmem:[%s15519_s8 + $0x578] sm:$0xff]  ;;  %v12845_v34 = vcombine.low %v1935_v61, %v1943_v42  ;;  %v12942_v61 = vcombine.high %v2031_v8, %v2039_v56 }
 0x64c   : > { %9139 = vmatprep.subr.bf16.mxu1 %v12752_v43  ;;  %v12847_v43 = vcombine.low %v1936_v29, %v1944_v30  ;;  %v12864_v54 = vcombine.high %v1952_v27, %v1960_v13  ;;  %v2047_v29 = vld [vmem:[%s15519_s8 + $0x830] sm:$0xff] }
 0x64d   : > { %v2055_v30 = vld [vmem:[%s15519_s8 + $0x870] sm:$0xff] }
 0x64e   : > { %8968 = vmatpush1.bf16.msra.mxu0 %v12749_v24  ;;  %v1968_v24 = vld [vmem:[%s15519_s8 + $0x5b8] sm:$0xff] }
 0x64f   : > { %9140 = vmatpush1.bf16.msra.mxu1 %v12751_v19  ;;  %8969 = vmatprep.subr.bf16.mxu0 %v12766_v47  ;;  %v1976_v19 = vld [vmem:[%s15519_s8 + $0x5f8] sm:$0xff]  ;;  %v12861_v47 = vcombine.low %v1951_v32, %v1959_v18  ;;  %v12958_v32 = vcombine.high %v2047_v29, %v2055_v30 }
 0x650   : > { %9141 = vmatprep.subr.bf16.mxu1 %v12768_v26  ;;  %v12863_v26 = vcombine.low %v1952_v27, %v1960_v13  ;;  %v12880_v1 = vcombine.high %v1968_v24, %v1976_v19  ;;  %v2063_v27 = vld [vmem:[%s15519_s8 + $0x8b0] sm:$0xff] }
 0x651   : > { %v2071_v13 = vld [vmem:[%s15519_s8 + $0x8f0] sm:$0xff] }
 0x652   : > { %8970 = vmatpush1.bf16.msra.mxu0 %v12765_v4  ;;  %v1984_v4 = vld [vmem:[%s15519_s8 + $0x638] sm:$0xff] }
 0x653   : > { %9142 = vmatpush1.bf16.msra.mxu1 %v12767_v55  ;;  %8971 = vmatprep.subr.bf16.mxu0 %v12782_v9  ;;  %v1992_v55 = vld [vmem:[%s15519_s8 + $0x678] sm:$0xff]  ;;  %v12877_v9 = vcombine.low %v1967_v14, %v1975_v40  ;;  %v12974_v14 = vcombine.high %v2063_v27, %v2071_v13  ;;  %v2079_v40 = vld [vmem:[%s15519_s8 + $0x930] sm:$0xff] }
 0x654   : > { %9143 = vmatprep.subr.bf16.mxu1 %v12784_v3  ;;  %v12879_v3 = vcombine.low %v1968_v24, %v1976_v19  ;;  %v12896_v58 = vcombine.high %v1984_v4, %v1992_v55  ;;  %v2087_v24 = vld [vmem:[%s15519_s8 + $0x970] sm:$0xff] }
 0x656   : > { %8972 = vmatpush1.bf16.msra.mxu0 %v12781_v46  ;;  %v2000_v46 = vld [vmem:[%s15519_s8 + $0x6b8] sm:$0xff] }
 0x657   : > { %9144 = vmatpush1.bf16.msra.mxu1 %v12783_v10  ;;  %8973 = vmatprep.subr.bf16.mxu0 %v12798_v20  ;;  %v2008_v10 = vld [vmem:[%s15519_s8 + $0x6f8] sm:$0xff]  ;;  %v12893_v20 = vcombine.low %v1983_v2, %v1991_v44  ;;  %v12990_v2 = vcombine.high %v2079_v40, %v2087_v24 }
 0x658   : > { %9145 = vmatprep.subr.bf16.mxu1 %v12800_v49  ;;  %v12895_v49 = vcombine.low %v1984_v4, %v1992_v55  ;;  %v12912_v62 = vcombine.high %v2000_v46, %v2008_v10  ;;  %v2095_v4 = vld [vmem:[%s15519_s8 + $0x9b0] sm:$0xff] }
 0x659   : > { %v2103_v55 = vld [vmem:[%s15519_s8 + $0x9f0] sm:$0xff] }
 0x65a   : > { %8974 = vmatpush1.bf16.msra.mxu0 %v12797_v60  ;;  %v2016_v60 = vld [vmem:[%s15519_s8 + $0x738] sm:$0xff] }
 0x65b   : > { %9146 = vmatpush1.bf16.msra.mxu1 %v12799_v5  ;;  %8975 = vmatprep.subr.bf16.mxu0 %v12814_v22  ;;  %v2024_v5 = vld [vmem:[%s15519_s8 + $0x778] sm:$0xff]  ;;  %v12909_v22 = vcombine.low %v1999_v39, %v2007_v45  ;;  %v2111_v39 = vld [vmem:[%s15519_s8 + $0xa30] sm:$0xff] }
 0x65c   : > { %9147 = vmatprep.subr.bf16.mxu1 %v12816_v11  ;;  %v12911_v11 = vcombine.low %v2000_v46, %v2008_v10  ;;  %v12928_v0 = vcombine.high %v2016_v60, %v2024_v5  ;;  %v2119_v45 = vld [vmem:[%s15519_s8 + $0xa70] sm:$0xff]  ;;  %v2112_v46 = vld [vmem:[%s15519_s8 + $0xa38] sm:$0xff] }
 0x65d   : > { %v2120_v10 = vld [vmem:[%s15519_s8 + $0xa78] sm:$0xff] }
 0x65e   : > { %8976 = vmatpush1.bf16.msra.mxu0 %v12813_v16  ;;  %v2032_v16 = vld [vmem:[%s15519_s8 + $0x7b8] sm:$0xff] }
 0x65f   : > { %9148 = vmatpush1.bf16.msra.mxu1 %v12815_v7  ;;  %8977 = vmatprep.subr.bf16.mxu0 %v12830_v37  ;;  %v2040_v7 = vld [vmem:[%s15519_s8 + $0x7f8] sm:$0xff]  ;;  %v12925_v37 = vcombine.low %v2015_v63, %v2023_v59  ;;  %v2127_v63 = vld [vmem:[%s15519_s8 + $0xab0] sm:$0xff] }
 0x660   : > { %9149 = vmatprep.subr.bf16.mxu1 %v12832_v21  ;;  %v12927_v21 = vcombine.low %v2016_v60, %v2024_v5  ;;  %v12944_v42 = vcombine.high %v2032_v16, %v2040_v7  ;;  %v2135_v59 = vld [vmem:[%s15519_s8 + $0xaf0] sm:$0xff]  ;;  %v2128_v60 = vld [vmem:[%s15519_s8 + $0xab8] sm:$0xff] }
 0x661   : > { %v2136_v5 = vld [vmem:[%s15519_s8 + $0xaf8] sm:$0xff] }
 0x662   : > { %8978 = vmatpush1.bf16.msra.mxu0 %v12829_v53  ;;  %v2048_v53 = vld [vmem:[%s15519_s8 + $0x838] sm:$0xff] }
 0x663   : > { %9150 = vmatpush1.bf16.msra.mxu1 %v12831_v35  ;;  %8979 = vmatprep.subr.bf16.mxu0 %v12846_v28  ;;  %v2056_v35 = vld [vmem:[%s15519_s8 + $0x878] sm:$0xff]  ;;  %v12941_v28 = vcombine.low %v2031_v8, %v2039_v56  ;;  %v2143_v8 = vld [vmem:[%s15519_s8 + $0xb30] sm:$0xff] }
 0x664   : > { %9151 = vmatprep.subr.bf16.mxu1 %v12848_v15  ;;  %v12943_v15 = vcombine.low %v2032_v16, %v2040_v7  ;;  %v12960_v18 = vcombine.high %v2048_v53, %v2056_v35  ;;  %v2151_v56 = vld [vmem:[%s15519_s8 + $0xb70] sm:$0xff]  ;;  %v2144_v16 = vld [vmem:[%s15519_s8 + $0xb38] sm:$0xff] }
 0x665   : > { %v2152_v7 = vld [vmem:[%s15519_s8 + $0xb78] sm:$0xff] }
 0x666   : > { %8980 = vmatpush1.bf16.msra.mxu0 %v12845_v34  ;;  %v12957_v34 = vcombine.low %v2047_v29, %v2055_v30  ;;  %v2159_v29 = vld [vmem:[%s15519_s8 + $0xbb0] sm:$0xff] }
 0x667   : > { %9152 = vmatpush1.bf16.msra.mxu1 %v12847_v43  ;;  %8981 = vmatprep.subr.bf16.mxu0 %v12862_v38  ;;  %v2064_v43 = vld [vmem:[%s15519_s8 + $0x8b8] sm:$0xff]  ;;  %v2167_v30 = vld [vmem:[%s15519_s8 + $0xbf0] sm:$0xff] }
 0x668   : > { %9153 = vmatprep.subr.bf16.mxu1 %v12864_v54  ;;  %v2072_v38 = vld [vmem:[%s15519_s8 + $0x8f8] sm:$0xff]  ;;  %v12959_v54 = vcombine.low %v2048_v53, %v2056_v35 }
 0x669   : > { %v12976_v19 = vcombine.high %v2064_v43, %v2072_v38  ;;  %v2160_v53 = vld [vmem:[%s15519_s8 + $0xbb8] sm:$0xff] }
 0x66a   : > { %8982 = vmatpush1.bf16.msra.mxu0 %v12861_v47  ;;  %v2080_v47 = vld [vmem:[%s15519_s8 + $0x938] sm:$0xff] }
 0x66b   : > { %9154 = vmatpush1.bf16.msra.mxu1 %v12863_v26  ;;  %8983 = vmatprep.subr.bf16.mxu0 %v12878_v36  ;;  %v2088_v26 = vld [vmem:[%s15519_s8 + $0x978] sm:$0xff]  ;;  %v12973_v36 = vcombine.low %v2063_v27, %v2071_v13  ;;  %v2175_v27 = vld [vmem:[%s15519_s8 + $0xc30] sm:$0xff] }
 0x66c   : > { %9155 = vmatprep.subr.bf16.mxu1 %v12880_v1  ;;  %v12975_v1 = vcombine.low %v2064_v43, %v2072_v38  ;;  %v12992_v44 = vcombine.high %v2080_v47, %v2088_v26  ;;  %v2168_v35 = vld [vmem:[%s15519_s8 + $0xbf8] sm:$0xff]  ;;  %v2183_v13 = vld [vmem:[%s15519_s8 + $0xc70] sm:$0xff]  ;;  %v13069_v38 = vcombine.low %v2159_v29, %v2167_v30 }
 0x66d   : > { %v2184_v43 = vld [vmem:[%s15519_s8 + $0xc78] sm:$0xff] }
 0x66e   : > { %8984 = vmatpush1.bf16.msra.mxu0 %v12877_v9  ;;  %v2096_v9 = vld [vmem:[%s15519_s8 + $0x9b8] sm:$0xff] }
 0x66f   : > { %9156 = vmatpush1.bf16.msra.mxu1 %v12879_v3  ;;  %8985 = vmatprep.subr.bf16.mxu0 %v12894_v6  ;;  %v12989_v3 = vcombine.low %v2079_v40, %v2087_v24  ;;  %v12991_v6 = vcombine.low %v2080_v47, %v2088_v26  ;;  %v2191_v24 = vld [vmem:[%s15519_s8 + $0xcb0] sm:$0xff]  ;;  %v2192_v47 = vld [vmem:[%s15519_s8 + $0xcb8] sm:$0xff] }
 0x670   : > { %9157 = vmatprep.subr.bf16.mxu1 %v12896_v58  ;;  %v13006_v58 = vcombine.high %v2095_v4, %v2103_v55  ;;  %v2200_v26 = vld [vmem:[%s15519_s8 + $0xcf8] sm:$0xff] }
 0x672   : > { %8986 = vmatpush1.bf16.msra.mxu0 %v12893_v20  ;;  %v13005_v20 = vcombine.low %v2095_v4, %v2103_v55  ;;  %v2207_v4 = vld [vmem:[%s15519_s8 + $0xd30] sm:$0xff] }
 0x673   : > { %9158 = vmatpush1.bf16.msra.mxu1 %v12895_v49  ;;  %8987 = vmatprep.subr.bf16.mxu0 %v12910_v51  ;;  %v13022_v51 = vcombine.high %v2111_v39, %v2119_v45  ;;  %v2215_v55 = vld [vmem:[%s15519_s8 + $0xd70] sm:$0xff] }
 0x674   : > { %9159 = vmatprep.subr.bf16.mxu1 %v12912_v62  ;;  %v13024_v62 = vcombine.high %v2112_v46, %v2120_v10 }
 0x676   : > { %8988 = vmatpush1.bf16.msra.mxu0 %v12909_v22  ;;  %v13021_v22 = vcombine.low %v2111_v39, %v2119_v45  ;;  %v2223_v39 = vld [vmem:[%s15519_s8 + $0xdb0] sm:$0xff] }
 0x677   : > { %9160 = vmatpush1.bf16.msra.mxu1 %v12911_v11  ;;  %8989 = vmatprep.subr.bf16.mxu0 %v12926_v41  ;;  %v13023_v11 = vcombine.low %v2112_v46, %v2120_v10  ;;  %v13038_v41 = vcombine.high %v2127_v63, %v2135_v59  ;;  %v2231_v45 = vld [vmem:[%s15519_s8 + $0xdf0] sm:$0xff]  ;;  %v2224_v46 = vld [vmem:[%s15519_s8 + $0xdb8] sm:$0xff] }
 0x678   : > { %9161 = vmatprep.subr.bf16.mxu1 %v12928_v0  ;;  %v13040_v0 = vcombine.high %v2128_v60, %v2136_v5  ;;  %v2232_v10 = vld [vmem:[%s15519_s8 + $0xdf8] sm:$0xff] }
 0x67a   : > { %8990 = vmatpush1.bf16.msra.mxu0 %v12925_v37  ;;  %v13037_v37 = vcombine.low %v2127_v63, %v2135_v59  ;;  %v2239_v63 = vld [vmem:[%s15519_s8 + $0xe30] sm:$0xff] }
 0x67b   : > { %9162 = vmatpush1.bf16.msra.mxu1 %v12927_v21  ;;  %8991 = vmatprep.subr.bf16.mxu0 %v12942_v61  ;;  %v13039_v21 = vcombine.low %v2128_v60, %v2136_v5  ;;  %v13054_v61 = vcombine.high %v2143_v8, %v2151_v56  ;;  %v2247_v59 = vld [vmem:[%s15519_s8 + $0xe70] sm:$0xff]  ;;  %v2240_v60 = vld [vmem:[%s15519_s8 + $0xe38] sm:$0xff] }
 0x67c   : > { %9163 = vmatprep.subr.bf16.mxu1 %v12944_v42  ;;  %v13056_v42 = vcombine.high %v2144_v16, %v2152_v7  ;;  %v2248_v5 = vld [vmem:[%s15519_s8 + $0xe78] sm:$0xff] }
 0x67e   : > { %8992 = vmatpush1.bf16.msra.mxu0 %v12941_v28  ;;  %v13053_v28 = vcombine.low %v2143_v8, %v2151_v56  ;;  %v2255_v8 = vld [vmem:[%s15519_s8 + $0xeb0] sm:$0xff] }
 0x67f   : > { %9164 = vmatpush1.bf16.msra.mxu1 %v12943_v15  ;;  %9004 = vmatprep.subr.bf16.mxu0 %v12958_v32  ;;  %v13055_v15 = vcombine.low %v2144_v16, %v2152_v7  ;;  %v13070_v32 = vcombine.high %v2159_v29, %v2167_v30  ;;  %v2263_v56 = vld [vmem:[%s15519_s8 + $0xef0] sm:$0xff]  ;;  %v2256_v16 = vld [vmem:[%s15519_s8 + $0xeb8] sm:$0xff] }
 0x680   : > { %9176 = vmatprep.subr.bf16.mxu1 %v12960_v18  ;;  %v13072_v18 = vcombine.high %v2160_v53, %v2168_v35  ;;  %v2264_v7 = vld [vmem:[%s15519_s8 + $0xef8] sm:$0xff]  ;;  %v2271_v29 = vld [vmem:[%s15519_s8 + $0xf30] sm:$0xff] }
 0x681   : > { %8994 = vmatmul.mubr.bf16.vlgmr.msra.gmra.mrb[36].mxu0 %v15861_v25  ;;  %v2279_v30 = vld [vmem:[%s15519_s8 + $0xf70] sm:$0xff] }
 0x682   : > { %9166 = vmatmul.mubr.bf16.vlgmr.msra.gmra.mrb[36].mxu1 %v15861_v25  ;;  %9005 = vmatpush1.bf16.msra.mxu0 %v12957_v34  ;;  %v2104_v25 = vld [vmem:[%s15519_s8 + $0x9f8] sm:$0xff] }
 0x683   : > { %9036 = vmatprep.mubr.bf16.mxu0 %v15878_v57  ;;  %9177 = vmatpush1.bf16.msra.mxu1 %v12959_v54  ;;  %v13007_v49 = vcombine.low %v2096_v9, %v2104_v25  ;;  %v2176_v34 = vld [vmem:[%s15519_s8 + $0xc38] sm:$0xff]  ;;  %v13071_v54 = vcombine.low %v2160_v53, %v2168_v35 }
 0x684   : > { %9208 = vmatprep.mubr.bf16.mxu1 %v15878_v57  ;;  %9006 = vmatprep.subr.bf16.mxu0 %v12974_v14  ;;  %v13008_v57 = vcombine.high %v2096_v9, %v2104_v25  ;;  %v13086_v14 = vcombine.high %v2175_v27, %v2183_v13  ;;  %v13088_v40 = vcombine.high %v2176_v34, %v2184_v43  ;;  %v2208_v9 = vld [vmem:[%s15519_s8 + $0xd38] sm:$0xff] }
 0x685   : > { %9178 = vmatprep.subr.bf16.mxu1 %v12976_v19  ;;  %v2199_v19 = vld [vmem:[%s15519_s8 + $0xcf0] sm:$0xff]  ;;  %v2216_v25 = vld [vmem:[%s15519_s8 + $0xd78] sm:$0xff] }
 0x686   : > { %9007 = vmatpush1.bf16.msra.mxu0 %v12973_v36  ;;  %v13085_v36 = vcombine.low %v2175_v27, %v2183_v13  ;;  %v2272_v53 = vld [vmem:[%s15519_s8 + $0xf38] sm:$0xff]  ;;  %v2287_v27 = vld [vmem:[%s15519_s8 + $0xfb0] sm:$0xff] }
 0x687   : > { %9179 = vmatpush1.bf16.msra.mxu1 %v12975_v1  ;;  %9008 = vmatprep.subr.bf16.mxu0 %v12990_v2  ;;  %v13087_v1 = vcombine.low %v2176_v34, %v2184_v43  ;;  %v13102_v2 = vcombine.high %v2191_v24, %v2199_v19  ;;  %v2280_v35 = vld [vmem:[%s15519_s8 + $0xf78] sm:$0xff]  ;;  %v2295_v13 = vld [vmem:[%s15519_s8 + $0xff0] sm:$0xff] }
 0x688   : > { %9180 = vmatprep.subr.bf16.mxu1 %v12992_v44  ;;  %v13104_v44 = vcombine.high %v2192_v47, %v2200_v26  ;;  %v2288_v34 = vld [vmem:[%s15519_s8 + $0xfb8] sm:$0xff] }
 0x689   : > { %v2296_v43 = vld [vmem:[%s15519_s8 + $0xff8] sm:$0xff] }
 0x68a   : > { %9009 = vmatpush1.bf16.msra.mxu0 %v12989_v3  ;;  %v13101_v3 = vcombine.low %v2191_v24, %v2199_v19  ;;  %v2303_v24 = vld [vmem:[%s15519_s8 + $0x1030] sm:$0xff] }
 0x68b   : > { %9181 = vmatpush1.bf16.msra.mxu1 %v12991_v6  ;;  %9010 = vmatprep.subr.bf16.mxu0 %v13006_v58  ;;  %v13103_v6 = vcombine.low %v2192_v47, %v2200_v26  ;;  %v13118_v58 = vcombine.high %v2207_v4, %v2215_v55  ;;  %v2311_v19 = vld [vmem:[%s15519_s8 + $0x1070] sm:$0xff]  ;;  %v2304_v47 = vld [vmem:[%s15519_s8 + $0x1038] sm:$0xff] }
 0x68c   : > { %9182 = vmatprep.subr.bf16.mxu1 %v13008_v57  ;;  %v13120_v57 = vcombine.high %v2208_v9, %v2216_v25  ;;  %v2312_v26 = vld [vmem:[%s15519_s8 + $0x1078] sm:$0xff] }
 0x68e   : > { %9011 = vmatpush1.bf16.msra.mxu0 %v13005_v20  ;;  %v13117_v20 = vcombine.low %v2207_v4, %v2215_v55  ;;  %v2319_v4 = vld [vmem:[%s15519_s8 + $0x10b0] sm:$0xff] }
 0x68f   : > { %9183 = vmatpush1.bf16.msra.mxu1 %v13007_v49  ;;  %9012 = vmatprep.subr.bf16.mxu0 %v13022_v51  ;;  %v13119_v49 = vcombine.low %v2208_v9, %v2216_v25  ;;  %v13134_v51 = vcombine.high %v2223_v39, %v2231_v45  ;;  %v2327_v55 = vld [vmem:[%s15519_s8 + $0x10f0] sm:$0xff]  ;;  %v13213_v9 = vcombine.low %v2303_v24, %v2311_v19  ;;  %v2320_v25 = vld [vmem:[%s15519_s8 + $0x10b8] sm:$0xff] }
 0x690   : > { %9184 = vmatprep.subr.bf16.mxu1 %v13024_v62  ;;  %v13136_v62 = vcombine.high %v2224_v46, %v2232_v10 }
 0x692   : > { %9013 = vmatpush1.bf16.msra.mxu0 %v13021_v22  ;;  %v13133_v22 = vcombine.low %v2223_v39, %v2231_v45  ;;  %v2343_v39 = vld [vmem:[%s15519_s8 + $0x1170] sm:$0xff] }
 0x693   : > { %9185 = vmatpush1.bf16.msra.mxu1 %v13023_v11  ;;  %9014 = vmatprep.subr.bf16.mxu0 %v13038_v41  ;;  %v13135_v11 = vcombine.low %v2224_v46, %v2232_v10  ;;  %v13150_v41 = vcombine.high %v2239_v63, %v2247_v59  ;;  %v2336_v46 = vld [vmem:[%s15519_s8 + $0x1138] sm:$0xff] }
 0x694   : > { %9186 = vmatprep.subr.bf16.mxu1 %v13040_v0  ;;  %v13152_v0 = vcombine.high %v2240_v60, %v2248_v5  ;;  %v2344_v10 = vld [vmem:[%s15519_s8 + $0x1178] sm:$0xff] }
 0x696   : > { %9015 = vmatpush1.bf16.msra.mxu0 %v13037_v37  ;;  %v13149_v37 = vcombine.low %v2239_v63, %v2247_v59  ;;  %v2351_v63 = vld [vmem:[%s15519_s8 + $0x11b0] sm:$0xff] }
 0x697   : > { %9187 = vmatpush1.bf16.msra.mxu1 %v13039_v21  ;;  %9016 = vmatprep.subr.bf16.mxu0 %v13054_v61  ;;  %v13151_v21 = vcombine.low %v2240_v60, %v2248_v5  ;;  %v13166_v61 = vcombine.high %v2255_v8, %v2263_v56  ;;  %v2359_v59 = vld [vmem:[%s15519_s8 + $0x11f0] sm:$0xff]  ;;  %v2352_v60 = vld [vmem:[%s15519_s8 + $0x11b8] sm:$0xff] }
 0x698   : > { %9188 = vmatprep.subr.bf16.mxu1 %v13056_v42  ;;  %v13168_v42 = vcombine.high %v2256_v16, %v2264_v7 }
 0x69a   : > { %9017 = vmatpush1.bf16.msra.mxu0 %v13053_v28  ;;  %v13165_v28 = vcombine.low %v2255_v8, %v2263_v56  ;;  %v2368_v8 = vld [vmem:[%s15519_s8 + $0x1238] sm:$0xff] }
 0x69b   : > { %9189 = vmatpush1.bf16.msra.mxu1 %v13055_v15  ;;  %9018 = vmatprep.subr.bf16.mxu0 %v13070_v32  ;;  %v13167_v15 = vcombine.low %v2256_v16, %v2264_v7  ;;  %v13182_v32 = vcombine.high %v2271_v29, %v2279_v30  ;;  %v2376_v56 = vld [vmem:[%s15519_s8 + $0x1278] sm:$0xff]  ;;  %v13261_v16 = vcombine.low %v2351_v63, %v2359_v59 }
 0x69c   : > { %9190 = vmatprep.subr.bf16.mxu1 %v13072_v18  ;;  %v13184_v18 = vcombine.high %v2272_v53, %v2280_v35 }
 0x69e   : > { %9019 = vmatpush1.bf16.msra.mxu0 %v13069_v38  ;;  %v13181_v38 = vcombine.low %v2271_v29, %v2279_v30  ;;  %v2384_v29 = vld [vmem:[%s15519_s8 + $0x12b8] sm:$0xff] }
 0x69f   : > { %9191 = vmatpush1.bf16.msra.mxu1 %v13071_v54  ;;  %9020 = vmatprep.subr.bf16.mxu0 %v13086_v14  ;;  %v13183_v54 = vcombine.low %v2272_v53, %v2280_v35  ;;  %v13198_v14 = vcombine.high %v2287_v27, %v2295_v13  ;;  %v2392_v30 = vld [vmem:[%s15519_s8 + $0x12f8] sm:$0xff]  ;;  %v13279_v35 = vcombine.low %v2368_v8, %v2376_v56 }
 0x6a0   : > { %9192 = vmatprep.subr.bf16.mxu1 %v13088_v40  ;;  %v13200_v40 = vcombine.high %v2288_v34, %v2296_v43 }
 0x6a2   : > { %9021 = vmatpush1.bf16.msra.mxu0 %v13085_v36  ;;  %v13197_v36 = vcombine.low %v2287_v27, %v2295_v13  ;;  %v2400_v27 = vld [vmem:[%s15519_s8 + $0x1338] sm:$0xff] }
 0x6a3   : > { %9193 = vmatpush1.bf16.msra.mxu1 %v13087_v1  ;;  %9022 = vmatprep.subr.bf16.mxu0 %v13102_v2  ;;  %v13199_v1 = vcombine.low %v2288_v34, %v2296_v43  ;;  %v13214_v2 = vcombine.high %v2303_v24, %v2311_v19  ;;  %v2408_v13 = vld [vmem:[%s15519_s8 + $0x1378] sm:$0xff]  ;;  %v13295_v43 = vcombine.low %v2384_v29, %v2392_v30 }
 0x6a4   : > { %9194 = vmatprep.subr.bf16.mxu1 %v13104_v44  ;;  %v13216_v44 = vcombine.high %v2304_v47, %v2312_v26  ;;  %v2416_v24 = vld [vmem:[%s15519_s8 + $0x13b8] sm:$0xff] }
 0x6a5   : > { %v2424_v19 = vld [vmem:[%s15519_s8 + $0x13f8] sm:$0xff] }
 0x6a6   : > { %9023 = vmatpush1.bf16.msra.mxu0 %v13101_v3  ;;  %v2328_v3 = vld [vmem:[%s15519_s8 + $0x10f8] sm:$0xff] }
 0x6a7   : > { %9195 = vmatpush1.bf16.msra.mxu1 %v13103_v6  ;;  %9024 = vmatprep.subr.bf16.mxu0 %v13118_v58  ;;  %v13215_v6 = vcombine.low %v2304_v47, %v2312_v26  ;;  %v13230_v58 = vcombine.high %v2319_v4, %v2327_v55  ;;  %v13232_v45 = vcombine.high %v2320_v25, %v2328_v3 }
 0x6a8   : > { %9196 = vmatprep.subr.bf16.mxu1 %v13120_v57  ;;  %v2335_v57 = vld [vmem:[%s15519_s8 + $0x1130] sm:$0xff]  ;;  %v13311_v26 = vcombine.low %v2400_v27, %v2408_v13 }
 0x6a9   : > { %v13245_v5 = vcombine.low %v2335_v57, %v2343_v39 }
 0x6aa   : > { %9025 = vmatpush1.bf16.msra.mxu0 %v13117_v20  ;;  %v13229_v20 = vcombine.low %v2319_v4, %v2327_v55  ;;  %v2432_v4 = vld [vmem:[%s15519_s8 + $0x1438] sm:$0xff] }
 0x6ab   : > { %9197 = vmatpush1.bf16.msra.mxu1 %v13119_v49  ;;  %9026 = vmatprep.subr.bf16.mxu0 %v13134_v51  ;;  %v13231_v49 = vcombine.low %v2320_v25, %v2328_v3  ;;  %v13246_v51 = vcombine.high %v2335_v57, %v2343_v39  ;;  %v2440_v55 = vld [vmem:[%s15519_s8 + $0x1478] sm:$0xff]  ;;  %v13327_v25 = vcombine.low %v2416_v24, %v2424_v19  ;;  %v2455_v57 = vld [vmem:[%s15519_s8 + $0x14f0] sm:$0xff] }
 0x6ac   : > { %9198 = vmatprep.subr.bf16.mxu1 %v13136_v62  ;;  %v13248_v62 = vcombine.high %v2336_v46, %v2344_v10  ;;  %v2448_v39 = vld [vmem:[%s15519_s8 + $0x14b8] sm:$0xff] }
 0x6ae   : > { %9027 = vmatpush1.bf16.msra.mxu0 %v13133_v22  ;;  %v13247_v22 = vcombine.low %v2336_v46, %v2344_v10  ;;  %v13343_v10 = vcombine.low %v2432_v4, %v2440_v55 }
 0x6af   : > { %9199 = vmatpush1.bf16.msra.mxu1 %v13135_v11  ;;  %9028 = vmatprep.subr.bf16.mxu0 %v13150_v41  ;;  %v13262_v11 = vcombine.high %v2351_v63, %v2359_v59  ;;  %v2367_v41 = vld [vmem:[%s15519_s8 + $0x1230] sm:$0xff]  ;;  %v2464_v63 = vld [vmem:[%s15519_s8 + $0x1538] sm:$0xff] }
 0x6b0   : > { %9200 = vmatprep.subr.bf16.mxu1 %v13152_v0  ;;  %v2375_v0 = vld [vmem:[%s15519_s8 + $0x1270] sm:$0xff]  ;;  %v2472_v59 = vld [vmem:[%s15519_s8 + $0x1578] sm:$0xff] }
 0x6b1   : > { %v13277_v53 = vcombine.low %v2367_v41, %v2375_v0 }
 0x6b2   : > { %9029 = vmatpush1.bf16.msra.mxu0 %v13149_v37  ;;  %v13278_v37 = vcombine.high %v2367_v41, %v2375_v0  ;;  %v2480_v41 = vld [vmem:[%s15519_s8 + $0x15b8] sm:$0xff] }
 0x6b3   : > { %9201 = vmatpush1.bf16.msra.mxu1 %v13151_v21  ;;  %9030 = vmatprep.subr.bf16.mxu0 %v13166_v61  ;;  %v13280_v21 = vcombine.high %v2368_v8, %v2376_v56  ;;  %v2383_v61 = vld [vmem:[%s15519_s8 + $0x12b0] sm:$0xff]  ;;  %v2488_v0 = vld [vmem:[%s15519_s8 + $0x15f8] sm:$0xff]  ;;  %v13375_v56 = vcombine.low %v2464_v63, %v2472_v59 }
 0x6b4   : > { %9202 = vmatprep.subr.bf16.mxu1 %v13168_v42  ;;  %v2391_v42 = vld [vmem:[%s15519_s8 + $0x12f0] sm:$0xff] }
 0x6b5   : > { %v13293_v34 = vcombine.low %v2383_v61, %v2391_v42 }
 0x6b6   : > { %9031 = vmatpush1.bf16.msra.mxu0 %v13165_v28  ;;  %v13294_v28 = vcombine.high %v2383_v61, %v2391_v42  ;;  %v2496_v61 = vld [vmem:[%s15519_s8 + $0x1638] sm:$0xff] }
 0x6b7   : > { %9203 = vmatpush1.bf16.msra.mxu1 %v13167_v15  ;;  %9032 = vmatprep.subr.bf16.mxu0 %v13182_v32  ;;  %v13296_v15 = vcombine.high %v2384_v29, %v2392_v30  ;;  %v2399_v32 = vld [vmem:[%s15519_s8 + $0x1330] sm:$0xff]  ;;  %v2504_v42 = vld [vmem:[%s15519_s8 + $0x1678] sm:$0xff]  ;;  %v13391_v30 = vcombine.low %v2480_v41, %v2488_v0 }
 0x6b8   : > { %9204 = vmatprep.subr.bf16.mxu1 %v13184_v18  ;;  %v2407_v18 = vld [vmem:[%s15519_s8 + $0x1370] sm:$0xff] }
 0x6b9   : > { %v13309_v47 = vcombine.low %v2399_v32, %v2407_v18 }
 0x6ba   : > { %9033 = vmatpush1.bf16.msra.mxu0 %v13181_v38  ;;  %v13310_v38 = vcombine.high %v2399_v32, %v2407_v18  ;;  %v2512_v32 = vld [vmem:[%s15519_s8 + $0x16b8] sm:$0xff] }
 0x6bb   : > { %9205 = vmatpush1.bf16.msra.mxu1 %v13183_v54  ;;  %9034 = vmatprep.subr.bf16.mxu0 %v13198_v14  ;;  %v13312_v54 = vcombine.high %v2400_v27, %v2408_v13  ;;  %v2415_v14 = vld [vmem:[%s15519_s8 + $0x13b0] sm:$0xff]  ;;  %v2520_v18 = vld [vmem:[%s15519_s8 + $0x16f8] sm:$0xff]  ;;  %v13407_v13 = vcombine.low %v2496_v61, %v2504_v42 }
 0x6bc   : > { %9206 = vmatprep.subr.bf16.mxu1 %v13200_v40  ;;  %v2423_v40 = vld [vmem:[%s15519_s8 + $0x13f0] sm:$0xff] }
 0x6be   : > { %9035 = vmatpush1.bf16.msra.mxu0 %v13197_v36  ;;  %v13326_v36 = vcombine.high %v2415_v14, %v2423_v40 }
 0x6bf   : > { %9207 = vmatpush1.bf16.msra.mxu1 %v13199_v1  ;;  %9047 = vmatprep.subr.bf16.mxu0 %v13214_v2  ;;  %v13328_v1 = vcombine.high %v2416_v24, %v2424_v19  ;;  %v2431_v2 = vld [vmem:[%s15519_s8 + $0x1430] sm:$0xff]  ;;  %v13423_v19 = vcombine.low %v2512_v32, %v2520_v18 }
 0x6c0   : > { %9219 = vmatprep.subr.bf16.mxu1 %v13216_v44  ;;  %v2439_v44 = vld [vmem:[%s15519_s8 + $0x1470] sm:$0xff] }
 0x6c1   : > { %9037 = vmatmul.mubr.bf16.vlgmr.msra.gmra.mrb[36].mxu0 %v15866_v52  ;;  %v13342_v3 = vcombine.high %v2431_v2, %v2439_v44  ;;  %v13341_v46 = vcombine.low %v2431_v2, %v2439_v44  ;;  %v2544_v2 = vld [vmem:[%s15519_s8 + $0x17b8] sm:$0xff] }
 0x6c2   : > { %9209 = vmatmul.mubr.bf16.vlgmr.msra.gmra.mrb[36].mxu1 %v15866_v52  ;;  %9048 = vmatpush1.bf16.msra.mxu0 %v13213_v9  ;;  %v2360_v52 = vld [vmem:[%s15519_s8 + $0x11f8] sm:$0xff]  ;;  %v13325_v9 = vcombine.low %v2415_v14, %v2423_v40 }
 0x6c3   : > { %9079 = vmatprep.mubr.bf16.mxu0 %v15939_v23  ;;  %9220 = vmatpush1.bf16.msra.mxu1 %v13215_v6  ;;  %v13263_v7 = vcombine.low %v2352_v60, %v2360_v52  ;;  %v13344_v6 = vcombine.high %v2432_v4, %v2440_v55  ;;  %v2528_v14 = vld [vmem:[%s15519_s8 + $0x1738] sm:$0xff] }
 0x6c4   : > { %9251 = vmatprep.mubr.bf16.mxu1 %v15939_v23  ;;  %9049 = vmatprep.subr.bf16.mxu0 %v13230_v58  ;;  %v13264_v23 = vcombine.high %v2352_v60, %v2360_v52  ;;  %v2447_v58 = vld [vmem:[%s15519_s8 + $0x14b0] sm:$0xff]  ;;  %v2536_v40 = vld [vmem:[%s15519_s8 + $0x1778] sm:$0xff] }
 0x6c5   : > { %9221 = vmatprep.subr.bf16.mxu1 %v13232_v45  ;;  %v2456_v45 = vld [vmem:[%s15519_s8 + $0x14f8] sm:$0xff]  ;;  %v13357_v60 = vcombine.low %v2447_v58, %v2455_v57  ;;  %v13439_v55 = vcombine.low %v2528_v14, %v2536_v40 }
 0x6c6   : > { %9050 = vmatpush1.bf16.msra.mxu0 %v13229_v20  ;;  %v13358_v20 = vcombine.high %v2447_v58, %v2455_v57  ;;  %v13359_v52 = vcombine.low %v2448_v39, %v2456_v45  ;;  %v2552_v44 = vld [vmem:[%s15519_s8 + $0x17f8] sm:$0xff] }
 0x6c7   : > { %9222 = vmatpush1.bf16.msra.mxu1 %v13231_v49  ;;  %9051 = vmatprep.subr.bf16.mxu0 %v13246_v51  ;;  %v13360_v49 = vcombine.high %v2448_v39, %v2456_v45  ;;  %v2463_v51 = vld [vmem:[%s15519_s8 + $0x1530] sm:$0xff]  ;;  %v2560_v58 = vld [vmem:[%s15519_s8 + $0x1838] sm:$0xff]  ;;  %v13455_v45 = vcombine.low %v2544_v2, %v2552_v44 }
 0x6c8   : > { %9223 = vmatprep.subr.bf16.mxu1 %v13248_v62  ;;  %v2471_v62 = vld [vmem:[%s15519_s8 + $0x1570] sm:$0xff]  ;;  %v2568_v57 = vld [vmem:[%s15519_s8 + $0x1878] sm:$0xff] }
 0x6c9   : > { %v13373_v8 = vcombine.low %v2463_v51, %v2471_v62 }
 0x6ca   : > { %9052 = vmatpush1.bf16.msra.mxu0 %v13245_v5  ;;  %v13374_v5 = vcombine.high %v2463_v51, %v2471_v62  ;;  %v2576_v62 = vld [vmem:[%s15519_s8 + $0x18b8] sm:$0xff] }
 0x6cb   : > { %9224 = vmatpush1.bf16.msra.mxu1 %v13247_v22  ;;  %9053 = vmatprep.subr.bf16.mxu0 %v13262_v11  ;;  %v13376_v22 = vcombine.high %v2464_v63, %v2472_v59  ;;  %v2479_v11 = vld [vmem:[%s15519_s8 + $0x15b0] sm:$0xff]  ;;  %v2584_v63 = vld [vmem:[%s15519_s8 + $0x18f8] sm:$0xff]  ;;  %v13471_v59 = vcombine.low %v2560_v58, %v2568_v57 }
 0x6cc   : > { %9225 = vmatprep.subr.bf16.mxu1 %v13264_v23  ;;  %v2487_v23 = vld [vmem:[%s15519_s8 + $0x15f0] sm:$0xff] }
 0x6cd   : > { %v13389_v29 = vcombine.low %v2479_v11, %v2487_v23 }
 0x6ce   : > { %9054 = vmatpush1.bf16.msra.mxu0 %v13261_v16  ;;  %v13390_v16 = vcombine.high %v2479_v11, %v2487_v23  ;;  %v2592_v11 = vld [vmem:[%s15519_s8 + $0x1938] sm:$0xff] }
 0x6cf   : > { %9226 = vmatpush1.bf16.msra.mxu1 %v13263_v7  ;;  %9055 = vmatprep.subr.bf16.mxu0 %v13278_v37  ;;  %v13392_v7 = vcombine.high %v2480_v41, %v2488_v0  ;;  %v2495_v37 = vld [vmem:[%s15519_s8 + $0x1630] sm:$0xff]  ;;  %v2600_v23 = vld [vmem:[%s15519_s8 + $0x1978] sm:$0xff]  ;;  %v13487_v0 = vcombine.low %v2576_v62, %v2584_v63 }
 0x6d0   : > { %9227 = vmatprep.subr.bf16.mxu1 %v13280_v21  ;;  %v2503_v21 = vld [vmem:[%s15519_s8 + $0x1670] sm:$0xff] }
 0x6d1   : > { %v13405_v27 = vcombine.low %v2495_v37, %v2503_v21 }
 0x6d2   : > { %9056 = vmatpush1.bf16.msra.mxu0 %v13277_v53  ;;  %v13406_v53 = vcombine.high %v2495_v37, %v2503_v21  ;;  %v2608_v37 = vld [vmem:[%s15519_s8 + $0x19b8] sm:$0xff] }
 0x6d3   : > { %9228 = vmatpush1.bf16.msra.mxu1 %v13279_v35  ;;  %9057 = vmatprep.subr.bf16.mxu0 %v13294_v28  ;;  %v13408_v35 = vcombine.high %v2496_v61, %v2504_v42  ;;  %v2511_v28 = vld [vmem:[%s15519_s8 + $0x16b0] sm:$0xff]  ;;  %v13503_v61 = vcombine.low %v2592_v11, %v2600_v23 }
 0x6d4   : > { %9229 = vmatprep.subr.bf16.mxu1 %v13296_v15  ;;  %v2519_v15 = vld [vmem:[%s15519_s8 + $0x16f0] sm:$0xff] }
 0x6d5   : > { %v13421_v24 = vcombine.low %v2511_v28, %v2519_v15 }
 0x6d6   : > { %9058 = vmatpush1.bf16.msra.mxu0 %v13293_v34  ;;  %v13422_v34 = vcombine.high %v2511_v28, %v2519_v15 }
 0x6d7   : > { %9230 = vmatpush1.bf16.msra.mxu1 %v13295_v43  ;;  %9059 = vmatprep.subr.bf16.mxu0 %v13310_v38  ;;  %v13424_v43 = vcombine.high %v2512_v32, %v2520_v18  ;;  %v2527_v38 = vld [vmem:[%s15519_s8 + $0x1730] sm:$0xff] }
 0x6d8   : > { %9231 = vmatprep.subr.bf16.mxu1 %v13312_v54  ;;  %v2535_v54 = vld [vmem:[%s15519_s8 + $0x1770] sm:$0xff] }
 0x6d9   : > { %v13437_v4 = vcombine.low %v2527_v38, %v2535_v54 }
 0x6da   : > { %9060 = vmatpush1.bf16.msra.mxu0 %v13309_v47  ;;  %v13438_v47 = vcombine.high %v2527_v38, %v2535_v54 }
 0x6db   : > { %9232 = vmatpush1.bf16.msra.mxu1 %v13311_v26  ;;  %9061 = vmatprep.subr.bf16.mxu0 %v13326_v36  ;;  %v13440_v26 = vcombine.high %v2528_v14, %v2536_v40  ;;  %v2543_v36 = vld [vmem:[%s15519_s8 + $0x17b0] sm:$0xff] }
 0x6dc   : > { %9233 = vmatprep.subr.bf16.mxu1 %v13328_v1  ;;  %v2551_v1 = vld [vmem:[%s15519_s8 + $0x17f0] sm:$0xff] }
 0x6dd   : > { %v13453_v39 = vcombine.low %v2543_v36, %v2551_v1 }
 0x6de   : > { %9062 = vmatpush1.bf16.msra.mxu0 %v13325_v9  ;;  %v13454_v9 = vcombine.high %v2543_v36, %v2551_v1  ;;  %v1753_v36 = vld [vmem:[#allocation2 + $0x40] sm:$0xff]  ;;  %v1755_v1 = vld [vmem:[#allocation2 + $0x50] sm:$0xff] }
 0x6df   : > { %9234 = vmatpush1.bf16.msra.mxu1 %v13327_v25  ;;  %9063 = vmatprep.subr.bf16.mxu0 %v13342_v3  ;;  %v13456_v25 = vcombine.high %v2544_v2, %v2552_v44  ;;  %v2559_v3 = vld [vmem:[%s15519_s8 + $0x1830] sm:$0xff]  ;;  %v1754_v44 = vld [vmem:[#allocation2 + $0x48] sm:$0xff] }
 0x6e0   : > { %9235 = vmatprep.subr.bf16.mxu1 %v13344_v6  ;;  %v2567_v6 = vld [vmem:[%s15519_s8 + $0x1870] sm:$0xff] }
 0x6e1   : > { %v13469_v51 = vcombine.low %v2559_v3, %v2567_v6 }
 0x6e2   : > { %9064 = vmatpush1.bf16.msra.mxu0 %v13341_v46  ;;  %v13470_v46 = vcombine.high %v2559_v3, %v2567_v6  ;;  %v1771_v6 = vld [vmem:[#allocation2 + $0xd0] sm:$0xff] }
 0x6e3   : > { %9236 = vmatpush1.bf16.msra.mxu1 %v13343_v10  ;;  %9065 = vmatprep.subr.bf16.mxu0 %v13358_v20  ;;  %v13472_v10 = vcombine.high %v2560_v58, %v2568_v57  ;;  %v2575_v20 = vld [vmem:[%s15519_s8 + $0x18b0] sm:$0xff] }
 0x6e4   : > { %9237 = vmatprep.subr.bf16.mxu1 %v13360_v49  ;;  %v2583_v49 = vld [vmem:[%s15519_s8 + $0x18f0] sm:$0xff] }
 0x6e5   : > { %v13485_v41 = vcombine.low %v2575_v20, %v2583_v49  ;;  %v2671_v57 = vld [vmem:[%s15519_s8 + $0x1bb0] sm:$0xff] }
 0x6e6   : > { %9066 = vmatpush1.bf16.msra.mxu0 %v13357_v60  ;;  %v13486_v60 = vcombine.high %v2575_v20, %v2583_v49  ;;  %v1770_v20 = vld [vmem:[#allocation2 + $0xc8] sm:$0xff] }
 0x6e7   : > { %9238 = vmatpush1.bf16.msra.mxu1 %v13359_v52  ;;  %9067 = vmatprep.subr.bf16.mxu0 %v13374_v5  ;;  %v2591_v52 = vld [vmem:[%s15519_s8 + $0x1930] sm:$0xff]  ;;  %v2672_v49 = vld [vmem:[%s15519_s8 + $0x1bb8] sm:$0xff] }
 0x6e8   : > { %9239 = vmatprep.subr.bf16.mxu1 %v13376_v22  ;;  %v2599_v5 = vld [vmem:[%s15519_s8 + $0x1970] sm:$0xff]  ;;  %v13488_v22 = vcombine.high %v2576_v62, %v2584_v63 }
 0x6e9   : > { %v13501_v21 = vcombine.low %v2591_v52, %v2599_v5 }
 0x6ea   : > { %9068 = vmatpush1.bf16.msra.mxu0 %v13373_v8  ;;  %v13502_v8 = vcombine.high %v2591_v52, %v2599_v5  ;;  %v1772_v52 = vld [vmem:[#allocation2 + $0xd8] sm:$0xff] }
 0x6eb   : > { %9240 = vmatpush1.bf16.msra.mxu1 %v13375_v56  ;;  %9069 = vmatprep.subr.bf16.mxu0 %v13390_v16  ;;  %v13504_v56 = vcombine.high %v2592_v11, %v2600_v23  ;;  %v2607_v16 = vld [vmem:[%s15519_s8 + $0x19b0] sm:$0xff] }
 0x6ec   : > { %9241 = vmatprep.subr.bf16.mxu1 %v13392_v7  ;;  %v2615_v7 = vld [vmem:[%s15519_s8 + $0x19f0] sm:$0xff] }
 0x6ed   : > { %v13518_v42 = vcombine.high %v2607_v16, %v2615_v7  ;;  %v13517_v28 = vcombine.low %v2607_v16, %v2615_v7 }
 0x6ee   : > { %9070 = vmatpush1.bf16.msra.mxu0 %v13389_v29  ;;  %v2623_v29 = vld [vmem:[%s15519_s8 + $0x1a30] sm:$0xff] }
 0x6ef   : > { %9242 = vmatpush1.bf16.msra.mxu1 %v13391_v30  ;;  %9071 = vmatprep.subr.bf16.mxu0 %v13406_v53  ;;  %v2631_v30 = vld [vmem:[%s15519_s8 + $0x1a70] sm:$0xff]  ;;  %v2624_v53 = vld [vmem:[%s15519_s8 + $0x1a38] sm:$0xff] }
 0x6f0   : > { %9243 = vmatprep.subr.bf16.mxu1 %v13408_v35  ;;  %v2632_v35 = vld [vmem:[%s15519_s8 + $0x1a78] sm:$0xff]  ;;  %v13534_v32 = vcombine.high %v2623_v29, %v2631_v30  ;;  %v13533_v38 = vcombine.low %v2623_v29, %v2631_v30 }
 0x6f1   : > { %v13536_v18 = vcombine.high %v2624_v53, %v2632_v35  ;;  %v13535_v54 = vcombine.low %v2624_v53, %v2632_v35 }
 0x6f2   : > { %9072 = vmatpush1.bf16.msra.mxu0 %v13405_v27  ;;  %v2639_v27 = vld [vmem:[%s15519_s8 + $0x1ab0] sm:$0xff] }
 0x6f3   : > { %9244 = vmatpush1.bf16.msra.mxu1 %v13407_v13  ;;  %9073 = vmatprep.subr.bf16.mxu0 %v13422_v34  ;;  %v2647_v13 = vld [vmem:[%s15519_s8 + $0x1af0] sm:$0xff]  ;;  %v2640_v34 = vld [vmem:[%s15519_s8 + $0x1ab8] sm:$0xff] }
 0x6f4   : > { %9245 = vmatprep.subr.bf16.mxu1 %v13424_v43  ;;  %v2648_v43 = vld [vmem:[%s15519_s8 + $0x1af8] sm:$0xff]  ;;  %v13550_v14 = vcombine.high %v2639_v27, %v2647_v13  ;;  %v13549_v2 = vcombine.low %v2639_v27, %v2647_v13 }
 0x6f5   : > { %v13552_v40 = vcombine.high %v2640_v34, %v2648_v43 }
 0x6f6   : > { %9074 = vmatpush1.bf16.msra.mxu0 %v13421_v24  ;;  %v2655_v24 = vld [vmem:[%s15519_s8 + $0x1b30] sm:$0xff] }
 0x6f7   : > { %9246 = vmatpush1.bf16.msra.mxu1 %v13423_v19  ;;  %9075 = vmatprep.subr.bf16.mxu0 %v13438_v47  ;;  %v2663_v19 = vld [vmem:[%s15519_s8 + $0x1b70] sm:$0xff]  ;;  %v2656_v47 = vld [vmem:[%s15519_s8 + $0x1b38] sm:$0xff] }
 0x6f8   : > { %9247 = vmatprep.subr.bf16.mxu1 %v13440_v26  ;;  %v2664_v26 = vld [vmem:[%s15519_s8 + $0x1b78] sm:$0xff]  ;;  %v13565_v5 = vcombine.low %v2655_v24, %v2663_v19 }
 0x6f9   : > { %v13568_v58 = vcombine.high %v2656_v47, %v2664_v26 }
 0x6fa   : > { %9076 = vmatpush1.bf16.msra.mxu0 %v13437_v4  ;;  %v1756_v4 = vld [vmem:[#allocation2 + $0x58] sm:$0xff] }
 0x6fb   : > { %9248 = vmatpush1.bf16.msra.mxu1 %v13439_v55  ;;  %9077 = vmatprep.subr.bf16.mxu0 %v13454_v9  ;;  %v13551_v55 = vcombine.low %v2640_v34, %v2648_v43  ;;  %v1769_v9 = vld [vmem:[#allocation2 + $0xc0] sm:$0xff] }
 0x6fc   : > { %9249 = vmatprep.subr.bf16.mxu1 %v13456_v25  ;;  %v13566_v25 = vcombine.high %v2655_v24, %v2663_v19 }
 0x6fe   : > { %9078 = vmatpush1.bf16.msra.mxu0 %v13453_v39  ;;  %v2679_v39 = vld [vmem:[%s15519_s8 + $0x1bf0] sm:$0xff] }
 0x6ff   : > { %9250 = vmatpush1.bf16.msra.mxu1 %v13455_v45  ;;  %9090 = vmatprep.subr.bf16.mxu0 %v13470_v46  ;;  %v13581_v29 = vcombine.low %v2671_v57, %v2679_v39 }
 0x700   : > { %9262 = vmatprep.subr.bf16.mxu1 %v13472_v10 }
 0x701   : > { %9080 = vmatmul.mubr.bf16.vlgmr.msra.gmra.mrb[36].mxu0 %v15928_v48 }
 0x702   : > { %9252 = vmatmul.mubr.bf16.vlgmr.msra.gmra.mrb[36].mxu1 %v15928_v48  ;;  %9091 = vmatpush1.bf16.msra.mxu0 %v13469_v51  ;;  %v2616_v48 = vld [vmem:[%s15519_s8 + $0x19f8] sm:$0xff] }
 0x703   : > { %9122 = vmatprep.mubr.bf16.mxu0 %v15968_v33  ;;  %9263 = vmatpush1.bf16.msra.mxu1 %v13471_v59  ;;  %v13519_v15 = vcombine.low %v2608_v37, %v2616_v48  ;;  %v2680_v51 = vld [vmem:[%s15519_s8 + $0x1bf8] sm:$0xff] }
 0x704   : > { %9294 = vmatprep.mubr.bf16.mxu1 %v15968_v33  ;;  %9092 = vmatprep.subr.bf16.mxu0 %v13486_v60  ;;  %v13520_v33 = vcombine.high %v2608_v37, %v2616_v48  ;;  %v13584_v37 = vcombine.high %v2672_v49, %v2680_v51  ;;  %v2687_v48 = vld [vmem:[%s15519_s8 + $0x1c30] sm:$0xff]  ;;  %v13583_v30 = vcombine.low %v2672_v49, %v2680_v51  ;;  %v2768_v51 = vld [vmem:[%s15519_s8 + $0x1eb8] sm:$0xff] }
 0x705   : > { %9264 = vmatprep.subr.bf16.mxu1 %v13488_v22  ;;  %v13567_v22 = vcombine.low %v2656_v47, %v2664_v26  ;;  %v2775_v49 = vld [vmem:[%s15519_s8 + $0x1ef0] sm:$0xff] }
 0x706   : > { %9093 = vmatpush1.bf16.msra.mxu0 %v13485_v41 }
 0x707   : > { %9265 = vmatpush1.bf16.msra.mxu1 %v13487_v0  ;;  %9094 = vmatprep.subr.bf16.mxu0 %v13502_v8  ;;  %v13582_v8 = vcombine.high %v2671_v57, %v2679_v39  ;;  %v2760_v57 = vld [vmem:[%s15519_s8 + $0x1e78] sm:$0xff] }
 0x708   : > { %9266 = vmatprep.subr.bf16.mxu1 %v13504_v56 }
 0x70a   : > { %9095 = vmatpush1.bf16.msra.mxu0 %v13501_v21  ;;  %v2695_v21 = vld [vmem:[%s15519_s8 + $0x1c70] sm:$0xff] }
 0x70b   : > { %9267 = vmatpush1.bf16.msra.mxu1 %v13503_v61  ;;  %9096 = vmatprep.subr.bf16.mxu0 %v13518_v42  ;;  %v2688_v42 = vld [vmem:[%s15519_s8 + $0x1c38] sm:$0xff]  ;;  %v13598_v53 = vcombine.high %v2687_v48, %v2695_v21  ;;  %v13597_v27 = vcombine.low %v2687_v48, %v2695_v21 }
 0x70c   : > { %9268 = vmatprep.subr.bf16.mxu1 %v13520_v33  ;;  %v2696_v33 = vld [vmem:[%s15519_s8 + $0x1c78] sm:$0xff] }
 0x70d   : > { %v13600_v35 = vcombine.high %v2688_v42, %v2696_v33  ;;  %v13599_v13 = vcombine.low %v2688_v42, %v2696_v33  ;;  %v2808_v48 = vld [vmem:[%s15519_s8 + $0x1ff8] sm:$0xff] }
 0x70e   : > { %9097 = vmatpush1.bf16.msra.mxu0 %v13517_v28  ;;  %v2703_v28 = vld [vmem:[%s15519_s8 + $0x1cb0] sm:$0xff] }
 0x70f   : > { %9269 = vmatpush1.bf16.msra.mxu1 %v13519_v15  ;;  %9098 = vmatprep.subr.bf16.mxu0 %v13534_v32  ;;  %v2711_v15 = vld [vmem:[%s15519_s8 + $0x1cf0] sm:$0xff]  ;;  %v2704_v32 = vld [vmem:[%s15519_s8 + $0x1cb8] sm:$0xff] }
 0x710   : > { %9270 = vmatprep.subr.bf16.mxu1 %v13536_v18  ;;  %v2712_v18 = vld [vmem:[%s15519_s8 + $0x1cf8] sm:$0xff]  ;;  %v13614_v34 = vcombine.high %v2703_v28, %v2711_v15  ;;  %v13613_v24 = vcombine.low %v2703_v28, %v2711_v15 }
 0x711   : > { %v13616_v43 = vcombine.high %v2704_v32, %v2712_v18  ;;  %v13615_v19 = vcombine.low %v2704_v32, %v2712_v18  ;;  %v1758_v28 = vld [vmem:[#allocation2 + $0x68] sm:$0xff]  ;;  %v1760_v32 = vld [vmem:[#allocation2 + $0x78] sm:$0xff]  ;;  %v1773_v18 = vld [vmem:[#allocation2 + $0xe0] sm:$0xff] }
 0x712   : > { %9099 = vmatpush1.bf16.msra.mxu0 %v13533_v38  ;;  %v2719_v38 = vld [vmem:[%s15519_s8 + $0x1d30] sm:$0xff] }
 0x713   : > { %9271 = vmatpush1.bf16.msra.mxu1 %v13535_v54  ;;  %9100 = vmatprep.subr.bf16.mxu0 %v13550_v14  ;;  %v2727_v54 = vld [vmem:[%s15519_s8 + $0x1d70] sm:$0xff]  ;;  %v2720_v14 = vld [vmem:[%s15519_s8 + $0x1d38] sm:$0xff] }
 0x714   : > { %v8780_v3 = vpop.f32.mrb[32].mxu0  ;;  %9272 = vmatprep.subr.bf16.mxu1 %v13552_v40  ;;  %v2728_v40 = vld [vmem:[%s15519_s8 + $0x1d78] sm:$0xff]  ;;  %v13630_v47 = vcombine.high %v2719_v38, %v2727_v54 }
 0x715   : > { %v9313_v45 = vadd.f32 %v8780_v3, %v1753_v36  ;;  %v8952_v46 = vpop.f32.mrb[32].mxu1  ;;  %v8782_v10 = vpop.f32.mrb[33].mxu0  ;;  %v13632_v26 = vcombine.high %v2720_v14, %v2728_v40  ;;  %v2735_v36 = vld [vmem:[%s15519_s8 + $0x1db0] sm:$0xff] }
 0x716   : > { %v9315_v62 = vadd.f32 %v8952_v46, %v1755_v1  ;;  %v9314_v63 = vadd.f32 %v8782_v10, %v1754_v44  ;;  %v8954_v59 = vpop.f32.mrb[33].mxu1  ;;  %v8784_v60 = vpop.f32.mrb[34].mxu0  ;;  %9101 = vmatpush1.bf16.msra.mxu0 %v13549_v2  ;;  %v2743_v1 = vld [vmem:[%s15519_s8 + $0x1df0] sm:$0xff]  ;;  %v2736_v2 = vld [vmem:[%s15519_s8 + $0x1db8] sm:$0xff] }
 0x717   : > { %9345 = vst [vmem:[#allocation2 + $0x40] sm:$0xff] %v9313_v45  ;;  %v9316_v11 = vadd.f32 %v8954_v59, %v1756_v4  ;;  %v9329_v23 = vadd.f32 %v8784_v60, %v1769_v9  ;;  %v8956_v41 = vpop.f32.mrb[34].mxu1  ;;  %9273 = vmatpush1.bf16.msra.mxu1 %v13551_v55  ;;  %v8786_v0 = vpop.f32.mrb[35].mxu0  ;;  %9102 = vmatprep.subr.bf16.mxu0 %v13566_v25  ;;  %v2744_v44 = vld [vmem:[%s15519_s8 + $0x1df8] sm:$0xff]  ;;  %v2751_v3 = vld [vmem:[%s15519_s8 + $0x1e30] sm:$0xff] }
 0x718   : > { %9347 = vst [vmem:[#allocation2 + $0x50] sm:$0xff] %v9315_v62  ;;  %9346 = vst [vmem:[#allocation2 + $0x48] sm:$0xff] %v9314_v63  ;;  %v9331_v56 = vadd.f32 %v8956_v41, %v1771_v6  ;;  %v9330_v16 = vadd.f32 %v8786_v0, %v1770_v20  ;;  %v8958_v7 = vpop.f32.mrb[35].mxu1  ;;  %9274 = vmatprep.subr.bf16.mxu1 %v13568_v58  ;;  %v13629_v4 = vcombine.low %v2719_v38, %v2727_v54  ;;  %v2759_v6 = vld [vmem:[%s15519_s8 + $0x1e70] sm:$0xff]  ;;  %v2752_v58 = vld [vmem:[%s15519_s8 + $0x1e38] sm:$0xff] }
 0x719   : > { %9348 = vst [vmem:[#allocation2 + $0x58] sm:$0xff] %v9316_v11  ;;  %9361 = vst [vmem:[#allocation2 + $0xc0] sm:$0xff] %v9329_v23  ;;  %v9332_v61 = vadd.f32 %v8958_v7, %v1772_v52  ;;  %v13631_v55 = vcombine.low %v2720_v14, %v2728_v40  ;;  %v13646_v9 = vcombine.high %v2735_v36, %v2743_v1  ;;  %v2767_v20 = vld [vmem:[%s15519_s8 + $0x1eb0] sm:$0xff]  ;;  %v2776_v62 = vld [vmem:[%s15519_s8 + $0x1ef8] sm:$0xff] }
 0x71a   : > { %9363 = vst [vmem:[#allocation2 + $0xd0] sm:$0xff] %v9331_v56  ;;  %9362 = vst [vmem:[#allocation2 + $0xc8] sm:$0xff] %v9330_v16  ;;  %9103 = vmatpush1.bf16.msra.mxu0 %v13565_v5  ;;  %v13648_v25 = vcombine.high %v2736_v2, %v2744_v44  ;;  %v13645_v39 = vcombine.low %v2735_v36, %v2743_v1  ;;  %v13647_v45 = vcombine.low %v2736_v2, %v2744_v44  ;;  %v2783_v5 = vld [vmem:[%s15519_s8 + $0x1f30] sm:$0xff]  ;;  %v2784_v11 = vld [vmem:[%s15519_s8 + $0x1f38] sm:$0xff] }
 0x71b   : > { %9364 = vst [vmem:[#allocation2 + $0xd8] sm:$0xff] %v9332_v61  ;;  %9275 = vmatpush1.bf16.msra.mxu1 %v13567_v22  ;;  %9104 = vmatprep.subr.bf16.mxu0 %v13582_v8  ;;  %v13662_v46 = vcombine.high %v2751_v3, %v2759_v6  ;;  %v13664_v10 = vcombine.high %v2752_v58, %v2760_v57  ;;  %v2791_v22 = vld [vmem:[%s15519_s8 + $0x1f70] sm:$0xff]  ;;  %v2792_v23 = vld [vmem:[%s15519_s8 + $0x1f78] sm:$0xff] }
 0x71c   : > { %9276 = vmatprep.subr.bf16.mxu1 %v13584_v37  ;;  %v13661_v63 = vcombine.low %v2751_v3, %v2759_v6  ;;  %v13663_v59 = vcombine.low %v2752_v58, %v2760_v57  ;;  %v13678_v60 = vcombine.high %v2767_v20, %v2775_v49  ;;  %v13680_v52 = vcombine.high %v2768_v51, %v2776_v62  ;;  %v2799_v16 = vld [vmem:[%s15519_s8 + $0x1fb0] sm:$0xff]  ;;  %v2800_v37 = vld [vmem:[%s15519_s8 + $0x1fb8] sm:$0xff] }
 0x71d   : > { %v13677_v41 = vcombine.low %v2767_v20, %v2775_v49  ;;  %v13679_v0 = vcombine.low %v2768_v51, %v2776_v62  ;;  %v13694_v8 = vcombine.high %v2783_v5, %v2791_v22  ;;  %v13696_v56 = vcombine.high %v2784_v11, %v2792_v23  ;;  %v2807_v7 = vld [vmem:[%s15519_s8 + $0x1ff0] sm:$0xff]  ;;  %v1774_v38 = vld [vmem:[#allocation2 + $0xe8] sm:$0xff] }
 0x71e   : > { %9105 = vmatpush1.bf16.msra.mxu0 %v13581_v29  ;;  %v13693_v21 = vcombine.low %v2783_v5, %v2791_v22  ;;  %v13695_v61 = vcombine.low %v2784_v11, %v2792_v23  ;;  %v13710_v42 = vcombine.high %v2799_v16, %v2807_v7  ;;  %v13712_v33 = vcombine.high %v2800_v37, %v2808_v48 }
 0x71f   : > { %9277 = vmatpush1.bf16.msra.mxu1 %v13583_v30  ;;  %9106 = vmatprep.subr.bf16.mxu0 %v13598_v53  ;;  %v13709_v29 = vcombine.low %v2799_v16, %v2807_v7  ;;  %v13711_v30 = vcombine.low %v2800_v37, %v2808_v48  ;;  %v1757_v53 = vld [vmem:[#allocation2 + $0x60] sm:$0xff] }
 0x720   : > { %9278 = vmatprep.subr.bf16.mxu1 %v13600_v35  ;;  %v1759_v35 = vld [vmem:[#allocation2 + $0x70] sm:$0xff] }
 0x722   : > { %9107 = vmatpush1.bf16.msra.mxu0 %v13597_v27 }
 0x723   : > { %9279 = vmatpush1.bf16.msra.mxu1 %v13599_v13  ;;  %9108 = vmatprep.subr.bf16.mxu0 %v13614_v34 }
 0x724   : > { %9280 = vmatprep.subr.bf16.mxu1 %v13616_v43  ;;  %v1775_v43 = vld [vmem:[#allocation2 + $0xf0] sm:$0xff] }
 0x726   : > { %9109 = vmatpush1.bf16.msra.mxu0 %v13613_v24 }
 0x727   : > { %9281 = vmatpush1.bf16.msra.mxu1 %v13615_v19  ;;  %9110 = vmatprep.subr.bf16.mxu0 %v13630_v47  ;;  %v1776_v19 = vld [vmem:[#allocation2 + $0xf8] sm:$0xff] }
 0x728   : > { %9282 = vmatprep.subr.bf16.mxu1 %v13632_v26 }
 0x72a   : > { %9111 = vmatpush1.bf16.msra.mxu0 %v13629_v4 }
 0x72b   : > { %9283 = vmatpush1.bf16.msra.mxu1 %v13631_v55  ;;  %9112 = vmatprep.subr.bf16.mxu0 %v13646_v9 }
 0x72c   : > { %9284 = vmatprep.subr.bf16.mxu1 %v13648_v25 }
 0x72e   : > { %9113 = vmatpush1.bf16.msra.mxu0 %v13645_v39 }
 0x72f   : > { %9285 = vmatpush1.bf16.msra.mxu1 %v13647_v45  ;;  %9114 = vmatprep.subr.bf16.mxu0 %v13662_v46 }
 0x730   : > { %9286 = vmatprep.subr.bf16.mxu1 %v13664_v10 }
 0x732   : > { %9115 = vmatpush1.bf16.msra.mxu0 %v13661_v63 }
 0x733   : > { %9287 = vmatpush1.bf16.msra.mxu1 %v13663_v59  ;;  %9116 = vmatprep.subr.bf16.mxu0 %v13678_v60 }
 0x734   : > { %9288 = vmatprep.subr.bf16.mxu1 %v13680_v52 }
 0x736   : > { %9117 = vmatpush1.bf16.msra.mxu0 %v13677_v41 }
 0x737   : > { %9289 = vmatpush1.bf16.msra.mxu1 %v13679_v0  ;;  %9118 = vmatprep.subr.bf16.mxu0 %v13694_v8 }
 0x738   : > { %9290 = vmatprep.subr.bf16.mxu1 %v13696_v56 }
 0x73a   : > { %9119 = vmatpush1.bf16.msra.mxu0 %v13693_v21 }
 0x73b   : > { %9291 = vmatpush1.bf16.msra.mxu1 %v13695_v61  ;;  %9120 = vmatprep.subr.bf16.mxu0 %v13710_v42 }
 0x73c   : > { %9292 = vmatprep.subr.bf16.mxu1 %v13712_v33 }
 0x73e   : > { %9121 = vmatpush1.bf16.msra.mxu0 %v13709_v29 }
 0x73f   : > { %9293 = vmatpush1.bf16.msra.mxu1 %v13711_v30 }
 0x741   : > { %9123 = vmatmul.mubr.bf16.vlgmr.msra.gmra.mrb[36].mxu0 %v15949_v31 }
 0x742   : > { %9295 = vmatmul.mubr.bf16.vlgmr.msra.gmra.mrb[36].mxu1 %v15949_v31 }
 0x814   : > { %v9124_v15 = vpop.f32.mrb[36].mxu0 }
 0x815   : > { %v9317_v27 = vadd.f32 %v9124_v15, %v1757_v53  ;;  %v9296_v13 = vpop.f32.mrb[36].mxu1  ;;  %v9126_v34 = vpop.f32.mrb[37].mxu0  ;;  %9372 = sbr.rel (%p13713_p12) target bundleno = 3248 (0xcb0), region = 120 }
 0x816   : > { %v9319_v54 = vadd.f32 %v9296_v13, %v1759_v35  ;;  %v9318_v14 = vadd.f32 %v9126_v34, %v1758_v28  ;;  %v9298_v40 = vpop.f32.mrb[37].mxu1  ;;  %v9128_v24 = vpop.f32.mrb[38].mxu0 }
 0x817   : > { %9349 = vst [vmem:[#allocation2 + $0x60] sm:$0xff] %v9317_v27  ;;  %v9320_v47 = vadd.f32 %v9298_v40, %v1760_v32  ;;  %v9333_v26 = vadd.f32 %v9128_v24, %v1773_v18  ;;  %v9300_v31 = vpop.f32.mrb[38].mxu1  ;;  %v9130_v36 = vpop.f32.mrb[39].mxu0 }
 0x818   : > { %9351 = vst [vmem:[#allocation2 + $0x70] sm:$0xff] %v9319_v54  ;;  %9350 = vst [vmem:[#allocation2 + $0x68] sm:$0xff] %v9318_v14  ;;  %v9335_v1 = vadd.f32 %v9300_v31, %v1775_v43  ;;  %v9334_v2 = vadd.f32 %v9130_v36, %v1774_v38  ;;  %v9302_v44 = vpop.f32.mrb[39].mxu1 }
 0x819   : > { %9352 = vst [vmem:[#allocation2 + $0x78] sm:$0xff] %v9320_v47  ;;  %9365 = vst [vmem:[#allocation2 + $0xe0] sm:$0xff] %v9333_v26  ;;  %v9336_v4 = vadd.f32 %v9302_v44, %v1776_v19 }
 0x81a   : > { %9367 = vst [vmem:[#allocation2 + $0xf0] sm:$0xff] %v9335_v1  ;;  %9366 = vst [vmem:[#allocation2 + $0xe8] sm:$0xff] %v9334_v2 }
 0x81b   : > { %9368 = vst [vmem:[#allocation2 + $0xf8] sm:$0xff] %v9336_v4 }
 0x81c   : > { %v9374_v55 = vld [vmem:[#allocation12 + $0x8] sm:$0xff]  ;;  %v16938_v6 = vld [vmem:[#allocation12] sm:$0xff]  ;;  %v15086_v39 = vmov 0.0   ;;  %v9376_v46 = vld [vmem:[#allocation12 + $0x18] sm:$0xff]  ;;  %vm9519_vm2 = vcmask 130048   ;;  %s17868_s2 = sld [smem:[#allocation70_spill]] }
 0x81d   : > { %v9390_v9 = vld [vmem:[#allocation2 + $0x8] sm:$0xff]  ;;  %v9428_v3 = vrot.slane %v9374_v55, %v15592_v12  ;;  %v9389_v58 = vld [vmem:[#allocation2] sm:$0xff]  ;;  %9590 = vmatprep.mubr.f32.mxu0 %v15086_v39  ;;  %9827 = vmatprep.mubr.f32.mxu1 %v15086_v39  ;;  %v9424_v45 = vrot.slane %v16938_v6, %v15592_v12  ;;  %v9392_v49 = vld [vmem:[#allocation2 + $0x18] sm:$0xff]  ;;  %v9436_v62 = vrot.slane %v9376_v46, %v15592_v12 }
 0x81e   : > { %v9406_v25 = vld [vmem:[#allocation2 + $0x88] sm:$0xff]  ;;  %v9405_v57 = vld [vmem:[#allocation2 + $0x80] sm:$0xff]  ;;  %v9408_v51 = vld [vmem:[#allocation2 + $0x98] sm:$0xff] }
 0x81f   : > { %v9486_v10 = vadd.f32 %v9428_v3, %v9390_v9  ;;  %v9502_v20 = vadd.f32 %v9428_v3, %v9406_v25  ;;  %v16945_v63 = vld [vmem:[#allocation12 + $0x10] sm:$0xff]  ;;  %v9485_v59 = vadd.f32 %v9424_v45, %v9389_v58  ;;  %v9501_v60 = vadd.f32 %v9424_v45, %v9405_v57  ;;  %v16949_v11 = vld [vmem:[#allocation12 + $0x28] sm:$0xff]  ;;  %v16953_v7 = vld [vmem:[#allocation12 + $0x38] sm:$0xff] }
 0x820   : > { %v9391_v52 = vld [vmem:[#allocation2 + $0x10] sm:$0xff]  ;;  %v9432_v22 = vrot.slane %v16945_v63, %v15592_v12  ;;  %v9488_v41 = vadd.f32 %v9436_v62, %v9392_v49  ;;  %v9504_v0 = vadd.f32 %v9436_v62, %v9408_v51  ;;  %v9394_v8 = vld [vmem:[#allocation2 + $0x28] sm:$0xff]  ;;  %v9444_v16 = vrot.slane %v16949_v11, %v15592_v12  ;;  %v9396_v42 = vld [vmem:[#allocation2 + $0x38] sm:$0xff] }
 0x821   : > { %v9407_v5 = vld [vmem:[#allocation2 + $0x90] sm:$0xff]  ;;  %v14135_v23 = vpack.c.bf16 %v9502_v20, %v9486_v10  ;;  %v9410_v56 = vld [vmem:[#allocation2 + $0xa8] sm:$0xff]  ;;  %v14137_v37 = vpack.c.bf16 %v9501_v60, %v9485_v59  ;;  %v9412_v33 = vld [vmem:[#allocation2 + $0xb8] sm:$0xff]  ;;  %v9452_v29 = vrot.slane %v16953_v7, %v15592_v12 }
 0x822   : > { %v16955_v48 = vld [vmem:[#allocation11] sm:$0xff]  ;;  %v9487_v21 = vadd.f32 %v9432_v22, %v9391_v52  ;;  %v9503_v61 = vadd.f32 %v9432_v22, %v9407_v5  ;;  %v16959_v30 = vld [vmem:[#allocation12 + $0x20] sm:$0xff]  ;;  %v14139_v53 = vpack.c.bf16 %v9504_v0, %v9488_v41  ;;  %v9490_v35 = vadd.f32 %v9444_v16, %v9394_v8  ;;  %v16967_v40 = vld [vmem:[#allocation12 + $0x58] sm:$0xff] }
 0x823   : > { %14136 = vmatprep.subr.bf16.mxu0 %v14135_v23  ;;  %v9506_v28 = vadd.f32 %v9444_v16, %v9410_v56  ;;  %v9393_v15 = vld [vmem:[#allocation2 + $0x20] sm:$0xff]  ;;  %v9440_v18 = vrot.slane %v16959_v30, %v15592_v12  ;;  %v16963_v27 = vld [vmem:[#allocation12 + $0x30] sm:$0xff]  ;;  %v9492_v34 = vadd.f32 %v9452_v29, %v9396_v42  ;;  %v9508_v43 = vadd.f32 %v9452_v29, %v9412_v33  ;;  %v9400_v19 = vld [vmem:[#allocation2 + $0x58] sm:$0xff] }
 0x824   : > { %v9409_v32 = vld [vmem:[#allocation2 + $0xa0] sm:$0xff]  ;;  %14138 = vmatpush1.bf16.msra.mxu0 %v14137_v37  ;;  %v14141_v13 = vpack.c.bf16 %v9503_v61, %v9487_v21  ;;  %v9395_v38 = vld [vmem:[#allocation2 + $0x30] sm:$0xff]  ;;  %v9448_v14 = vrot.slane %v16963_v27, %v15592_v12  ;;  %v9416_v47 = vld [vmem:[#allocation2 + $0xd8] sm:$0xff]  ;;  %v9468_v26 = vrot.slane %v16967_v40, %v15592_v12 }
 0x825   : > { %v9411_v54 = vld [vmem:[#allocation2 + $0xb0] sm:$0xff]  ;;  %14140 = vmatprep.subr.bf16.mxu0 %v14139_v53  ;;  %v14143_v24 = vpack.c.bf16 %v9506_v28, %v9490_v35  ;;  %v14147_v36 = vpack.c.bf16 %v9508_v43, %v9492_v34  ;;  %v9489_v9 = vadd.f32 %v9440_v18, %v9393_v15  ;;  %v9505_v25 = vadd.f32 %v9440_v18, %v9409_v32  ;;  %v16978_v57 = vld [vmem:[#allocation11 + $0x8] sm:$0xff]  ;;  %v16980_v51 = vld [vmem:[#allocation12 + $0x48] sm:$0xff] }
 0x826   : > { %v16971_v31 = vld [vmem:[#allocation12 + $0x50] sm:$0xff]  ;;  %v9491_v1 = vadd.f32 %v9448_v14, %v9395_v38  ;;  %v9507_v2 = vadd.f32 %v9448_v14, %v9411_v54  ;;  %v9496_v3 = vadd.f32 %v9468_v26, %v9400_v19  ;;  %v9512_v58 = vadd.f32 %v9468_v26, %v9416_v47  ;;  %v9388_v62 = vld [vmem:[#allocation12 + $0x78] sm:$0xff]  ;;  %v9398_v23 = vld [vmem:[#allocation2 + $0x48] sm:$0xff] }
 0x827   : > { %v9399_v44 = vld [vmem:[#allocation2 + $0x50] sm:$0xff]  ;;  %v9464_v55 = vrot.slane %v16971_v31, %v15592_v12  ;;  %13714 = vmatmul.mubr.msk.f32.vlgmr.msra.gmra.mrb[0].mxu0 %vm9519_vm2, %v16955_v48  ;;  %14267 = vmatprep.subr.bf16.mxu1 %v14147_v36  ;;  %v9404_v59 = vld [vmem:[#allocation2 + $0x78] sm:$0xff]  ;;  %v9484_v52 = vrot.slane %v9388_v62, %v15592_v12  ;;  %v14145_v22 = vpack.c.bf16 %v9505_v25, %v9489_v9  ;;  %v9414_v41 = vld [vmem:[#allocation2 + $0xc8] sm:$0xff] }
 0x828   : > { %v9415_v4 = vld [vmem:[#allocation2 + $0xd0] sm:$0xff]  ;;  %9596 = vmatprep.mubr.f32.mxu0 %v15086_v39  ;;  %14142 = vmatpush1.bf16.msra.mxu0 %v14141_v13  ;;  %v14149_v45 = vpack.c.bf16 %v9507_v2, %v9491_v1  ;;  %v14155_v20 = vpack.c.bf16 %v9512_v58, %v9496_v3  ;;  %v9420_v60 = vld [vmem:[#allocation2 + $0xf8] sm:$0xff]  ;;  %v9460_v56 = vrot.slane %v16980_v51, %v15592_v12  ;;  %v16994_v61 = vld [vmem:[#allocation12 + $0x40] sm:$0xff] }
 0x829   : > { %v9495_v46 = vadd.f32 %v9464_v55, %v9399_v44  ;;  %v9511_v10 = vadd.f32 %v9464_v55, %v9415_v4  ;;  %14144 = vmatprep.subr.bf16.mxu0 %v14143_v24  ;;  %v9387_v5 = vld [vmem:[#allocation12 + $0x70] sm:$0xff]  ;;  %v9500_v16 = vadd.f32 %v9484_v52, %v9404_v59  ;;  %v9516_v37 = vadd.f32 %v9484_v52, %v9420_v60  ;;  %v9386_v33 = vld [vmem:[#allocation12 + $0x68] sm:$0xff]  ;;  %v9397_v32 = vld [vmem:[#allocation2 + $0x40] sm:$0xff] }
 0x82a   : > { %14268 = vmatpush1.bf16.msra.mxu1 %v14149_v45  ;;  %v9403_v0 = vld [vmem:[#allocation2 + $0x70] sm:$0xff]  ;;  %v9480_v21 = vrot.slane %v9387_v5, %v15592_v12  ;;  %v9494_v35 = vadd.f32 %v9460_v56, %v9398_v23  ;;  %v9510_v28 = vadd.f32 %v9460_v56, %v9414_v41  ;;  %v9413_v18 = vld [vmem:[#allocation2 + $0xc0] sm:$0xff]  ;;  %v9456_v34 = vrot.slane %v16994_v61, %v15592_v12  ;;  %v9402_v43 = vld [vmem:[#allocation2 + $0x68] sm:$0xff] }
 0x82b   : > { %v14157_v49 = vpack.c.bf16 %v9511_v10, %v9495_v46  ;;  %13715 = vmatmul.mubr.msk.f32.gmra.mrb[2].mxu0 %vm9519_vm2, %v16978_v57  ;;  %14156 = vmatprep.subr.bf16.mxu1 %v14155_v20  ;;  %v9419_v8 = vld [vmem:[#allocation2 + $0xf0] sm:$0xff]  ;;  %v14163_v42 = vpack.c.bf16 %v9516_v37, %v9500_v16  ;;  %v17002_v13 = vld [vmem:[#allocation12 + $0x60] sm:$0xff]  ;;  %v9418_v38 = vld [vmem:[#allocation2 + $0xe8] sm:$0xff]  ;;  %v9476_v14 = vrot.slane %v9386_v33, %v15592_v12 }
 0x82c   : > { %9667 = vmatprep.mubr.f32.mxu0 %v15086_v39  ;;  %v9499_v29 = vadd.f32 %v9480_v21, %v9403_v0  ;;  %v9515_v53 = vadd.f32 %v9480_v21, %v9419_v8  ;;  %v14151_v54 = vpack.c.bf16 %v9510_v28, %v9494_v35  ;;  %v9401_v24 = vld [vmem:[#allocation2 + $0x60] sm:$0xff]  ;;  %v9493_v47 = vadd.f32 %v9456_v34, %v9397_v32  ;;  %v14449_v46 = vld [vmem:[#allocation14 + $0x8] sm:$0xff]   ;;  %v14450_v10 = vld [vmem:[#allocation14 + $0x50] sm:$0xff]  }
 0x82d   : > { %13721 = vmatmul.mubr.msk.f32.vlgmr.msra.gmra.mrb[0].mxu1 %vm9519_vm2, %v16978_v57  ;;  %v9417_v19 = vld [vmem:[#allocation2 + $0xe0] sm:$0xff]  ;;  %v9509_v26 = vadd.f32 %v9456_v34, %v9413_v18  ;;  %v9498_v1 = vadd.f32 %v9476_v14, %v9402_v43  ;;  %v9514_v2 = vadd.f32 %v9476_v14, %v9418_v38  ;;  %v14456_v59 = vld [vmem:[#allocation14 + $0x18] sm:$0xff]   ;;  %v14459_v52 = vld [vmem:[#allocation14 + $0xd0] sm:$0xff]  }
 0x82e   : > { %14158 = vmatpush1.bf16.msra.mxu1 %v14157_v49  ;;  %9975 = vmatprep.mubr.f32.mxu1 %v15086_v39  ;;  %v14165_v15 = vpack.c.bf16 %v9515_v53, %v9499_v29  ;;  %v14446_v3 = vld [vmem:[#allocation14 + $0x40] sm:$0xff]   ;;  %v14452_v49 = vld [vmem:[#allocation14 + $0x10] sm:$0xff]   ;;  %v14462_v23 = vld [vmem:[#allocation14 + $0x68] sm:$0xff]  }
 0x82f   : > { %13716 = vmatmul.mubr.msk.f32.vlgmr.msra.gmra.mrb[4].mxu0 %vm9519_vm2, %v16955_v48  ;;  %14164 = vmatprep.subr.bf16.mxu1 %v14163_v42  ;;  %v14153_v44 = vpack.c.bf16 %v9509_v26, %v9493_v47  ;;  %v14159_v9 = vpack.c.bf16 %v9514_v2, %v9498_v1  ;;  %v14447_v58 = vld [vmem:[#allocation14] sm:$0xff]   ;;  %v14463_v41 = vld [vmem:[#allocation14 + $0xd8] sm:$0xff]   ;;  %v14464_v0 = vld [vmem:[#allocation14 + $0x28] sm:$0xff]   ;;  %v17060_v2 = vrot.slane %v16938_v6, %v15812_v17 }
 0x830   : > { %9673 = vmatprep.mubr.f32.mxu0 %v15086_v39  ;;  %14146 = vmatpush1.bf16.msra.mxu0 %v14145_v22  ;;  %v14451_v20 = vld [vmem:[#allocation14 + $0xc0] sm:$0xff]   ;;  %v14461_v22 = vld [vmem:[#allocation14 + $0x90] sm:$0xff]   ;;  %v14465_v8 = vld [vmem:[#allocation14 + $0x98] sm:$0xff]  }
 0x831   : > { %14148 = vmatprep.subr.bf16.mxu0 %v14147_v36  ;;  %13724 = vmatmul.mubr.msk.f32.vlgmr.msra.gmra.mrb[2].mxu1 %vm9519_vm2, %v16955_v48  ;;  %v9472_v36 = vrot.slane %v17002_v13, %v15592_v12  ;;  %v14453_v62 = vld [vmem:[#allocation14 + $0x80] sm:$0xff]   ;;  %v14466_v56 = vld [vmem:[#allocation14 + $0x70] sm:$0xff]   ;;  %v14470_v42 = vld [vmem:[#allocation14 + $0x78] sm:$0xff]  }
 0x832   : > { %9981 = vmatprep.mubr.f32.mxu1 %v15086_v39  ;;  %14166 = vmatpush1.bf16.msra.mxu1 %v14165_v15  ;;  %v14458_v60 = vld [vmem:[#allocation14 + $0x60] sm:$0xff]   ;;  %v14468_v37 = vld [vmem:[#allocation14 + $0x30] sm:$0xff]   ;;  %v14471_v33 = vld [vmem:[#allocation14 + $0xe8] sm:$0xff]  }
 0x833   : > { %13717 = vmatmul.mubr.msk.f32.gmra.mrb[6].mxu0 %vm9519_vm2, %v16978_v57  ;;  %v9497_v4 = vadd.f32 %v9472_v36, %v9401_v24  ;;  %v9513_v55 = vadd.f32 %v9472_v36, %v9417_v19  ;;  %13903 = vmatprep.subr.bf16.mxu1 %v14451_v20  ;;  %v14460_v5 = vld [vmem:[#allocation14 + $0x20] sm:$0xff]   ;;  %v14472_v29 = vld [vmem:[#allocation14 + $0x38] sm:$0xff]   ;;  %v14473_v53 = vld [vmem:[#allocation14 + $0xa8] sm:$0xff]   ;;  %v17054_v36 = vrot.slane %v16938_v6, %v15781_v50 }
 0x834   : > { %9744 = vmatprep.mubr.f32.mxu0 %v15086_v39  ;;  %v14467_v16 = vld [vmem:[#allocation14 + $0xe0] sm:$0xff]   ;;  %v14474_v35 = vld [vmem:[#allocation14 + $0xf0] sm:$0xff]   ;;  %v14478_v32 = vld [vmem:[#allocation14 + $0xf8] sm:$0xff]  }
 0x835   : > { %13725 = vmatmul.mubr.msk.f32.gmra.mrb[4].mxu1 %vm9519_vm2, %v16978_v57  ;;  %v14161_v25 = vpack.c.bf16 %v9513_v55, %v9497_v4  ;;  %v14469_v21 = vld [vmem:[#allocation14 + $0xa0] sm:$0xff]   ;;  %v14476_v15 = vld [vmem:[#allocation14 + $0xb0] sm:$0xff]   ;;  %v14480_v18 = vld [vmem:[#allocation14 + $0xb8] sm:$0xff]  }
 0x836   : > { %10129 = vmatprep.mubr.f32.mxu1 %v15086_v39  ;;  %v14475_v28 = vld [vmem:[#allocation14 + $0x140] sm:$0xff]   ;;  %v14624_v4 = vld [vmem:[#allocation12 + $0x8] sm:$0xff]  ;;  %v14625_v6 = vld [vmem:[#allocation12 + $0x18] sm:$0xff] }
 0x837   : > { %13718 = vmatmul.mubr.msk.f32.vlgmr.msra.gmra.mrb[8].mxu0 %vm9519_vm2, %v16955_v48  ;;  %v14483_v34 = vld [vmem:[#allocation14 + $0x1c0] sm:$0xff]   ;;  %v17063_v55 = vrot.slane %v14624_v4, %v15781_v50 }
 0x838   : > { %9750 = vmatprep.mubr.f32.mxu0 %v15086_v39  ;;  %14150 = vmatpush1.bf16.msra.mxu0 %v14149_v45  ;;  %v14448_v45 = vld [vmem:[#allocation14 + $0x48] sm:$0xff]  }
 0x839   : > { %14152 = vmatprep.subr.bf16.mxu0 %v14151_v54  ;;  %13728 = vmatmul.mubr.msk.f32.vlgmr.msra.gmra.mrb[6].mxu1 %vm9519_vm2, %v16955_v48 }
 0x83a   : > { %10135 = vmatprep.mubr.f32.mxu1 %v15086_v39  ;;  %13904 = vmatpush3.bf16.msra.mxu1 %v14453_v62  ;;  %v17090_v62 = vrot.slane %v16949_v11, %v15781_v50  ;;  %v17110_v11 = vrot.slane %v16971_v31, %v15812_v17 }
 0x83b   : > { %13719 = vmatmul.mubr.msk.f32.gmra.mrb[10].mxu0 %vm9519_vm2, %v16978_v57 }
 0x83c   : > { %9821 = vmatprep.mubr.f32.mxu0 %v15086_v39  ;;  %17814 = vst [vmem:[#allocation44_spill] sm:$0xff] %v17090_v62  ;;  %17818 = vst [vmem:[#allocation48_spill] sm:$0xff] %v17110_v11 }
 0x83d   : > { %13729 = vmatmul.mubr.msk.f32.gmra.mrb[8].mxu1 %vm9519_vm2, %v16978_v57 }
 0x83f   : > { %13720 = vmatmul.mubr.msk.f32.vlgmr.msra.gmra.mrb[12].mxu0 %vm9519_vm2, %v16955_v48 }
 0x840   : > { %14154 = vmatpush1.bf16.msra.mxu0 %v14153_v44  ;;  %9898 = vmatprep.mubr.f32.mxu0 %v15086_v39 }
 0x841   : > { %14160 = vmatprep.subr.bf16.mxu0 %v14159_v9 }
 0x843   : > { %13722 = vmatmul.mubr.msk.f32.vlgmr.msra.gmra.mrb[14].mxu0 %vm9519_vm2, %v16955_v48 }
 0x844   : > { %9904 = vmatprep.mubr.f32.mxu0 %v15086_v39  ;;  %14162 = vmatpush1.bf16.msra.mxu0 %v14161_v25  ;;  %v17069_v25 = vrot.slane %v16945_v63, %v15781_v50 }
 0x845   : > { %13881 = vmatprep.subr.bf16.mxu0 %v14446_v3 }
 0x847   : > { %13723 = vmatmul.mubr.msk.f32.gmra.mrb[16].mxu0 %vm9519_vm2, %v16978_v57 }
 0x848   : > { %10052 = vmatprep.mubr.f32.mxu0 %v15086_v39 }
 0x84b   : > { %13726 = vmatmul.mubr.msk.f32.vlgmr.msra.gmra.mrb[18].mxu0 %vm9519_vm2, %v16955_v48  ;;  %v14455_v48 = vld [vmem:[#allocation14 + $0xc8] sm:$0xff]  }
 0x84c   : > { %10058 = vmatprep.mubr.f32.mxu0 %v15086_v39  ;;  %13882 = vmatpush3.bf16.msra.mxu0 %v14447_v58  ;;  %v14454_v39 = vld [vmem:[#allocation14 + $0x58] sm:$0xff]  }
 0x84d   : > { %13883 = vmatprep.subr.bf16.mxu0 %v14448_v45  ;;  %13905 = vmatprep.subr.bf16.mxu1 %v14455_v48  ;;  %v17075_v45 = vrot.slane %v16945_v63, %v15812_v17  ;;  %v17096_v63 = vrot.slane %v16963_v27, %v15781_v50 }
 0x84f   : > { %13727 = vmatmul.mubr.msk.f32.gmra.mrb[20].mxu0 %vm9519_vm2, %v16978_v57  ;;  %v14457_v57 = vld [vmem:[#allocation14 + $0x88] sm:$0xff]   ;;  %17815 = vst [vmem:[#allocation45_spill] sm:$0xff] %v17096_v63 }
 0x850   : > { %13884 = vmatpush3.bf16.msra.mxu0 %v14449_v46  ;;  %13906 = vmatpush3.bf16.msra.mxu1 %v14457_v57  ;;  %v17078_v46 = vrot.slane %v14625_v6, %v15781_v50  ;;  %v17102_v57 = vrot.slane %v16963_v27, %v15812_v17  ;;  %v17123_v27 = vrot.slane %v14624_v4, %v15812_v17 }
 0x851   : > { %13885 = vmatprep.subr.bf16.mxu0 %v14450_v10  ;;  %13907 = vmatprep.subr.bf16.mxu1 %v14459_v52  ;;  %v17082_v10 = vrot.slane %v16959_v30, %v15781_v50 }
 0x852   : > { %17816 = vst [vmem:[#allocation46_spill] sm:$0xff] %v17102_v57  ;;  %17821 = vst [vmem:[#allocation51_spill] sm:$0xff] %v17123_v27 }
 0x853   : > { %17812 = vst [vmem:[#allocation42_spill] sm:$0xff] %v17082_v10 }
 0x854   : > { %13886 = vmatpush3.bf16.msra.mxu0 %v14452_v49  ;;  %13908 = vmatpush3.bf16.msra.mxu1 %v14461_v22  ;;  %v17086_v49 = vrot.slane %v16959_v30, %v15812_v17  ;;  %v17106_v30 = vrot.slane %v16971_v31, %v15781_v50  ;;  %v17120_v22 = vrot.slane %v16967_v40, %v15781_v50 }
 0x855   : > { %13887 = vmatprep.subr.bf16.mxu0 %v14454_v39  ;;  %13909 = vmatprep.subr.bf16.mxu1 %v14463_v41 }
 0x856   : > { %17813 = vst [vmem:[#allocation43_spill] sm:$0xff] %v17086_v49  ;;  %17817 = vst [vmem:[#allocation47_spill] sm:$0xff] %v17106_v30 }
 0x857   : > { %17820 = vst [vmem:[#allocation50_spill] sm:$0xff] %v17120_v22 }
 0x858   : > { %13888 = vmatpush3.bf16.msra.mxu0 %v14456_v59  ;;  %13910 = vmatpush3.bf16.msra.mxu1 %v14465_v8 }
 0x859   : > { %13889 = vmatprep.subr.bf16.mxu0 %v14458_v60  ;;  %13911 = vmatprep.subr.bf16.mxu1 %v14467_v16 }
 0x85c   : > { %13890 = vmatpush3.bf16.msra.mxu0 %v14460_v5  ;;  %13912 = vmatpush3.bf16.msra.mxu1 %v14469_v21  ;;  %v17116_v5 = vrot.slane %v16953_v7, %v15781_v50  ;;  %v17134_v7 = vrot.slane %v14625_v6, %v15812_v17  ;;  %v14626_v21 = vld [vmem:[#allocation12 + $0x28] sm:$0xff] }
 0x85d   : > { %13891 = vmatprep.subr.bf16.mxu0 %v14462_v23  ;;  %13913 = vmatprep.subr.bf16.mxu1 %v14471_v33 }
 0x85e   : > { %17819 = vst [vmem:[#allocation49_spill] sm:$0xff] %v17116_v5  ;;  %17823 = vst [vmem:[#allocation53_spill] sm:$0xff] %v17134_v7 }
 0x860   : > { %13892 = vmatpush3.bf16.msra.mxu0 %v14464_v0  ;;  %13914 = vmatpush3.bf16.msra.mxu1 %v14473_v53  ;;  %v17131_v0 = vrot.slane %v16994_v61, %v15781_v50 }
 0x861   : > { %13893 = vmatprep.subr.bf16.mxu0 %v14466_v56  ;;  %13915 = vmatprep.subr.bf16.mxu1 %v14474_v35 }
 0x862   : > { %17822 = vst [vmem:[#allocation52_spill] sm:$0xff] %v17131_v0 }
 0x864   : > { %13894 = vmatpush3.bf16.msra.mxu0 %v14468_v37  ;;  %13916 = vmatpush3.bf16.msra.mxu1 %v14476_v15  ;;  %v17142_v37 = vrot.slane %v16994_v61, %v15812_v17 }
 0x865   : > { %13895 = vmatprep.subr.bf16.mxu0 %v14470_v42  ;;  %13917 = vmatprep.subr.bf16.mxu1 %v14478_v32  ;;  %v17145_v42 = vrot.slane %v14626_v21, %v15812_v17 }
 0x866   : > { %17824 = vst [vmem:[#allocation54_spill] sm:$0xff] %v17142_v37 }
 0x867   : > { %17825 = vst [vmem:[#allocation55_spill] sm:$0xff] %v17145_v42 }
 0x868   : > { %13896 = vmatpush3.bf16.msra.mxu0 %v14472_v29  ;;  %13918 = vmatpush3.bf16.msra.mxu1 %v14480_v18 }
 0x869   : > { %13925 = vmatprep.subr.bf16.mxu0 %v14475_v28  ;;  %13947 = vmatprep.subr.bf16.mxu1 %v14483_v34  ;;  %v17153_v28 = vrot.slane %v16980_v51, %v15781_v50  ;;  %v14627_v34 = vld [vmem:[#allocation12 + $0x38] sm:$0xff] }
 0x86b   : > { %17826 = vst [vmem:[#allocation56_spill] sm:$0xff] %v17153_v28 }
 0x8fa   : > { %v17038_v43 = vpop.f32.mrb[0].mxu0 }
 0x8fb   : > { %v17040_v38 = vpop.f32.mrb[1].mxu0 }
 0x8fe   : > { %v17042_v54 = vpop.f32.mrb[2].mxu0 }
 0x8ff   : > { %v10142_v14 = vadd.f32 %v17042_v54, %v17038_v43  ;;  %v17046_v24 = vpop.f32.mrb[3].mxu0 }
 0x900   : > { %v10149_v19 = vadd.f32 %v17046_v24, %v17040_v38  ;;  %v17050_v47 = vpop.f32.mrb[0].mxu1 }
 0x901   : > { %v10143_v26 = vrot.slane %v10142_v14, 4  ;;  %v17056_v1 = vpop.f32.mrb[1].mxu1 }
 0x902   : > { %v10150_v44 = vrot.slane %v10149_v19, 4  ;;  %v17065_v9 = vpop.f32.mrb[4].mxu0 }
 0x903   : > { %v10144_v3 = vadd.f32 %v10143_v26, %v10142_v14  ;;  %v17071_v58 = vpop.f32.mrb[5].mxu0  ;;  %v17160_v14 = vrot.slane %v14627_v34, %v15812_v17 }
 0x904   : > { %v10151_v20 = vadd.f32 %v10150_v44, %v10149_v19  ;;  %v17092_v39 = vpop.f32.mrb[2].mxu1 }
 0x905   : > { %v10145_v48 = vrot.slane %v10144_v3, 2  ;;  %v17098_v59 = vpop.f32.mrb[3].mxu1  ;;  %17827 = vst [vmem:[#allocation57_spill] sm:$0xff] %v17160_v14 }
 0x906   : > { %v10152_v60 = vrot.slane %v10151_v20, 2  ;;  %v17112_v52 = vpop.f32.mrb[6].mxu0 }
 0x907   : > { %v10146_v23 = vadd.f32 %v10145_v48, %v10144_v3  ;;  %v10156_v41 = vadd.f32 %v17112_v52, %v17065_v9  ;;  %v17127_v31 = vpop.f32.mrb[7].mxu0  ;;  %v17166_v3 = vrot.slane %v16967_v40, %v15812_v17  ;;  %v17182_v40 = vrot.slane %v16980_v51, %v15812_v17 }
 0x908   : > { %v10153_v8 = vadd.f32 %v10152_v60, %v10151_v20  ;;  %v10163_v56 = vadd.f32 %v17127_v31, %v17071_v58  ;;  %v17138_v16 = vpop.f32.mrb[4].mxu1  ;;  %v17170_v60 = vrot.slane %v17002_v13, %v15781_v50 }
 0x909   : > { %v10147_v33 = vrot.slane %v10146_v23, 1  ;;  %v10157_v29 = vrot.slane %v10156_v41, 4  ;;  %v10212_v53 = vadd.f32 %v17138_v16, %v17092_v39  ;;  %v17149_v35 = vpop.f32.mrb[5].mxu1  ;;  %17828 = vst [vmem:[#allocation58_spill] sm:$0xff] %v17166_v3  ;;  %17833 = vst [vmem:[#allocation63_spill] sm:$0xff] %v17182_v40 }
 0x90a   : > { %v10154_v15 = vrot.slane %v10153_v8, 1  ;;  %v10164_v32 = vrot.slane %v10163_v56, 4  ;;  %v17155_v18 = vpop.f32.mrb[8].mxu0  ;;  %v10219_v61 = vadd.f32 %v17149_v35, %v17098_v59  ;;  %17829 = vst [vmem:[#allocation59_spill] sm:$0xff] %v17170_v60 }
 0x90b   : > { %v10148_v19 = vadd.f32 %v10147_v33, %v10146_v23  ;;  %v10158_v26 = vadd.f32 %v10157_v29, %v10156_v41  ;;  %v17162_v44 = vpop.f32.mrb[9].mxu0  ;;  %v10213_v4 = vrot.slane %v10212_v53, 4  ;;  %v17176_v23 = vrot.slane %v17002_v13, %v15812_v17 }
 0x90c   : > { %v10155_v6 = vadd.f32 %v10154_v15, %v10153_v8  ;;  %v10165_v20 = vadd.f32 %v10164_v32, %v10163_v56  ;;  %v10220_v48 = vrot.slane %v10219_v61, 4  ;;  %v17172_v21 = vpop.f32.mrb[6].mxu1 }
 0x90d   : > { %17830 = vst [vmem:[#allocation60_spill] sm:$0xff] %v17172_v21  ;;  %v10254_v34 = vmul.f32 0.0625, %v10148_v19  ;;  %v10159_v12 = vrot.slane %v10158_v26, 2  ;;  %17831 = vst [vmem:[#allocation61_spill] sm:$0xff] %v17176_v23  ;;  %v17178_v41 = vpop.f32.mrb[7].mxu1  ;;  %v10214_v29 = vadd.f32 %v10213_v4, %v10212_v53 }
 0x90e   : > { %17832 = vst [vmem:[#allocation62_spill] sm:$0xff] %v17178_v41  ;;  %v10255_v8 = vmul.f32 0.0625, %v10155_v6  ;;  %v10166_v56 = vrot.slane %v10165_v20, 2  ;;  %v17184_v33 = vpop.f32.mrb[10].mxu0  ;;  %v17186_v15 = vadd.f32 %v10220_v48, %v10219_v61 }
 0x90f   : > { %v17189_v32 = vsub.f32 %v17038_v43, %v10254_v34  ;;  %v17192_v19 = vsub.f32 %v17042_v54, %v10254_v34  ;;  %v10160_v13 = vadd.f32 %v10159_v12, %v10158_v26  ;;  %v10170_v23 = vadd.f32 %v17184_v33, %v17155_v18  ;;  %v17196_v60 = vpop.f32.mrb[11].mxu0 }
 0x910   : > { %v17199_v51 = vsub.f32 %v17040_v38, %v10255_v8  ;;  %v17202_v6 = vsub.f32 %v17046_v24, %v10255_v8  ;;  %v10167_v53 = vadd.f32 %v10166_v56, %v10165_v20  ;;  %v10177_v43 = vadd.f32 %v17196_v60, %v17162_v44  ;;  %v17206_v61 = vpop.f32.mrb[8].mxu1 }
 0x911   : > { %17834 = vst [vmem:[#allocation64_spill] sm:$0xff] %v17206_v61  ;;  %v10302_v12 = vmul.f32 %v17189_v32, %v17189_v32  ;;  %v10318_v54 = vmul.f32 %v17192_v19, %v17192_v19  ;;  %v10161_v26 = vrot.slane %v10160_v13, 1  ;;  %v10171_v4 = vrot.slane %v10170_v23, 4  ;;  %v17212_v48 = vpop.f32.mrb[9].mxu1 }
 0x912   : > { %17835 = vst [vmem:[#allocation65_spill] sm:$0xff] %v17212_v48  ;;  %v10303_v38 = vmul.f32 %v17199_v51, %v17199_v51  ;;  %v10319_v24 = vmul.f32 %v17202_v6, %v17202_v6  ;;  %v10168_v20 = vrot.slane %v10167_v53, 1  ;;  %v10178_v34 = vrot.slane %v10177_v43, 4  ;;  %v17218_v8 = vpop.f32.mrb[12].mxu0 }
 0x913   : > { %v10334_v56 = vadd.f32 %v10318_v54, %v10302_v12  ;;  %v10162_v17 = vadd.f32 %v10161_v26, %v10160_v13  ;;  %v10172_v40 = vadd.f32 %v10171_v4, %v10170_v23  ;;  %v10184_v3 = vadd.f32 %v17050_v47, %v17218_v8  ;;  %v17222_v28 = vpop.f32.mrb[13].mxu0 }
 0x914   : > { %v10341_v37 = vadd.f32 %v10319_v24, %v10303_v38  ;;  %v10169_v0 = vadd.f32 %v10168_v20, %v10167_v53  ;;  %v10179_v14 = vadd.f32 %v10178_v34, %v10177_v43  ;;  %v10215_v42 = vrot.slane %v10214_v29, 2 }
 0x915   : > { %v10335_v7 = vrot.slane %v10334_v56, 4  ;;  %v10256_v22 = vmul.f32 0.0625, %v10162_v17  ;;  %v10173_v5 = vrot.slane %v10172_v40, 2  ;;  %v10185_v27 = vrot.slane %v10184_v3, 4 }
 0x916   : > { %v10342_v57 = vrot.slane %v10341_v37, 4  ;;  %v10257_v11 = vmul.f32 0.0625, %v10169_v0  ;;  %v10180_v63 = vrot.slane %v10179_v14, 2  ;;  %v10216_v30 = vadd.f32 %v10215_v42, %v10214_v29  ;;  %v17224_v12 = vpop.f32.mrb[14].mxu0 }
 0x917   : > { %v10336_v23 = vadd.f32 %v10335_v7, %v10334_v56  ;;  %v17227_v13 = vsub.f32 %v17065_v9, %v10256_v22  ;;  %v17230_v54 = vsub.f32 %v17112_v52, %v10256_v22  ;;  %v10174_v53 = vadd.f32 %v10173_v5, %v10172_v40  ;;  %v17232_v43 = vpop.f32.mrb[15].mxu0 }
 0x918   : > { %v10343_v26 = vadd.f32 %v10342_v57, %v10341_v37  ;;  %v17235_v17 = vsub.f32 %v17071_v58, %v10257_v11  ;;  %v17238_v0 = vsub.f32 %v17127_v31, %v10257_v11  ;;  %v10181_v42 = vadd.f32 %v10180_v63, %v10179_v14 }
 0x919   : > { %v10337_v29 = vrot.slane %v10336_v23, 2  ;;  %v10304_v7 = vmul.f32 %v17227_v13, %v17227_v13  ;;  %v10320_v9 = vmul.f32 %v17230_v54, %v17230_v54  ;;  %v10175_v52 = vrot.slane %v10174_v53, 1 }
 0x91a   : > { %v10344_v22 = vrot.slane %v10343_v26, 2  ;;  %v10305_v5 = vmul.f32 %v17235_v17, %v17235_v17  ;;  %v10321_v58 = vmul.f32 %v17238_v0, %v17238_v0  ;;  %v10182_v57 = vrot.slane %v10181_v42, 1  ;;  %v17248_v37 = vpop.f32.mrb[16].mxu0 }
 0x91b   : > { %v10338_v11 = vadd.f32 %v10337_v29, %v10336_v23  ;;  %v10348_v63 = vadd.f32 %v10320_v9, %v10304_v7  ;;  %v10176_v31 = vadd.f32 %v10175_v52, %v10174_v53  ;;  %v10186_v14 = vadd.f32 %v10185_v27, %v10184_v3  ;;  %v17250_v40 = vpop.f32.mrb[17].mxu0 }
 0x91c   : > { %v10345_v4 = vadd.f32 %v10344_v22, %v10343_v26  ;;  %v10355_v38 = vadd.f32 %v10321_v58, %v10305_v5  ;;  %v10183_v24 = vadd.f32 %v10182_v57, %v10181_v42  ;;  %v10217_v20 = vrot.slane %v10216_v30, 1 }
 0x91d   : > { %v10339_v34 = vrot.slane %v10338_v11, 1  ;;  %v10349_v56 = vrot.slane %v10348_v63, 4  ;;  %v10258_v48 = vmul.f32 0.0625, %v10176_v31  ;;  %v10187_v41 = vrot.slane %v10186_v14, 2 }
 0x91e   : > { %v10346_v62 = vrot.slane %v10345_v4, 1  ;;  %v10356_v61 = vrot.slane %v10355_v38, 4  ;;  %v10259_v21 = vmul.f32 0.0625, %v10183_v24  ;;  %v10218_v49 = vadd.f32 %v10217_v20, %v10216_v30  ;;  %v17252_v10 = vpop.f32.mrb[18].mxu0 }
 0x91f   : > { %v10340_v23 = vadd.f32 %v10339_v34, %v10338_v11  ;;  %v10350_v29 = vadd.f32 %v10349_v56, %v10348_v63  ;;  %v17255_v27 = vsub.f32 %v17155_v18, %v10258_v48  ;;  %v17258_v3 = vsub.f32 %v17184_v33, %v10258_v48  ;;  %v17260_v53 = vpop.f32.mrb[19].mxu0 }
 0x920   : > { %v10347_v26 = vadd.f32 %v10346_v62, %v10345_v4  ;;  %v10357_v42 = vadd.f32 %v10356_v61, %v10355_v38  ;;  %v17263_v7 = vsub.f32 %v17162_v44, %v10259_v21  ;;  %v17266_v9 = vsub.f32 %v17196_v60, %v10259_v21 }
 0x921   : > { %v10446_v30 = vmul.f32 0.0625, %v10340_v23  ;;  %v10351_v52 = vrot.slane %v10350_v29, 2  ;;  %v10306_v22 = vmul.f32 %v17255_v27, %v17255_v27  ;;  %v10322_v18 = vmul.f32 %v17258_v3, %v17258_v3 }
 0x922   : > { %v10447_v33 = vmul.f32 0.0625, %v10347_v26  ;;  %v10358_v48 = vrot.slane %v10357_v42, 2  ;;  %v10307_v62 = vmul.f32 %v17263_v7, %v17263_v7  ;;  %v10323_v44 = vmul.f32 %v17266_v9, %v17266_v9  ;;  %v17276_v61 = vpop.f32.mrb[20].mxu0 }
 0x923   : > { %v10462_v60 = vadd.f32 1e-05, %v10446_v30  ;;  %v10352_v21 = vadd.f32 %v10351_v52, %v10350_v29  ;;  %v10362_v5 = vadd.f32 %v10322_v18, %v10306_v22  ;;  %v10188_v58 = vadd.f32 %v10187_v41, %v10186_v14  ;;  %v17278_v57 = vpop.f32.mrb[21].mxu0 }
 0x924   : > { %v10463_v11 = vadd.f32 1e-05, %v10447_v33  ;;  %v10359_v63 = vadd.f32 %v10358_v48, %v10357_v42  ;;  %v10369_v31 = vadd.f32 %v10323_v44, %v10307_v62  ;;  %v10264_v4 = vmul.f32 0.0625, %v10218_v49 }
 0x925   : > { %14582 = vrsqrt.f32 %v10462_v60  ;;  %v10353_v38 = vrot.slane %v10352_v21, 1  ;;  %v10363_v24 = vrot.slane %v10362_v5, 4  ;;  %v10189_v20 = vrot.slane %v10188_v58, 1 }
 0x926   : > { %14584 = vrsqrt.f32 %v10463_v11  ;;  %v10360_v34 = vrot.slane %v10359_v63, 1  ;;  %v10370_v56 = vrot.slane %v10369_v31, 4  ;;  %v17281_v23 = vsub.f32 %v17092_v39, %v10264_v4 }
 0x927   : > { %v10354_v26 = vadd.f32 %v10353_v38, %v10352_v21  ;;  %v10364_v29 = vadd.f32 %v10363_v24, %v10362_v5  ;;  %v10190_v30 = vadd.f32 %v10189_v20, %v10188_v58  ;;  %v17284_v41 = vsub.f32 %v17138_v16, %v10264_v4 }
 0x928   : > { %v10361_v14 = vadd.f32 %v10360_v34, %v10359_v63  ;;  %v10371_v42 = vadd.f32 %v10370_v56, %v10369_v31  ;;  %v10312_v49 = vmul.f32 %v17281_v23, %v17281_v23  ;;  %v10191_v52 = vadd.f32 %v17056_v1, %v17222_v28 }
 0x929   : > { %v10448_v22 = vmul.f32 0.0625, %v10354_v26  ;;  %v10365_v18 = vrot.slane %v10364_v29, 2  ;;  %v10260_v33 = vmul.f32 0.0625, %v10190_v30  ;;  %v10328_v39 = vmul.f32 %v17284_v41, %v17284_v41 }
 0x92a   : > { %v10449_v48 = vmul.f32 0.0625, %v10361_v14  ;;  %v10372_v62 = vrot.slane %v10371_v42, 2  ;;  %v10192_v44 = vrot.slane %v10191_v52, 4  ;;  %v10222_v16 = vrot.slane %v17186_v15, 2 }
 0x92b   : > { %v10464_v60 = vadd.f32 1e-05, %v10448_v22  ;;  %v10366_v21 = vadd.f32 %v10365_v18, %v10364_v29  ;;  %v17294_v5 = vsub.f32 %v17218_v8, %v10260_v33  ;;  %v17297_v58 = vsub.f32 %v17050_v47, %v10260_v33 }
 0x92c   : > { %v10465_v11 = vadd.f32 1e-05, %v10449_v48  ;;  %v10373_v63 = vadd.f32 %v10372_v62, %v10371_v42  ;;  %v10404_v31 = vadd.f32 %v10328_v39, %v10312_v49  ;;  %v10193_v4 = vadd.f32 %v10192_v44, %v10191_v52 }
 0x92d   : > { %14586 = vrsqrt.f32 %v10464_v60  ;;  %v10367_v38 = vrot.slane %v10366_v21, 1  ;;  %v10308_v24 = vmul.f32 %v17294_v5, %v17294_v5  ;;  %v10324_v20 = vmul.f32 %v17297_v58, %v17297_v58 }
 0x92e   : > { %14588 = vrsqrt.f32 %v10465_v11  ;;  %v10374_v34 = vrot.slane %v10373_v63, 1  ;;  %v10405_v56 = vrot.slane %v10404_v31, 4  ;;  %v10194_v8 = vrot.slane %v10193_v4, 2 }
 0x92f   : > { %v14583_v26 = vpop.eup %14582  ;;  %v10368_v29 = vadd.f32 %v10367_v38, %v10366_v21  ;;  %v10376_v47 = vadd.f32 %v10324_v20, %v10308_v24  ;;  %v10223_v30 = vadd.f32 %v10222_v16, %v17186_v15  ;;  %v17306_v14 = vadd.f32 %v17248_v37, %v17224_v12  ;;  %v17316_v38 = vld [vmem:[#allocation12 + $0x68] sm:$0xff] }
 0x930   : > { %v14585_v42 = vpop.eup %14584  ;;  %v10494_v49 = vmul.f32 %v14583_v26, %v17189_v32  ;;  %v10510_v52 = vmul.f32 %v14583_v26, %v17192_v19  ;;  %v10375_v22 = vadd.f32 %v10374_v34, %v10373_v63  ;;  %v10406_v18 = vadd.f32 %v10405_v56, %v10404_v31 }
 0x931   : > { %v17311_v33 = vmul.f32 %v14585_v42, %v17199_v51  ;;  %v10511_v39 = vmul.f32 %v14585_v42, %v17202_v6  ;;  %v10450_v48 = vmul.f32 0.0625, %v10368_v29  ;;  %v10377_v62 = vrot.slane %v10376_v47, 4 }
 0x932   : > { %v10590_v15 = vmul.f32 %v17054_v36, %v10494_v49  ;;  %v10606_v44 = vmul.f32 %v17054_v36, %v10510_v52  ;;  %v10451_v16 = vmul.f32 0.0625, %v10375_v22  ;;  %v10407_v60 = vrot.slane %v10406_v18, 2 }
 0x933   : > { %v10466_v21 = vadd.f32 1e-05, %v10450_v48  ;;  %v10378_v11 = vadd.f32 %v10377_v62, %v10376_v47  ;;  %v10195_v32 = vadd.f32 %v10194_v8, %v10193_v4  ;;  %v17320_v19 = vrot.slane %v17316_v38, %v15781_v50 }
 0x934   : > { %v10686_v51 = vadd.f32 %v17060_v2, %v10590_v15  ;;  %v10702_v6 = vadd.f32 %v17060_v2, %v10606_v44  ;;  %v10467_v63 = vadd.f32 1e-05, %v10451_v16  ;;  %v10408_v31 = vadd.f32 %v10407_v60, %v10406_v18 }
 0x935   : > { %17836 = vst [vmem:[#allocation66_spill] sm:$0xff] %v17320_v19  ;;  %14590 = vrsqrt.f32 %v10466_v21  ;;  %v10379_v24 = vrot.slane %v10378_v11, 2  ;;  %v10196_v36 = vrot.slane %v10195_v32, 1  ;;  %v10224_v20 = vrot.slane %v10223_v30, 1 }
 0x936   : > { %v10718_v34 = vmax.f32 %v10686_v51, 0.0  ;;  %v10734_v56 = vmax.f32 %v10702_v6, 0.0  ;;  %14592 = vrsqrt.f32 %v10467_v63  ;;  %v10409_v4 = vrot.slane %v10408_v31, 1 }
 0x937   : > { %v14587_v8 = vpop.eup %14586  ;;  %v17325_v26 = vmul.f32 %v17063_v55, %v10511_v39  ;;  %v10380_v29 = vadd.f32 %v10379_v24, %v10378_v11  ;;  %v10197_v47 = vadd.f32 %v10196_v36, %v10195_v32  ;;  %v10225_v42 = vadd.f32 %v10224_v20, %v10223_v30 }
 0x938   : > { %v14589_v49 = vpop.eup %14588  ;;  %v17327_v52 = vpack.c.bf16 %v10734_v56, %v10718_v34  ;;  %v10496_v2 = vmul.f32 %v14587_v8, %v17227_v13  ;;  %v10512_v22 = vmul.f32 %v14587_v8, %v17230_v54  ;;  %v10410_v18 = vadd.f32 %v10409_v4, %v10408_v31 }
 0x939   : > { %v17332_v48 = vmul.f32 %v14589_v49, %v17235_v17  ;;  %v10513_v62 = vmul.f32 %v14589_v49, %v17238_v0  ;;  %v10381_v15 = vrot.slane %v10380_v29, 1  ;;  %v10261_v44 = vmul.f32 0.0625, %v10197_v47 }
 0x93a   : > { %v10592_v39 = vmul.f32 %v17069_v25, %v10496_v2  ;;  %v10608_v16 = vmul.f32 %v17069_v25, %v10512_v22  ;;  %v10456_v30 = vmul.f32 0.0625, %v10410_v18  ;;  %v10265_v60 = vmul.f32 0.0625, %v10225_v42 }
 0x93b   : > { %v10382_v21 = vadd.f32 %v10381_v15, %v10380_v29  ;;  %v17338_v11 = vsub.f32 %v17222_v28, %v10261_v44  ;;  %v17341_v13 = vsub.f32 %v17056_v1, %v10261_v44  ;;  %v10199_v54 = vrot.slane %v17306_v14, 4 }
 0x93c   : > { %v10688_v17 = vadd.f32 %v17075_v45, %v10592_v39  ;;  %v10704_v0 = vadd.f32 %v17075_v45, %v10608_v16  ;;  %v10472_v32 = vadd.f32 1e-05, %v10456_v30  ;;  %v17347_v51 = vsub.f32 %v17098_v59, %v10265_v60  ;;  %v17838_v39 = vld [vmem:[#allocation43_spill] sm:$0xff] }
 0x93d   : > { %v10452_v25 = vmul.f32 0.0625, %v10382_v21  ;;  %v10309_v6 = vmul.f32 %v17338_v11, %v17338_v11  ;;  %v10325_v28 = vmul.f32 %v17341_v13, %v17341_v13  ;;  %v17354_v1 = vsub.f32 %v17149_v35, %v10265_v60 }
 0x93e   : > { %v10720_v63 = vmax.f32 %v10688_v17, 0.0  ;;  %v10736_v31 = vmax.f32 %v10704_v0, 0.0  ;;  %14594 = vrsqrt.f32 %v10472_v32  ;;  %v10313_v45 = vmul.f32 %v17347_v51, %v17347_v51  ;;  %v17839_v17 = vld [vmem:[#allocation60_spill] sm:$0xff] }
 0x93f   : > { %v14591_v24 = vpop.eup %14590  ;;  %v10468_v36 = vadd.f32 1e-05, %v10452_v25  ;;  %v10383_v59 = vadd.f32 %v10325_v28, %v10309_v6  ;;  %v10329_v20 = vmul.f32 %v17354_v1, %v17354_v1  ;;  %v10200_v34 = vadd.f32 %v10199_v54, %v17306_v14  ;;  %v17837_v14 = vld [vmem:[#allocation42_spill] sm:$0xff]  ;;  %v17840_v0 = vld [vmem:[#allocation64_spill] sm:$0xff] }
 0x940   : > { %v14593_v56 = vpop.eup %14592  ;;  %v17361_v4 = vpack.c.bf16 %v10736_v31, %v10720_v63  ;;  %v10498_v35 = vmul.f32 %v14591_v24, %v17255_v27  ;;  %v10514_v8 = vmul.f32 %v14591_v24, %v17258_v3  ;;  %v10205_v29 = vadd.f32 %v17250_v40, %v17232_v43  ;;  %v17841_v25 = vld [vmem:[#allocation44_spill] sm:$0xff] }
 0x941   : > { %v17368_v47 = vmul.f32 %v14593_v56, %v17263_v7  ;;  %v10515_v42 = vmul.f32 %v14593_v56, %v17266_v9  ;;  %14596 = vrsqrt.f32 %v10468_v36  ;;  %v10384_v49 = vrot.slane %v10383_v59, 4 }
 0x942   : > { %v17372_v2 = vmul.f32 %v17078_v46, %v10513_v62  ;;  %v10610_v22 = vmul.f32 %v17837_v14, %v10514_v8  ;;  %v10411_v18 = vadd.f32 %v10329_v20, %v10313_v45  ;;  %v10201_v15 = vrot.slane %v10200_v34, 2  ;;  %v17842_v8 = vld [vmem:[#allocation62_spill] sm:$0xff] }
 0x943   : > { %v17376_v27 = vmul.f32 %v17837_v14, %v10498_v35  ;;  %v10385_v3 = vadd.f32 %v10384_v49, %v10383_v59  ;;  %v10206_v44 = vrot.slane %v10205_v29, 4  ;;  %v10226_v7 = vadd.f32 %v17276_v61, %v17252_v10 }
 0x944   : > { %v17381_v16 = vadd.f32 %v17838_v39, %v10610_v22  ;;  %v10412_v9 = vrot.slane %v10411_v18, 4  ;;  %v10202_v30 = vadd.f32 %v10201_v15, %v10200_v34  ;;  %v10233_v62 = vadd.f32 %v17278_v57, %v17260_v53 }
 0x945   : > { %v10386_v60 = vrot.slane %v10385_v3, 2  ;;  %v10207_v21 = vadd.f32 %v10206_v44, %v10205_v29  ;;  %v10227_v54 = vrot.slane %v10226_v7, 4  ;;  %v10240_v32 = vadd.f32 %v17840_v0, %v17839_v17  ;;  %v17843_v29 = vld [vmem:[#allocation65_spill] sm:$0xff] }
 0x946   : > { %v17388_v6 = vmul.f32 %v17841_v25, %v10515_v42  ;;  %v10413_v28 = vadd.f32 %v10412_v9, %v10411_v18  ;;  %v10203_v63 = vrot.slane %v10202_v30, 1  ;;  %v10234_v31 = vrot.slane %v10233_v62, 4 }
 0x947   : > { %v10387_v24 = vadd.f32 %v10386_v60, %v10385_v3  ;;  %v10208_v36 = vrot.slane %v10207_v21, 2  ;;  %v10228_v59 = vadd.f32 %v10227_v54, %v10226_v7  ;;  %v10247_v49 = vadd.f32 %v17843_v29, %v17842_v8  ;;  %v17844_v60 = vld [vmem:[#allocation47_spill] sm:$0xff] }
 0x948   : > { %v14595_v20 = vpop.eup %14594  ;;  %v10414_v34 = vrot.slane %v10413_v28, 2  ;;  %v10204_v56 = vadd.f32 %v10203_v63, %v10202_v30  ;;  %v10235_v35 = vadd.f32 %v10234_v31, %v10233_v62  ;;  %v10241_v45 = vrot.slane %v10240_v32, 4 }
 0x949   : > { %v10504_v14 = vmul.f32 %v14595_v20, %v17281_v23  ;;  %v10520_v42 = vmul.f32 %v14595_v20, %v17284_v41  ;;  %v10388_v22 = vrot.slane %v10387_v24, 1  ;;  %v10209_v18 = vadd.f32 %v10208_v36, %v10207_v21  ;;  %v17845_v20 = vld [vmem:[#allocation45_spill] sm:$0xff] }
 0x94a   : > { %v10415_v15 = vadd.f32 %v10414_v34, %v10413_v28  ;;  %v10262_v44 = vmul.f32 0.0625, %v10204_v56  ;;  %v10229_v9 = vrot.slane %v10228_v59, 2  ;;  %v10236_v30 = vrot.slane %v10235_v35, 2  ;;  %v17846_v34 = vld [vmem:[#allocation48_spill] sm:$0xff] }
 0x94b   : > { %v14597_v3 = vpop.eup %14596  ;;  %v10616_v7 = vmul.f32 %v17844_v60, %v10520_v42  ;;  %v10389_v54 = vadd.f32 %v10388_v22, %v10387_v24  ;;  %v10210_v50 = vrot.slane %v10209_v18, 1  ;;  %v17402_v41 = vmul.f32 %v17844_v60, %v10504_v14 }
 0x94c   : > { %v10500_v62 = vmul.f32 %v14597_v3, %v17294_v5  ;;  %v10516_v63 = vmul.f32 %v14597_v3, %v17297_v58  ;;  %v10416_v31 = vrot.slane %v10415_v15, 1  ;;  %v17399_v23 = vsub.f32 %v17224_v12, %v10262_v44 }
 0x94d   : > { %v10453_v21 = vmul.f32 0.0625, %v10389_v54  ;;  %v17405_v28 = vsub.f32 %v17248_v37, %v10262_v44  ;;  %v10211_v36 = vadd.f32 %v10210_v50, %v10209_v18  ;;  %v17409_v56 = vadd.f32 %v17846_v34, %v10616_v7  ;;  %v17847_v37 = vld [vmem:[#allocation46_spill] sm:$0xff] }
 0x94e   : > { %v10596_v24 = vmul.f32 %v17845_v20, %v10500_v62  ;;  %v10417_v5 = vadd.f32 %v10416_v31, %v10415_v15  ;;  %v10310_v58 = vmul.f32 %v17399_v23, %v17399_v23  ;;  %v17414_v12 = vmul.f32 %v17845_v20, %v10516_v63 }
 0x94f   : > { %v10469_v42 = vadd.f32 1e-05, %v10453_v21  ;;  %v10326_v14 = vmul.f32 %v17405_v28, %v17405_v28  ;;  %v10263_v22 = vmul.f32 0.0625, %v10211_v36  ;;  %v10230_v18 = vadd.f32 %v10229_v9, %v10228_v59 }
 0x950   : > { %v17419_v44 = vadd.f32 %v17847_v37, %v10596_v24  ;;  %v10457_v50 = vmul.f32 0.0625, %v10417_v5  ;;  %v10237_v3 = vadd.f32 %v10236_v30, %v10235_v35  ;;  %v10242_v35 = vadd.f32 %v10241_v45, %v10240_v32 }
 0x951   : > { %14598 = vrsqrt.f32 %v10469_v42  ;;  %v10390_v60 = vadd.f32 %v10326_v14, %v10310_v58  ;;  %v17422_v15 = vsub.f32 %v17232_v43, %v10263_v22  ;;  %v17425_v7 = vsub.f32 %v17250_v40, %v10263_v22  ;;  %v17848_v22 = vld [vmem:[#allocation51_spill] sm:$0xff] }
 0x952   : > { %v10473_v62 = vadd.f32 1e-05, %v10457_v50  ;;  %v10231_v63 = vrot.slane %v10230_v18, 1  ;;  %v10238_v31 = vrot.slane %v10237_v3, 1  ;;  %v10248_v30 = vrot.slane %v10247_v49, 4 }
 0x953   : > { %v10391_v21 = vrot.slane %v10390_v60, 4  ;;  %v10311_v36 = vmul.f32 %v17422_v15, %v17422_v15  ;;  %v10327_v59 = vmul.f32 %v17425_v7, %v17425_v7  ;;  %v10243_v24 = vrot.slane %v10242_v35, 2 }
 0x954   : > { %14600 = vrsqrt.f32 %v10473_v62  ;;  %v10232_v9 = vadd.f32 %v10231_v63, %v10230_v18  ;;  %v10239_v43 = vadd.f32 %v10238_v31, %v10237_v3  ;;  %v10591_v5 = vmul.f32 %v17063_v55, %v17311_v33 }
 0x955   : > { %v10392_v20 = vadd.f32 %v10391_v21, %v10390_v60  ;;  %v10397_v40 = vadd.f32 %v10327_v59, %v10311_v36  ;;  %v10249_v14 = vadd.f32 %v10248_v30, %v10247_v49  ;;  %v17436_v50 = vadd.f32 %v17848_v22, %v17325_v26 }
 0x956   : > { %v10266_v58 = vmul.f32 0.0625, %v10232_v9  ;;  %v10267_v42 = vmul.f32 0.0625, %v10239_v43  ;;  %v10244_v32 = vadd.f32 %v10243_v24, %v10242_v35  ;;  %v10687_v45 = vadd.f32 %v17848_v22, %v10591_v5  ;;  %v17850_v5 = vld [vmem:[#allocation49_spill] sm:$0xff] }
 0x957   : > { %v10393_v54 = vrot.slane %v10392_v20, 2  ;;  %v10398_v19 = vrot.slane %v10397_v40, 4  ;;  %v10250_v62 = vrot.slane %v10249_v14, 2 }
 0x958   : > { %v17440_v18 = vsub.f32 %v17252_v10, %v10266_v58  ;;  %v17443_v3 = vsub.f32 %v17276_v61, %v10266_v58  ;;  %v17446_v55 = vsub.f32 %v17260_v53, %v10267_v42  ;;  %v17449_v33 = vsub.f32 %v17278_v57, %v10267_v42 }
 0x959   : > { %v10394_v49 = vadd.f32 %v10393_v54, %v10392_v20  ;;  %v10399_v26 = vadd.f32 %v10398_v19, %v10397_v40  ;;  %v10245_v60 = vrot.slane %v10244_v32, 1  ;;  %v10251_v54 = vadd.f32 %v10250_v62, %v10249_v14 }
 0x95a   : > { %17849 = vst [vmem:[#allocation42_spill] sm:$0xff] %v17449_v33  ;;  %v10314_v63 = vmul.f32 %v17440_v18, %v17440_v18  ;;  %v10330_v10 = vmul.f32 %v17443_v3, %v17443_v3  ;;  %v10315_v61 = vmul.f32 %v17446_v55, %v17446_v55  ;;  %v10331_v53 = vmul.f32 %v17449_v33, %v17449_v33 }
 0x95b   : > { %v14599_v31 = vpop.eup %14598  ;;  %v10395_v21 = vrot.slane %v10394_v49, 1  ;;  %v10400_v57 = vrot.slane %v10399_v26, 2  ;;  %v10246_v36 = vadd.f32 %v10245_v60, %v10244_v32  ;;  %v10252_v40 = vrot.slane %v10251_v54, 1 }
 0x95c   : > { %v10501_v19 = vmul.f32 %v14599_v31, %v17338_v11  ;;  %v17461_v59 = vmul.f32 %v14599_v31, %v17341_v13  ;;  %v10418_v35 = vadd.f32 %v10330_v10, %v10314_v63  ;;  %v10425_v9 = vadd.f32 %v10331_v53, %v10315_v61  ;;  %v17851_v63 = vld [vmem:[#allocation50_spill] sm:$0xff] }
 0x95d   : > { %v10396_v43 = vadd.f32 %v10395_v21, %v10394_v49  ;;  %v10401_v30 = vadd.f32 %v10400_v57, %v10399_v26  ;;  %v10268_v20 = vmul.f32 0.0625, %v10246_v36  ;;  %v10719_v33 = vmax.f32 %v10687_v45, 0.0 }
 0x95e   : > { %v14601_v24 = vpop.eup %14600  ;;  %v17464_v58 = vmul.f32 %v17850_v5, %v10501_v19  ;;  %v10419_v42 = vrot.slane %v10418_v35, 4  ;;  %v10426_v22 = vrot.slane %v10425_v9, 4  ;;  %v10253_v53 = vadd.f32 %v10252_v40, %v10251_v54  ;;  %v14477_v40 = vld [vmem:[#allocation14 + $0x100] sm:$0xff]  }
 0x95f   : > { %v17467_v14 = vmul.f32 %v14601_v24, %v17347_v51  ;;  %v10521_v11 = vmul.f32 %v14601_v24, %v17354_v1  ;;  %v10454_v13 = vmul.f32 0.0625, %v10396_v43  ;;  %v10402_v32 = vrot.slane %v10401_v30, 1 }
 0x960   : > { %v10420_v60 = vadd.f32 %v10419_v42, %v10418_v35  ;;  %v10427_v62 = vadd.f32 %v10426_v22, %v10425_v9  ;;  %v17471_v49 = vsub.f32 %v17839_v17, %v10268_v20  ;;  %v17474_v26 = vsub.f32 %v17840_v0, %v10268_v20 }
 0x961   : > { %v17477_v10 = vmul.f32 %v17851_v63, %v10521_v11  ;;  %v10470_v61 = vadd.f32 1e-05, %v10454_v13  ;;  %v10403_v45 = vadd.f32 %v10402_v32, %v10401_v30  ;;  %v10269_v57 = vmul.f32 0.0625, %v10253_v53  ;;  %v14479_v11 = vld [vmem:[#allocation14 + $0x148] sm:$0xff]  }
 0x962   : > { %v10421_v51 = vrot.slane %v10420_v60, 2  ;;  %v10428_v31 = vrot.slane %v10427_v62, 2  ;;  %v10316_v1 = vmul.f32 %v17471_v49, %v17471_v49  ;;  %v10332_v21 = vmul.f32 %v17474_v26, %v17474_v26 }
 0x963   : > { %14602 = vrsqrt.f32 %v10470_v61  ;;  %v10455_v17 = vmul.f32 0.0625, %v10403_v45  ;;  %v10735_v0 = vmax.f32 %v17436_v50, 0.0  ;;  %v10593_v9 = vmul.f32 %v17078_v46, %v17332_v48  ;;  %v17852_v50 = vld [vmem:[#allocation53_spill] sm:$0xff]  ;;  %v14481_v61 = vld [vmem:[#allocation14 + $0x108] sm:$0xff]  }
 0x964   : > { %v10422_v36 = vadd.f32 %v10421_v51, %v10420_v60  ;;  %v10429_v19 = vadd.f32 %v10428_v31, %v10427_v62  ;;  %v10432_v35 = vadd.f32 %v10332_v21, %v10316_v1  ;;  %v17487_v43 = vsub.f32 %v17842_v8, %v10269_v57  ;;  %v17853_v51 = vld [vmem:[#allocation55_spill] sm:$0xff] }
 0x965   : > { %v10471_v54 = vadd.f32 1e-05, %v10455_v17  ;;  %v17490_v30 = vsub.f32 %v17843_v29, %v10269_v57  ;;  %v10752_v20 = vpack.c.bf16 %v10735_v0, %v10719_v33  ;;  %v10689_v13 = vadd.f32 %v17852_v50, %v10593_v9 }
 0x966   : > { %v10423_v24 = vrot.slane %v10422_v36, 1  ;;  %v10430_v42 = vrot.slane %v10429_v19, 1  ;;  %v10433_v22 = vrot.slane %v10432_v35, 4  ;;  %v10317_v32 = vmul.f32 %v17487_v43, %v17487_v43 }
 0x967   : > { %14604 = vrsqrt.f32 %v10471_v54  ;;  %v10333_v46 = vmul.f32 %v17490_v30, %v17490_v30  ;;  %11827 = vmatprep.mubr.bf16.mxu0 %v10752_v20  ;;  %v10705_v48 = vadd.f32 %v17852_v50, %v17372_v2  ;;  %v10721_v60 = vmax.f32 %v10689_v13, 0.0  ;;  %v14482_v2 = vld [vmem:[#allocation14 + $0x150] sm:$0xff]  }
 0x968   : > { %v10424_v8 = vadd.f32 %v10423_v24, %v10422_v36  ;;  %v10431_v29 = vadd.f32 %v10430_v42, %v10429_v19  ;;  %v10434_v33 = vadd.f32 %v10433_v22, %v10432_v35  ;;  %11828 = vmatmul.mubr.bf16.vlgmr.msra.gmra.mrb[24].mxu0 %v17327_v52  ;;  %v10595_v53 = vmul.f32 %v17841_v25, %v17368_v47  ;;  %v14485_v36 = vld [vmem:[#allocation14 + $0x180] sm:$0xff]   ;;  %v14487_v25 = vld [vmem:[#allocation14 + $0x1c8] sm:$0xff]   ;;  %v14484_v42 = vld [vmem:[#allocation14 + $0x110] sm:$0xff]  }
 0x969   : > { %v10439_v62 = vadd.f32 %v10333_v46, %v10317_v32  ;;  %13926 = vmatpush3.bf16.msra.mxu0 %v14477_v40  ;;  %v10737_v45 = vmax.f32 %v10705_v48, 0.0  ;;  %v10707_v31 = vadd.f32 %v17853_v51, %v17388_v6  ;;  %v10613_v57 = vmul.f32 %v17850_v5, %v17461_v59  ;;  %v17854_v6 = vld [vmem:[#allocation57_spill] sm:$0xff]  ;;  %v14489_v46 = vld [vmem:[#allocation14 + $0x188] sm:$0xff]  }
 0x96a   : > { %v10458_v1 = vmul.f32 0.0625, %v10424_v8  ;;  %v10459_v21 = vmul.f32 0.0625, %v10431_v29  ;;  %v10435_v17 = vrot.slane %v10434_v33, 2  ;;  %13927 = vmatprep.subr.bf16.mxu0 %v14479_v11  ;;  %v10691_v19 = vadd.f32 %v17853_v51, %v10595_v53  ;;  %v17855_v29 = vld [vmem:[#allocation52_spill] sm:$0xff]  ;;  %v17856_v51 = vld [vmem:[#allocation54_spill] sm:$0xff] }
 0x96b   : > { %v10440_v52 = vrot.slane %v10439_v62, 4  ;;  %v10754_v0 = vpack.c.bf16 %v10737_v45, %v10721_v60  ;;  %v10739_v35 = vmax.f32 %v10707_v31, 0.0  ;;  %v10693_v20 = vadd.f32 %v17854_v6, %v17464_v58  ;;  %v14486_v58 = vld [vmem:[#allocation14 + $0x158] sm:$0xff]  }
 0x96c   : > { %v10474_v9 = vadd.f32 1e-05, %v10458_v1  ;;  %v10475_v54 = vadd.f32 1e-05, %v10459_v21  ;;  %v10436_v47 = vadd.f32 %v10435_v17, %v10434_v33  ;;  %v10723_v22 = vmax.f32 %v10691_v19, 0.0 }
 0x96d   : > { %v14603_v40 = vpop.eup %14602  ;;  %v10441_v24 = vadd.f32 %v10440_v52, %v10439_v62  ;;  %13928 = vmatpush3.bf16.msra.mxu0 %v14481_v61  ;;  %11868 = vmatprep.mubr.bf16.mxu1 %v10754_v0  ;;  %v10709_v59 = vadd.f32 %v17854_v6, %v10613_v57  ;;  %v10690_v5 = vadd.f32 %v17838_v39, %v17376_v27  ;;  %v10725_v8 = vmax.f32 %v10693_v20, 0.0  ;;  %v14488_v61 = vld [vmem:[#allocation14 + $0x118] sm:$0xff]   ;;  %v14493_v52 = vld [vmem:[#allocation14 + $0x190] sm:$0xff]   ;;  %v17860_v6 = vld [vmem:[#allocation58_spill] sm:$0xff] }
 0x96e   : > { %v10502_v11 = vmul.f32 %v14603_v40, %v17399_v23  ;;  %v10518_v50 = vmul.f32 %v14603_v40, %v17405_v28  ;;  %14606 = vrsqrt.f32 %v10474_v9  ;;  %v10437_v13 = vrot.slane %v10436_v47, 1  ;;  %13929 = vmatprep.subr.bf16.mxu0 %v14482_v2  ;;  %11869 = vmatmul.mubr.bf16.vlgmr.msra.gmra.mrb[12].mxu1 %v17361_v4  ;;  %v14491_v23 = vld [vmem:[#allocation14 + $0x1d0] sm:$0xff]   ;;  %v14490_v2 = vld [vmem:[#allocation14 + $0x160] sm:$0xff]   ;;  %v14494_v40 = vld [vmem:[#allocation14 + $0x168] sm:$0xff]  }
 0x96f   : > { %14608 = vrsqrt.f32 %v10475_v54  ;;  %v10442_v32 = vrot.slane %v10441_v24, 2  ;;  %13948 = vmatpush3.bf16.msra.mxu1 %v14485_v36  ;;  %v10756_v48 = vpack.c.bf16 %v10739_v35, %v10723_v22  ;;  %v10741_v28 = vmax.f32 %v10709_v59, 0.0 }
 0x970   : > { %v10598_v33 = vmul.f32 %v17855_v29, %v10502_v11  ;;  %v10614_v27 = vmul.f32 %v17855_v29, %v10518_v50  ;;  %v10438_v39 = vadd.f32 %v10437_v13, %v10436_v47  ;;  %13949 = vmatprep.subr.bf16.mxu1 %v14487_v25  ;;  %v10722_v4 = vmax.f32 %v10690_v5, 0.0  ;;  %v14492_v47 = vld [vmem:[#allocation14 + $0x120] sm:$0xff]   ;;  %v14497_v11 = vld [vmem:[#allocation14 + $0x198] sm:$0xff]  }
 0x971   : > { %v14605_v60 = vpop.eup %14604  ;;  %v10443_v62 = vadd.f32 %v10442_v32, %v10441_v24  ;;  %13930 = vmatpush3.bf16.msra.mxu0 %v14484_v42  ;;  %11909 = vmatprep.mubr.bf16.mxu0 %v10756_v48  ;;  %v10708_v45 = vadd.f32 %v17847_v37, %v17414_v12  ;;  %v10601_v53 = vmul.f32 %v17851_v63, %v17467_v14  ;;  %v17857_v36 = vmax.f32 %v17381_v16, 0.0  ;;  %v17858_v63 = vld [vmem:[#allocation56_spill] sm:$0xff]  ;;  %v17861_v24 = vld [vmem:[#allocation63_spill] sm:$0xff]  ;;  %v17862_v13 = vld [vmem:[#allocation41_spill] sm:$0xff] }
 0x972   : > { %v17522_v31 = vadd.f32 %v17856_v51, %v10614_v27  ;;  %v10503_v1 = vmul.f32 %v14605_v60, %v17422_v15  ;;  %v10519_v21 = vmul.f32 %v14605_v60, %v17425_v7  ;;  %v10460_v17 = vmul.f32 0.0625, %v10438_v39  ;;  %13931 = vmatprep.subr.bf16.mxu0 %v14486_v58  ;;  %v14495_v15 = vld [vmem:[#allocation14 + $0x1d8] sm:$0xff]  }
 0x973   : > { %v10444_v57 = vrot.slane %v10443_v62, 1  ;;  %13950 = vmatpush3.bf16.msra.mxu1 %v14489_v46  ;;  %v10758_v0 = vpack.c.bf16 %v10741_v28, %v10725_v8  ;;  %v17528_v12 = vpack.c.bf16 %v17857_v36, %v10722_v4  ;;  %v10740_v37 = vmax.f32 %v10708_v45, 0.0  ;;  %v14499_v46 = vld [vmem:[#allocation14 + $0x1e0] sm:$0xff]   ;;  %v14498_v4 = vld [vmem:[#allocation14 + $0x170] sm:$0xff]   ;;  %v14502_v36 = vld [vmem:[#allocation14 + $0x178] sm:$0xff]  }
 0x974   : > { %v10744_v14 = vmax.f32 %v17409_v56, 0.0  ;;  %v10615_v19 = vmul.f32 %v17858_v63, %v10519_v21  ;;  %v10476_v35 = vadd.f32 1e-05, %v10460_v17  ;;  %13951 = vmatprep.subr.bf16.mxu1 %v14491_v23  ;;  %v10599_v7 = vmul.f32 %v17858_v63, %v10503_v1 }
 0x975   : > { %v10742_v9 = vmax.f32 %v17522_v31, 0.0  ;;  %v10445_v54 = vadd.f32 %v10444_v57, %v10443_v62  ;;  %13932 = vmatpush3.bf16.msra.mxu0 %v14488_v61  ;;  %11950 = vmatprep.mubr.bf16.mxu1 %v10758_v0  ;;  %v17859_v16 = vmax.f32 %v17419_v44, 0.0  ;;  %v10697_v20 = vadd.f32 %v17860_v6, %v10601_v53  ;;  %v17863_v62 = vld [vmem:[#allocation42_spill] sm:$0xff] }
 0x976   : > { %14610 = vrsqrt.f32 %v10476_v35  ;;  %13933 = vmatprep.subr.bf16.mxu0 %v14490_v2  ;;  %v10695_v42 = vadd.f32 %v17861_v24, %v10599_v7  ;;  %v10711_v22 = vadd.f32 %v17861_v24, %v10615_v19  ;;  %v10713_v59 = vadd.f32 %v17860_v6, %v17477_v10  ;;  %v17865_v31 = vld [vmem:[#allocation66_spill] sm:$0xff]  ;;  %v17866_v2 = vld [vmem:[#allocation61_spill] sm:$0xff]  ;;  %v17867_v7 = vld [vmem:[#allocation40_spill] sm:$0xff] }
 0x977   : > { %v17536_v25 = vpack.c.bf16 %v10740_v37, %v17859_v16  ;;  %v10461_v5 = vmul.f32 0.0625, %v10445_v54  ;;  %13952 = vmatpush3.bf16.msra.mxu1 %v14493_v52  ;;  %v10729_v50 = vmax.f32 %v10697_v20, 0.0  ;;  %v10694_v44 = vadd.f32 %v17856_v51, %v10598_v33  ;;  %v14496_v33 = vld [vmem:[#allocation14 + $0x128] sm:$0xff]   ;;  %v14500_v52 = vld [vmem:[#allocation14 + $0x130] sm:$0xff]  }
 0x978   : > { %v10677_v58 = vrot.slane %v17316_v38, %v17862_v13  ;;  %v14607_v32 = vpop.eup %14606  ;;  %13953 = vmatprep.subr.bf16.mxu1 %v14495_v15  ;;  %v10727_v48 = vmax.f32 %v10695_v42, 0.0  ;;  %v10743_v8 = vmax.f32 %v10711_v22, 0.0  ;;  %v10745_v29 = vmax.f32 %v10713_v59, 0.0  ;;  %v14629_v15 = vld [vmem:[#allocation12 + $0x70] sm:$0xff]  ;;  %v14505_v54 = vld [vmem:[#allocation14 + $0x1a8] sm:$0xff]   ;;  %v14507_v59 = vld [vmem:[#allocation14 + $0x240] sm:$0xff]  }
 0x979   : > { %v10696_v27 = vadd.f32 %v17846_v34, %v17402_v41  ;;  %v14609_v39 = vpop.eup %14608  ;;  %v10506_v10 = vmul.f32 %v14607_v32, %v17440_v18  ;;  %v10522_v23 = vmul.f32 %v14607_v32, %v17443_v3  ;;  %v10477_v28 = vadd.f32 1e-05, %v10461_v5  ;;  %13934 = vmatpush3.bf16.msra.mxu0 %v14492_v47  ;;  %v17864_v41 = vld [vmem:[#allocation59_spill] sm:$0xff]  ;;  %v14501_v3 = vld [vmem:[#allocation14 + $0x1a0] sm:$0xff]  }
 0x97a   : > { %v10726_v60 = vmax.f32 %v10694_v44, 0.0  ;;  %v10507_v38 = vmul.f32 %v14609_v39, %v17446_v55  ;;  %v10523_v61 = vmul.f32 %v14609_v39, %v17863_v62  ;;  %13935 = vmatprep.subr.bf16.mxu0 %v14494_v40  ;;  %v17552_v45 = vpack.c.bf16 %v10743_v8, %v10727_v48  ;;  %v14503_v55 = vld [vmem:[#allocation14 + $0x1e8] sm:$0xff]   ;;  %v14506_v6 = vld [vmem:[#allocation14 + $0x1f0] sm:$0xff]   ;;  %v14509_v48 = vld [vmem:[#allocation14 + $0x200] sm:$0xff]  }
 0x97b   : > { %v17554_v53 = vpack.c.bf16 %v10745_v29, %v10729_v50  ;;  %v10602_v34 = vmul.f32 %v17864_v41, %v10506_v10  ;;  %v10618_v18 = vmul.f32 %v17864_v41, %v10522_v23  ;;  %14612 = vrsqrt.f32 %v10477_v28  ;;  %13954 = vmatpush3.bf16.msra.mxu1 %v14497_v11  ;;  %v14508_v44 = vld [vmem:[#allocation14 + $0x1b0] sm:$0xff]   ;;  %v14511_v39 = vld [vmem:[#allocation14 + $0x248] sm:$0xff]   ;;  %v14512_v28 = vld [vmem:[#allocation14 + $0x1b8] sm:$0xff]  }
 0x97c   : > { %v17558_v51 = vpack.c.bf16 %v10742_v9, %v10726_v60  ;;  %v10619_v1 = vmul.f32 %v17865_v31, %v10523_v61  ;;  %13955 = vmatprep.subr.bf16.mxu1 %v14499_v46  ;;  %v10603_v21 = vmul.f32 %v17865_v31, %v10507_v38  ;;  %v10728_v17 = vmax.f32 %v10696_v27, 0.0  ;;  %v14515_v38 = vld [vmem:[#allocation14 + $0x2c0] sm:$0xff]  }
 0x97d   : > { %v10714_v57 = vadd.f32 %v17866_v2, %v10618_v18  ;;  %13936 = vmatpush3.bf16.msra.mxu0 %v14496_v33  ;;  %v10698_v0 = vadd.f32 %v17866_v2, %v10602_v34  ;;  %v10585_v9 = vrot.slane %v14629_v15, %v17867_v7  ;;  %v10681_v56 = vrot.slane %v14629_v15, %v17862_v13  ;;  %v14517_v34 = vld [vmem:[#allocation14 + $0x280] sm:$0xff]   ;;  %v14519_v18 = vld [vmem:[#allocation14 + $0x2c8] sm:$0xff]  }
 0x97e   : > { %13937 = vmatprep.subr.bf16.mxu0 %v14498_v4  ;;  %v10699_v37 = vadd.f32 %v10677_v58, %v10603_v21  ;;  %v10715_v63 = vadd.f32 %v10677_v58, %v10619_v1  ;;  %v17566_v19 = vpack.c.bf16 %v10744_v14, %v10728_v17  ;;  %v14504_v14 = vld [vmem:[#allocation14 + $0x138] sm:$0xff]   ;;  %v14523_v21 = vld [vmem:[#allocation14 + $0x2d0] sm:$0xff]   ;;  %v14522_v2 = vld [vmem:[#allocation14 + $0x260] sm:$0xff]  }
 0x97f   : > { %v10746_v35 = vmax.f32 %v10714_v57, 0.0  ;;  %13956 = vmatpush3.bf16.msra.mxu1 %v14501_v3  ;;  %v10730_v47 = vmax.f32 %v10698_v0, 0.0  ;;  %v14630_v58 = vld [vmem:[#allocation12 + $0x78] sm:$0xff]  ;;  %v14525_v57 = vld [vmem:[#allocation14 + $0x290] sm:$0xff]   ;;  %v14526_v0 = vld [vmem:[#allocation14 + $0x268] sm:$0xff]  }
 0x980   : > { %v14611_v16 = vpop.eup %14610  ;;  %13957 = vmatprep.subr.bf16.mxu1 %v14503_v55  ;;  %v10731_v20 = vmax.f32 %v10699_v37, 0.0  ;;  %v10747_v40 = vmax.f32 %v10715_v63, 0.0  ;;  %v10589_v32 = vrot.slane %v14630_v58, %v17867_v7  ;;  %v10685_v10 = vrot.slane %v14630_v58, %v17862_v13  ;;  %v14518_v1 = vld [vmem:[#allocation14 + $0x258] sm:$0xff]   ;;  %v14521_v55 = vld [vmem:[#allocation14 + $0x288] sm:$0xff]   ;;  %v14531_v37 = vld [vmem:[#allocation14 + $0x2e0] sm:$0xff]  }
 0x981   : > { %v10508_v24 = vmul.f32 %v14611_v16, %v17471_v49  ;;  %v10524_v42 = vmul.f32 %v14611_v16, %v17474_v26  ;;  %13938 = vmatpush3.bf16.msra.mxu0 %v14500_v52  ;;  %v17572_v22 = vpack.c.bf16 %v10746_v35, %v10730_v47  ;;  %v14510_v49 = vld [vmem:[#allocation14 + $0x1f8] sm:$0xff]   ;;  %v14530_v63 = vld [vmem:[#allocation14 + $0x270] sm:$0xff]   ;;  %v14533_v35 = vld [vmem:[#allocation14 + $0x2a0] sm:$0xff]  }
 0x982   : > { %13939 = vmatprep.subr.bf16.mxu0 %v14502_v36  ;;  %v17574_v5 = vpack.c.bf16 %v10747_v40, %v10731_v20  ;;  %v14520_v17 = vld [vmem:[#allocation14 + $0x218] sm:$0xff]   ;;  %v14535_v15 = vld [vmem:[#allocation14 + $0x2e8] sm:$0xff]   ;;  %v14538_v16 = vld [vmem:[#allocation14 + $0x2f0] sm:$0xff]  }
 0x983   : > { %v10604_v11 = vmul.f32 %v10585_v9, %v10508_v24  ;;  %v10620_v50 = vmul.f32 %v10585_v9, %v10524_v42  ;;  %13958 = vmatpush3.bf16.msra.mxu1 %v14505_v54  ;;  %v14527_v52 = vld [vmem:[#allocation14 + $0x2d8] sm:$0xff]   ;;  %v14532_v9 = vld [vmem:[#allocation14 + $0x230] sm:$0xff]   ;;  %v14537_v47 = vld [vmem:[#allocation14 + $0x2a8] sm:$0xff]  }
 0x984   : > { %13959 = vmatprep.subr.bf16.mxu1 %v14506_v6  ;;  %v14529_v36 = vld [vmem:[#allocation14 + $0x298] sm:$0xff]   ;;  %v14539_v20 = vld [vmem:[#allocation14 + $0x340] sm:$0xff]   ;;  %v14540_v40 = vld [vmem:[#allocation14 + $0x2b0] sm:$0xff]  }
 0x985   : > { %v14613_v26 = vpop.eup %14612  ;;  %v10716_v46 = vadd.f32 %v10681_v56, %v10620_v50  ;;  %13940 = vmatpush3.bf16.msra.mxu0 %v14504_v14  ;;  %v10700_v8 = vadd.f32 %v10681_v56, %v10604_v11  ;;  %v14534_v54 = vld [vmem:[#allocation14 + $0x278] sm:$0xff]   ;;  %v14541_v42 = vld [vmem:[#allocation14 + $0x300] sm:$0xff]   ;;  %v14543_v56 = vld [vmem:[#allocation14 + $0x348] sm:$0xff]  }
 0x986   : > { %v10509_v29 = vmul.f32 %v14613_v26, %v17487_v43  ;;  %v10525_v27 = vmul.f32 %v14613_v26, %v17490_v30  ;;  %13969 = vmatprep.subr.bf16.mxu0 %v14507_v59  ;;  %v14513_v43 = vld [vmem:[#allocation14 + $0x208] sm:$0xff]   ;;  %v14514_v30 = vld [vmem:[#allocation14 + $0x250] sm:$0xff]   ;;  %v14536_v6 = vld [vmem:[#allocation14 + $0x238] sm:$0xff]  }
 0x987   : > { %v10748_v23 = vmax.f32 %v10716_v46, 0.0  ;;  %13960 = vmatpush3.bf16.msra.mxu1 %v14508_v44  ;;  %v10732_v33 = vmax.f32 %v10700_v8, 0.0  ;;  %v14542_v24 = vld [vmem:[#allocation14 + $0x2f8] sm:$0xff]   ;;  %v14547_v59 = vld [vmem:[#allocation14 + $0x3c0] sm:$0xff]   ;;  %v14545_v11 = vld [vmem:[#allocation14 + $0x308] sm:$0xff]  }
 0x988   : > { %v10621_v60 = vmul.f32 %v10589_v32, %v10525_v27  ;;  %11910 = vmatmul.mubr.bf16.vlgmr.msra.gmra.mrb[28].mxu0 %v17528_v12  ;;  %13961 = vmatprep.subr.bf16.mxu1 %v14510_v49  ;;  %v10605_v62 = vmul.f32 %v10589_v32, %v10509_v29  ;;  %v14516_v12 = vld [vmem:[#allocation14 + $0x210] sm:$0xff]   ;;  %v14544_v14 = vld [vmem:[#allocation14 + $0x2b8] sm:$0xff]   ;;  %v14549_v44 = vld [vmem:[#allocation14 + $0x380] sm:$0xff]  }
 0x989   : > { %13970 = vmatpush3.bf16.msra.mxu0 %v14509_v48  ;;  %11991 = vmatprep.mubr.bf16.mxu0 %v17552_v45  ;;  %v17582_v61 = vpack.c.bf16 %v10748_v23, %v10732_v33  ;;  %v14546_v50 = vld [vmem:[#allocation14 + $0x350] sm:$0xff]   ;;  %v14551_v58 = vld [vmem:[#allocation14 + $0x3c8] sm:$0xff]   ;;  %v14550_v49 = vld [vmem:[#allocation14 + $0x358] sm:$0xff]  }
 0x98a   : > { %13971 = vmatprep.subr.bf16.mxu0 %v14511_v39  ;;  %v10701_v4 = vadd.f32 %v10685_v10, %v10605_v62  ;;  %v10717_v41 = vadd.f32 %v10685_v10, %v10621_v60  ;;  %v14548_v32 = vld [vmem:[#allocation14 + $0x310] sm:$0xff]   ;;  %v14554_v46 = vld [vmem:[#allocation14 + $0x360] sm:$0xff]   ;;  %v14559_v8 = vld [vmem:[#allocation14 + $0x3d8] sm:$0xff]  }
 0x98b   : > { %13962 = vmatpush3.bf16.msra.mxu1 %v14512_v28  ;;  %v14555_v26 = vld [vmem:[#allocation14 + $0x3d0] sm:$0xff]   ;;  %v14556_v29 = vld [vmem:[#allocation14 + $0x320] sm:$0xff]   ;;  %v14561_v27 = vld [vmem:[#allocation14 + $0x398] sm:$0xff]  }
 0x98c   : > { %13991 = vmatprep.subr.bf16.mxu1 %v14515_v38  ;;  %v10733_v3 = vmax.f32 %v10701_v4, 0.0  ;;  %v10749_v31 = vmax.f32 %v10717_v41, 0.0  ;;  %v14557_v48 = vld [vmem:[#allocation14 + $0x390] sm:$0xff]   ;;  %v14563_v39 = vld [vmem:[#allocation14 + $0x3e0] sm:$0xff]   ;;  %v14560_v10 = vld [vmem:[#allocation14 + $0x328] sm:$0xff]  }
 0x98d   : > { %13972 = vmatpush3.bf16.msra.mxu0 %v14513_v43  ;;  %v14562_v23 = vld [vmem:[#allocation14 + $0x370] sm:$0xff]   ;;  %v14565_v28 = vld [vmem:[#allocation14 + $0x3a0] sm:$0xff]   ;;  %v14567_v33 = vld [vmem:[#allocation14 + $0x3e8] sm:$0xff]  }
 0x98e   : > { %11951 = vmatmul.mubr.bf16.vlgmr.msra.gmra.mrb[16].mxu1 %v17536_v25  ;;  %13973 = vmatprep.subr.bf16.mxu0 %v14514_v30  ;;  %v17585_v45 = vpack.c.bf16 %v10749_v31, %v10733_v3  ;;  %v14524_v25 = vld [vmem:[#allocation14 + $0x220] sm:$0xff]   ;;  %v14564_v60 = vld [vmem:[#allocation14 + $0x330] sm:$0xff]   ;;  %v14566_v38 = vld [vmem:[#allocation14 + $0x378] sm:$0xff]  }
 0x98f   : > { %13992 = vmatpush3.bf16.msra.mxu1 %v14517_v34  ;;  %12032 = vmatprep.mubr.bf16.mxu1 %v17554_v53  ;;  %v14528_v53 = vld [vmem:[#allocation14 + $0x228] sm:$0xff]   ;;  %v14570_v43 = vld [vmem:[#allocation14 + $0x3f0] sm:$0xff]   ;;  %v14568_v30 = vld [vmem:[#allocation14 + $0x338] sm:$0xff]  }
 0x990   : > { %13993 = vmatprep.subr.bf16.mxu1 %v14519_v18  ;;  %v14569_v62 = vld [vmem:[#allocation14 + $0x3a8] sm:$0xff]   ;;  %v14571_v4 = vld [vmem:[#allocation14 + $0x3b0] sm:$0xff]   ;;  %v14572_v41 = vld [vmem:[#allocation14 + $0x3f8] sm:$0xff]  }
 0x991   : > { %13974 = vmatpush3.bf16.msra.mxu0 %v14516_v12  ;;  %v14573_v34 = vld [vmem:[#allocation14 + $0x3b8] sm:$0xff]   ;;  %v12123_v18 = vld [vmem:[%s17868_s2] sm:$0xff] }
 0x992   : > { %13975 = vmatprep.subr.bf16.mxu0 %v14518_v1  ;;  %v17598_v31 = vld [vmem:[#allocation15] sm:$0xff] }
 0x993   : > { %13994 = vmatpush3.bf16.msra.mxu1 %v14521_v55 }
 0x994   : > { %13995 = vmatprep.subr.bf16.mxu1 %v14523_v21  ;;  %v17869_v21 = vld [vmem:[#allocation39_spill] sm:$0xff] }
 0x995   : > { %13976 = vmatpush3.bf16.msra.mxu0 %v14520_v17 }
 0x996   : > { %13977 = vmatprep.subr.bf16.mxu0 %v14522_v2 }
 0x997   : > { %13996 = vmatpush3.bf16.msra.mxu1 %v14525_v57 }
 0x998   : > { %13997 = vmatprep.subr.bf16.mxu1 %v14527_v52 }
 0x999   : > { %13978 = vmatpush3.bf16.msra.mxu0 %v14524_v25 }
 0x99a   : > { %13979 = vmatprep.subr.bf16.mxu0 %v14526_v0 }
 0x99b   : > { %13998 = vmatpush3.bf16.msra.mxu1 %v14529_v36 }
 0x99c   : > { %13999 = vmatprep.subr.bf16.mxu1 %v14531_v37 }
 0x99d   : > { %13980 = vmatpush3.bf16.msra.mxu0 %v14528_v53 }
 0x99e   : > { %13981 = vmatprep.subr.bf16.mxu0 %v14530_v63 }
 0x99f   : > { %14000 = vmatpush3.bf16.msra.mxu1 %v14533_v35 }
 0x9a0   : > { %14001 = vmatprep.subr.bf16.mxu1 %v14535_v15 }
 0x9a1   : > { %13982 = vmatpush3.bf16.msra.mxu0 %v14532_v9 }
 0x9a2   : > { %13983 = vmatprep.subr.bf16.mxu0 %v14534_v54 }
 0x9a3   : > { %14002 = vmatpush3.bf16.msra.mxu1 %v14537_v47 }
 0x9a4   : > { %14003 = vmatprep.subr.bf16.mxu1 %v14538_v16 }
 0x9a5   : > { %13984 = vmatpush3.bf16.msra.mxu0 %v14536_v6 }
 0x9a6   : > { %14013 = vmatprep.subr.bf16.mxu0 %v14539_v20 }
 0x9a7   : > { %14004 = vmatpush3.bf16.msra.mxu1 %v14540_v40 }
 0x9a8   : > { %11992 = vmatmul.mubr.bf16.vlgmr.msra.gmra.mrb[32].mxu0 %v17558_v51  ;;  %14005 = vmatprep.subr.bf16.mxu1 %v14542_v24  ;;  %v14553_v51 = vld [vmem:[#allocation14 + $0x388] sm:$0xff]  }
 0x9a9   : > { %14014 = vmatpush3.bf16.msra.mxu0 %v14541_v42  ;;  %12073 = vmatprep.mubr.bf16.mxu0 %v17574_v5  ;;  %v14552_v5 = vld [vmem:[#allocation14 + $0x318] sm:$0xff]  }
 0x9aa   : > { %14015 = vmatprep.subr.bf16.mxu0 %v14543_v56 }
 0x9ab   : > { %14006 = vmatpush3.bf16.msra.mxu1 %v14544_v14 }
 0x9ac   : > { %14035 = vmatprep.subr.bf16.mxu1 %v14547_v59 }
 0x9ad   : > { %14016 = vmatpush3.bf16.msra.mxu0 %v14545_v11 }
 0x9ae   : > { %12033 = vmatmul.mubr.bf16.vlgmr.msra.gmra.mrb[20].mxu1 %v17566_v19  ;;  %14017 = vmatprep.subr.bf16.mxu0 %v14546_v50  ;;  %v14558_v19 = vld [vmem:[#allocation14 + $0x368] sm:$0xff]  }
 0x9af   : > { %14036 = vmatpush3.bf16.msra.mxu1 %v14549_v44  ;;  %12114 = vmatprep.mubr.bf16.mxu1 %v17585_v45 }
 0x9b0   : > { %14037 = vmatprep.subr.bf16.mxu1 %v14551_v58 }
 0x9b1   : > { %14018 = vmatpush3.bf16.msra.mxu0 %v14548_v32 }
 0x9b2   : > { %14019 = vmatprep.subr.bf16.mxu0 %v14550_v49 }
 0x9b3   : > { %14038 = vmatpush3.bf16.msra.mxu1 %v14553_v51 }
 0x9b4   : > { %14039 = vmatprep.subr.bf16.mxu1 %v14555_v26 }
 0x9b5   : > { %14020 = vmatpush3.bf16.msra.mxu0 %v14552_v5 }
 0x9b6   : > { %14021 = vmatprep.subr.bf16.mxu0 %v14554_v46 }
 0x9b7   : > { %14040 = vmatpush3.bf16.msra.mxu1 %v14557_v48 }
 0x9b8   : > { %14041 = vmatprep.subr.bf16.mxu1 %v14559_v8 }
 0x9b9   : > { %14022 = vmatpush3.bf16.msra.mxu0 %v14556_v29 }
 0x9ba   : > { %14023 = vmatprep.subr.bf16.mxu0 %v14558_v19 }
 0x9bb   : > { %14042 = vmatpush3.bf16.msra.mxu1 %v14561_v27 }
 0x9bc   : > { %14043 = vmatprep.subr.bf16.mxu1 %v14563_v39 }
 0x9bd   : > { %14024 = vmatpush3.bf16.msra.mxu0 %v14560_v10 }
 0x9be   : > { %14025 = vmatprep.subr.bf16.mxu0 %v14562_v23 }
 0x9bf   : > { %14044 = vmatpush3.bf16.msra.mxu1 %v14565_v28 }
 0x9c0   : > { %14045 = vmatprep.subr.bf16.mxu1 %v14567_v33 }
 0x9c1   : > { %14026 = vmatpush3.bf16.msra.mxu0 %v14564_v60 }
 0x9c2   : > { %14027 = vmatprep.subr.bf16.mxu0 %v14566_v38 }
 0x9c3   : > { %14046 = vmatpush3.bf16.msra.mxu1 %v14569_v62 }
 0x9c4   : > { %14047 = vmatprep.subr.bf16.mxu1 %v14570_v43 }
 0x9c5   : > { %14028 = vmatpush3.bf16.msra.mxu0 %v14568_v30 }
 0x9c7   : > { %14048 = vmatpush3.bf16.msra.mxu1 %v14571_v4 }
 0x9c8   : > { %12074 = vmatmul.mubr.bf16.vlgmr.msra.gmra.mrb[36].mxu0 %v17572_v22  ;;  %14049 = vmatprep.subr.bf16.mxu1 %v14572_v41  ;;  %v11026_v22 = vrot.slane %v17598_v31, %v17869_v21 }
 0x9c9   : > { %14077 = vmatprep.mubr.msk.f32.mxu0 %vm9519_vm2, %v12123_v18 }
 0x9cb   : > { %14050 = vmatpush3.bf16.msra.mxu1 %v14573_v34 }
 0x9ce   : > { %12115 = vmatmul.mubr.bf16.vlgmr.msra.gmra.mrb[24].mxu1 %v17582_v61 }
 0xa3b   : > { %v13897_v3 = vpop.f32.mrb[24].mxu0 }
 0xa3c   : > { %v13898_v12 = vpop.f32.mrb[25].mxu0 }
 0xa3d   : > { %v13899_v1 = vadd.f32 %v13898_v12, %v13897_v3  ;;  %v13900_v45 = vpop.f32.mrb[26].mxu0 }
 0xa3e   : > { %v13901_v55 = vpop.f32.mrb[27].mxu0 }
 0xa3f   : > { %v13902_v17 = vadd.f32 %v13901_v55, %v13900_v45  ;;  %v11830_v61 = vadd.f32 %v13899_v1, %v11026_v22 }
 0xa41   : > { %v13919_v2 = vpop.f32.mrb[12].mxu1  ;;  %v11833_v36 = vadd.f32 %v13902_v17, %v11026_v22  ;;  %v12124_v22 = vld [vmem:[%s17868_s2 + $0x8] sm:$0xff]  ;;  %v12125_v17 = vld [vmem:[%s17868_s2 + $0x10] sm:$0xff] }
 0xa42   : > { %v13920_v57 = vpop.f32.mrb[13].mxu1 }
 0xa43   : > { %v13921_v52 = vadd.f32 %v13920_v57, %v13919_v2  ;;  %v13922_v25 = vpop.f32.mrb[14].mxu1  ;;  %v12126_v2 = vld [vmem:[%s17868_s2 + $0x18] sm:$0xff]  ;;  %v14574_v57 = vld [vmem:[#allocation17] sm:$0xff]  }
 0xa44   : > { %v13923_v0 = vpop.f32.mrb[15].mxu1  ;;  %14083 = vmatprep.subr.bf16.mxu1 %v14574_v57 }
 0xa45   : > { %v11871_v37 = vadd.f32 %v13921_v52, %v11830_v61  ;;  %v13924_v53 = vadd.f32 %v13923_v0, %v13922_v25  ;;  %14084 = vmatpush3.bf16.msra.mxu1 %v14574_v57  ;;  %v14575_v61 = vld [vmem:[#allocation17 + $0x8] sm:$0xff]   ;;  %v14576_v52 = vld [vmem:[#allocation17 + $0x10] sm:$0xff]   ;;  %v14577_v25 = vld [vmem:[#allocation17 + $0x18] sm:$0xff]  }
 0xa46   : > { %14085 = vmatprep.subr.bf16.mxu1 %v14575_v61  ;;  %v14578_v0 = vld [vmem:[#allocation17 + $0x20] sm:$0xff]  }
 0xa47   : > { %v11874_v63 = vadd.f32 %v13924_v53, %v11833_v36  ;;  %v14579_v36 = vld [vmem:[#allocation17 + $0x28] sm:$0xff]   ;;  %v14581_v53 = vld [vmem:[#allocation17 + $0x38] sm:$0xff]  }
 0xa49   : > { %14086 = vmatpush3.bf16.msra.mxu1 %v14575_v61 }
 0xa4a   : > { %14087 = vmatprep.subr.bf16.mxu1 %v14576_v52 }
 0xa4d   : > { %14088 = vmatpush3.bf16.msra.mxu1 %v14576_v52 }
 0xa4e   : > { %14089 = vmatprep.subr.bf16.mxu1 %v14577_v25 }
 0xa51   : > { %14090 = vmatpush3.bf16.msra.mxu1 %v14577_v25 }
 0xa52   : > { %14091 = vmatprep.subr.bf16.mxu1 %v14578_v0 }
 0xa55   : > { %14092 = vmatpush3.bf16.msra.mxu1 %v14578_v0 }
 0xa56   : > { %14093 = vmatprep.subr.bf16.mxu1 %v14579_v36 }
 0xa59   : > { %14094 = vmatpush3.bf16.msra.mxu1 %v14579_v36 }
 0xa5b   : > { %v13941_v35 = vpop.f32.mrb[28].mxu0 }
 0xa5c   : > { %v13942_v15 = vpop.f32.mrb[29].mxu0 }
 0xa5d   : > { %v13943_v9 = vadd.f32 %v13942_v15, %v13941_v35  ;;  %v13944_v54 = vpop.f32.mrb[30].mxu0 }
 0xa5e   : > { %v13945_v47 = vpop.f32.mrb[31].mxu0 }
 0xa5f   : > { %v11912_v16 = vadd.f32 %v13943_v9, %v11871_v37  ;;  %v13946_v6 = vadd.f32 %v13945_v47, %v13944_v54  ;;  %v14580_v37 = vld [vmem:[#allocation17 + $0x30] sm:$0xff]  }
 0xa60   : > { %14095 = vmatprep.subr.bf16.mxu1 %v14580_v37 }
 0xa61   : > { %v11915_v20 = vadd.f32 %v13946_v6, %v11874_v63  ;;  %v13963_v40 = vpop.f32.mrb[16].mxu1  ;;  %14096 = vmatpush3.bf16.msra.mxu1 %v14580_v37 }
 0xa62   : > { %v13964_v24 = vpop.f32.mrb[17].mxu1  ;;  %14097 = vmatprep.subr.bf16.mxu1 %v14581_v53 }
 0xa63   : > { %v13965_v42 = vadd.f32 %v13964_v24, %v13963_v40  ;;  %v13966_v56 = vpop.f32.mrb[18].mxu1 }
 0xa64   : > { %v13967_v14 = vpop.f32.mrb[19].mxu1 }
 0xa65   : > { %v11953_v59 = vadd.f32 %v13965_v42, %v11912_v16  ;;  %v13968_v11 = vadd.f32 %v13967_v14, %v13966_v56  ;;  %14098 = vmatpush3.bf16.msra.mxu1 %v14581_v53 }
 0xa67   : > { %v11956_v50 = vadd.f32 %v13968_v11, %v11915_v20 }
 0xa7b   : > { %v13985_v44 = vpop.f32.mrb[32].mxu0 }
 0xa7c   : > { %v13986_v58 = vpop.f32.mrb[33].mxu0 }
 0xa7d   : > { %v13987_v32 = vadd.f32 %v13986_v58, %v13985_v44  ;;  %v13988_v49 = vpop.f32.mrb[34].mxu0 }
 0xa7e   : > { %v13989_v51 = vpop.f32.mrb[35].mxu0 }
 0xa7f   : > { %v11994_v26 = vadd.f32 %v13987_v32, %v11953_v59  ;;  %v13990_v5 = vadd.f32 %v13989_v51, %v13988_v49 }
 0xa81   : > { %v11997_v46 = vadd.f32 %v13990_v5, %v11956_v50  ;;  %v14007_v48 = vpop.f32.mrb[20].mxu1 }
 0xa82   : > { %v14008_v8 = vpop.f32.mrb[21].mxu1 }
 0xa83   : > { %v14009_v29 = vadd.f32 %v14008_v8, %v14007_v48  ;;  %v14010_v19 = vpop.f32.mrb[22].mxu1 }
 0xa84   : > { %v14011_v27 = vpop.f32.mrb[23].mxu1 }
 0xa85   : > { %v12035_v39 = vadd.f32 %v14009_v29, %v11994_v26  ;;  %v14012_v10 = vadd.f32 %v14011_v27, %v14010_v19 }
 0xa87   : > { %v12038_v23 = vadd.f32 %v14012_v10, %v11997_v46 }
 0xa9b   : > { %v14029_v28 = vpop.f32.mrb[36].mxu0 }
 0xa9c   : > { %v14030_v33 = vpop.f32.mrb[37].mxu0 }
 0xa9d   : > { %v14031_v60 = vadd.f32 %v14030_v33, %v14029_v28  ;;  %v14032_v38 = vpop.f32.mrb[38].mxu0  ;;  %v12261_v28 = vrot.slane %v17598_v31, %v17867_v7 }
 0xa9e   : > { %v14033_v62 = vpop.f32.mrb[39].mxu0 }
 0xa9f   : > { %v12076_v43 = vadd.f32 %v14031_v60, %v12035_v39  ;;  %v14034_v30 = vadd.f32 %v14033_v62, %v14032_v38  ;;  %v12269_v60 = vrot.slane %v17598_v31, %v17862_v13 }
 0xaa1   : > { %v12079_v4 = vadd.f32 %v14034_v30, %v12038_v23  ;;  %v14051_v41 = vpop.f32.mrb[24].mxu1 }
 0xaa2   : > { %v14052_v34 = vpop.f32.mrb[25].mxu1 }
 0xaa3   : > { %v14053_v18 = vadd.f32 %v14052_v34, %v14051_v41  ;;  %v14054_v3 = vpop.f32.mrb[26].mxu1 }
 0xaa4   : > { %v14055_v12 = vpop.f32.mrb[27].mxu1 }
 0xaa5   : > { %v12117_v1 = vadd.f32 %v14053_v18, %v12076_v43  ;;  %v14056_v45 = vadd.f32 %v14055_v12, %v14054_v3 }
 0xaa7   : > { %v12120_v55 = vadd.f32 %v14056_v45, %v12079_v4 }
 0xaa9   : > { %v14167_v21 = vpack.c.bf16 %v12120_v55, %v12117_v1 }
 0xaab   : > { %14168 = vmatprep.subr.bf16.mxu0 %v14167_v21 }
 0xaac   : > { %14170 = vmatpush3.bf16.msra.mxu0 %v14167_v21 }
 0xaaf   : > { %14078 = vmatmul.mubr.msk.f32.vlgmr.msra.gmra.mrb[22].mxu0 %vm9519_vm2, %v12124_v22 }
 0xab0   : > { %14080 = vmatprep.mubr.msk.f32.mxu0 %vm9519_vm2, %v12125_v17  ;;  %v13862_v17 = vld [vmem:[#allocation18] ss:$0 sm:$0xff] }
 0xab3   : > { %14081 = vmatmul.mubr.msk.f32.gmra.mrb[40].mxu0 %vm9519_vm2, %v12126_v2 }
 0xb82   : > { %v14079_v63 = vpop.f32.mrb[22].mxu0 }
 0xb83   : > { %v12205_v35 = vpop.f32.mrb[23].mxu0 }
 0xb84   : > { %v12224_v15 = vadd.f32 %v14079_v63, %v12205_v35 }
 0xb86   : > { %v14082_v9 = vpop.f32.mrb[40].mxu0 }
 0xb87   : > { %v12215_v54 = vpop.f32.mrb[41].mxu0 }
 0xb88   : > { %v12225_v47 = vadd.f32 %v12224_v15, %v12215_v54 }
 0xb8a   : > { %v12226_v16 = vadd.f32 %v14082_v9, %v12225_v47 }
 0xb8c   : > { %v12227_v6 = vrot.slane %v12226_v16, 4 }
 0xb8e   : > { %v12228_v20 = vadd.f32 %v12227_v6, %v12226_v16 }
 0xb90   : > { %v12229_v40 = vrot.slane %v12228_v20, 2 }
 0xb92   : > { %v12230_v24 = vadd.f32 %v12229_v40, %v12228_v20 }
 0xb94   : > { %v12231_v42 = vrot.slane %v12230_v24, 1 }
 0xb96   : > { %v12232_v56 = vadd.f32 %v12231_v42, %v12230_v24 }
 0xb98   : > { %v12233_v14 = vmul.f32 0.03125, %v12232_v56 }
 0xb9a   : > { %v12234_v59 = vsub.f32 %v12205_v35, %v12233_v14  ;;  %v12235_v11 = vsub.f32 %v14079_v63, %v12233_v14  ;;  %v12236_v50 = vsub.f32 %v12215_v54, %v12233_v14  ;;  %v12237_v44 = vsub.f32 %v14082_v9, %v12233_v14 }
 0xb9c   : > { %v12238_v58 = vmul.f32 %v12234_v59, %v12234_v59  ;;  %v12239_v32 = vmul.f32 %v12235_v11, %v12235_v11  ;;  %v12240_v49 = vmul.f32 %v12236_v50, %v12236_v50  ;;  %v12241_v26 = vmul.f32 %v12237_v44, %v12237_v44 }
 0xb9e   : > { %v12242_v51 = vadd.f32 %v12239_v32, %v12238_v58 }
 0xba0   : > { %v12243_v5 = vadd.f32 %v12242_v51, %v12240_v49 }
 0xba2   : > { %v12244_v46 = vadd.f32 %v12243_v5, %v12241_v26 }
 0xba4   : > { %v12245_v48 = vrot.slane %v12244_v46, 4 }
 0xba6   : > { %v12246_v8 = vadd.f32 %v12245_v48, %v12244_v46 }
 0xba8   : > { %v12247_v29 = vrot.slane %v12246_v8, 2 }
 0xbaa   : > { %v12248_v19 = vadd.f32 %v12247_v29, %v12246_v8 }
 0xbac   : > { %v12249_v27 = vrot.slane %v12248_v19, 1 }
 0xbae   : > { %v12250_v39 = vadd.f32 %v12249_v27, %v12248_v19 }
 0xbb0   : > { %v12251_v10 = vmul.f32 0.03125, %v12250_v39 }
 0xbb2   : > { %v12252_v23 = vadd.f32 1e-05, %v12251_v10 }
 0xbb4   : > { %14614 = vrsqrt.f32 %v12252_v23 }
 0xbbe   : > { %v14615_v33 = vpop.eup %14614 }
 0xbbf   : > { %v12254_v38 = vmul.f32 %v14615_v33, %v12234_v59  ;;  %v12255_v62 = vmul.f32 %v14615_v33, %v12235_v11  ;;  %v12256_v43 = vmul.f32 %v14615_v33, %v12236_v50  ;;  %v12257_v30 = vmul.f32 %v14615_v33, %v12237_v44 }
 0xbc1   : > { %v12262_v4 = vmul.f32 %v12261_v28, %v12254_v38  ;;  %v12263_v41 = vmul.f32 %v12261_v28, %v12255_v62  ;;  %v12264_v34 = vmul.f32 %v12261_v28, %v12256_v43  ;;  %v12265_v18 = vmul.f32 %v12261_v28, %v12257_v30 }
 0xbc3   : > { %v12272_v3 = vadd.f32 %v12269_v60, %v12264_v34  ;;  %v12273_v12 = vadd.f32 %v12269_v60, %v12265_v18  ;;  %v12270_v1 = vadd.f32 %v12269_v60, %v12262_v4  ;;  %v12271_v45 = vadd.f32 %v12269_v60, %v12263_v41 }
 0xbc5   : > { %14616 = vtanh.f32 %v12272_v3 }
 0xbc6   : > { %14618 = vtanh.f32 %v12273_v12 }
 0xbc7   : > { %14620 = vtanh.f32 %v12270_v1 }
 0xbc8   : > { %14622 = vtanh.f32 %v12271_v45 }
 0xbcf   : > { %v14617_v7 = vpop.eup %14616 }
 0xbd0   : > { %v14619_v55 = vpop.eup %14618  ;;  %12280 = vst [vmem:[#allocation20 + $0x10] sm:$0xff] %v14617_v7 }
 0xbd1   : > { %v14621_v13 = vpop.eup %14620  ;;  %12281 = vst [vmem:[#allocation20 + $0x18] sm:$0xff] %v14619_v55  ;;  %v12283_v31 = vpack.c.bf16 %v14619_v55, %v14617_v7 }
 0xbd2   : > { %v14623_v21 = vpop.eup %14622  ;;  %12278 = vst [vmem:[#allocation20] sm:$0xff] %v14621_v13 }
 0xbd3   : > { %12279 = vst [vmem:[#allocation20 + $0x8] sm:$0xff] %v14623_v21  ;;  %v12282_v22 = vpack.c.bf16 %v14623_v21, %v14621_v13 }
 0xbd5   : > { %14099 = vmatprep.mubr.bf16.mxu1 %v12282_v22 }
 0xbd6   : > { %14100 = vmatmul.mubr.bf16.vlgmr.msra.gmra.mrb[28].mxu1 %v12283_v31 }
 0xca9   : > { %v14101_v2 = vpop.f32.mrb[28].mxu1 }
 0xcaa   : > { %v12398_v57 = vadd.f32 %v14101_v2, %v13862_v17  ;;  %v12389_v61 = vpop.f32.mrb[29].mxu1 }
 0xcab   : > { %v12390_v52 = vadd.f32 %v13862_v17, %v12389_v61  ;;  %v14102_v25 = vpop.f32.mrb[30].mxu1 }
 0xcac   : > { %12406 = vst [vmem:[#allocation21 + $0x10] sm:$0xff] %v12398_v57  ;;  %v12401_v0 = vadd.f32 %v14102_v25, %v13862_v17  ;;  %v12392_v36 = vpop.f32.mrb[31].mxu1 }
 0xcad   : > { %12404 = vst [vmem:[#allocation21] sm:$0xff] %v12390_v52  ;;  %v12393_v37 = vadd.f32 %v13862_v17, %v12392_v36 }
 0xcae   : > { %12407 = vst [vmem:[#allocation21 + $0x18] sm:$0xff] %v12401_v0 }
 0xcaf   : > { %12405 = vst [vmem:[#allocation21 + $0x8] sm:$0xff] %v12393_v37 }
 0xcb0 PF: > { %s17870_s26 = sld [smem:[#allocation34_spill]]  ;;  %s15087_s20 = smov [#allocation20]  }
 0xcb1   : > { %s12414_s15 = sshll.u32 %s15087_s20, 4  ;;  %s12415_s15 = int_to_ptr.vmem [resolvable:$true] %s12414_s15 }
 0xcb2   : > { %s14945_s19 = scalar_lea.vmem %s12415_s15, 512  ;;  %p14952_p2 = scmp.lt.s32.totalorder %s12415_s15, %s12415_s15 }
 0xcb3   : > { %p14946_p5 = scmp.ne.s32.totalorder %s12415_s15, %s14945_s19  ;;  %p14953_p13 = scmp.lt.s32.totalorder %s14945_s19, %s14945_s19 }
 0xcb5   : > { %p14954_p7 = por %p14953_p13, %p14952_p2 }
 0xcb6   : > { %p14367_p0 = scmp.eq.s32.totalorder %s17870_s26, 1 }
 0xcb8   : > { %p14947_p3 = pnand %p14946_p5, %p14367_p0 }
 0xcba   : > { %p14948_p4 = pneg %p14947_p3 }
 0xcbc   : > { %p14955_p1 = pnand %p14954_p7, %p14948_p4 }
 0xcbe   : > { %14958 = shalt.err (!%p14955_p1)
}
 0xcbf   : > { %s17871_s25 = sld [smem:[#allocation71_spill]] }
 0xcc5   : > { %s17872_s24 = smov %s17871_s25  ;;  %s14959_s16 = scalar_lea.hbm %s17871_s25, 512 }
 0xcc6   : > { %p14960_p6 = scmp.ne.s32.totalorder %s17872_s24, %s14959_s16  ;;  %p14965_p8 = scmp.lt.u32.totalorder %s14959_s16, %s17872_s24 }
 0xcc8   : > { %p14961_p10 = pnand %p14960_p6, %p14367_p0 }
 0xcca   : > { %p14962_p11 = pneg %p14961_p10 }
 0xccc   : > { %p14967_p9 = pnand %p14965_p8, %p14962_p11 }
 0xcce   : > { %14970 = shalt.err (!%p14967_p9)
}
 0xccf   : > { %s15088_s18 = smov 128   ;;  %s15089_s30 = smov 8  }
 0xcd0   : > { %14308 = dma.vmem_to_hbm [thread:$0]  (%p14367_p0), %s12415_s15, 512, %s17872_s24, [#allocation5], %s15088_s18, %s15088_s18, %s15089_s30  }
 0xcd1   : > { %s15090_s13 = smov [#allocation21]  }
 0xcd2   : > { %s12427_s12 = sshll.u32 %s15090_s13, 4  ;;  %s12428_s12 = int_to_ptr.vmem [resolvable:$true] %s12427_s12 }
 0xcd3   : > { %s14971_s23 = scalar_lea.vmem %s12428_s12, 512  ;;  %p14978_p4 = scmp.lt.s32.totalorder %s12428_s12, %s12428_s12 }
 0xcd4   : > { %p14972_p12 = scmp.ne.s32.totalorder %s12428_s12, %s14971_s23  ;;  %p14979_p2 = scmp.lt.s32.totalorder %s14971_s23, %s14971_s23 }
 0xcd6   : > { %p14973_p5 = pnand %p14972_p12, %p14367_p0  ;;  %p14980_p13 = por %p14979_p2, %p14978_p4 }
 0xcd8   : > { %p14974_p3 = pneg %p14973_p5 }
 0xcda   : > { %p14981_p7 = pnand %p14980_p13, %p14974_p3 }
 0xcdc   : > { %14984 = shalt.err (!%p14981_p7)
}
 0xcdd   : > { %s17873_s19 = sld [smem:[#allocation72_spill]] }
 0xce3   : > { %s14985_s0 = scalar_lea.hbm %s17873_s19, 512 }
 0xce4   : > { %p14986_p1 = scmp.ne.s32.totalorder %s17873_s19, %s14985_s0  ;;  %p14991_p11 = scmp.lt.u32.totalorder %s14985_s0, %s17873_s19 }
 0xce6   : > { %p14987_p6 = pnand %p14986_p1, %p14367_p0 }
 0xce8   : > { %p14988_p10 = pneg %p14987_p6 }
 0xcea   : > { %p14993_p8 = pnand %p14991_p11, %p14988_p10 }
 0xcec   : > { %14996 = shalt.err (!%p14993_p8)
}
 0xced   : > { %14310 = dma.vmem_to_hbm [thread:$0]  (%p14367_p0), %s12428_s12, 512, %s17873_s19, [#allocation22], %s15088_s18, %s15088_s18, %s15089_s30  }
 0xcee   : > { %15042 = dma.done.wait (%p14367_p0), [#allocation5], 512  }
 0xcef   : > { %15044 = vsyncadd (%p14367_p0), [#allocation5], 4294966784 }
 0xcf0   : > { %15046 = dma.done.wait (%p14367_p0), [#allocation22], 512  }
 0xcf1   : > { %15048 = vsyncadd (%p14367_p0), [#allocation22], 4294966784 }
 0xcf2 PF: > { %s17874_s28 = sld [smem:[#allocation36_spill]]  ;;  %s17875_s25 = sld [smem:[#allocation32_spill]] }
 0xcf3   : > { %s17876_s26 = sld [smem:[#allocation33_spill]]  ;;  %s17877_s27 = sld [smem:[#allocation37_spill]] }
 0xcf8   : > { %p28_p9 = scmp.ge.s32.totalorder %s17874_s28, 4  }
 0xcfa   :  { %30 = sbr.rel (!%p28_p9) target bundleno = 15 (0xf), region = 174 }
 0xd01   :  { %12447 = vsyncpa [#allocation4], 1 }
 0xd02   :  { %12449 = vsyncpa [#allocation4 + $0x1], 1 }
 0xd03   :  { %12450 = vsyncpa [#allocation7], 1 }
 0xd04   :  { %12451 = vsyncpa [#allocation13], 1 }
 0xd05   :  { %12452 = vsyncpa [#allocation16], 1 }
 0xd06   :  { %12453 = vsyncpa [#allocation19], 1 }
 0xd07   :  { %12454 = vsyncpa [#allocation5], 1 }
 0xd08   :  { %12456 = vsyncpa [#allocation5 + $0x1], 1 }
 0xd09   :  { %12457 = vsyncpa [#allocation22], 1 }

</bundles_post_ra>
